<compile_context>
chip_gen: v7x
topology: tpu7x:2x2x1
jax: 0.10.0
libtpu: 0.0.40
codegen_flags: <defaults>
</compile_context>

<pallas_src>
import functools
import math

import jax
import jax.numpy as jnp
from jax.experimental import pallas as pl
from jax.experimental.pallas import tpu as pltpu

BIGNET_DIM = 1024
LORA_DIM = 32
LORA_ALPHA = 1.0
LORA_SCALING = LORA_ALPHA / LORA_DIM
LN_EPS = 1e-5
LAYERS_PER_BLOCK = 3
NUM_BLOCKS = 6
NUM_LAYERS = NUM_BLOCKS * LAYERS_PER_BLOCK          # 18
NUM_LN = NUM_BLOCKS - 1                             # 5


# ---------------------------------------------------------------------------
# Fused kernel: one grid step == one residual block (3 LoRALinear layers).
#   step 0      : block input = x
#   step B > 0  : block input = LayerNorm(previous block output)   (params index B-1)
#   per step    : out_l = bf16_linear(h) + scaling * (h @ A_t) @ B_t ; ReLU, ReLU, +res
#   last step   : write final activation to the output
# ---------------------------------------------------------------------------
def _lora_bignet_kernel(x_ref, w_ref, b_ref, a_ref, lb_ref, lnw_ref, lnb_ref,
                        o_ref, act_ref, *, scaling, eps, layers_per_block):
    B = pl.program_id(0)

    # ---- establish the block input (and the residual) -----------------------------
    @pl.when(B == 0)
    def _first_block_input():
        act_ref[...] = x_ref[...]

    @pl.when(B > 0)
    def _layernorm_block_input():
        # group_norm(num_groups=1): normalize over channels per sample (biased var)
        h = act_ref[...]
        mean = jnp.mean(h, axis=-1, keepdims=True)
        hc = h - mean
        var = jnp.mean(hc * hc, axis=-1, keepdims=True)
        gamma = lnw_ref[B - 1]                       # (1, C), VMEM-resident
        beta = lnb_ref[B - 1]
        act_ref[...] = hc * jax.lax.rsqrt(var + eps) * gamma + beta

    res = act_ref[...]                               # block input == residual
    h = res

    # ---- three LoRALinear layers, straight-line ------------------------------------
    for l in range(layers_per_block):
        # TODO(synk): PyTorch's base path is fp16 end-to-end; the TPU MXU has no native
        # fp16 input path, so fp16 rounding is emulated with bf16 inputs and the matmul
        # accumulates in f32.
        xb = h.astype(jnp.bfloat16)                  # emulate x.to(half)
        base = jnp.dot(xb, w_ref[l], preferred_element_type=jnp.float32)   # (Bn, Cout)
        base = base + b_ref[l].astype(jnp.float32)
        la = jnp.dot(h, a_ref[l], preferred_element_type=jnp.float32)      # (Bn, r) f32
        lo = jnp.dot(la, lb_ref[l], preferred_element_type=jnp.float32)    # (Bn, Cout)
        out = base + lo * scaling
        if l < layers_per_block - 1:
            h = jnp.maximum(out, 0.0)                # ReLU between layers
        else:
            h = out + res                            # residual at block end

    act_ref[...] = h                                 # carry to next grid step

    @pl.when(B == pl.num_programs(0) - 1)
    def _write_output():
        o_ref[...] = h


def lora_bignet_pallas(x, W, b, A, LB, ln_w, ln_b):
    Bn, C = x.shape
    n_layers, Cin, Cout = W.shape
    r = A.shape[2]
    lpb = LAYERS_PER_BLOCK
    n_blocks = n_layers // lpb

    # Advisory cost estimate (helps XLA schedule around the single custom call).
    flops = int(2 * Bn * n_layers * (Cin * Cout + Cin * r + r * Cout))
    bytes_accessed = int(W.size * 2 + b.size * 2
                         + (A.size + LB.size + ln_w.size + ln_b.size) * 4
                         + 2 * x.size * 4)
    cost = pl.CostEstimate(flops=flops,
                           transcendentals=Bn * (n_blocks - 1),
                           bytes_accessed=bytes_accessed)

    kernel = functools.partial(_lora_bignet_kernel, scaling=LORA_SCALING,
                               eps=LN_EPS, layers_per_block=lpb)

    return pl.pallas_call(
        kernel,
        out_shape=jax.ShapeDtypeStruct((Bn, C), jnp.float32),
        grid_spec=pltpu.PrefetchScalarGridSpec(
            num_scalar_prefetch=0,
            grid=(n_blocks,),
            in_specs=[
                pl.BlockSpec((Bn, Cin), lambda B: (0, 0)),             # x (resident)
                pl.BlockSpec((lpb, Cin, Cout), lambda B: (B, 0, 0)),   # W^T  bf16 stream
                pl.BlockSpec((lpb, 1, Cout), lambda B: (B, 0, 0)),     # bias bf16 stream
                pl.BlockSpec((lpb, Cin, r), lambda B: (B, 0, 0)),      # lora_a^T stream
                pl.BlockSpec((lpb, r, Cout), lambda B: (B, 0, 0)),     # lora_b^T stream
                pl.BlockSpec((NUM_LN, 1, C), lambda B: (0, 0, 0)),     # ln gamma resident
                pl.BlockSpec((NUM_LN, 1, C), lambda B: (0, 0, 0)),     # ln beta  resident
            ],
            out_specs=pl.BlockSpec((Bn, C), lambda B: (0, 0)),
            scratch_shapes=[
                pltpu.VMEM((Bn, C), jnp.float32),    # carried activation / block input
            ],
        ),
        compiler_params=pltpu.CompilerParams(
            dimension_semantics=("arbitrary",),      # blocks are sequential (carried state)
            # ~14 MiB actual footprint (12 MiB W double-buffer + small params); 48 MiB
            # limit leaves headroom and stays inside v7x's 64 MiB physical VMEM.
            vmem_limit_bytes=48 * 1024 * 1024,
        ),
        cost_estimate=cost,
    )(x, W, b, A, LB, ln_w, ln_b)


# ---------------------------------------------------------------------------
# Parameter construction (deterministic, mirrors the PyTorch __init__).
# Weights are pre-stacked and pre-transposed ONCE on the host so the kernel streams
# them in the MXU-native (in_features, out_features) orientation.
# ---------------------------------------------------------------------------
def init_lora_bignet_params(key):
    layer_keys = jax.random.split(key, NUM_LAYERS)
    bound = 1.0 / math.sqrt(BIGNET_DIM)              # nn.Linear default init bound
    ws, bs, As, LBs = [], [], [], []
    for lk in layer_keys:
        k1, k2, k3 = jax.random.split(lk, 3)
        w = jax.random.uniform(k1, (BIGNET_DIM, BIGNET_DIM), jnp.float32, -bound, bound)
        ws.append(w.T.astype(jnp.bfloat16))          # (Cin, Cout), bf16 (fp16 stand-in)
        bs.append(jax.random.uniform(k2, (BIGNET_DIM,), jnp.float32,
                                     -bound, bound).astype(jnp.bfloat16))
        # kaiming_uniform(a=sqrt(5)) bound for lora_a equals 1/sqrt(fan_in) here
        a = jax.random.uniform(k3, (LORA_DIM, BIGNET_DIM), jnp.float32, -bound, bound)
        As.append(a.T)                               # (Cin, r) f32
        LBs.append(jnp.zeros((LORA_DIM, BIGNET_DIM), jnp.float32))  # lora_b^T = zeros
    return {
        "W": jnp.stack(ws),                                        # (18, C, C)  bf16
        "b": jnp.stack(bs).reshape(NUM_LAYERS, 1, BIGNET_DIM),     # (18, 1, C)  bf16
        "A": jnp.stack(As),                                        # (18, C, r)  f32
        "LB": jnp.stack(LBs),                                      # (18, r, C)  f32
        "ln_w": jnp.ones((NUM_LN, 1, BIGNET_DIM), jnp.float32),    # (5, 1, C)
        "ln_b": jnp.zeros((NUM_LN, 1, BIGNET_DIM), jnp.float32),   # (5, 1, C)
    }


# ---------------------------------------------------------------------------
# Forward pass: a single fused pallas_call for the whole network.
# ---------------------------------------------------------------------------
@jax.jit
def lora_bignet_forward(params, x):
    return lora_bignet_pallas(x, params["W"], params["b"], params["A"],
                              params["LB"], params["ln_w"], params["ln_b"])


if __name__ == "__main__":
    key = jax.random.PRNGKey(0)
    pkey, xkey = jax.random.split(key)

    params = init_lora_bignet_params(pkey)
    batch = 8
    x = jax.random.normal(xkey, (batch, BIGNET_DIM), dtype=jnp.float32)

    out = lora_bignet_forward(params, x)
    out = jax.block_until_ready(out)

    assert out.shape == (batch, BIGNET_DIM) and out.dtype == jnp.float32
    assert bool(jnp.all(jnp.isfinite(out)))
    print("KERNEL_OK")
</pallas_src>

<mosaic_0001>
module attributes {stable_mosaic.version = 11 : i64} {
  func.func @_lora_bignet_kernel(%arg0: i32, %arg1: memref<8x1024xf32, #tpu.memory_space<vmem>>, %arg2: memref<3x1024x1024xbf16, #tpu.memory_space<vmem>>, %arg3: memref<3x1x1024xbf16, #tpu.memory_space<vmem>>, %arg4: memref<3x1024x32xf32, #tpu.memory_space<vmem>>, %arg5: memref<3x32x1024xf32, #tpu.memory_space<vmem>>, %arg6: memref<5x1x1024xf32, #tpu.memory_space<vmem>>, %arg7: memref<5x1x1024xf32, #tpu.memory_space<vmem>>, %arg8: memref<8x1024xf32, #tpu.memory_space<vmem>>, %arg9: memref<8x1024xf32, #tpu.memory_space<vmem>>) attributes {dimension_semantics = [#tpu.dimension_semantics<arbitrary>], iteration_bounds = array<i64: 6>, scalar_prefetch = 0 : i64, scratch_operands = 1 : i64, tpu.core_type = #tpu.core_type<tc>, window_params = [{pipeline_mode = #tpu.pipeline_mode<synchronous>, transform_indices = @transform_0, window_bounds = array<i64: 8, 1024>}, {transform_indices = @transform_1, window_bounds = array<i64: 3, 1024, 1024>}, {transform_indices = @transform_2, window_bounds = array<i64: 3, 1, 1024>}, {transform_indices = @transform_3, window_bounds = array<i64: 3, 1024, 32>}, {transform_indices = @transform_4, window_bounds = array<i64: 3, 32, 1024>}, {pipeline_mode = #tpu.pipeline_mode<synchronous>, transform_indices = @transform_5, window_bounds = array<i64: 5, 1, 1024>}, {pipeline_mode = #tpu.pipeline_mode<synchronous>, transform_indices = @transform_6, window_bounds = array<i64: 5, 1, 1024>}, {pipeline_mode = #tpu.pipeline_mode<synchronous>, transform_indices = @transform_7, window_bounds = array<i64: 8, 1024>}]} {
    %c0_i32 = arith.constant 0 : i32
    %0 = arith.cmpi eq, %arg0, %c0_i32 : i32
    %1 = arith.extui %0 : i1 to i32
    %c0_i32_0 = arith.constant 0 : i32
    %2 = arith.cmpi ne, %1, %c0_i32_0 : i32
    scf.if %2 {
      %c0_54 = arith.constant 0 : index
      %c0_55 = arith.constant 0 : index
      %70 = vector.load %arg1[%c0_54, %c0_55] : memref<8x1024xf32, #tpu.memory_space<vmem>>, vector<8x1024xf32>
      %c0_56 = arith.constant 0 : index
      %c0_57 = arith.constant 0 : index
      %71 = vector.load %arg9[%c0_56, %c0_57] : memref<8x1024xf32, #tpu.memory_space<vmem>>, vector<8x1024xf32>
      tpu.vector_store %arg9[%c0_56, %c0_57], %70 {strides = array<i32>} : memref<8x1024xf32, #tpu.memory_space<vmem>>, vector<8x1024xf32>,
    } else {
    }
    %c0_i32_1 = arith.constant 0 : i32
    %3 = arith.cmpi sgt, %arg0, %c0_i32_1 : i32
    %4 = arith.extui %3 : i1 to i32
    %c0_i32_2 = arith.constant 0 : i32
    %5 = arith.cmpi ne, %4, %c0_i32_2 : i32
    scf.if %5 {
      %c0_54 = arith.constant 0 : index
      %c0_55 = arith.constant 0 : index
      %70 = vector.load %arg9[%c0_54, %c0_55] : memref<8x1024xf32, #tpu.memory_space<vmem>>, vector<8x1024xf32>
      %cst_56 = arith.constant dense<0.000000e+00> : vector<8xf32>
      %71 = vector.multi_reduction <add>, %70, %cst_56 [1] : vector<8x1024xf32> to vector<8xf32>
      %72 = vector.shape_cast %71 : vector<8xf32> to vector<8x1xf32>
      %cst_57 = arith.constant 1.024000e+03 : f32
      %73 = vector.broadcast %cst_57 : f32 to vector<8x1xf32>
      %74 = arith.divf %72, %73 : vector<8x1xf32>
      %75 = vector.broadcast %74 : vector<8x1xf32> to vector<8x1024xf32>
      %76 = arith.subf %70, %75 : vector<8x1024xf32>
      %77 = arith.mulf %76, %76 : vector<8x1024xf32>
      %cst_58 = arith.constant dense<0.000000e+00> : vector<8xf32>
      %78 = vector.multi_reduction <add>, %77, %cst_58 [1] : vector<8x1024xf32> to vector<8xf32>
      %79 = vector.shape_cast %78 : vector<8xf32> to vector<8x1xf32>
      %cst_59 = arith.constant 1.024000e+03 : f32
      %80 = vector.broadcast %cst_59 : f32 to vector<8x1xf32>
      %81 = arith.divf %79, %80 : vector<8x1xf32>
      %c1_i32 = arith.constant 1 : i32
      %82 = arith.subi %arg0, %c1_i32 : i32
      %83 = arith.index_cast %82 : i32 to index
      %c0_60 = arith.constant 0 : index
      %c0_61 = arith.constant 0 : index
      %84 = vector.load %arg6[%83, %c0_60, %c0_61] : memref<5x1x1024xf32, #tpu.memory_space<vmem>>, vector<1x1x1024xf32>
      %85 = vector.shape_cast %84 : vector<1x1x1024xf32> to vector<1x1024xf32>
      %c1_i32_62 = arith.constant 1 : i32
      %86 = arith.subi %arg0, %c1_i32_62 : i32
      %87 = arith.index_cast %86 : i32 to index
      %c0_63 = arith.constant 0 : index
      %c0_64 = arith.constant 0 : index
      %88 = vector.load %arg7[%87, %c0_63, %c0_64] : memref<5x1x1024xf32, #tpu.memory_space<vmem>>, vector<1x1x1024xf32>
      %89 = vector.shape_cast %88 : vector<1x1x1024xf32> to vector<1x1024xf32>
      %cst_65 = arith.constant 9.99999974E-6 : f32
      %90 = vector.broadcast %cst_65 : f32 to vector<8x1xf32>
      %91 = arith.addf %81, %90 : vector<8x1xf32>
      %92 = math.rsqrt %91 : vector<8x1xf32>
      %93 = vector.broadcast %92 : vector<8x1xf32> to vector<8x1024xf32>
      %94 = arith.mulf %76, %93 : vector<8x1024xf32>
      %95 = vector.broadcast %85 : vector<1x1024xf32> to vector<8x1024xf32>
      %96 = arith.mulf %94, %95 : vector<8x1024xf32>
      %97 = vector.broadcast %89 : vector<1x1024xf32> to vector<8x1024xf32>
      %98 = arith.addf %96, %97 : vector<8x1024xf32>
      %c0_66 = arith.constant 0 : index
      %c0_67 = arith.constant 0 : index
      %99 = vector.load %arg9[%c0_66, %c0_67] : memref<8x1024xf32, #tpu.memory_space<vmem>>, vector<8x1024xf32>
      tpu.vector_store %arg9[%c0_66, %c0_67], %98 {strides = array<i32>} : memref<8x1024xf32, #tpu.memory_space<vmem>>, vector<8x1024xf32>,
    } else {
    }
    %c0 = arith.constant 0 : index
    %c0_3 = arith.constant 0 : index
    %6 = vector.load %arg9[%c0, %c0_3] : memref<8x1024xf32, #tpu.memory_space<vmem>>, vector<8x1024xf32>
    %7 = arith.truncf %6 : vector<8x1024xf32> to vector<8x1024xbf16>
    %c0_4 = arith.constant 0 : index
    %c0_5 = arith.constant 0 : index
    %c0_6 = arith.constant 0 : index
    %8 = vector.load %arg2[%c0_4, %c0_5, %c0_6] : memref<3x1024x1024xbf16, #tpu.memory_space<vmem>>, vector<1x1024x1024xbf16>
    %9 = vector.shape_cast %8 : vector<1x1024x1024xbf16> to vector<1024x1024xbf16>
    %cst = arith.constant dense<0.000000e+00> : vector<8x1024xf32>
    %10 = tpu.matmul %7, %9, %cst {dimension_numbers = #tpu.dot_dimension_numbers<[1], [0], [0], [1], [0, 0, 1, 1], [], []>} : vector<8x1024xbf16>, vector<1024x1024xbf16>, vector<8x1024xf32> -> vector<8x1024xf32>
    %c0_7 = arith.constant 0 : index
    %c0_8 = arith.constant 0 : index
    %c0_9 = arith.constant 0 : index
    %11 = vector.load %arg3[%c0_7, %c0_8, %c0_9] : memref<3x1x1024xbf16, #tpu.memory_space<vmem>>, vector<1x1x1024xbf16>
    %12 = vector.shape_cast %11 : vector<1x1x1024xbf16> to vector<1x1024xbf16>
    %13 = arith.extf %12 : vector<1x1024xbf16> to vector<1x1024xf32>
    %14 = vector.broadcast %13 : vector<1x1024xf32> to vector<8x1024xf32>
    %15 = arith.addf %10, %14 : vector<8x1024xf32>
    %c0_10 = arith.constant 0 : index
    %c0_11 = arith.constant 0 : index
    %c0_12 = arith.constant 0 : index
    %16 = vector.load %arg4[%c0_10, %c0_11, %c0_12] : memref<3x1024x32xf32, #tpu.memory_space<vmem>>, vector<1x1024x32xf32>
    %17 = vector.shape_cast %16 : vector<1x1024x32xf32> to vector<1024x32xf32>
    %cst_13 = arith.constant dense<0.000000e+00> : vector<8x32xf32>
    %18 = tpu.matmul %6, %17, %cst_13 {dimension_numbers = #tpu.dot_dimension_numbers<[1], [0], [0], [1], [0, 0, 1, 1], [], []>} : vector<8x1024xf32>, vector<1024x32xf32>, vector<8x32xf32> -> vector<8x32xf32>
    %c0_14 = arith.constant 0 : index
    %c0_15 = arith.constant 0 : index
    %c0_16 = arith.constant 0 : index
    %19 = vector.load %arg5[%c0_14, %c0_15, %c0_16] : memref<3x32x1024xf32, #tpu.memory_space<vmem>>, vector<1x32x1024xf32>
    %20 = vector.shape_cast %19 : vector<1x32x1024xf32> to vector<32x1024xf32>
    %cst_17 = arith.constant dense<0.000000e+00> : vector<8x1024xf32>
    %21 = tpu.matmul %18, %20, %cst_17 {dimension_numbers = #tpu.dot_dimension_numbers<[1], [0], [0], [1], [0, 0, 1, 1], [], []>} : vector<8x32xf32>, vector<32x1024xf32>, vector<8x1024xf32> -> vector<8x1024xf32>
    %cst_18 = arith.constant 3.125000e-02 : f32
    %22 = vector.broadcast %cst_18 : f32 to vector<8x1024xf32>
    %23 = arith.mulf %21, %22 : vector<8x1024xf32>
    %24 = arith.addf %15, %23 : vector<8x1024xf32>
    %cst_19 = arith.constant 0.000000e+00 : f32
    %25 = vector.broadcast %cst_19 : f32 to vector<8x1024xf32>
    %26 = arith.maximumf %24, %25 : vector<8x1024xf32>
    %27 = arith.truncf %26 : vector<8x1024xf32> to vector<8x1024xbf16>
    %c1 = arith.constant 1 : index
    %c0_20 = arith.constant 0 : index
    %c0_21 = arith.constant 0 : index
    %28 = vector.load %arg2[%c1, %c0_20, %c0_21] : memref<3x1024x1024xbf16, #tpu.memory_space<vmem>>, vector<1x1024x1024xbf16>
    %29 = vector.shape_cast %28 : vector<1x1024x1024xbf16> to vector<1024x1024xbf16>
    %cst_22 = arith.constant dense<0.000000e+00> : vector<8x1024xf32>
    %30 = tpu.matmul %27, %29, %cst_22 {dimension_numbers = #tpu.dot_dimension_numbers<[1], [0], [0], [1], [0, 0, 1, 1], [], []>} : vector<8x1024xbf16>, vector<1024x1024xbf16>, vector<8x1024xf32> -> vector<8x1024xf32>
    %c1_23 = arith.constant 1 : index
    %c0_24 = arith.constant 0 : index
    %c0_25 = arith.constant 0 : index
    %31 = vector.load %arg3[%c1_23, %c0_24, %c0_25] : memref<3x1x1024xbf16, #tpu.memory_space<vmem>>, vector<1x1x1024xbf16>
    %32 = vector.shape_cast %31 : vector<1x1x1024xbf16> to vector<1x1024xbf16>
    %33 = arith.extf %32 : vector<1x1024xbf16> to vector<1x1024xf32>
    %34 = vector.broadcast %33 : vector<1x1024xf32> to vector<8x1024xf32>
    %35 = arith.addf %30, %34 : vector<8x1024xf32>
    %c1_26 = arith.constant 1 : index
    %c0_27 = arith.constant 0 : index
    %c0_28 = arith.constant 0 : index
    %36 = vector.load %arg4[%c1_26, %c0_27, %c0_28] : memref<3x1024x32xf32, #tpu.memory_space<vmem>>, vector<1x1024x32xf32>
    %37 = vector.shape_cast %36 : vector<1x1024x32xf32> to vector<1024x32xf32>
    %cst_29 = arith.constant dense<0.000000e+00> : vector<8x32xf32>
    %38 = tpu.matmul %26, %37, %cst_29 {dimension_numbers = #tpu.dot_dimension_numbers<[1], [0], [0], [1], [0, 0, 1, 1], [], []>} : vector<8x1024xf32>, vector<1024x32xf32>, vector<8x32xf32> -> vector<8x32xf32>
    %c1_30 = arith.constant 1 : index
    %c0_31 = arith.constant 0 : index
    %c0_32 = arith.constant 0 : index
    %39 = vector.load %arg5[%c1_30, %c0_31, %c0_32] : memref<3x32x1024xf32, #tpu.memory_space<vmem>>, vector<1x32x1024xf32>
    %40 = vector.shape_cast %39 : vector<1x32x1024xf32> to vector<32x1024xf32>
    %cst_33 = arith.constant dense<0.000000e+00> : vector<8x1024xf32>
    %41 = tpu.matmul %38, %40, %cst_33 {dimension_numbers = #tpu.dot_dimension_numbers<[1], [0], [0], [1], [0, 0, 1, 1], [], []>} : vector<8x32xf32>, vector<32x1024xf32>, vector<8x1024xf32> -> vector<8x1024xf32>
    %cst_34 = arith.constant 3.125000e-02 : f32
    %42 = vector.broadcast %cst_34 : f32 to vector<8x1024xf32>
    %43 = arith.mulf %41, %42 : vector<8x1024xf32>
    %44 = arith.addf %35, %43 : vector<8x1024xf32>
    %cst_35 = arith.constant 0.000000e+00 : f32
    %45 = vector.broadcast %cst_35 : f32 to vector<8x1024xf32>
    %46 = arith.maximumf %44, %45 : vector<8x1024xf32>
    %47 = arith.truncf %46 : vector<8x1024xf32> to vector<8x1024xbf16>
    %c2 = arith.constant 2 : index
    %c0_36 = arith.constant 0 : index
    %c0_37 = arith.constant 0 : index
    %48 = vector.load %arg2[%c2, %c0_36, %c0_37] : memref<3x1024x1024xbf16, #tpu.memory_space<vmem>>, vector<1x1024x1024xbf16>
    %49 = vector.shape_cast %48 : vector<1x1024x1024xbf16> to vector<1024x1024xbf16>
    %cst_38 = arith.constant dense<0.000000e+00> : vector<8x1024xf32>
    %50 = tpu.matmul %47, %49, %cst_38 {dimension_numbers = #tpu.dot_dimension_numbers<[1], [0], [0], [1], [0, 0, 1, 1], [], []>} : vector<8x1024xbf16>, vector<1024x1024xbf16>, vector<8x1024xf32> -> vector<8x1024xf32>
    %c2_39 = arith.constant 2 : index
    %c0_40 = arith.constant 0 : index
    %c0_41 = arith.constant 0 : index
    %51 = vector.load %arg3[%c2_39, %c0_40, %c0_41] : memref<3x1x1024xbf16, #tpu.memory_space<vmem>>, vector<1x1x1024xbf16>
    %52 = vector.shape_cast %51 : vector<1x1x1024xbf16> to vector<1x1024xbf16>
    %53 = arith.extf %52 : vector<1x1024xbf16> to vector<1x1024xf32>
    %54 = vector.broadcast %53 : vector<1x1024xf32> to vector<8x1024xf32>
    %55 = arith.addf %50, %54 : vector<8x1024xf32>
    %c2_42 = arith.constant 2 : index
    %c0_43 = arith.constant 0 : index
    %c0_44 = arith.constant 0 : index
    %56 = vector.load %arg4[%c2_42, %c0_43, %c0_44] : memref<3x1024x32xf32, #tpu.memory_space<vmem>>, vector<1x1024x32xf32>
    %57 = vector.shape_cast %56 : vector<1x1024x32xf32> to vector<1024x32xf32>
    %cst_45 = arith.constant dense<0.000000e+00> : vector<8x32xf32>
    %58 = tpu.matmul %46, %57, %cst_45 {dimension_numbers = #tpu.dot_dimension_numbers<[1], [0], [0], [1], [0, 0, 1, 1], [], []>} : vector<8x1024xf32>, vector<1024x32xf32>, vector<8x32xf32> -> vector<8x32xf32>
    %c2_46 = arith.constant 2 : index
    %c0_47 = arith.constant 0 : index
    %c0_48 = arith.constant 0 : index
    %59 = vector.load %arg5[%c2_46, %c0_47, %c0_48] : memref<3x32x1024xf32, #tpu.memory_space<vmem>>, vector<1x32x1024xf32>
    %60 = vector.shape_cast %59 : vector<1x32x1024xf32> to vector<32x1024xf32>
    %cst_49 = arith.constant dense<0.000000e+00> : vector<8x1024xf32>
    %61 = tpu.matmul %58, %60, %cst_49 {dimension_numbers = #tpu.dot_dimension_numbers<[1], [0], [0], [1], [0, 0, 1, 1], [], []>} : vector<8x32xf32>, vector<32x1024xf32>, vector<8x1024xf32> -> vector<8x1024xf32>
    %cst_50 = arith.constant 3.125000e-02 : f32
    %62 = vector.broadcast %cst_50 : f32 to vector<8x1024xf32>
    %63 = arith.mulf %61, %62 : vector<8x1024xf32>
    %64 = arith.addf %55, %63 : vector<8x1024xf32>
    %65 = arith.addf %64, %6 : vector<8x1024xf32>
    %c0_51 = arith.constant 0 : index
    %c0_52 = arith.constant 0 : index
    %66 = vector.load %arg9[%c0_51, %c0_52] : memref<8x1024xf32, #tpu.memory_space<vmem>>, vector<8x1024xf32>
    tpu.vector_store %arg9[%c0_51, %c0_52], %65 {strides = array<i32>} : memref<8x1024xf32, #tpu.memory_space<vmem>>, vector<8x1024xf32>,
    %c5_i32 = arith.constant 5 : i32
    %67 = arith.cmpi eq, %arg0, %c5_i32 : i32
    %68 = arith.extui %67 : i1 to i32
    %c0_i32_53 = arith.constant 0 : i32
    %69 = arith.cmpi ne, %68, %c0_i32_53 : i32
    scf.if %69 {
      %c0_54 = arith.constant 0 : index
      %c0_55 = arith.constant 0 : index
      %70 = vector.load %arg8[%c0_54, %c0_55] : memref<8x1024xf32, #tpu.memory_space<vmem>>, vector<8x1024xf32>
      tpu.vector_store %arg8[%c0_54, %c0_55], %65 {strides = array<i32>} : memref<8x1024xf32, #tpu.memory_space<vmem>>, vector<8x1024xf32>,
    } else {
    }
    return
  }
  func.func @transform_0(%arg0: i32) -> (i32, i32) {
    %c0_i32 = arith.constant 0 : i32
    %c0_i32_0 = arith.constant 0 : i32
    %c0_i32_1 = arith.constant 0 : i32
    return %c0_i32, %c0_i32_0 : i32, i32
  }
  func.func @transform_1(%arg0: i32) -> (i32, i32, i32) {
    %c0_i32 = arith.constant 0 : i32
    %c0_i32_0 = arith.constant 0 : i32
    %c0_i32_1 = arith.constant 0 : i32
    return %arg0, %c0_i32, %c0_i32_0 : i32, i32, i32
  }
  func.func @transform_2(%arg0: i32) -> (i32, i32, i32) {
    %c0_i32 = arith.constant 0 : i32
    %c0_i32_0 = arith.constant 0 : i32
    %c0_i32_1 = arith.constant 0 : i32
    return %arg0, %c0_i32, %c0_i32_0 : i32, i32, i32
  }
  func.func @transform_3(%arg0: i32) -> (i32, i32, i32) {
    %c0_i32 = arith.constant 0 : i32
    %c0_i32_0 = arith.constant 0 : i32
    %c0_i32_1 = arith.constant 0 : i32
    return %arg0, %c0_i32, %c0_i32_0 : i32, i32, i32
  }
  func.func @transform_4(%arg0: i32) -> (i32, i32, i32) {
    %c0_i32 = arith.constant 0 : i32
    %c0_i32_0 = arith.constant 0 : i32
    %c0_i32_1 = arith.constant 0 : i32
    return %arg0, %c0_i32, %c0_i32_0 : i32, i32, i32
  }
  func.func @transform_5(%arg0: i32) -> (i32, i32, i32) {
    %c0_i32 = arith.constant 0 : i32
    %c0_i32_0 = arith.constant 0 : i32
    %c0_i32_1 = arith.constant 0 : i32
    %c0_i32_2 = arith.constant 0 : i32
    return %c0_i32, %c0_i32_0, %c0_i32_1 : i32, i32, i32
  }
  func.func @transform_6(%arg0: i32) -> (i32, i32, i32) {
    %c0_i32 = arith.constant 0 : i32
    %c0_i32_0 = arith.constant 0 : i32
    %c0_i32_1 = arith.constant 0 : i32
    %c0_i32_2 = arith.constant 0 : i32
    return %c0_i32, %c0_i32_0, %c0_i32_1 : i32, i32, i32
  }
  func.func @transform_7(%arg0: i32) -> (i32, i32) {
    %c0_i32 = arith.constant 0 : i32
    %c0_i32_0 = arith.constant 0 : i32
    %c0_i32_1 = arith.constant 0 : i32
    return %c0_i32, %c0_i32_0 : i32, i32
  }
}

</mosaic_0001>

<bundles_post_ra>
// kernel: lora_bignet_forward.1
= control target key start
LH: loop header
LB: loop body
LE: loop exit
PB: predicated region body
PF: predicated region fallthrough
CT: control target
= control target key end

     0   :  { %12 = vsyncpa [#allocation4], 0  ;;  %s21092_s0 = inlined_call_operand.vmem [shape: f32[8,1024], index: 0, kind: input, shape index: {}]   ;;  %s21093_s1 = inlined_call_operand.hbm [shape: bf16[18,1024,1024], index: 1, kind: input, shape index: {}]   ;;  %s21094_s2 = inlined_call_operand.vmem [shape: bf16[18,1,1024], index: 2, kind: input, shape index: {}]   ;;  %s21095_s3 = inlined_call_operand.vmem [shape: f32[18,1024,32], index: 3, kind: input, shape index: {}]   ;;  %s21096_s4 = inlined_call_operand.vmem [shape: f32[18,32,1024], index: 4, kind: input, shape index: {}]   ;;  %s21097_s5 = inlined_call_operand.vmem [shape: f32[5,1,1024], index: 5, kind: input, shape index: {}]   ;;  %s21098_s6 = inlined_call_operand.vmem [shape: f32[5,1,1024], index: 6, kind: input, shape index: {}]   ;;  %s21099_s7 = inlined_call_operand.hbm [shape: f32[8,1024], index: 7, kind: output, shape index: {}]  }
   0x1   :  { %14 = vsyncpa [#allocation4 + $0x1], 0 }
   0x2   :  { %15 = vsyncpa [#allocation5], 0  ;;  %s18408_s24 = smov 0   ;;  %s18410_s25 = smov 0  }
   0x3   :  { %s18412_s26 = smov 0   ;;  %s18414_s27 = smov 0  }
   0x4 LB: > { %s18427_s28 = sadd.s32 4294967295, %s18361_s27   ;;  %s18430_s29 = sadd.s32 1, %s18361_s27   ;;  %s18361_s27 = sphi %s18414_s27, %s21106_s27   ;;  %s18357_s26 = sphi %s18412_s26, %s21105_s26   ;;  %s18353_s25 = sphi %s18410_s25, %s21104_s25   ;;  %s18349_s24 = sphi %s18408_s24, %s21103_s24  }
   0x5   : > { %s46_s30 = ssub.s32 %s18361_s27, %s18430_s29  ;;  %s49_s8 = sadd.s32 1, %s18357_s26 }
   0x6   : > { %p47_p0 = scmp.eq.s32.totalorder %s46_s30, 0  ;;  %p56_p1 = scmp.ne.s32.totalorder %s18357_s26, %s18353_s25 }
   0x7   : > { %p57_p2 = scmp.eq.s32.totalorder %s18361_s27, 0  ;;  %p62_p3 = scmp.ne.s32.totalorder %s18353_s25, %s18349_s24 }
   0x8   : > { %s18440_s9 = scalar_select %p47_p0, %s18357_s26, %s49_s8  }
   0x9   : > { %p58_p4 = por %p57_p2, %p56_p1  ;;  %p63_p5 = scmp.eq.s32.totalorder %s18427_s28, 0 }
   0xa   : > { %p18207_p6 = scmp.lt.s32.totalorder %s18361_s27, 6  ;;  %s236_s11 = sand.u32 1, %s18357_s26  }
   0xb   : > { %p18444_p7 = por %p63_p5, %p62_p3  ;;  %s18195_s12 = smul.u32 12288, %s236_s11 }
   0xc   : > { %s17294_s13 = smul.u32 196608, %s18361_s27  ;;  %p18450_p8 = pnand %p18207_p6, %p58_p4 }
   0xd   : > { %s240_s18 = scalar_lea.vmem [#allocation3], %s18195_s12  ;;  %s18462_s20 = scalar_lea.sflag [#allocation4], %s236_s11 }
   0xe   : > { %s18457_s17 = scalar_lea.hbm %s21093_s1, %s17294_s13  ;;  %s248_s19 = sshll.u32 %s240_s18, 4  ;;  %s18459_s19 = int_to_ptr.vmem [resolvable:$true] %s248_s19 }
   0xf   : > { %s18267_s21 = scalar_lea.hbm %s18457_s17, 196608  ;;  %p18269_p11 = pneg %p18450_p8 }
  0x10   : > { %p18268_p10 = scmp.ne.s32.totalorder %s18457_s17, %s18267_s21  ;;  %s18272_s24 = scalar_lea.hbm %s21093_s1, 1179648 }
  0x11   : > { %p18273_p0 = scmp.lt.u32.totalorder %s18457_s17, %s21093_s1  ;;  %p18274_p1 = scmp.lt.u32.totalorder %s18272_s24, %s18267_s21 }
  0x12   : > { %p18270_p12 = pnand %p18269_p11, %p18268_p10  ;;  %p18276_p3 = scmp.lt.u32.totalorder %s18267_s21, %s18457_s17 }
  0x13   : > { %p18275_p2 = por %p18274_p1, %p18273_p0 }
  0x14   : > { %p18271_p13 = pneg %p18270_p12 }
  0x15   : > { %p18277_p4 = por %p18276_p3, %p18275_p2 }
  0x17   : > { %p18278_p5 = pnand %p18277_p4, %p18271_p13 }
  0x19   : > { %18281 = shalt.err (!%p18278_p5)
}
  0x1a   : > { %s18282_s11 = scalar_lea.vmem %s18459_s19, 196608  ;;  %s18363_s12 = smov [#allocation3]  }
  0x1b   : > { %p18283_p6 = scmp.ne.s32.totalorder %s18459_s19, %s18282_s11  ;;  %s18287_s13 = sshll.u32 %s18363_s12, 4  ;;  %s18288_s13 = int_to_ptr.vmem [resolvable:$false] %s18287_s13 }
  0x1c   : > { %s18289_s15 = scalar_lea.vmem %s18288_s13, 393216  ;;  %p18290_p9 = scmp.lt.s32.totalorder %s18459_s19, %s18288_s13 }
  0x1d   : > { %p18285_p10 = pnand %p18283_p6, %p18269_p11  ;;  %p18291_p0 = scmp.lt.s32.totalorder %s18289_s15, %s18282_s11 }
  0x1f   : > { %p18286_p12 = pneg %p18285_p10  ;;  %p18292_p1 = por %p18291_p0, %p18290_p9 }
  0x21   : > { %p18293_p2 = pnand %p18292_p1, %p18286_p12 }
  0x23   : > { %18296 = shalt.err (!%p18293_p2)
}
  0x24   : > { %s18364_s16 = smov 512   ;;  %s18365_s18 = smov 32  }
  0x25   : > { %18206 = dma.hbm_to_vmem [thread:$0]  (!%p18450_p8), %s18457_s17, 196608, %s18459_s19, %s18462_s20, %s18364_s16, %s18364_s16, %s18365_s18  }
  0x26   : > { %p285_p11 = scmp.lt.s32.totalorder %s18361_s27, 7  ;;  %p21102_p13 = scmp.ge.s32.totalorder %s18361_s27, 1 }
  0x28   : > { %p286_p3 = pnand %p21102_p13, %p285_p11 }
  0x29   : > { %s291_s21 = sand.u32 (!%p286_p3), 1, %s18353_s25  }
  0x2a   : > { %289 = sbr.rel (%p286_p3) target bundleno = 3367 (0xd27), region = 48  ;;  %s292_s23 = scalar_lea.sflag (!%p286_p3), [#allocation4], %s291_s21 }
  0x2b   : > { %s18196_s22 = smul.u32 (!%p286_p3), 12288, %s291_s21 }
  0x2d   : > { %s18494_s24 = scalar_lea.vmem (!%p286_p3), [#allocation3], %s18196_s22 }
  0x31   : > { %18340 = dma.done.wait (%p18444_p7), %s292_s23, 196608  }
  0x32   : > { %18342 = vsyncadd (%p18444_p7), %s292_s23, 4294770688  ;;  %s339_s30 = smul.u32 3, %s18427_s28  ;;  %p14387_p7 = scmp.ne.s32.totalorder %s18427_s28, 0 }
  0x33   : > { %v363_v0 = vld [vmem:[%s21092_s0] sm:$0xff] (!%p14387_p7)  ;;  %v364_v1 = vld [vmem:[%s21092_s0 + $0x8] sm:$0xff] (!%p14387_p7)  ;;  %v365_v2 = vld [vmem:[%s21092_s0 + $0x10] sm:$0xff] (!%p14387_p7) }
  0x34   : > { %p340_p9 = scmp.lt.s32.totalorder %s339_s30, 17  ;;  %362 = sbr.rel (%p14387_p7) target bundleno = 59 (0x3b), region = 56  ;;  %371 = vst [vmem:[#allocation2] sm:$0xff] (!%p14387_p7), %v363_v0  ;;  %372 = vst [vmem:[#allocation2 + $0x8] sm:$0xff] (!%p14387_p7), %v364_v1  ;;  %v366_v3 = vld [vmem:[%s21092_s0 + $0x18] sm:$0xff] (!%p14387_p7)  ;;  %v367_v4 = vld [vmem:[%s21092_s0 + $0x20] sm:$0xff] (!%p14387_p7) }
  0x35   : > { %373 = vst [vmem:[#allocation2 + $0x10] sm:$0xff] (!%p14387_p7), %v365_v2  ;;  %v368_v5 = vld [vmem:[%s21092_s0 + $0x28] sm:$0xff] (!%p14387_p7)  ;;  %374 = vst [vmem:[#allocation2 + $0x18] sm:$0xff] (!%p14387_p7), %v366_v3  ;;  %v369_v6 = vld [vmem:[%s21092_s0 + $0x30] sm:$0xff] (!%p14387_p7) }
  0x36   : > { %s21108_s30 = smov (!%p340_p9, %s339_s30), 17  ;;  %375 = vst [vmem:[#allocation2 + $0x20] sm:$0xff] (!%p14387_p7), %v367_v4  ;;  %376 = vst [vmem:[#allocation2 + $0x28] sm:$0xff] (!%p14387_p7), %v368_v5  ;;  %v370_v7 = vld [vmem:[%s21092_s0 + $0x38] sm:$0xff] (!%p14387_p7) }
  0x37   : > { %s14382_s14 = sshll.u32 %s21108_s30, 3  ;;  %s17292_s27 = sshll.u32 %s21108_s30, 10  ;;  %377 = vst [vmem:[#allocation2 + $0x30] sm:$0xff] (!%p14387_p7), %v369_v6  ;;  %378 = vst [vmem:[#allocation2 + $0x38] sm:$0xff] (!%p14387_p7), %v370_v7 }
  0x38   : > { %s18504_s20 = scalar_lea.vmem %s21094_s2, %s14382_s14  ;;  %s18509_s12 = scalar_lea.vmem %s21095_s3, %s17292_s27 }
  0x39   : > { %s17293_s13 = sshll.u32 %s21108_s30, 8 }
  0x3a   : > { %s18514_s16 = scalar_lea.vmem %s21096_s4, %s17293_s13 }
  0x3b PF: > { %p14388_p8 = scmp.le.s32.totalorder %s18427_s28, 0 }
  0x3c   : > { %v383_v8 = vld [vmem:[#allocation2] sm:$0xff] (!%p14388_p8)  ;;  %v384_v9 = vld [vmem:[#allocation2 + $0x8] sm:$0xff] (!%p14388_p8)  ;;  %v385_v10 = vld [vmem:[#allocation2 + $0x10] sm:$0xff] (!%p14388_p8)  ;;  %s14389_s22 = sadd.s32 (!%p14388_p8), 4294967295, %s18427_s28  ;;  %v445_v48 = vlaneseq (!%p14388_p8) }
  0x3d   : > { %382 = sbr.rel (%p14388_p8) target bundleno = 404 (0x194), region = 60  ;;  %v391_v11 = vadd.f32 (!%p14388_p8), %v384_v9, %v383_v8  ;;  %v386_v12 = vld [vmem:[#allocation2 + $0x18] sm:$0xff] (!%p14388_p8)  ;;  %v387_v14 = vld [vmem:[#allocation2 + $0x20] sm:$0xff] (!%p14388_p8)  ;;  %v388_v16 = vld [vmem:[#allocation2 + $0x28] sm:$0xff] (!%p14388_p8)  ;;  %s14390_s23 = sshll.u32 (!%p14388_p8), %s14389_s22, 3 }
  0x3e   : > { %v389_v18 = vld [vmem:[#allocation2 + $0x30] sm:$0xff] (!%p14388_p8)  ;;  %v390_v20 = vld [vmem:[#allocation2 + $0x38] sm:$0xff] (!%p14388_p8)  ;;  %v446_v52 = vshrl.u32 (!%p14388_p8), %v445_v48, 7  ;;  %s430_s30 = scalar_lea.vmem (!%p14388_p8), %s21097_s5, %s14390_s23  ;;  %s432_s8 = scalar_lea.vmem (!%p14388_p8), %s21098_s6, %s14390_s23 }
  0x3f   : > { %v392_v13 = vadd.f32 (!%p14388_p8), %v391_v11, %v385_v10  ;;  %v431_v57 = vld [vmem:[%s430_s30] sm:$0xff] (!%p14388_p8) }
  0x40   : > { %v447_v53 = vsub.s32 (!%p14388_p8), 0, %v446_v52  ;;  %v451_v54 = vsub.s32 (!%p14388_p8), 1, %v446_v52  ;;  %v455_v55 = vsub.s32 (!%p14388_p8), 2, %v446_v52  ;;  %v459_v56 = vsub.s32 (!%p14388_p8), 3, %v446_v52  ;;  %v433_v62 = vld [vmem:[%s432_s8] sm:$0xff] (!%p14388_p8) }
  0x41   : > { %v393_v15 = vadd.f32 (!%p14388_p8), %v392_v13, %v386_v12  ;;  %v463_v58 = vsub.s32 (!%p14388_p8), 4, %v446_v52  ;;  %v467_v59 = vsub.s32 (!%p14388_p8), 5, %v446_v52  ;;  %v471_v60 = vsub.s32 (!%p14388_p8), 6, %v446_v52 }
  0x42   : > { %v475_v61 = vsub.s32 (!%p14388_p8), 7, %v446_v52  ;;  %v448_v63 = vrot.slane (!%p14388_p8), %v431_v57, %v447_v53  ;;  %v452_v0 = vrot.slane (!%p14388_p8), %v431_v57, %v451_v54  ;;  %v456_v1 = vrot.slane (!%p14388_p8), %v431_v57, %v455_v55 }
  0x43   : > { %v394_v17 = vadd.f32 (!%p14388_p8), %v393_v15, %v387_v14  ;;  %v460_v2 = vrot.slane (!%p14388_p8), %v431_v57, %v459_v56  ;;  %v464_v3 = vrot.slane (!%p14388_p8), %v431_v57, %v463_v58  ;;  %v468_v4 = vrot.slane (!%p14388_p8), %v431_v57, %v467_v59 }
  0x44   : > { %v472_v5 = vrot.slane %v431_v57, %v471_v60  ;;  %v476_v6 = vrot.slane %v431_v57, %v475_v61  ;;  %v497_v7 = vrot.slane %v433_v62, %v447_v53  ;;  %v517_v13 = vrot.slane %v433_v62, %v467_v59 }
  0x45   : > { %v395_v19 = vadd.f32 %v394_v17, %v388_v16  ;;  %v525_v15 = vrot.slane %v433_v62, %v475_v61 }
  0x47   : > { %v396_v21 = vadd.f32 %v395_v19, %v389_v18 }
  0x49   : > { %v397_v22 = vadd.f32 %v396_v21, %v390_v20 }
  0x4b   : > { %398 = vadd.xlane.f32.xlu0 %v397_v22 }
  0xd8   : > { %v399_v23 = vpop.xlane.xlu0 %398 }
  0xd9   : > { %v401_v24 = vmul.f32 0.0009765625, %v399_v23 }
  0xdb   : > { %v402_v25 = vsub.f32 %v383_v8, %v401_v24  ;;  %v403_v26 = vsub.f32 %v384_v9, %v401_v24  ;;  %v404_v27 = vsub.f32 %v385_v10, %v401_v24  ;;  %v405_v28 = vsub.f32 %v386_v12, %v401_v24 }
  0xdc   : > { %v406_v31 = vsub.f32 %v387_v14, %v401_v24  ;;  %v407_v34 = vsub.f32 %v388_v16, %v401_v24  ;;  %v408_v37 = vsub.f32 %v389_v18, %v401_v24  ;;  %v409_v40 = vsub.f32 %v390_v20, %v401_v24 }
  0xdd   : > { %v410_v29 = vmul.f32 %v402_v25, %v402_v25  ;;  %v411_v30 = vmul.f32 %v403_v26, %v403_v26  ;;  %v412_v32 = vmul.f32 %v404_v27, %v404_v27  ;;  %v413_v35 = vmul.f32 %v405_v28, %v405_v28 }
  0xde   : > { %v414_v38 = vmul.f32 %v406_v31, %v406_v31  ;;  %v415_v41 = vmul.f32 %v407_v34, %v407_v34  ;;  %v416_v43 = vmul.f32 %v408_v37, %v408_v37  ;;  %v417_v45 = vmul.f32 %v409_v40, %v409_v40 }
  0xdf   : > { %v418_v33 = vadd.f32 %v411_v30, %v410_v29  ;;  %v501_v8 = vrot.slane %v433_v62, %v451_v54  ;;  %v505_v9 = vrot.slane %v433_v62, %v455_v55  ;;  %v509_v10 = vrot.slane %v433_v62, %v459_v56 }
  0xe0   : > { %v513_v12 = vrot.slane %v433_v62, %v463_v58  ;;  %v521_v14 = vrot.slane %v433_v62, %v471_v60 }
  0xe1   : > { %v419_v36 = vadd.f32 %v418_v33, %v412_v32 }
  0xe3   : > { %v420_v39 = vadd.f32 %v419_v36, %v413_v35 }
  0xe5   : > { %v421_v42 = vadd.f32 %v420_v39, %v414_v38 }
  0xe7   : > { %v422_v44 = vadd.f32 %v421_v42, %v415_v41 }
  0xe9   : > { %v423_v46 = vadd.f32 %v422_v44, %v416_v43 }
  0xeb   : > { %v424_v47 = vadd.f32 %v423_v46, %v417_v45 }
  0xed   : > { %425 = vadd.xlane.f32.xlu0 %v424_v47 }
 0x17a   : > { %v426_v49 = vpop.xlane.xlu0 %425 }
 0x17b   : > { %v427_v50 = vmul.f32 0.0009765625, %v426_v49 }
 0x17d   : > { %v434_v51 = vadd.f32 1e-05, %v427_v50 }
 0x17f   : > { %18246 = vrsqrt.f32 %v434_v51 }
 0x189   : > { %v18247_v11 = vpop.eup %18246 }
 0x18a   : > { %v436_v16 = vmul.f32 %v18247_v11, %v402_v25  ;;  %v437_v17 = vmul.f32 %v18247_v11, %v403_v26  ;;  %v438_v18 = vmul.f32 %v18247_v11, %v404_v27  ;;  %v439_v19 = vmul.f32 %v18247_v11, %v405_v28 }
 0x18b   : > { %v440_v20 = vmul.f32 %v18247_v11, %v406_v31  ;;  %v441_v21 = vmul.f32 %v18247_v11, %v407_v34  ;;  %v442_v22 = vmul.f32 %v18247_v11, %v408_v37  ;;  %v443_v23 = vmul.f32 %v18247_v11, %v409_v40 }
 0x18c   : > { %v485_v24 = vmul.f32 %v448_v63, %v436_v16  ;;  %v486_v29 = vmul.f32 %v452_v0, %v437_v17  ;;  %v487_v30 = vmul.f32 %v456_v1, %v438_v18  ;;  %v488_v32 = vmul.f32 %v460_v2, %v439_v19 }
 0x18d   : > { %v489_v33 = vmul.f32 %v464_v3, %v440_v20  ;;  %v490_v35 = vmul.f32 %v468_v4, %v441_v21  ;;  %v491_v36 = vmul.f32 %v472_v5, %v442_v22  ;;  %v492_v38 = vmul.f32 %v476_v6, %v443_v23 }
 0x18e   : > { %v534_v39 = vadd.f32 %v497_v7, %v485_v24  ;;  %v535_v41 = vadd.f32 %v501_v8, %v486_v29  ;;  %v536_v42 = vadd.f32 %v505_v9, %v487_v30  ;;  %v537_v43 = vadd.f32 %v509_v10, %v488_v32 }
 0x18f   : > { %v538_v25 = vadd.f32 %v513_v12, %v489_v33  ;;  %v539_v26 = vadd.f32 %v517_v13, %v490_v35  ;;  %v540_v27 = vadd.f32 %v521_v14, %v491_v36  ;;  %v541_v28 = vadd.f32 %v525_v15, %v492_v38 }
 0x190   : > { %542 = vst [vmem:[#allocation2] sm:$0xff] %v534_v39  ;;  %543 = vst [vmem:[#allocation2 + $0x8] sm:$0xff] %v535_v41 }
 0x191   : > { %544 = vst [vmem:[#allocation2 + $0x10] sm:$0xff] %v536_v42  ;;  %545 = vst [vmem:[#allocation2 + $0x18] sm:$0xff] %v537_v43 }
 0x192   : > { %546 = vst [vmem:[#allocation2 + $0x20] sm:$0xff] %v538_v25  ;;  %547 = vst [vmem:[#allocation2 + $0x28] sm:$0xff] %v539_v26 }
 0x193   : > { %548 = vst [vmem:[#allocation2 + $0x30] sm:$0xff] %v540_v27  ;;  %549 = vst [vmem:[#allocation2 + $0x38] sm:$0xff] %v541_v28 }
 0x194 PF: > { %v566_v31 = vld [vmem:[%s18494_s24] sm:$0xff]  ;;  %vm4811_vm0 = vcmask 261120   ;;  %p17285_p4 = scmp.ne.s32.totalorder %s18427_s28, 5 }
 0x195   : > { %v570_v34 = vld [vmem:[%s18494_s24 + $0x20] sm:$0xff] }
 0x196   : > { %v694_v37 = vld [vmem:[%s18494_s24 + $0x400] sm:$0xff]  ;;  %v14392_v40 = vcombine.high %v566_v31, %v570_v34  ;;  %v14391_v45 = vcombine.low %v566_v31, %v570_v34 }
 0x197   : > { %v698_v44 = vld [vmem:[%s18494_s24 + $0x420] sm:$0xff]  ;;  %v551_v35 = vld [vmem:[#allocation2 + $0x8] sm:$0xff] }
 0x198   : > { %v574_v46 = vld [vmem:[%s18494_s24 + $0x40] sm:$0xff]  ;;  %v14520_v48 = vcombine.high %v694_v37, %v698_v44  ;;  %v14519_v49 = vcombine.low %v694_v37, %v698_v44  ;;  %3715 = vmatprep.subr.bf16.mxu0 %v14392_v40  ;;  %v553_v36 = vld [vmem:[#allocation2 + $0x18] sm:$0xff]  ;;  %v18579_v42 = vpack.c.bf16 %v551_v35, %v551_v35 }
 0x199   : > { %v578_v47 = vld [vmem:[%s18494_s24 + $0x60] sm:$0xff]  ;;  %3716 = vmatpush1.bf16.msra.mxu0 %v14391_v45  ;;  %v18581_v43 = vpack.c.bf16 %v553_v36, %v553_v36 }
 0x19a   : > { %v14400_v50 = vcombine.high %v574_v46, %v578_v47  ;;  %v702_v51 = vld [vmem:[%s18494_s24 + $0x440] sm:$0xff]  ;;  %3756 = vmatprep.subr.bf16.mxu1 %v14520_v48  ;;  %v14399_v58 = vcombine.low %v574_v46, %v578_v47  ;;  %3747 = vmatprep.mubr.bf16.mxu0 %v18579_v42 }
 0x19b   : > { %v706_v52 = vld [vmem:[%s18494_s24 + $0x460] sm:$0xff]  ;;  %3757 = vmatpush1.bf16.msra.mxu1 %v14519_v49  ;;  %3788 = vmatprep.mubr.bf16.mxu1 %v18581_v43 }
 0x19c   : > { %v582_v53 = vld [vmem:[%s18494_s24 + $0x80] sm:$0xff]  ;;  %v14528_v54 = vcombine.high %v702_v51, %v706_v52  ;;  %3717 = vmatprep.subr.bf16.mxu0 %v14400_v50  ;;  %v14527_v59 = vcombine.low %v702_v51, %v706_v52 }
 0x19d   : > { %v586_v55 = vld [vmem:[%s18494_s24 + $0xa0] sm:$0xff]  ;;  %3718 = vmatpush1.bf16.msra.mxu0 %v14399_v58 }
 0x19e   : > { %v710_v56 = vld [vmem:[%s18494_s24 + $0x480] sm:$0xff]  ;;  %v14408_v60 = vcombine.high %v582_v53, %v586_v55  ;;  %3758 = vmatprep.subr.bf16.mxu1 %v14528_v54  ;;  %v14407_v2 = vcombine.low %v582_v53, %v586_v55 }
 0x19f   : > { %v714_v57 = vld [vmem:[%s18494_s24 + $0x4a0] sm:$0xff]  ;;  %3759 = vmatpush1.bf16.msra.mxu1 %v14527_v59 }
 0x1a0   : > { %v14536_v61 = vcombine.high %v710_v56, %v714_v57  ;;  %v590_v62 = vld [vmem:[%s18494_s24 + $0xc0] sm:$0xff]  ;;  %3719 = vmatprep.subr.bf16.mxu0 %v14408_v60  ;;  %v14535_v3 = vcombine.low %v710_v56, %v714_v57 }
 0x1a1   : > { %v594_v63 = vld [vmem:[%s18494_s24 + $0xe0] sm:$0xff]  ;;  %3720 = vmatpush1.bf16.msra.mxu0 %v14407_v2 }
 0x1a2   : > { %v718_v0 = vld [vmem:[%s18494_s24 + $0x4c0] sm:$0xff]  ;;  %v14416_v4 = vcombine.high %v590_v62, %v594_v63  ;;  %3760 = vmatprep.subr.bf16.mxu1 %v14536_v61  ;;  %v14415_v10 = vcombine.low %v590_v62, %v594_v63 }
 0x1a3   : > { %v722_v1 = vld [vmem:[%s18494_s24 + $0x4e0] sm:$0xff]  ;;  %3761 = vmatpush1.bf16.msra.mxu1 %v14535_v3 }
 0x1a4   : > { %v14544_v5 = vcombine.high %v718_v0, %v722_v1  ;;  %v598_v6 = vld [vmem:[%s18494_s24 + $0x100] sm:$0xff]  ;;  %3721 = vmatprep.subr.bf16.mxu0 %v14416_v4  ;;  %v14543_v11 = vcombine.low %v718_v0, %v722_v1 }
 0x1a5   : > { %v602_v7 = vld [vmem:[%s18494_s24 + $0x120] sm:$0xff]  ;;  %3722 = vmatpush1.bf16.msra.mxu0 %v14415_v10 }
 0x1a6   : > { %v726_v8 = vld [vmem:[%s18494_s24 + $0x500] sm:$0xff]  ;;  %v14424_v12 = vcombine.high %v598_v6, %v602_v7  ;;  %3762 = vmatprep.subr.bf16.mxu1 %v14544_v5  ;;  %v14423_v18 = vcombine.low %v598_v6, %v602_v7 }
 0x1a7   : > { %v730_v9 = vld [vmem:[%s18494_s24 + $0x520] sm:$0xff]  ;;  %3763 = vmatpush1.bf16.msra.mxu1 %v14543_v11 }
 0x1a8   : > { %v14552_v13 = vcombine.high %v726_v8, %v730_v9  ;;  %v606_v14 = vld [vmem:[%s18494_s24 + $0x140] sm:$0xff]  ;;  %3723 = vmatprep.subr.bf16.mxu0 %v14424_v12  ;;  %v14551_v19 = vcombine.low %v726_v8, %v730_v9 }
 0x1a9   : > { %v610_v15 = vld [vmem:[%s18494_s24 + $0x160] sm:$0xff]  ;;  %3724 = vmatpush1.bf16.msra.mxu0 %v14423_v18 }
 0x1aa   : > { %v734_v16 = vld [vmem:[%s18494_s24 + $0x540] sm:$0xff]  ;;  %v14432_v20 = vcombine.high %v606_v14, %v610_v15  ;;  %3764 = vmatprep.subr.bf16.mxu1 %v14552_v13  ;;  %v14431_v30 = vcombine.low %v606_v14, %v610_v15 }
 0x1ab   : > { %v738_v17 = vld [vmem:[%s18494_s24 + $0x560] sm:$0xff]  ;;  %3765 = vmatpush1.bf16.msra.mxu1 %v14551_v19 }
 0x1ac   : > { %v14560_v21 = vcombine.high %v734_v16, %v738_v17  ;;  %v614_v22 = vld [vmem:[%s18494_s24 + $0x180] sm:$0xff]  ;;  %3725 = vmatprep.subr.bf16.mxu0 %v14432_v20  ;;  %v14559_v32 = vcombine.low %v734_v16, %v738_v17 }
 0x1ad   : > { %v618_v23 = vld [vmem:[%s18494_s24 + $0x1a0] sm:$0xff]  ;;  %3726 = vmatpush1.bf16.msra.mxu0 %v14431_v30 }
 0x1ae   : > { %v742_v24 = vld [vmem:[%s18494_s24 + $0x580] sm:$0xff]  ;;  %v14440_v33 = vcombine.high %v614_v22, %v618_v23  ;;  %3766 = vmatprep.subr.bf16.mxu1 %v14560_v21  ;;  %v14439_v27 = vcombine.low %v614_v22, %v618_v23 }
 0x1af   : > { %v746_v29 = vld [vmem:[%s18494_s24 + $0x5a0] sm:$0xff]  ;;  %3767 = vmatpush1.bf16.msra.mxu1 %v14559_v32 }
 0x1b0   : > { %v14568_v38 = vcombine.high %v742_v24, %v746_v29  ;;  %v622_v39 = vld [vmem:[%s18494_s24 + $0x1c0] sm:$0xff]  ;;  %3727 = vmatprep.subr.bf16.mxu0 %v14440_v33  ;;  %v14567_v28 = vcombine.low %v742_v24, %v746_v29 }
 0x1b1   : > { %v626_v41 = vld [vmem:[%s18494_s24 + $0x1e0] sm:$0xff]  ;;  %3728 = vmatpush1.bf16.msra.mxu0 %v14439_v27 }
 0x1b2   : > { %v750_v25 = vld [vmem:[%s18494_s24 + $0x5c0] sm:$0xff]  ;;  %v14448_v31 = vcombine.high %v622_v39, %v626_v41  ;;  %3768 = vmatprep.subr.bf16.mxu1 %v14568_v38  ;;  %v14447_v46 = vcombine.low %v622_v39, %v626_v41 }
 0x1b3   : > { %v754_v26 = vld [vmem:[%s18494_s24 + $0x5e0] sm:$0xff]  ;;  %3769 = vmatpush1.bf16.msra.mxu1 %v14567_v28 }
 0x1b4   : > { %v14576_v34 = vcombine.high %v750_v25, %v754_v26  ;;  %v630_v37 = vld [vmem:[%s18494_s24 + $0x200] sm:$0xff]  ;;  %3729 = vmatprep.subr.bf16.mxu0 %v14448_v31  ;;  %v14575_v47 = vcombine.low %v750_v25, %v754_v26 }
 0x1b5   : > { %v634_v40 = vld [vmem:[%s18494_s24 + $0x220] sm:$0xff]  ;;  %3730 = vmatpush1.bf16.msra.mxu0 %v14447_v46 }
 0x1b6   : > { %v758_v44 = vld [vmem:[%s18494_s24 + $0x600] sm:$0xff]  ;;  %v14456_v48 = vcombine.high %v630_v37, %v634_v40  ;;  %3770 = vmatprep.subr.bf16.mxu1 %v14576_v34  ;;  %v14455_v54 = vcombine.low %v630_v37, %v634_v40 }
 0x1b7   : > { %v762_v45 = vld [vmem:[%s18494_s24 + $0x620] sm:$0xff]  ;;  %3771 = vmatpush1.bf16.msra.mxu1 %v14575_v47 }
 0x1b8   : > { %v14584_v49 = vcombine.high %v758_v44, %v762_v45  ;;  %v638_v50 = vld [vmem:[%s18494_s24 + $0x240] sm:$0xff]  ;;  %3731 = vmatprep.subr.bf16.mxu0 %v14456_v48  ;;  %v14583_v55 = vcombine.low %v758_v44, %v762_v45 }
 0x1b9   : > { %v642_v51 = vld [vmem:[%s18494_s24 + $0x260] sm:$0xff]  ;;  %3732 = vmatpush1.bf16.msra.mxu0 %v14455_v54 }
 0x1ba   : > { %v766_v52 = vld [vmem:[%s18494_s24 + $0x640] sm:$0xff]  ;;  %v14464_v56 = vcombine.high %v638_v50, %v642_v51  ;;  %3772 = vmatprep.subr.bf16.mxu1 %v14584_v49  ;;  %v14463_v62 = vcombine.low %v638_v50, %v642_v51  ;;  %v552_v51 = vld [vmem:[#allocation2 + $0x10] sm:$0xff] }
 0x1bb   : > { %v770_v53 = vld [vmem:[%s18494_s24 + $0x660] sm:$0xff]  ;;  %3773 = vmatpush1.bf16.msra.mxu1 %v14583_v55 }
 0x1bc   : > { %v14592_v57 = vcombine.high %v766_v52, %v770_v53  ;;  %v646_v58 = vld [vmem:[%s18494_s24 + $0x280] sm:$0xff]  ;;  %3733 = vmatprep.subr.bf16.mxu0 %v14464_v56  ;;  %v14591_v63 = vcombine.low %v766_v52, %v770_v53 }
 0x1bd   : > { %v650_v59 = vld [vmem:[%s18494_s24 + $0x2a0] sm:$0xff]  ;;  %3734 = vmatpush1.bf16.msra.mxu0 %v14463_v62  ;;  %v557_v62 = vld [vmem:[#allocation2 + $0x38] sm:$0xff] }
 0x1be   : > { %v774_v60 = vld [vmem:[%s18494_s24 + $0x680] sm:$0xff]  ;;  %v14472_v0 = vcombine.high %v646_v58, %v650_v59  ;;  %3774 = vmatprep.subr.bf16.mxu1 %v14592_v57  ;;  %v14471_v6 = vcombine.low %v646_v58, %v650_v59  ;;  %v555_v59 = vld [vmem:[#allocation2 + $0x28] sm:$0xff] }
 0x1bf   : > { %v778_v61 = vld [vmem:[%s18494_s24 + $0x6a0] sm:$0xff]  ;;  %3775 = vmatpush1.bf16.msra.mxu1 %v14591_v63 }
 0x1c0   : > { %v14600_v1 = vcombine.high %v774_v60, %v778_v61  ;;  %v654_v2 = vld [vmem:[%s18494_s24 + $0x2c0] sm:$0xff]  ;;  %3735 = vmatprep.subr.bf16.mxu0 %v14472_v0  ;;  %v14599_v7 = vcombine.low %v774_v60, %v778_v61  ;;  %v18629_v60 = vpack.c.bf16 %v552_v51, %v552_v51 }
 0x1c1   : > { %v658_v3 = vld [vmem:[%s18494_s24 + $0x2e0] sm:$0xff]  ;;  %3736 = vmatpush1.bf16.msra.mxu0 %v14471_v6 }
 0x1c2   : > { %v782_v4 = vld [vmem:[%s18494_s24 + $0x6c0] sm:$0xff]  ;;  %v14480_v8 = vcombine.high %v654_v2, %v658_v3  ;;  %3776 = vmatprep.subr.bf16.mxu1 %v14600_v1  ;;  %v14479_v14 = vcombine.low %v654_v2, %v658_v3 }
 0x1c3   : > { %v786_v5 = vld [vmem:[%s18494_s24 + $0x6e0] sm:$0xff]  ;;  %3777 = vmatpush1.bf16.msra.mxu1 %v14599_v7  ;;  %v18638_v7 = vpack.c.bf16 %v557_v62, %v557_v62 }
 0x1c4   : > { %v14608_v9 = vcombine.high %v782_v4, %v786_v5  ;;  %v662_v10 = vld [vmem:[%s18494_s24 + $0x300] sm:$0xff]  ;;  %3737 = vmatprep.subr.bf16.mxu0 %v14480_v8  ;;  %v14607_v15 = vcombine.low %v782_v4, %v786_v5  ;;  %v18633_v4 = vpack.c.bf16 %v555_v59, %v555_v59 }
 0x1c5   : > { %v666_v11 = vld [vmem:[%s18494_s24 + $0x320] sm:$0xff]  ;;  %3738 = vmatpush1.bf16.msra.mxu0 %v14479_v14 }
 0x1c6   : > { %v790_v12 = vld [vmem:[%s18494_s24 + $0x700] sm:$0xff]  ;;  %v14488_v16 = vcombine.high %v662_v10, %v666_v11  ;;  %3778 = vmatprep.subr.bf16.mxu1 %v14608_v9  ;;  %v14487_v22 = vcombine.low %v662_v10, %v666_v11 }
 0x1c7   : > { %v794_v13 = vld [vmem:[%s18494_s24 + $0x720] sm:$0xff]  ;;  %3779 = vmatpush1.bf16.msra.mxu1 %v14607_v15 }
 0x1c8   : > { %v14616_v17 = vcombine.high %v790_v12, %v794_v13  ;;  %v670_v18 = vld [vmem:[%s18494_s24 + $0x340] sm:$0xff]  ;;  %3739 = vmatprep.subr.bf16.mxu0 %v14488_v16  ;;  %v14615_v23 = vcombine.low %v790_v12, %v794_v13 }
 0x1c9   : > { %v674_v19 = vld [vmem:[%s18494_s24 + $0x360] sm:$0xff]  ;;  %3740 = vmatpush1.bf16.msra.mxu0 %v14487_v22 }
 0x1ca   : > { %v798_v20 = vld [vmem:[%s18494_s24 + $0x740] sm:$0xff]  ;;  %v14496_v24 = vcombine.high %v670_v18, %v674_v19  ;;  %3780 = vmatprep.subr.bf16.mxu1 %v14616_v17  ;;  %v14495_v36 = vcombine.low %v670_v18, %v674_v19 }
 0x1cb   : > { %v802_v21 = vld [vmem:[%s18494_s24 + $0x760] sm:$0xff]  ;;  %3781 = vmatpush1.bf16.msra.mxu1 %v14615_v23 }
 0x1cc   : > { %v14624_v29 = vcombine.high %v798_v20, %v802_v21  ;;  %v678_v30 = vld [vmem:[%s18494_s24 + $0x380] sm:$0xff]  ;;  %3741 = vmatprep.subr.bf16.mxu0 %v14496_v24  ;;  %v14623_v38 = vcombine.low %v798_v20, %v802_v21 }
 0x1cd   : > { %v682_v32 = vld [vmem:[%s18494_s24 + $0x3a0] sm:$0xff]  ;;  %3742 = vmatpush1.bf16.msra.mxu0 %v14495_v36 }
 0x1ce   : > { %v806_v33 = vld [vmem:[%s18494_s24 + $0x780] sm:$0xff]  ;;  %v14504_v39 = vcombine.high %v678_v30, %v682_v32  ;;  %3782 = vmatprep.subr.bf16.mxu1 %v14624_v29  ;;  %v14503_v31 = vcombine.low %v678_v30, %v682_v32 }
 0x1cf   : > { %v810_v35 = vld [vmem:[%s18494_s24 + $0x7a0] sm:$0xff]  ;;  %3783 = vmatpush1.bf16.msra.mxu1 %v14623_v38 }
 0x1d0   : > { %v14632_v41 = vcombine.high %v806_v33, %v810_v35  ;;  %v686_v25 = vld [vmem:[%s18494_s24 + $0x3c0] sm:$0xff]  ;;  %3743 = vmatprep.subr.bf16.mxu0 %v14504_v39  ;;  %v14631_v34 = vcombine.low %v806_v33, %v810_v35 }
 0x1d1   : > { %v690_v26 = vld [vmem:[%s18494_s24 + $0x3e0] sm:$0xff]  ;;  %3744 = vmatpush1.bf16.msra.mxu0 %v14503_v31 }
 0x1d2   : > { %v814_v27 = vld [vmem:[%s18494_s24 + $0x7c0] sm:$0xff]  ;;  %v14512_v37 = vcombine.high %v686_v25, %v690_v26  ;;  %3784 = vmatprep.subr.bf16.mxu1 %v14632_v41  ;;  %v14511_v48 = vcombine.low %v686_v25, %v690_v26 }
 0x1d3   : > { %v818_v28 = vld [vmem:[%s18494_s24 + $0x7e0] sm:$0xff]  ;;  %3785 = vmatpush1.bf16.msra.mxu1 %v14631_v34 }
 0x1d4   : > { %v14640_v40 = vcombine.high %v814_v27, %v818_v28  ;;  %v822_v44 = vld [vmem:[%s18494_s24 + $0x800] sm:$0xff]  ;;  %3745 = vmatprep.subr.bf16.mxu0 %v14512_v37  ;;  %v14639_v50 = vcombine.low %v814_v27, %v818_v28 }
 0x1d5   : > { %v826_v45 = vld [vmem:[%s18494_s24 + $0x820] sm:$0xff]  ;;  %3746 = vmatpush1.bf16.msra.mxu0 %v14511_v48 }
 0x1d6   : > { %v950_v46 = vld [vmem:[%s18494_s24 + $0xc00] sm:$0xff]  ;;  %v14648_v52 = vcombine.high %v822_v44, %v826_v45  ;;  %3786 = vmatprep.subr.bf16.mxu1 %v14640_v40  ;;  %v14647_v61 = vcombine.low %v822_v44, %v826_v45 }
 0x1d7   : > { %v954_v47 = vld [vmem:[%s18494_s24 + $0xc20] sm:$0xff]  ;;  %3787 = vmatpush1.bf16.msra.mxu1 %v14639_v50 }
 0x1d8   : > { %v550_v49 = vld [vmem:[#allocation2] sm:$0xff]  ;;  %v14776_v53 = vcombine.high %v950_v46, %v954_v47  ;;  %3797 = vmatprep.subr.bf16.mxu0 %v14648_v52  ;;  %v14775_v63 = vcombine.low %v950_v46, %v954_v47 }
 0x1d9   : > { %v830_v54 = vld [vmem:[%s18494_s24 + $0x840] sm:$0xff]  ;;  %v18625_v56 = vpack.c.bf16 %v550_v49, %v550_v49 }
 0x1da   : > { %v834_v55 = vld [vmem:[%s18494_s24 + $0x860] sm:$0xff]  ;;  %3838 = vmatprep.subr.bf16.mxu1 %v14776_v53  ;;  %3789 = vmatmul.mubr.bf16.vlgmr.msra.gmra.mrb[0].mxu1 %v18629_v60 }
 0x1db   : > { %v958_v57 = vld [vmem:[%s18494_s24 + $0xc40] sm:$0xff]  ;;  %v14656_v0 = vcombine.high %v830_v54, %v834_v55  ;;  %3748 = vmatmul.mubr.bf16.vlgmr.msra.gmra.mrb[0].mxu0 %v18625_v56  ;;  %v14655_v8 = vcombine.low %v830_v54, %v834_v55  ;;  %3839 = vmatpush1.bf16.msra.mxu1 %v14775_v63 }
 0x1dc   : > { %v962_v58 = vld [vmem:[%s18494_s24 + $0xc60] sm:$0xff]  ;;  %3798 = vmatpush1.bf16.msra.mxu0 %v14647_v61  ;;  %3829 = vmatprep.mubr.bf16.mxu0 %v18633_v4 }
 0x1dd   : > { %v14784_v1 = vcombine.high %v958_v57, %v962_v58  ;;  %v838_v2 = vld [vmem:[%s18494_s24 + $0x880] sm:$0xff]  ;;  %3799 = vmatprep.subr.bf16.mxu0 %v14656_v0  ;;  %v14783_v9 = vcombine.low %v958_v57, %v962_v58  ;;  %3870 = vmatprep.mubr.bf16.mxu1 %v18638_v7 }
 0x1de   : > { %v842_v3 = vld [vmem:[%s18494_s24 + $0x8a0] sm:$0xff] }
 0x1df   : > { %v966_v5 = vld [vmem:[%s18494_s24 + $0xc80] sm:$0xff]  ;;  %v14664_v10 = vcombine.high %v838_v2, %v842_v3  ;;  %3840 = vmatprep.subr.bf16.mxu1 %v14784_v1  ;;  %v14663_v16 = vcombine.low %v838_v2, %v842_v3 }
 0x1e0   : > { %v970_v6 = vld [vmem:[%s18494_s24 + $0xca0] sm:$0xff]  ;;  %3800 = vmatpush1.bf16.msra.mxu0 %v14655_v8  ;;  %3841 = vmatpush1.bf16.msra.mxu1 %v14783_v9 }
 0x1e1   : > { %v14792_v11 = vcombine.high %v966_v5, %v970_v6  ;;  %v846_v12 = vld [vmem:[%s18494_s24 + $0x8c0] sm:$0xff]  ;;  %3801 = vmatprep.subr.bf16.mxu0 %v14664_v10  ;;  %v14791_v17 = vcombine.low %v966_v5, %v970_v6 }
 0x1e2   : > { %v850_v13 = vld [vmem:[%s18494_s24 + $0x8e0] sm:$0xff] }
 0x1e3   : > { %v974_v14 = vld [vmem:[%s18494_s24 + $0xcc0] sm:$0xff]  ;;  %v14672_v18 = vcombine.high %v846_v12, %v850_v13  ;;  %3842 = vmatprep.subr.bf16.mxu1 %v14792_v11  ;;  %v14671_v24 = vcombine.low %v846_v12, %v850_v13 }
 0x1e4   : > { %v978_v15 = vld [vmem:[%s18494_s24 + $0xce0] sm:$0xff]  ;;  %3802 = vmatpush1.bf16.msra.mxu0 %v14663_v16  ;;  %3843 = vmatpush1.bf16.msra.mxu1 %v14791_v17 }
 0x1e5   : > { %v14800_v19 = vcombine.high %v974_v14, %v978_v15  ;;  %v854_v20 = vld [vmem:[%s18494_s24 + $0x900] sm:$0xff]  ;;  %3803 = vmatprep.subr.bf16.mxu0 %v14672_v18  ;;  %v14799_v29 = vcombine.low %v974_v14, %v978_v15 }
 0x1e6   : > { %v858_v21 = vld [vmem:[%s18494_s24 + $0x920] sm:$0xff] }
 0x1e7   : > { %v982_v22 = vld [vmem:[%s18494_s24 + $0xd00] sm:$0xff]  ;;  %v14680_v30 = vcombine.high %v854_v20, %v858_v21  ;;  %3844 = vmatprep.subr.bf16.mxu1 %v14800_v19  ;;  %v14679_v39 = vcombine.low %v854_v20, %v858_v21 }
 0x1e8   : > { %v986_v23 = vld [vmem:[%s18494_s24 + $0xd20] sm:$0xff]  ;;  %3804 = vmatpush1.bf16.msra.mxu0 %v14671_v24  ;;  %3845 = vmatpush1.bf16.msra.mxu1 %v14799_v29 }
 0x1e9   : > { %v14808_v32 = vcombine.high %v982_v22, %v986_v23  ;;  %v862_v33 = vld [vmem:[%s18494_s24 + $0x940] sm:$0xff]  ;;  %3805 = vmatprep.subr.bf16.mxu0 %v14680_v30  ;;  %v14807_v41 = vcombine.low %v982_v22, %v986_v23 }
 0x1ea   : > { %v866_v35 = vld [vmem:[%s18494_s24 + $0x960] sm:$0xff] }
 0x1eb   : > { %v990_v36 = vld [vmem:[%s18494_s24 + $0xd40] sm:$0xff]  ;;  %v14688_v25 = vcombine.high %v862_v33, %v866_v35  ;;  %3846 = vmatprep.subr.bf16.mxu1 %v14808_v32  ;;  %v14687_v37 = vcombine.low %v862_v33, %v866_v35 }
 0x1ec   : > { %v994_v38 = vld [vmem:[%s18494_s24 + $0xd60] sm:$0xff]  ;;  %3806 = vmatpush1.bf16.msra.mxu0 %v14679_v39  ;;  %3847 = vmatpush1.bf16.msra.mxu1 %v14807_v41 }
 0x1ed   : > { %v14816_v26 = vcombine.high %v990_v36, %v994_v38  ;;  %v870_v27 = vld [vmem:[%s18494_s24 + $0x980] sm:$0xff]  ;;  %3807 = vmatprep.subr.bf16.mxu0 %v14688_v25  ;;  %v14815_v40 = vcombine.low %v990_v36, %v994_v38 }
 0x1ee   : > { %v874_v28 = vld [vmem:[%s18494_s24 + $0x9a0] sm:$0xff] }
 0x1ef   : > { %v998_v31 = vld [vmem:[%s18494_s24 + $0xd80] sm:$0xff]  ;;  %v14696_v44 = vcombine.high %v870_v27, %v874_v28  ;;  %3848 = vmatprep.subr.bf16.mxu1 %v14816_v26  ;;  %v14695_v50 = vcombine.low %v870_v27, %v874_v28 }
 0x1f0   : > { %v1002_v34 = vld [vmem:[%s18494_s24 + $0xda0] sm:$0xff]  ;;  %3808 = vmatpush1.bf16.msra.mxu0 %v14687_v37  ;;  %3849 = vmatpush1.bf16.msra.mxu1 %v14815_v40 }
 0x1f1   : > { %v14824_v45 = vcombine.high %v998_v31, %v1002_v34  ;;  %v878_v46 = vld [vmem:[%s18494_s24 + $0x9c0] sm:$0xff]  ;;  %3809 = vmatprep.subr.bf16.mxu0 %v14696_v44  ;;  %v14823_v51 = vcombine.low %v998_v31, %v1002_v34 }
 0x1f2   : > { %v882_v47 = vld [vmem:[%s18494_s24 + $0x9e0] sm:$0xff] }
 0x1f3   : > { %v1006_v48 = vld [vmem:[%s18494_s24 + $0xdc0] sm:$0xff]  ;;  %v14704_v52 = vcombine.high %v878_v46, %v882_v47  ;;  %3850 = vmatprep.subr.bf16.mxu1 %v14824_v45  ;;  %v14703_v59 = vcombine.low %v878_v46, %v882_v47 }
 0x1f4   : > { %v1010_v49 = vld [vmem:[%s18494_s24 + $0xde0] sm:$0xff]  ;;  %3810 = vmatpush1.bf16.msra.mxu0 %v14695_v50  ;;  %3851 = vmatpush1.bf16.msra.mxu1 %v14823_v51 }
 0x1f5   : > { %v14832_v53 = vcombine.high %v1006_v48, %v1010_v49  ;;  %v886_v54 = vld [vmem:[%s18494_s24 + $0xa00] sm:$0xff]  ;;  %3811 = vmatprep.subr.bf16.mxu0 %v14704_v52  ;;  %v14831_v61 = vcombine.low %v1006_v48, %v1010_v49 }
 0x1f6   : > { %v890_v55 = vld [vmem:[%s18494_s24 + $0xa20] sm:$0xff] }
 0x1f7   : > { %v1014_v57 = vld [vmem:[%s18494_s24 + $0xe00] sm:$0xff]  ;;  %v14712_v62 = vcombine.high %v886_v54, %v890_v55  ;;  %3852 = vmatprep.subr.bf16.mxu1 %v14832_v53  ;;  %v14711_v5 = vcombine.low %v886_v54, %v890_v55 }
 0x1f8   : > { %v1018_v58 = vld [vmem:[%s18494_s24 + $0xe20] sm:$0xff]  ;;  %3812 = vmatpush1.bf16.msra.mxu0 %v14703_v59  ;;  %3853 = vmatpush1.bf16.msra.mxu1 %v14831_v61 }
 0x1f9   : > { %v14840_v63 = vcombine.high %v1014_v57, %v1018_v58  ;;  %v894_v0 = vld [vmem:[%s18494_s24 + $0xa40] sm:$0xff]  ;;  %3813 = vmatprep.subr.bf16.mxu0 %v14712_v62  ;;  %v14839_v6 = vcombine.low %v1014_v57, %v1018_v58  ;;  %v567_v62 = vld [vmem:[%s18494_s24 + $0x8] sm:$0xff] }
 0x1fa   : > { %v898_v1 = vld [vmem:[%s18494_s24 + $0xa60] sm:$0xff] }
 0x1fb   : > { %v1022_v2 = vld [vmem:[%s18494_s24 + $0xe40] sm:$0xff]  ;;  %v14720_v8 = vcombine.high %v894_v0, %v898_v1  ;;  %3854 = vmatprep.subr.bf16.mxu1 %v14840_v63  ;;  %v14719_v14 = vcombine.low %v894_v0, %v898_v1  ;;  %v571_v63 = vld [vmem:[%s18494_s24 + $0x28] sm:$0xff] }
 0x1fc   : > { %v1026_v3 = vld [vmem:[%s18494_s24 + $0xe60] sm:$0xff]  ;;  %3814 = vmatpush1.bf16.msra.mxu0 %v14711_v5  ;;  %3855 = vmatpush1.bf16.msra.mxu1 %v14839_v6  ;;  %v695_v0 = vld [vmem:[%s18494_s24 + $0x408] sm:$0xff]  ;;  %v556_v6 = vld [vmem:[#allocation2 + $0x30] sm:$0xff] }
 0x1fd   : > { %v14848_v9 = vcombine.high %v1022_v2, %v1026_v3  ;;  %v902_v10 = vld [vmem:[%s18494_s24 + $0xa80] sm:$0xff]  ;;  %3815 = vmatprep.subr.bf16.mxu0 %v14720_v8  ;;  %v14847_v15 = vcombine.low %v1022_v2, %v1026_v3  ;;  %v699_v1 = vld [vmem:[%s18494_s24 + $0x428] sm:$0xff]  ;;  %v14394_v8 = vcombine.high %v567_v62, %v571_v63 }
 0x1fe   : > { %v906_v11 = vld [vmem:[%s18494_s24 + $0xaa0] sm:$0xff] }
 0x1ff   : > { %v1030_v12 = vld [vmem:[%s18494_s24 + $0xe80] sm:$0xff]  ;;  %v14728_v16 = vcombine.high %v902_v10, %v906_v11  ;;  %3856 = vmatprep.subr.bf16.mxu1 %v14848_v9  ;;  %v14727_v22 = vcombine.low %v902_v10, %v906_v11  ;;  %v14522_v9 = vcombine.high %v695_v0, %v699_v1  ;;  %v575_v10 = vld [vmem:[%s18494_s24 + $0x48] sm:$0xff] }
 0x200   : > { %v1034_v13 = vld [vmem:[%s18494_s24 + $0xea0] sm:$0xff]  ;;  %3816 = vmatpush1.bf16.msra.mxu0 %v14719_v14  ;;  %3857 = vmatpush1.bf16.msra.mxu1 %v14847_v15  ;;  %v579_v11 = vld [vmem:[%s18494_s24 + $0x68] sm:$0xff]  ;;  %v18705_v15 = vpack.c.bf16 %v556_v6, %v556_v6 }
 0x201   : > { %v14856_v17 = vcombine.high %v1030_v12, %v1034_v13  ;;  %v910_v18 = vld [vmem:[%s18494_s24 + $0xac0] sm:$0xff]  ;;  %3817 = vmatprep.subr.bf16.mxu0 %v14728_v16  ;;  %v14855_v23 = vcombine.low %v1030_v12, %v1034_v13  ;;  %v703_v13 = vld [vmem:[%s18494_s24 + $0x448] sm:$0xff]  ;;  %v14393_v16 = vcombine.low %v567_v62, %v571_v63 }
 0x202   : > { %v914_v19 = vld [vmem:[%s18494_s24 + $0xae0] sm:$0xff]  ;;  %v707_v14 = vld [vmem:[%s18494_s24 + $0x468] sm:$0xff] }
 0x203   : > { %v1038_v20 = vld [vmem:[%s18494_s24 + $0xec0] sm:$0xff]  ;;  %v14736_v24 = vcombine.high %v910_v18, %v914_v19  ;;  %3858 = vmatprep.subr.bf16.mxu1 %v14856_v17  ;;  %v14735_v36 = vcombine.low %v910_v18, %v914_v19  ;;  %v14521_v17 = vcombine.low %v695_v0, %v699_v1  ;;  %v14402_v18 = vcombine.high %v575_v10, %v579_v11  ;;  %v623_v0 = vld [vmem:[%s18494_s24 + $0x1c8] sm:$0xff] }
 0x204   : > { %v1042_v21 = vld [vmem:[%s18494_s24 + $0xee0] sm:$0xff]  ;;  %3818 = vmatpush1.bf16.msra.mxu0 %v14727_v22  ;;  %3859 = vmatpush1.bf16.msra.mxu1 %v14855_v23  ;;  %v14530_v19 = vcombine.high %v703_v13, %v707_v14  ;;  %v711_v22 = vld [vmem:[%s18494_s24 + $0x488] sm:$0xff] }
 0x205   : > { %v14864_v29 = vcombine.high %v1038_v20, %v1042_v21  ;;  %v918_v30 = vld [vmem:[%s18494_s24 + $0xb00] sm:$0xff]  ;;  %3819 = vmatprep.subr.bf16.mxu0 %v14736_v24  ;;  %v14863_v38 = vcombine.low %v1038_v20, %v1042_v21  ;;  %v583_v20 = vld [vmem:[%s18494_s24 + $0x88] sm:$0xff]  ;;  %v14401_v24 = vcombine.low %v575_v10, %v579_v11 }
 0x206   : > { %v922_v32 = vld [vmem:[%s18494_s24 + $0xb20] sm:$0xff]  ;;  %v587_v21 = vld [vmem:[%s18494_s24 + $0xa8] sm:$0xff] }
 0x207   : > { %v1046_v33 = vld [vmem:[%s18494_s24 + $0xf00] sm:$0xff]  ;;  %v14744_v39 = vcombine.high %v918_v30, %v922_v32  ;;  %3860 = vmatprep.subr.bf16.mxu1 %v14864_v29  ;;  %v14743_v31 = vcombine.low %v918_v30, %v922_v32  ;;  %v715_v23 = vld [vmem:[%s18494_s24 + $0x4a8] sm:$0xff]  ;;  %v14529_v29 = vcombine.low %v703_v13, %v707_v14  ;;  %v14410_v30 = vcombine.high %v583_v20, %v587_v21 }
 0x208   : > { %v1050_v35 = vld [vmem:[%s18494_s24 + $0xf20] sm:$0xff]  ;;  %3820 = vmatpush1.bf16.msra.mxu0 %v14735_v36  ;;  %3861 = vmatpush1.bf16.msra.mxu1 %v14863_v38  ;;  %v14538_v32 = vcombine.high %v711_v22, %v715_v23  ;;  %v719_v36 = vld [vmem:[%s18494_s24 + $0x4c8] sm:$0xff] }
 0x209   : > { %v14872_v41 = vcombine.high %v1046_v33, %v1050_v35  ;;  %v926_v25 = vld [vmem:[%s18494_s24 + $0xb40] sm:$0xff]  ;;  %3821 = vmatprep.subr.bf16.mxu0 %v14744_v39  ;;  %v14871_v34 = vcombine.low %v1046_v33, %v1050_v35  ;;  %v591_v33 = vld [vmem:[%s18494_s24 + $0xc8] sm:$0xff]  ;;  %v14409_v39 = vcombine.low %v583_v20, %v587_v21 }
 0x20a   : > { %v930_v26 = vld [vmem:[%s18494_s24 + $0xb60] sm:$0xff]  ;;  %v595_v35 = vld [vmem:[%s18494_s24 + $0xe8] sm:$0xff] }
 0x20b   : > { %v1054_v27 = vld [vmem:[%s18494_s24 + $0xf40] sm:$0xff]  ;;  %v14752_v37 = vcombine.high %v926_v25, %v930_v26  ;;  %3862 = vmatprep.subr.bf16.mxu1 %v14872_v41  ;;  %v14751_v48 = vcombine.low %v926_v25, %v930_v26  ;;  %v723_v38 = vld [vmem:[%s18494_s24 + $0x4e8] sm:$0xff]  ;;  %v14537_v41 = vcombine.low %v711_v22, %v715_v23  ;;  %v14418_v25 = vcombine.high %v591_v33, %v595_v35 }
 0x20c   : > { %v1058_v28 = vld [vmem:[%s18494_s24 + $0xf60] sm:$0xff]  ;;  %3822 = vmatpush1.bf16.msra.mxu0 %v14743_v31  ;;  %3863 = vmatpush1.bf16.msra.mxu1 %v14871_v34  ;;  %v14546_v26 = vcombine.high %v719_v36, %v723_v38  ;;  %v727_v31 = vld [vmem:[%s18494_s24 + $0x508] sm:$0xff] }
 0x20d   : > { %v14880_v40 = vcombine.high %v1054_v27, %v1058_v28  ;;  %v934_v44 = vld [vmem:[%s18494_s24 + $0xb80] sm:$0xff]  ;;  %3823 = vmatprep.subr.bf16.mxu0 %v14752_v37  ;;  %v14879_v49 = vcombine.low %v1054_v27, %v1058_v28  ;;  %v599_v27 = vld [vmem:[%s18494_s24 + $0x108] sm:$0xff]  ;;  %v14417_v37 = vcombine.low %v591_v33, %v595_v35 }
 0x20e   : > { %v938_v45 = vld [vmem:[%s18494_s24 + $0xba0] sm:$0xff]  ;;  %v603_v28 = vld [vmem:[%s18494_s24 + $0x128] sm:$0xff] }
 0x20f   : > { %v1062_v46 = vld [vmem:[%s18494_s24 + $0xf80] sm:$0xff]  ;;  %v14760_v50 = vcombine.high %v934_v44, %v938_v45  ;;  %3864 = vmatprep.subr.bf16.mxu1 %v14880_v40  ;;  %v14759_v57 = vcombine.low %v934_v44, %v938_v45  ;;  %v731_v34 = vld [vmem:[%s18494_s24 + $0x528] sm:$0xff]  ;;  %v14545_v40 = vcombine.low %v719_v36, %v723_v38  ;;  %v14426_v44 = vcombine.high %v599_v27, %v603_v28 }
 0x210   : > { %v1066_v47 = vld [vmem:[%s18494_s24 + $0xfa0] sm:$0xff]  ;;  %3824 = vmatpush1.bf16.msra.mxu0 %v14751_v48  ;;  %3865 = vmatpush1.bf16.msra.mxu1 %v14879_v49  ;;  %v14554_v45 = vcombine.high %v727_v31, %v731_v34  ;;  %v735_v48 = vld [vmem:[%s18494_s24 + $0x548] sm:$0xff] }
 0x211   : > { %v14888_v51 = vcombine.high %v1062_v46, %v1066_v47  ;;  %v942_v52 = vld [vmem:[%s18494_s24 + $0xbc0] sm:$0xff]  ;;  %3825 = vmatprep.subr.bf16.mxu0 %v14760_v50  ;;  %v14887_v58 = vcombine.low %v1062_v46, %v1066_v47  ;;  %v607_v46 = vld [vmem:[%s18494_s24 + $0x148] sm:$0xff]  ;;  %v14425_v50 = vcombine.low %v599_v27, %v603_v28 }
 0x212   : > { %v946_v53 = vld [vmem:[%s18494_s24 + $0xbe0] sm:$0xff]  ;;  %v611_v47 = vld [vmem:[%s18494_s24 + $0x168] sm:$0xff] }
 0x213   : > { %v1070_v54 = vld [vmem:[%s18494_s24 + $0xfc0] sm:$0xff]  ;;  %v14768_v59 = vcombine.high %v942_v52, %v946_v53  ;;  %3866 = vmatprep.subr.bf16.mxu1 %v14888_v51  ;;  %v14767_v2 = vcombine.low %v942_v52, %v946_v53  ;;  %v739_v49 = vld [vmem:[%s18494_s24 + $0x568] sm:$0xff]  ;;  %v14553_v51 = vcombine.low %v727_v31, %v731_v34  ;;  %v14434_v52 = vcombine.high %v607_v46, %v611_v47 }
 0x214   : > { %v1074_v55 = vld [vmem:[%s18494_s24 + $0xfe0] sm:$0xff]  ;;  %3826 = vmatpush1.bf16.msra.mxu0 %v14759_v57  ;;  %3867 = vmatpush1.bf16.msra.mxu1 %v14887_v58  ;;  %v14562_v53 = vcombine.high %v735_v48, %v739_v49  ;;  %v743_v57 = vld [vmem:[%s18494_s24 + $0x588] sm:$0xff] }
 0x215   : > { %v14896_v61 = vcombine.high %v1070_v54, %v1074_v55  ;;  %v554_v3 = vld [vmem:[#allocation2 + $0x20] sm:$0xff]  ;;  %3827 = vmatprep.subr.bf16.mxu0 %v14768_v59  ;;  %v14895_v5 = vcombine.low %v1070_v54, %v1074_v55  ;;  %v615_v54 = vld [vmem:[%s18494_s24 + $0x188] sm:$0xff]  ;;  %v14433_v59 = vcombine.low %v607_v46, %v611_v47 }
 0x216   : > { %v18701_v12 = vpack.c.bf16 %v554_v3, %v554_v3  ;;  %v619_v55 = vld [vmem:[%s18494_s24 + $0x1a8] sm:$0xff] }
 0x217   : > { %3868 = vmatprep.subr.bf16.mxu1 %v14896_v61  ;;  %v747_v58 = vld [vmem:[%s18494_s24 + $0x5a8] sm:$0xff]  ;;  %v14561_v61 = vcombine.low %v735_v48, %v739_v49  ;;  %v14442_v62 = vcombine.high %v615_v54, %v619_v55 }
 0x218   : > { %3828 = vmatpush1.bf16.msra.mxu0 %v14767_v2  ;;  %3869 = vmatpush1.bf16.msra.mxu1 %v14895_v5  ;;  %v14570_v63 = vcombine.high %v743_v57, %v747_v58  ;;  %v627_v1 = vld [vmem:[%s18494_s24 + $0x1e8] sm:$0xff]  ;;  %v14441_v5 = vcombine.low %v615_v54, %v619_v55  ;;  %v14569_v6 = vcombine.low %v743_v57, %v747_v58 }
 0x219   : > { %3879 = vmatprep.subr.bf16.mxu0 %v14394_v8  ;;  %3920 = vmatprep.subr.bf16.mxu1 %v14522_v9  ;;  %v751_v2 = vld [vmem:[%s18494_s24 + $0x5c8] sm:$0xff]  ;;  %v14450_v8 = vcombine.high %v623_v0, %v627_v1 }
 0x21a   : > { %v755_v3 = vld [vmem:[%s18494_s24 + $0x5e8] sm:$0xff] }
 0x21b   : > { %3830 = vmatmul.mubr.bf16.vlgmr.msra.gmra.mrb[4].mxu0 %v18701_v12  ;;  %3871 = vmatmul.mubr.bf16.vlgmr.msra.gmra.mrb[4].mxu1 %v18705_v15  ;;  %v14578_v9 = vcombine.high %v751_v2, %v755_v3  ;;  %v631_v10 = vld [vmem:[%s18494_s24 + $0x208] sm:$0xff] }
 0x21c   : > { %3880 = vmatpush1.bf16.msra.mxu0 %v14393_v16  ;;  %3921 = vmatpush1.bf16.msra.mxu1 %v14521_v17  ;;  %v635_v11 = vld [vmem:[%s18494_s24 + $0x228] sm:$0xff]  ;;  %v14449_v16 = vcombine.low %v623_v0, %v627_v1  ;;  %v14577_v17 = vcombine.low %v751_v2, %v755_v3 }
 0x21d   : > { %3881 = vmatprep.subr.bf16.mxu0 %v14402_v18  ;;  %3922 = vmatprep.subr.bf16.mxu1 %v14530_v19  ;;  %v759_v13 = vld [vmem:[%s18494_s24 + $0x608] sm:$0xff]  ;;  %v14458_v18 = vcombine.high %v631_v10, %v635_v11 }
 0x21e   : > { %3911 = vmatprep.mubr.bf16.mxu0 %v18579_v42  ;;  %3952 = vmatprep.mubr.bf16.mxu1 %v18581_v43  ;;  %v763_v14 = vld [vmem:[%s18494_s24 + $0x628] sm:$0xff] }
 0x21f   : > { %v14586_v19 = vcombine.high %v759_v13, %v763_v14  ;;  %v639_v20 = vld [vmem:[%s18494_s24 + $0x248] sm:$0xff] }
 0x220   : > { %3882 = vmatpush1.bf16.msra.mxu0 %v14401_v24  ;;  %3923 = vmatpush1.bf16.msra.mxu1 %v14529_v29  ;;  %v643_v21 = vld [vmem:[%s18494_s24 + $0x268] sm:$0xff]  ;;  %v14457_v24 = vcombine.low %v631_v10, %v635_v11  ;;  %v14585_v29 = vcombine.low %v759_v13, %v763_v14 }
 0x221   : > { %3883 = vmatprep.subr.bf16.mxu0 %v14410_v30  ;;  %3924 = vmatprep.subr.bf16.mxu1 %v14538_v32  ;;  %v767_v22 = vld [vmem:[%s18494_s24 + $0x648] sm:$0xff]  ;;  %v14466_v30 = vcombine.high %v639_v20, %v643_v21 }
 0x222   : > { %v771_v23 = vld [vmem:[%s18494_s24 + $0x668] sm:$0xff] }
 0x223   : > { %v14594_v32 = vcombine.high %v767_v22, %v771_v23  ;;  %v647_v33 = vld [vmem:[%s18494_s24 + $0x288] sm:$0xff] }
 0x224   : > { %3884 = vmatpush1.bf16.msra.mxu0 %v14409_v39  ;;  %3925 = vmatpush1.bf16.msra.mxu1 %v14537_v41  ;;  %v651_v35 = vld [vmem:[%s18494_s24 + $0x2a8] sm:$0xff]  ;;  %v14465_v39 = vcombine.low %v639_v20, %v643_v21  ;;  %v14593_v41 = vcombine.low %v767_v22, %v771_v23 }
 0x225   : > { %3885 = vmatprep.subr.bf16.mxu0 %v14418_v25  ;;  %3926 = vmatprep.subr.bf16.mxu1 %v14546_v26  ;;  %v775_v36 = vld [vmem:[%s18494_s24 + $0x688] sm:$0xff]  ;;  %v14474_v25 = vcombine.high %v647_v33, %v651_v35 }
 0x226   : > { %v779_v38 = vld [vmem:[%s18494_s24 + $0x6a8] sm:$0xff] }
 0x227   : > { %v14602_v26 = vcombine.high %v775_v36, %v779_v38  ;;  %v655_v27 = vld [vmem:[%s18494_s24 + $0x2c8] sm:$0xff] }
 0x228   : > { %3886 = vmatpush1.bf16.msra.mxu0 %v14417_v37  ;;  %3927 = vmatpush1.bf16.msra.mxu1 %v14545_v40  ;;  %v659_v28 = vld [vmem:[%s18494_s24 + $0x2e8] sm:$0xff]  ;;  %v14473_v37 = vcombine.low %v647_v33, %v651_v35  ;;  %v14601_v40 = vcombine.low %v775_v36, %v779_v38 }
 0x229   : > { %3887 = vmatprep.subr.bf16.mxu0 %v14426_v44  ;;  %3928 = vmatprep.subr.bf16.mxu1 %v14554_v45  ;;  %v783_v31 = vld [vmem:[%s18494_s24 + $0x6c8] sm:$0xff]  ;;  %v14482_v44 = vcombine.high %v655_v27, %v659_v28 }
 0x22a   : > { %v787_v34 = vld [vmem:[%s18494_s24 + $0x6e8] sm:$0xff] }
 0x22b   : > { %v14610_v45 = vcombine.high %v783_v31, %v787_v34  ;;  %v663_v46 = vld [vmem:[%s18494_s24 + $0x308] sm:$0xff] }
 0x22c   : > { %3888 = vmatpush1.bf16.msra.mxu0 %v14425_v50  ;;  %3929 = vmatpush1.bf16.msra.mxu1 %v14553_v51  ;;  %v667_v47 = vld [vmem:[%s18494_s24 + $0x328] sm:$0xff]  ;;  %v14481_v50 = vcombine.low %v655_v27, %v659_v28  ;;  %v14609_v51 = vcombine.low %v783_v31, %v787_v34 }
 0x22d   : > { %3889 = vmatprep.subr.bf16.mxu0 %v14434_v52  ;;  %3930 = vmatprep.subr.bf16.mxu1 %v14562_v53  ;;  %v791_v48 = vld [vmem:[%s18494_s24 + $0x708] sm:$0xff]  ;;  %v14490_v52 = vcombine.high %v663_v46, %v667_v47 }
 0x22e   : > { %v795_v49 = vld [vmem:[%s18494_s24 + $0x728] sm:$0xff] }
 0x22f   : > { %v14618_v53 = vcombine.high %v791_v48, %v795_v49  ;;  %v671_v54 = vld [vmem:[%s18494_s24 + $0x348] sm:$0xff] }
 0x230   : > { %3890 = vmatpush1.bf16.msra.mxu0 %v14433_v59  ;;  %3931 = vmatpush1.bf16.msra.mxu1 %v14561_v61  ;;  %v675_v55 = vld [vmem:[%s18494_s24 + $0x368] sm:$0xff]  ;;  %v14489_v59 = vcombine.low %v663_v46, %v667_v47  ;;  %v14617_v61 = vcombine.low %v791_v48, %v795_v49 }
 0x231   : > { %3891 = vmatprep.subr.bf16.mxu0 %v14442_v62  ;;  %3932 = vmatprep.subr.bf16.mxu1 %v14570_v63  ;;  %v799_v57 = vld [vmem:[%s18494_s24 + $0x748] sm:$0xff]  ;;  %v14498_v62 = vcombine.high %v671_v54, %v675_v55 }
 0x232   : > { %v803_v58 = vld [vmem:[%s18494_s24 + $0x768] sm:$0xff] }
 0x233   : > { %v14626_v63 = vcombine.high %v799_v57, %v803_v58  ;;  %v679_v0 = vld [vmem:[%s18494_s24 + $0x388] sm:$0xff] }
 0x234   : > { %3892 = vmatpush1.bf16.msra.mxu0 %v14441_v5  ;;  %3933 = vmatpush1.bf16.msra.mxu1 %v14569_v6  ;;  %v683_v1 = vld [vmem:[%s18494_s24 + $0x3a8] sm:$0xff]  ;;  %v14497_v5 = vcombine.low %v671_v54, %v675_v55  ;;  %v14625_v6 = vcombine.low %v799_v57, %v803_v58 }
 0x235   : > { %3893 = vmatprep.subr.bf16.mxu0 %v14450_v8  ;;  %3934 = vmatprep.subr.bf16.mxu1 %v14578_v9  ;;  %v807_v2 = vld [vmem:[%s18494_s24 + $0x788] sm:$0xff]  ;;  %v14506_v8 = vcombine.high %v679_v0, %v683_v1 }
 0x236   : > { %v811_v3 = vld [vmem:[%s18494_s24 + $0x7a8] sm:$0xff] }
 0x237   : > { %v14634_v9 = vcombine.high %v807_v2, %v811_v3  ;;  %v687_v10 = vld [vmem:[%s18494_s24 + $0x3c8] sm:$0xff] }
 0x238   : > { %3894 = vmatpush1.bf16.msra.mxu0 %v14449_v16  ;;  %3935 = vmatpush1.bf16.msra.mxu1 %v14577_v17  ;;  %v691_v11 = vld [vmem:[%s18494_s24 + $0x3e8] sm:$0xff]  ;;  %v14505_v16 = vcombine.low %v679_v0, %v683_v1  ;;  %v14633_v17 = vcombine.low %v807_v2, %v811_v3 }
 0x239   : > { %3895 = vmatprep.subr.bf16.mxu0 %v14458_v18  ;;  %3936 = vmatprep.subr.bf16.mxu1 %v14586_v19  ;;  %v815_v13 = vld [vmem:[%s18494_s24 + $0x7c8] sm:$0xff]  ;;  %v14514_v18 = vcombine.high %v687_v10, %v691_v11 }
 0x23a   : > { %v819_v14 = vld [vmem:[%s18494_s24 + $0x7e8] sm:$0xff] }
 0x23b   : > { %v14642_v19 = vcombine.high %v815_v13, %v819_v14  ;;  %v823_v20 = vld [vmem:[%s18494_s24 + $0x808] sm:$0xff] }
 0x23c   : > { %3896 = vmatpush1.bf16.msra.mxu0 %v14457_v24  ;;  %3937 = vmatpush1.bf16.msra.mxu1 %v14585_v29  ;;  %v827_v21 = vld [vmem:[%s18494_s24 + $0x828] sm:$0xff]  ;;  %v14513_v24 = vcombine.low %v687_v10, %v691_v11  ;;  %v14641_v29 = vcombine.low %v815_v13, %v819_v14 }
 0x23d   : > { %3897 = vmatprep.subr.bf16.mxu0 %v14466_v30  ;;  %3938 = vmatprep.subr.bf16.mxu1 %v14594_v32  ;;  %v951_v22 = vld [vmem:[%s18494_s24 + $0xc08] sm:$0xff]  ;;  %v14650_v30 = vcombine.high %v823_v20, %v827_v21 }
 0x23e   : > { %v955_v23 = vld [vmem:[%s18494_s24 + $0xc28] sm:$0xff] }
 0x23f   : > { %v14778_v32 = vcombine.high %v951_v22, %v955_v23  ;;  %v831_v33 = vld [vmem:[%s18494_s24 + $0x848] sm:$0xff] }
 0x240   : > { %3898 = vmatpush1.bf16.msra.mxu0 %v14465_v39  ;;  %3939 = vmatpush1.bf16.msra.mxu1 %v14593_v41  ;;  %v835_v35 = vld [vmem:[%s18494_s24 + $0x868] sm:$0xff]  ;;  %v14649_v39 = vcombine.low %v823_v20, %v827_v21  ;;  %v14777_v41 = vcombine.low %v951_v22, %v955_v23 }
 0x241   : > { %3899 = vmatprep.subr.bf16.mxu0 %v14474_v25  ;;  %3940 = vmatprep.subr.bf16.mxu1 %v14602_v26  ;;  %v959_v36 = vld [vmem:[%s18494_s24 + $0xc48] sm:$0xff]  ;;  %v14658_v25 = vcombine.high %v831_v33, %v835_v35 }
 0x242   : > { %v963_v38 = vld [vmem:[%s18494_s24 + $0xc68] sm:$0xff] }
 0x243   : > { %v14786_v26 = vcombine.high %v959_v36, %v963_v38  ;;  %v839_v27 = vld [vmem:[%s18494_s24 + $0x888] sm:$0xff] }
 0x244   : > { %3900 = vmatpush1.bf16.msra.mxu0 %v14473_v37  ;;  %3941 = vmatpush1.bf16.msra.mxu1 %v14601_v40  ;;  %v843_v28 = vld [vmem:[%s18494_s24 + $0x8a8] sm:$0xff]  ;;  %v14657_v37 = vcombine.low %v831_v33, %v835_v35  ;;  %v14785_v40 = vcombine.low %v959_v36, %v963_v38 }
 0x245   : > { %3901 = vmatprep.subr.bf16.mxu0 %v14482_v44  ;;  %3942 = vmatprep.subr.bf16.mxu1 %v14610_v45  ;;  %v967_v31 = vld [vmem:[%s18494_s24 + $0xc88] sm:$0xff]  ;;  %v14666_v44 = vcombine.high %v839_v27, %v843_v28 }
 0x246   : > { %v971_v34 = vld [vmem:[%s18494_s24 + $0xca8] sm:$0xff] }
 0x247   : > { %v14794_v45 = vcombine.high %v967_v31, %v971_v34  ;;  %v847_v46 = vld [vmem:[%s18494_s24 + $0x8c8] sm:$0xff] }
 0x248   : > { %3902 = vmatpush1.bf16.msra.mxu0 %v14481_v50  ;;  %3943 = vmatpush1.bf16.msra.mxu1 %v14609_v51  ;;  %v851_v47 = vld [vmem:[%s18494_s24 + $0x8e8] sm:$0xff]  ;;  %v14665_v50 = vcombine.low %v839_v27, %v843_v28  ;;  %v14793_v51 = vcombine.low %v967_v31, %v971_v34 }
 0x249   : > { %3903 = vmatprep.subr.bf16.mxu0 %v14490_v52  ;;  %3944 = vmatprep.subr.bf16.mxu1 %v14618_v53  ;;  %v975_v48 = vld [vmem:[%s18494_s24 + $0xcc8] sm:$0xff]  ;;  %v14674_v52 = vcombine.high %v847_v46, %v851_v47 }
 0x24a   : > { %v979_v49 = vld [vmem:[%s18494_s24 + $0xce8] sm:$0xff] }
 0x24b   : > { %v14802_v53 = vcombine.high %v975_v48, %v979_v49  ;;  %v855_v54 = vld [vmem:[%s18494_s24 + $0x908] sm:$0xff] }
 0x24c   : > { %3904 = vmatpush1.bf16.msra.mxu0 %v14489_v59  ;;  %3945 = vmatpush1.bf16.msra.mxu1 %v14617_v61  ;;  %v859_v55 = vld [vmem:[%s18494_s24 + $0x928] sm:$0xff]  ;;  %v14673_v59 = vcombine.low %v847_v46, %v851_v47  ;;  %v14801_v61 = vcombine.low %v975_v48, %v979_v49 }
 0x24d   : > { %3905 = vmatprep.subr.bf16.mxu0 %v14498_v62  ;;  %3946 = vmatprep.subr.bf16.mxu1 %v14626_v63  ;;  %v983_v57 = vld [vmem:[%s18494_s24 + $0xd08] sm:$0xff]  ;;  %v14682_v62 = vcombine.high %v855_v54, %v859_v55 }
 0x24e   : > { %v987_v58 = vld [vmem:[%s18494_s24 + $0xd28] sm:$0xff] }
 0x24f   : > { %v14810_v63 = vcombine.high %v983_v57, %v987_v58  ;;  %v863_v0 = vld [vmem:[%s18494_s24 + $0x948] sm:$0xff] }
 0x250   : > { %3906 = vmatpush1.bf16.msra.mxu0 %v14497_v5  ;;  %3947 = vmatpush1.bf16.msra.mxu1 %v14625_v6  ;;  %v867_v1 = vld [vmem:[%s18494_s24 + $0x968] sm:$0xff]  ;;  %v14681_v5 = vcombine.low %v855_v54, %v859_v55  ;;  %v14809_v6 = vcombine.low %v983_v57, %v987_v58 }
 0x251   : > { %3907 = vmatprep.subr.bf16.mxu0 %v14506_v8  ;;  %3948 = vmatprep.subr.bf16.mxu1 %v14634_v9  ;;  %v991_v2 = vld [vmem:[%s18494_s24 + $0xd48] sm:$0xff]  ;;  %v14690_v8 = vcombine.high %v863_v0, %v867_v1 }
 0x252   : > { %v995_v3 = vld [vmem:[%s18494_s24 + $0xd68] sm:$0xff] }
 0x253   : > { %v14818_v9 = vcombine.high %v991_v2, %v995_v3  ;;  %v871_v10 = vld [vmem:[%s18494_s24 + $0x988] sm:$0xff] }
 0x254   : > { %3908 = vmatpush1.bf16.msra.mxu0 %v14505_v16  ;;  %3949 = vmatpush1.bf16.msra.mxu1 %v14633_v17  ;;  %v875_v11 = vld [vmem:[%s18494_s24 + $0x9a8] sm:$0xff]  ;;  %v14689_v16 = vcombine.low %v863_v0, %v867_v1  ;;  %v14817_v17 = vcombine.low %v991_v2, %v995_v3 }
 0x255   : > { %3909 = vmatprep.subr.bf16.mxu0 %v14514_v18  ;;  %3950 = vmatprep.subr.bf16.mxu1 %v14642_v19  ;;  %v999_v13 = vld [vmem:[%s18494_s24 + $0xd88] sm:$0xff]  ;;  %v14698_v18 = vcombine.high %v871_v10, %v875_v11 }
 0x256   : > { %v1003_v14 = vld [vmem:[%s18494_s24 + $0xda8] sm:$0xff] }
 0x257   : > { %v14826_v19 = vcombine.high %v999_v13, %v1003_v14  ;;  %v879_v20 = vld [vmem:[%s18494_s24 + $0x9c8] sm:$0xff] }
 0x258   : > { %3910 = vmatpush1.bf16.msra.mxu0 %v14513_v24  ;;  %3951 = vmatpush1.bf16.msra.mxu1 %v14641_v29  ;;  %v883_v21 = vld [vmem:[%s18494_s24 + $0x9e8] sm:$0xff]  ;;  %v14697_v24 = vcombine.low %v871_v10, %v875_v11  ;;  %v14825_v29 = vcombine.low %v999_v13, %v1003_v14 }
 0x259   : > { %3961 = vmatprep.subr.bf16.mxu0 %v14650_v30  ;;  %4002 = vmatprep.subr.bf16.mxu1 %v14778_v32  ;;  %v1007_v22 = vld [vmem:[%s18494_s24 + $0xdc8] sm:$0xff]  ;;  %v14706_v30 = vcombine.high %v879_v20, %v883_v21 }
 0x25a   : > { %v1011_v23 = vld [vmem:[%s18494_s24 + $0xde8] sm:$0xff] }
 0x25b   : > { %3912 = vmatmul.mubr.bf16.vlgmr.msra.gmra.mrb[8].mxu0 %v18625_v56  ;;  %3953 = vmatmul.mubr.bf16.vlgmr.msra.gmra.mrb[8].mxu1 %v18629_v60  ;;  %v14834_v32 = vcombine.high %v1007_v22, %v1011_v23  ;;  %v887_v33 = vld [vmem:[%s18494_s24 + $0xa08] sm:$0xff] }
 0x25c   : > { %3962 = vmatpush1.bf16.msra.mxu0 %v14649_v39  ;;  %4003 = vmatpush1.bf16.msra.mxu1 %v14777_v41  ;;  %v891_v35 = vld [vmem:[%s18494_s24 + $0xa28] sm:$0xff]  ;;  %v14705_v39 = vcombine.low %v879_v20, %v883_v21  ;;  %v14833_v41 = vcombine.low %v1007_v22, %v1011_v23 }
 0x25d   : > { %3963 = vmatprep.subr.bf16.mxu0 %v14658_v25  ;;  %4004 = vmatprep.subr.bf16.mxu1 %v14786_v26  ;;  %v1015_v36 = vld [vmem:[%s18494_s24 + $0xe08] sm:$0xff]  ;;  %v14714_v25 = vcombine.high %v887_v33, %v891_v35 }
 0x25e   : > { %3993 = vmatprep.mubr.bf16.mxu0 %v18633_v4  ;;  %4034 = vmatprep.mubr.bf16.mxu1 %v18638_v7  ;;  %v1019_v38 = vld [vmem:[%s18494_s24 + $0xe28] sm:$0xff] }
 0x25f   : > { %v14842_v26 = vcombine.high %v1015_v36, %v1019_v38  ;;  %v895_v27 = vld [vmem:[%s18494_s24 + $0xa48] sm:$0xff] }
 0x260   : > { %3964 = vmatpush1.bf16.msra.mxu0 %v14657_v37  ;;  %4005 = vmatpush1.bf16.msra.mxu1 %v14785_v40  ;;  %v899_v28 = vld [vmem:[%s18494_s24 + $0xa68] sm:$0xff]  ;;  %v14713_v37 = vcombine.low %v887_v33, %v891_v35  ;;  %v14841_v40 = vcombine.low %v1015_v36, %v1019_v38 }
 0x261   : > { %3965 = vmatprep.subr.bf16.mxu0 %v14666_v44  ;;  %4006 = vmatprep.subr.bf16.mxu1 %v14794_v45  ;;  %v1023_v31 = vld [vmem:[%s18494_s24 + $0xe48] sm:$0xff]  ;;  %v14722_v44 = vcombine.high %v895_v27, %v899_v28 }
 0x262   : > { %v1027_v34 = vld [vmem:[%s18494_s24 + $0xe68] sm:$0xff] }
 0x263   : > { %v14850_v45 = vcombine.high %v1023_v31, %v1027_v34  ;;  %v903_v46 = vld [vmem:[%s18494_s24 + $0xa88] sm:$0xff] }
 0x264   : > { %3966 = vmatpush1.bf16.msra.mxu0 %v14665_v50  ;;  %4007 = vmatpush1.bf16.msra.mxu1 %v14793_v51  ;;  %v907_v47 = vld [vmem:[%s18494_s24 + $0xaa8] sm:$0xff]  ;;  %v14721_v50 = vcombine.low %v895_v27, %v899_v28  ;;  %v14849_v51 = vcombine.low %v1023_v31, %v1027_v34  ;;  %v568_v27 = vld [vmem:[%s18494_s24 + $0x10] sm:$0xff] }
 0x265   : > { %3967 = vmatprep.subr.bf16.mxu0 %v14674_v52  ;;  %4008 = vmatprep.subr.bf16.mxu1 %v14802_v53  ;;  %v1031_v48 = vld [vmem:[%s18494_s24 + $0xe88] sm:$0xff]  ;;  %v14730_v52 = vcombine.high %v903_v46, %v907_v47  ;;  %v572_v28 = vld [vmem:[%s18494_s24 + $0x30] sm:$0xff] }
 0x266   : > { %v1035_v49 = vld [vmem:[%s18494_s24 + $0xea8] sm:$0xff]  ;;  %v696_v31 = vld [vmem:[%s18494_s24 + $0x410] sm:$0xff] }
 0x267   : > { %v14858_v53 = vcombine.high %v1031_v48, %v1035_v49  ;;  %v911_v54 = vld [vmem:[%s18494_s24 + $0xac8] sm:$0xff]  ;;  %v700_v34 = vld [vmem:[%s18494_s24 + $0x430] sm:$0xff] }
 0x268   : > { %3968 = vmatpush1.bf16.msra.mxu0 %v14673_v59  ;;  %4009 = vmatpush1.bf16.msra.mxu1 %v14801_v61  ;;  %v915_v55 = vld [vmem:[%s18494_s24 + $0xae8] sm:$0xff]  ;;  %v14729_v59 = vcombine.low %v903_v46, %v907_v47  ;;  %v14857_v61 = vcombine.low %v1031_v48, %v1035_v49  ;;  %v576_v46 = vld [vmem:[%s18494_s24 + $0x50] sm:$0xff] }
 0x269   : > { %3969 = vmatprep.subr.bf16.mxu0 %v14682_v62  ;;  %4010 = vmatprep.subr.bf16.mxu1 %v14810_v63  ;;  %v1039_v57 = vld [vmem:[%s18494_s24 + $0xec8] sm:$0xff]  ;;  %v14738_v62 = vcombine.high %v911_v54, %v915_v55  ;;  %v580_v47 = vld [vmem:[%s18494_s24 + $0x70] sm:$0xff] }
 0x26a   : > { %v1043_v58 = vld [vmem:[%s18494_s24 + $0xee8] sm:$0xff]  ;;  %v704_v48 = vld [vmem:[%s18494_s24 + $0x450] sm:$0xff] }
 0x26b   : > { %v14866_v63 = vcombine.high %v1039_v57, %v1043_v58  ;;  %v919_v0 = vld [vmem:[%s18494_s24 + $0xb08] sm:$0xff]  ;;  %v708_v49 = vld [vmem:[%s18494_s24 + $0x470] sm:$0xff] }
 0x26c   : > { %3970 = vmatpush1.bf16.msra.mxu0 %v14681_v5  ;;  %4011 = vmatpush1.bf16.msra.mxu1 %v14809_v6  ;;  %v923_v1 = vld [vmem:[%s18494_s24 + $0xb28] sm:$0xff]  ;;  %v14737_v5 = vcombine.low %v911_v54, %v915_v55  ;;  %v14865_v6 = vcombine.low %v1039_v57, %v1043_v58  ;;  %v584_v54 = vld [vmem:[%s18494_s24 + $0x90] sm:$0xff] }
 0x26d   : > { %3971 = vmatprep.subr.bf16.mxu0 %v14690_v8  ;;  %4012 = vmatprep.subr.bf16.mxu1 %v14818_v9  ;;  %v1047_v2 = vld [vmem:[%s18494_s24 + $0xf08] sm:$0xff]  ;;  %v14746_v8 = vcombine.high %v919_v0, %v923_v1  ;;  %v588_v55 = vld [vmem:[%s18494_s24 + $0xb0] sm:$0xff] }
 0x26e   : > { %v1051_v3 = vld [vmem:[%s18494_s24 + $0xf28] sm:$0xff]  ;;  %v712_v57 = vld [vmem:[%s18494_s24 + $0x490] sm:$0xff] }
 0x26f   : > { %v14874_v9 = vcombine.high %v1047_v2, %v1051_v3  ;;  %v927_v10 = vld [vmem:[%s18494_s24 + $0xb48] sm:$0xff]  ;;  %v716_v58 = vld [vmem:[%s18494_s24 + $0x4b0] sm:$0xff] }
 0x270   : > { %3972 = vmatpush1.bf16.msra.mxu0 %v14689_v16  ;;  %4013 = vmatpush1.bf16.msra.mxu1 %v14817_v17  ;;  %v931_v11 = vld [vmem:[%s18494_s24 + $0xb68] sm:$0xff]  ;;  %v14745_v16 = vcombine.low %v919_v0, %v923_v1  ;;  %v14873_v17 = vcombine.low %v1047_v2, %v1051_v3  ;;  %v14540_v0 = vcombine.high %v712_v57, %v716_v58  ;;  %v592_v1 = vld [vmem:[%s18494_s24 + $0xd0] sm:$0xff] }
 0x271   : > { %3973 = vmatprep.subr.bf16.mxu0 %v14698_v18  ;;  %4014 = vmatprep.subr.bf16.mxu1 %v14826_v19  ;;  %v1055_v13 = vld [vmem:[%s18494_s24 + $0xf48] sm:$0xff]  ;;  %v14754_v18 = vcombine.high %v927_v10, %v931_v11  ;;  %v596_v2 = vld [vmem:[%s18494_s24 + $0xf0] sm:$0xff] }
 0x272   : > { %v1059_v14 = vld [vmem:[%s18494_s24 + $0xf68] sm:$0xff]  ;;  %v720_v3 = vld [vmem:[%s18494_s24 + $0x4d0] sm:$0xff] }
 0x273   : > { %v14882_v19 = vcombine.high %v1055_v13, %v1059_v14  ;;  %v935_v20 = vld [vmem:[%s18494_s24 + $0xb88] sm:$0xff] }
 0x274   : > { %3974 = vmatpush1.bf16.msra.mxu0 %v14697_v24  ;;  %4015 = vmatpush1.bf16.msra.mxu1 %v14825_v29  ;;  %v939_v21 = vld [vmem:[%s18494_s24 + $0xba8] sm:$0xff]  ;;  %v14753_v24 = vcombine.low %v927_v10, %v931_v11  ;;  %v14881_v29 = vcombine.low %v1055_v13, %v1059_v14  ;;  %v14539_v10 = vcombine.low %v712_v57, %v716_v58  ;;  %v600_v14 = vld [vmem:[%s18494_s24 + $0x110] sm:$0xff] }
 0x275   : > { %3975 = vmatprep.subr.bf16.mxu0 %v14706_v30  ;;  %4016 = vmatprep.subr.bf16.mxu1 %v14834_v32  ;;  %v1063_v22 = vld [vmem:[%s18494_s24 + $0xf88] sm:$0xff]  ;;  %v14762_v30 = vcombine.high %v935_v20, %v939_v21  ;;  %v14420_v11 = vcombine.high %v592_v1, %v596_v2 }
 0x276   : > { %v1067_v23 = vld [vmem:[%s18494_s24 + $0xfa8] sm:$0xff] }
 0x277   : > { %v14890_v32 = vcombine.high %v1063_v22, %v1067_v23  ;;  %v943_v33 = vld [vmem:[%s18494_s24 + $0xbc8] sm:$0xff] }
 0x278   : > { %3976 = vmatpush1.bf16.msra.mxu0 %v14705_v39  ;;  %4017 = vmatpush1.bf16.msra.mxu1 %v14833_v41  ;;  %v947_v35 = vld [vmem:[%s18494_s24 + $0xbe8] sm:$0xff]  ;;  %v14761_v39 = vcombine.low %v935_v20, %v939_v21  ;;  %v14889_v41 = vcombine.low %v1063_v22, %v1067_v23  ;;  %v14419_v21 = vcombine.low %v592_v1, %v596_v2 }
 0x279   : > { %3977 = vmatprep.subr.bf16.mxu0 %v14714_v25  ;;  %4018 = vmatprep.subr.bf16.mxu1 %v14842_v26  ;;  %v1071_v36 = vld [vmem:[%s18494_s24 + $0xfc8] sm:$0xff]  ;;  %v14770_v25 = vcombine.high %v943_v33, %v947_v35 }
 0x27a   : > { %v1075_v38 = vld [vmem:[%s18494_s24 + $0xfe8] sm:$0xff] }
 0x27b   : > { %v14898_v26 = vcombine.high %v1071_v36, %v1075_v38 }
 0x27c   : > { %3978 = vmatpush1.bf16.msra.mxu0 %v14713_v37  ;;  %4019 = vmatpush1.bf16.msra.mxu1 %v14841_v40  ;;  %v14769_v37 = vcombine.low %v943_v33, %v947_v35  ;;  %v14897_v40 = vcombine.low %v1071_v36, %v1075_v38  ;;  %v736_v35 = vld [vmem:[%s18494_s24 + $0x550] sm:$0xff] }
 0x27d   : > { %3979 = vmatprep.subr.bf16.mxu0 %v14722_v44  ;;  %4020 = vmatprep.subr.bf16.mxu1 %v14850_v45  ;;  %v14396_v44 = vcombine.high %v568_v27, %v572_v28  ;;  %v14524_v45 = vcombine.high %v696_v31, %v700_v34  ;;  %v740_v36 = vld [vmem:[%s18494_s24 + $0x570] sm:$0xff] }
 0x280   : > { %3980 = vmatpush1.bf16.msra.mxu0 %v14721_v50  ;;  %4021 = vmatpush1.bf16.msra.mxu1 %v14849_v51  ;;  %v14395_v50 = vcombine.low %v568_v27, %v572_v28  ;;  %v14523_v51 = vcombine.low %v696_v31, %v700_v34  ;;  %v616_v27 = vld [vmem:[%s18494_s24 + $0x190] sm:$0xff] }
 0x281   : > { %3981 = vmatprep.subr.bf16.mxu0 %v14730_v52  ;;  %4022 = vmatprep.subr.bf16.mxu1 %v14858_v53  ;;  %v14404_v52 = vcombine.high %v576_v46, %v580_v47  ;;  %v14532_v53 = vcombine.high %v704_v48, %v708_v49  ;;  %v620_v28 = vld [vmem:[%s18494_s24 + $0x1b0] sm:$0xff] }
 0x282   : > { %v744_v34 = vld [vmem:[%s18494_s24 + $0x590] sm:$0xff] }
 0x284   : > { %3982 = vmatpush1.bf16.msra.mxu0 %v14729_v59  ;;  %4023 = vmatpush1.bf16.msra.mxu1 %v14857_v61  ;;  %v1083_v59 = vlaneseq  ;;  %v14403_v61 = vcombine.low %v576_v46, %v580_v47  ;;  %v14444_v46 = vcombine.high %v616_v27, %v620_v28 }
 0x285   : > { %3983 = vmatprep.subr.bf16.mxu0 %v14738_v62  ;;  %4024 = vmatprep.subr.bf16.mxu1 %v14866_v63  ;;  %v14531_v62 = vcombine.low %v704_v48, %v708_v49  ;;  %v14412_v63 = vcombine.high %v584_v54, %v588_v55  ;;  %v624_v49 = vld [vmem:[%s18494_s24 + $0x1d0] sm:$0xff] }
 0x288   : > { %3984 = vmatpush1.bf16.msra.mxu0 %v14737_v5  ;;  %4025 = vmatpush1.bf16.msra.mxu1 %v14865_v6  ;;  %v724_v5 = vld [vmem:[%s18494_s24 + $0x4f0] sm:$0xff]  ;;  %v18854_v6 = vshrl.u32 %v1083_v59, 7 }
 0x289   : > { %3985 = vmatprep.subr.bf16.mxu0 %v14746_v8  ;;  %4026 = vmatprep.subr.bf16.mxu1 %v14874_v9  ;;  %v14411_v8 = vcombine.low %v584_v54, %v588_v55  ;;  %v1078_v9 = vld [vmem:[%s18504_s20] sm:$0xff]  ;;  %v14548_v13 = vcombine.high %v720_v3, %v724_v5  ;;  %v14547_v23 = vcombine.low %v720_v3, %v724_v5  ;;  %v752_v54 = vld [vmem:[%s18494_s24 + $0x5d0] sm:$0xff] }
 0x28a   : > { %v18865_v20 = vsub.s32 0, %v18854_v6  ;;  %v18868_v22 = vsub.s32 2, %v18854_v6  ;;  %v756_v55 = vld [vmem:[%s18494_s24 + $0x5f0] sm:$0xff] }
 0x28c   : > { %3986 = vmatpush1.bf16.msra.mxu0 %v14745_v16  ;;  %4027 = vmatpush1.bf16.msra.mxu1 %v14873_v17  ;;  %v604_v16 = vld [vmem:[%s18494_s24 + $0x130] sm:$0xff] }
 0x28d   : > { %3987 = vmatprep.subr.bf16.mxu0 %v14754_v18  ;;  %4028 = vmatprep.subr.bf16.mxu1 %v14882_v19  ;;  %v728_v17 = vld [vmem:[%s18494_s24 + $0x510] sm:$0xff]  ;;  %v18862_v19 = vunpack.c.l.bf16 %v1078_v9  ;;  %v14427_v38 = vcombine.low %v600_v14, %v604_v16 }
 0x28e   : > { %v732_v18 = vld [vmem:[%s18494_s24 + $0x530] sm:$0xff] }
 0x28f   : > { %v1086_v33 = vrot.slane %v18862_v19, %v18865_v20  ;;  %v632_v9 = vld [vmem:[%s18494_s24 + $0x210] sm:$0xff] }
 0x290   : > { %3988 = vmatpush1.bf16.msra.mxu0 %v14753_v24  ;;  %4029 = vmatpush1.bf16.msra.mxu1 %v14881_v29  ;;  %v14428_v24 = vcombine.high %v600_v14, %v604_v16  ;;  %v14556_v29 = vcombine.high %v728_v17, %v732_v18  ;;  %v14579_v16 = vcombine.low %v752_v54, %v756_v55 }
 0x291   : > { %3989 = vmatprep.subr.bf16.mxu0 %v14762_v30  ;;  %4030 = vmatprep.subr.bf16.mxu1 %v14890_v32  ;;  %v608_v30 = vld [vmem:[%s18494_s24 + $0x150] sm:$0xff]  ;;  %v1126_v31 = vrot.slane %v1086_v33, %v18865_v20 }
 0x292   : > { %v612_v32 = vld [vmem:[%s18494_s24 + $0x170] sm:$0xff] }
 0x294   : > { %3990 = vmatpush1.bf16.msra.mxu0 %v14761_v39  ;;  %4031 = vmatpush1.bf16.msra.mxu1 %v14889_v41  ;;  %v1090_v39 = vrot.slane %v18862_v19, %v18868_v22  ;;  %v14555_v41 = vcombine.low %v728_v17, %v732_v18 }
 0x295   : > { %3991 = vmatprep.subr.bf16.mxu0 %v14770_v25  ;;  %4032 = vmatprep.subr.bf16.mxu1 %v14898_v26  ;;  %v14436_v25 = vcombine.high %v608_v30, %v612_v32  ;;  %v14564_v26 = vcombine.high %v736_v35, %v740_v36 }
 0x298   : > { %3992 = vmatpush1.bf16.msra.mxu0 %v14769_v37  ;;  %4033 = vmatpush1.bf16.msra.mxu1 %v14897_v40  ;;  %v748_v37 = vld [vmem:[%s18494_s24 + $0x5b0] sm:$0xff]  ;;  %v1130_v40 = vrot.slane %v1090_v39, %v18865_v20 }
 0x299   : > { %4043 = vmatprep.subr.bf16.mxu0 %v14396_v44  ;;  %4084 = vmatprep.subr.bf16.mxu1 %v14524_v45  ;;  %v14435_v44 = vcombine.low %v608_v30, %v612_v32  ;;  %v14563_v45 = vcombine.low %v736_v35, %v740_v36  ;;  %v14572_v48 = vcombine.high %v744_v34, %v748_v37  ;;  %v648_v36 = vld [vmem:[%s18494_s24 + $0x290] sm:$0xff] }
 0x29a   : > { %v14571_v1 = vcombine.low %v744_v34, %v748_v37  ;;  %v776_v39 = vld [vmem:[%s18494_s24 + $0x690] sm:$0xff] }
 0x29b   : > { %3994 = vmatmul.mubr.bf16.vlgmr.msra.gmra.mrb[12].mxu0 %v18701_v12  ;;  %4035 = vmatmul.mubr.bf16.vlgmr.msra.gmra.mrb[12].mxu1 %v18705_v15  ;;  %v660_v34 = vld [vmem:[%s18494_s24 + $0x2f0] sm:$0xff] }
 0x29c   : > { %4044 = vmatpush1.bf16.msra.mxu0 %v14395_v50  ;;  %4085 = vmatpush1.bf16.msra.mxu1 %v14523_v51  ;;  %v628_v50 = vld [vmem:[%s18494_s24 + $0x1f0] sm:$0xff] }
 0x29d   : > { %4045 = vmatprep.subr.bf16.mxu0 %v14404_v52  ;;  %4086 = vmatprep.subr.bf16.mxu1 %v14532_v53  ;;  %v14452_v2 = vcombine.high %v624_v49, %v628_v50  ;;  %v14451_v14 = vcombine.low %v624_v49, %v628_v50  ;;  %v784_v37 = vld [vmem:[%s18494_s24 + $0x6d0] sm:$0xff] }
 0x29e   : > { %4075 = vmatprep.mubr.bf16.mxu0 %v18579_v42  ;;  %4116 = vmatprep.mubr.bf16.mxu1 %v18581_v43  ;;  %v668_v49 = vld [vmem:[%s18494_s24 + $0x330] sm:$0xff] }
 0x29f   : > { %v792_v50 = vld [vmem:[%s18494_s24 + $0x710] sm:$0xff] }
 0x2a0   : > { %4046 = vmatpush1.bf16.msra.mxu0 %v14403_v61  ;;  %4087 = vmatpush1.bf16.msra.mxu1 %v14531_v62  ;;  %v14443_v61 = vcombine.low %v616_v27, %v620_v28 }
 0x2a1   : > { %4047 = vmatprep.subr.bf16.mxu0 %v14412_v63  ;;  %4088 = vmatprep.subr.bf16.mxu1 %v14540_v0 }
 0x2a4   : > { %4048 = vmatpush1.bf16.msra.mxu0 %v14411_v8  ;;  %4089 = vmatpush1.bf16.msra.mxu1 %v14539_v10  ;;  %v14580_v8 = vcombine.high %v752_v54, %v756_v55  ;;  %v636_v10 = vld [vmem:[%s18494_s24 + $0x230] sm:$0xff] }
 0x2a5   : > { %4049 = vmatprep.subr.bf16.mxu0 %v14420_v11  ;;  %4090 = vmatprep.subr.bf16.mxu1 %v14548_v13  ;;  %v760_v11 = vld [vmem:[%s18494_s24 + $0x610] sm:$0xff]  ;;  %v14460_v17 = vcombine.high %v632_v9, %v636_v10  ;;  %v14459_v30 = vcombine.low %v632_v9, %v636_v10 }
 0x2a6   : > { %v764_v13 = vld [vmem:[%s18494_s24 + $0x630] sm:$0xff] }
 0x2a7   : > { %v14588_v18 = vcombine.high %v760_v11, %v764_v13  ;;  %v14587_v32 = vcombine.low %v760_v11, %v764_v13  ;;  %v808_v9 = vld [vmem:[%s18494_s24 + $0x790] sm:$0xff] }
 0x2a8   : > { %4050 = vmatpush1.bf16.msra.mxu0 %v14419_v21  ;;  %4091 = vmatpush1.bf16.msra.mxu1 %v14547_v23  ;;  %v640_v21 = vld [vmem:[%s18494_s24 + $0x250] sm:$0xff] }
 0x2a9   : > { %4051 = vmatprep.subr.bf16.mxu0 %v14428_v24  ;;  %4092 = vmatprep.subr.bf16.mxu1 %v14556_v29  ;;  %v644_v23 = vld [vmem:[%s18494_s24 + $0x270] sm:$0xff] }
 0x2aa   : > { %v768_v24 = vld [vmem:[%s18494_s24 + $0x650] sm:$0xff]  ;;  %v14468_v33 = vcombine.high %v640_v21, %v644_v23 }
 0x2ab   : > { %v772_v29 = vld [vmem:[%s18494_s24 + $0x670] sm:$0xff] }
 0x2ac   : > { %4052 = vmatpush1.bf16.msra.mxu0 %v14427_v38  ;;  %4093 = vmatpush1.bf16.msra.mxu1 %v14555_v41  ;;  %v14596_v35 = vcombine.high %v768_v24, %v772_v29  ;;  %v652_v38 = vld [vmem:[%s18494_s24 + $0x2b0] sm:$0xff] }
 0x2ad   : > { %4053 = vmatprep.subr.bf16.mxu0 %v14436_v25  ;;  %4094 = vmatprep.subr.bf16.mxu1 %v14564_v26  ;;  %v3790_v52 = vpop.f32.mrb[0].mxu1  ;;  %v780_v41 = vld [vmem:[%s18494_s24 + $0x6b0] sm:$0xff]  ;;  %v14467_v25 = vcombine.low %v640_v21, %v644_v23  ;;  %v14595_v26 = vcombine.low %v768_v24, %v772_v29  ;;  %v14476_v27 = vcombine.high %v648_v36, %v652_v38 }
 0x2ae   : > { %v3749_v47 = vpop.f32.mrb[0].mxu0  ;;  %v3792_v58 = vpop.f32.mrb[1].mxu1  ;;  %v14604_v28 = vcombine.high %v776_v39, %v780_v41  ;;  %v812_v10 = vld [vmem:[%s18494_s24 + $0x7b0] sm:$0xff] }
 0x2af   : > { %v3750_v51 = vadd.f32 %v3749_v47, %v1126_v31  ;;  %v3751_v53 = vpop.f32.mrb[1].mxu0  ;;  %v3794_v63 = vpop.f32.mrb[2].mxu1  ;;  %v656_v31 = vld [vmem:[%s18494_s24 + $0x2d0] sm:$0xff]  ;;  %v14635_v29 = vcombine.low %v808_v9, %v812_v10 }
 0x2b0   : > { %v3752_v57 = vadd.f32 %v3751_v53, %v1130_v40  ;;  %v3753_v59 = vpop.f32.mrb[2].mxu0  ;;  %4054 = vmatpush1.bf16.msra.mxu0 %v14435_v44  ;;  %4095 = vmatpush1.bf16.msra.mxu1 %v14563_v45  ;;  %v3795_v5 = vpop.f32.mrb[3].mxu1  ;;  %v788_v40 = vld [vmem:[%s18494_s24 + $0x6f0] sm:$0xff]  ;;  %v14475_v44 = vcombine.low %v648_v36, %v652_v38  ;;  %v14603_v45 = vcombine.low %v776_v39, %v780_v41 }
 0x2b1   : > { %v18888_v62 = vadd.f32 %v3790_v52, %v3750_v51  ;;  %v3754_v0 = vpop.f32.mrb[3].mxu0  ;;  %4055 = vmatprep.subr.bf16.mxu0 %v14444_v46  ;;  %4096 = vmatprep.subr.bf16.mxu1 %v14572_v48  ;;  %v14484_v46 = vcombine.high %v656_v31, %v660_v34  ;;  %v14612_v47 = vcombine.high %v784_v37, %v788_v40  ;;  %v664_v48 = vld [vmem:[%s18494_s24 + $0x310] sm:$0xff] }
 0x2b2   : > { %v18890_v3 = vadd.f32 %v3792_v58, %v3752_v57  ;;  %v796_v51 = vld [vmem:[%s18494_s24 + $0x730] sm:$0xff]  ;;  %v14483_v52 = vcombine.low %v656_v31, %v660_v34  ;;  %v14611_v53 = vcombine.low %v784_v37, %v788_v40  ;;  %v14492_v54 = vcombine.high %v664_v48, %v668_v49 }
 0x2b3   : > { %v14620_v55 = vcombine.high %v792_v50, %v796_v51  ;;  %v672_v57 = vld [vmem:[%s18494_s24 + $0x350] sm:$0xff]  ;;  %v14491_v63 = vcombine.low %v664_v48, %v668_v49  ;;  %v14619_v0 = vcombine.low %v792_v50, %v796_v51 }
 0x2b4   : > { %4056 = vmatpush1.bf16.msra.mxu0 %v14443_v61  ;;  %4097 = vmatpush1.bf16.msra.mxu1 %v14571_v1  ;;  %v676_v58 = vld [vmem:[%s18494_s24 + $0x370] sm:$0xff] }
 0x2b5   : > { %4057 = vmatprep.subr.bf16.mxu0 %v14452_v2  ;;  %4098 = vmatprep.subr.bf16.mxu1 %v14580_v8  ;;  %v800_v59 = vld [vmem:[%s18494_s24 + $0x750] sm:$0xff]  ;;  %v14500_v1 = vcombine.high %v672_v57, %v676_v58  ;;  %v14499_v11 = vcombine.low %v672_v57, %v676_v58 }
 0x2b6   : > { %v804_v61 = vld [vmem:[%s18494_s24 + $0x770] sm:$0xff] }
 0x2b7   : > { %v14628_v2 = vcombine.high %v800_v59, %v804_v61  ;;  %v680_v5 = vld [vmem:[%s18494_s24 + $0x390] sm:$0xff]  ;;  %v14627_v13 = vcombine.low %v800_v59, %v804_v61 }
 0x2b8   : > { %4058 = vmatpush1.bf16.msra.mxu0 %v14451_v14  ;;  %4099 = vmatpush1.bf16.msra.mxu1 %v14579_v16  ;;  %v684_v8 = vld [vmem:[%s18494_s24 + $0x3b0] sm:$0xff]  ;;  %v14636_v16 = vcombine.high %v808_v9, %v812_v10 }
 0x2b9   : > { %4059 = vmatprep.subr.bf16.mxu0 %v14460_v17  ;;  %4100 = vmatprep.subr.bf16.mxu1 %v14588_v18  ;;  %v14508_v14 = vcombine.high %v680_v5, %v684_v8  ;;  %v688_v17 = vld [vmem:[%s18494_s24 + $0x3d0] sm:$0xff]  ;;  %v14507_v24 = vcombine.low %v680_v5, %v684_v8 }
 0x2ba   : > { %v692_v18 = vld [vmem:[%s18494_s24 + $0x3f0] sm:$0xff] }
 0x2bb   : > { %v816_v21 = vld [vmem:[%s18494_s24 + $0x7d0] sm:$0xff]  ;;  %v14515_v39 = vcombine.low %v688_v17, %v692_v18 }
 0x2bc   : > { %4060 = vmatpush1.bf16.msra.mxu0 %v14459_v30  ;;  %4101 = vmatpush1.bf16.msra.mxu1 %v14587_v32  ;;  %v820_v23 = vld [vmem:[%s18494_s24 + $0x7f0] sm:$0xff]  ;;  %v14516_v30 = vcombine.high %v688_v17, %v692_v18 }
 0x2bd   : > { %4061 = vmatprep.subr.bf16.mxu0 %v14468_v33  ;;  %4102 = vmatprep.subr.bf16.mxu1 %v14596_v35  ;;  %v14644_v32 = vcombine.high %v816_v21, %v820_v23  ;;  %v824_v33 = vld [vmem:[%s18494_s24 + $0x810] sm:$0xff]  ;;  %v14643_v41 = vcombine.low %v816_v21, %v820_v23 }
 0x2be   : > { %v828_v35 = vld [vmem:[%s18494_s24 + $0x830] sm:$0xff] }
 0x2bf   : > { %v952_v36 = vld [vmem:[%s18494_s24 + $0xc10] sm:$0xff]  ;;  %v14651_v37 = vcombine.low %v824_v33, %v828_v35 }
 0x2c0   : > { %4062 = vmatpush1.bf16.msra.mxu0 %v14467_v25  ;;  %4103 = vmatpush1.bf16.msra.mxu1 %v14595_v26  ;;  %v956_v38 = vld [vmem:[%s18494_s24 + $0xc30] sm:$0xff]  ;;  %v14652_v25 = vcombine.high %v824_v33, %v828_v35 }
 0x2c1   : > { %4063 = vmatprep.subr.bf16.mxu0 %v14476_v27  ;;  %4104 = vmatprep.subr.bf16.mxu1 %v14604_v28  ;;  %v14780_v26 = vcombine.high %v952_v36, %v956_v38  ;;  %v832_v27 = vld [vmem:[%s18494_s24 + $0x850] sm:$0xff]  ;;  %v14779_v40 = vcombine.low %v952_v36, %v956_v38 }
 0x2c2   : > { %v836_v28 = vld [vmem:[%s18494_s24 + $0x870] sm:$0xff] }
 0x2c3   : > { %v960_v31 = vld [vmem:[%s18494_s24 + $0xc50] sm:$0xff]  ;;  %v14659_v50 = vcombine.low %v832_v27, %v836_v28 }
 0x2c4   : > { %4064 = vmatpush1.bf16.msra.mxu0 %v14475_v44  ;;  %4105 = vmatpush1.bf16.msra.mxu1 %v14603_v45  ;;  %v964_v34 = vld [vmem:[%s18494_s24 + $0xc70] sm:$0xff]  ;;  %v14660_v44 = vcombine.high %v832_v27, %v836_v28 }
 0x2c5   : > { %4065 = vmatprep.subr.bf16.mxu0 %v14484_v46  ;;  %4106 = vmatprep.subr.bf16.mxu1 %v14612_v47  ;;  %v14788_v45 = vcombine.high %v960_v31, %v964_v34  ;;  %v840_v46 = vld [vmem:[%s18494_s24 + $0x890] sm:$0xff]  ;;  %v14787_v51 = vcombine.low %v960_v31, %v964_v34 }
 0x2c6   : > { %v844_v47 = vld [vmem:[%s18494_s24 + $0x8b0] sm:$0xff] }
 0x2c7   : > { %v968_v48 = vld [vmem:[%s18494_s24 + $0xc90] sm:$0xff]  ;;  %v14667_v59 = vcombine.low %v840_v46, %v844_v47 }
 0x2c8   : > { %4066 = vmatpush1.bf16.msra.mxu0 %v14483_v52  ;;  %4107 = vmatpush1.bf16.msra.mxu1 %v14611_v53  ;;  %v972_v49 = vld [vmem:[%s18494_s24 + $0xcb0] sm:$0xff]  ;;  %v14668_v52 = vcombine.high %v840_v46, %v844_v47 }
 0x2c9   : > { %4067 = vmatprep.subr.bf16.mxu0 %v14492_v54  ;;  %4108 = vmatprep.subr.bf16.mxu1 %v14620_v55  ;;  %v14796_v53 = vcombine.high %v968_v48, %v972_v49  ;;  %v848_v54 = vld [vmem:[%s18494_s24 + $0x8d0] sm:$0xff]  ;;  %v14795_v61 = vcombine.low %v968_v48, %v972_v49 }
 0x2ca   : > { %v852_v55 = vld [vmem:[%s18494_s24 + $0x8f0] sm:$0xff] }
 0x2cb   : > { %v976_v57 = vld [vmem:[%s18494_s24 + $0xcd0] sm:$0xff]  ;;  %v14675_v9 = vcombine.low %v848_v54, %v852_v55 }
 0x2cc   : > { %4068 = vmatpush1.bf16.msra.mxu0 %v14491_v63  ;;  %4109 = vmatpush1.bf16.msra.mxu1 %v14619_v0  ;;  %v980_v58 = vld [vmem:[%s18494_s24 + $0xcf0] sm:$0xff]  ;;  %v14676_v63 = vcombine.high %v848_v54, %v852_v55 }
 0x2cd   : > { %4069 = vmatprep.subr.bf16.mxu0 %v14500_v1  ;;  %4110 = vmatprep.subr.bf16.mxu1 %v14628_v2  ;;  %v14804_v0 = vcombine.high %v976_v57, %v980_v58  ;;  %v856_v1 = vld [vmem:[%s18494_s24 + $0x910] sm:$0xff]  ;;  %v14803_v10 = vcombine.low %v976_v57, %v980_v58 }
 0x2ce   : > { %v860_v2 = vld [vmem:[%s18494_s24 + $0x930] sm:$0xff] }
 0x2cf   : > { %v984_v5 = vld [vmem:[%s18494_s24 + $0xd10] sm:$0xff]  ;;  %v14683_v21 = vcombine.low %v856_v1, %v860_v2 }
 0x2d0   : > { %4070 = vmatpush1.bf16.msra.mxu0 %v14499_v11  ;;  %4111 = vmatpush1.bf16.msra.mxu1 %v14627_v13  ;;  %v988_v8 = vld [vmem:[%s18494_s24 + $0xd30] sm:$0xff]  ;;  %v14684_v11 = vcombine.high %v856_v1, %v860_v2 }
 0x2d1   : > { %4071 = vmatprep.subr.bf16.mxu0 %v14508_v14  ;;  %4112 = vmatprep.subr.bf16.mxu1 %v14636_v16  ;;  %v14812_v13 = vcombine.high %v984_v5, %v988_v8  ;;  %v864_v14 = vld [vmem:[%s18494_s24 + $0x950] sm:$0xff]  ;;  %v14811_v23 = vcombine.low %v984_v5, %v988_v8 }
 0x2d2   : > { %v868_v16 = vld [vmem:[%s18494_s24 + $0x970] sm:$0xff] }
 0x2d3   : > { %v992_v17 = vld [vmem:[%s18494_s24 + $0xd50] sm:$0xff]  ;;  %v14691_v36 = vcombine.low %v864_v14, %v868_v16 }
 0x2d4   : > { %4072 = vmatpush1.bf16.msra.mxu0 %v14507_v24  ;;  %4113 = vmatpush1.bf16.msra.mxu1 %v14635_v29  ;;  %v996_v18 = vld [vmem:[%s18494_s24 + $0xd70] sm:$0xff]  ;;  %v14692_v24 = vcombine.high %v864_v14, %v868_v16 }
 0x2d5   : > { %4073 = vmatprep.subr.bf16.mxu0 %v14516_v30  ;;  %4114 = vmatprep.subr.bf16.mxu1 %v14644_v32  ;;  %v14820_v29 = vcombine.high %v992_v17, %v996_v18  ;;  %v872_v30 = vld [vmem:[%s18494_s24 + $0x990] sm:$0xff]  ;;  %v14819_v38 = vcombine.low %v992_v17, %v996_v18 }
 0x2d6   : > { %v876_v32 = vld [vmem:[%s18494_s24 + $0x9b0] sm:$0xff] }
 0x2d7   : > { %v1000_v33 = vld [vmem:[%s18494_s24 + $0xd90] sm:$0xff]  ;;  %v14699_v47 = vcombine.low %v872_v30, %v876_v32 }
 0x2d8   : > { %4074 = vmatpush1.bf16.msra.mxu0 %v14515_v39  ;;  %4115 = vmatpush1.bf16.msra.mxu1 %v14643_v41  ;;  %v1004_v35 = vld [vmem:[%s18494_s24 + $0xdb0] sm:$0xff]  ;;  %v14700_v39 = vcombine.high %v872_v30, %v876_v32 }
 0x2d9   : > { %4125 = vmatprep.subr.bf16.mxu0 %v14652_v25  ;;  %4166 = vmatprep.subr.bf16.mxu1 %v14780_v26  ;;  %v14828_v25 = vcombine.high %v1000_v33, %v1004_v35  ;;  %v880_v26 = vld [vmem:[%s18494_s24 + $0x9d0] sm:$0xff] }
 0x2da   : > { %v884_v27 = vld [vmem:[%s18494_s24 + $0x9f0] sm:$0xff] }
 0x2db   : > { %4076 = vmatmul.mubr.bf16.vlgmr.msra.gmra.mrb[16].mxu0 %v18625_v56  ;;  %4117 = vmatmul.mubr.bf16.vlgmr.msra.gmra.mrb[16].mxu1 %v18629_v60  ;;  %v888_v54 = vld [vmem:[%s18494_s24 + $0xa10] sm:$0xff] }
 0x2dc   : > { %4126 = vmatpush1.bf16.msra.mxu0 %v14651_v37  ;;  %4167 = vmatpush1.bf16.msra.mxu1 %v14779_v40  ;;  %v1008_v37 = vld [vmem:[%s18494_s24 + $0xdd0] sm:$0xff] }
 0x2dd   : > { %4127 = vmatprep.subr.bf16.mxu0 %v14660_v44  ;;  %4168 = vmatprep.subr.bf16.mxu1 %v14788_v45  ;;  %v1012_v40 = vld [vmem:[%s18494_s24 + $0xdf0] sm:$0xff] }
 0x2de   : > { %4157 = vmatprep.mubr.bf16.mxu0 %v18633_v4  ;;  %4198 = vmatprep.mubr.bf16.mxu1 %v18638_v7  ;;  %v892_v55 = vld [vmem:[%s18494_s24 + $0xa30] sm:$0xff] }
 0x2df   : > { %v1016_v57 = vld [vmem:[%s18494_s24 + $0xe10] sm:$0xff] }
 0x2e0   : > { %4128 = vmatpush1.bf16.msra.mxu0 %v14659_v50  ;;  %4169 = vmatpush1.bf16.msra.mxu1 %v14787_v51  ;;  %v14708_v51 = vcombine.high %v880_v26, %v884_v27  ;;  %v1020_v58 = vld [vmem:[%s18494_s24 + $0xe30] sm:$0xff] }
 0x2e1   : > { %4129 = vmatprep.subr.bf16.mxu0 %v14668_v52  ;;  %4170 = vmatprep.subr.bf16.mxu1 %v14796_v53  ;;  %v14836_v53 = vcombine.high %v1008_v37, %v1012_v40  ;;  %v896_v1 = vld [vmem:[%s18494_s24 + $0xa50] sm:$0xff] }
 0x2e2   : > { %v900_v2 = vld [vmem:[%s18494_s24 + $0xa70] sm:$0xff] }
 0x2e3   : > { %v1024_v5 = vld [vmem:[%s18494_s24 + $0xe50] sm:$0xff] }
 0x2e4   : > { %4130 = vmatpush1.bf16.msra.mxu0 %v14667_v59  ;;  %4171 = vmatpush1.bf16.msra.mxu1 %v14795_v61  ;;  %v14707_v59 = vcombine.low %v880_v26, %v884_v27  ;;  %v14835_v61 = vcombine.low %v1008_v37, %v1012_v40  ;;  %v1028_v8 = vld [vmem:[%s18494_s24 + $0xe70] sm:$0xff] }
 0x2e5   : > { %4131 = vmatprep.subr.bf16.mxu0 %v14676_v63  ;;  %4172 = vmatprep.subr.bf16.mxu1 %v14804_v0  ;;  %v14716_v63 = vcombine.high %v888_v54, %v892_v55  ;;  %v14844_v0 = vcombine.high %v1016_v57, %v1020_v58  ;;  %v904_v14 = vld [vmem:[%s18494_s24 + $0xa90] sm:$0xff] }
 0x2e6   : > { %v908_v16 = vld [vmem:[%s18494_s24 + $0xab0] sm:$0xff] }
 0x2e7   : > { %v1032_v17 = vld [vmem:[%s18494_s24 + $0xe90] sm:$0xff] }
 0x2e8   : > { %4132 = vmatpush1.bf16.msra.mxu0 %v14675_v9  ;;  %4173 = vmatpush1.bf16.msra.mxu1 %v14803_v10  ;;  %v14715_v9 = vcombine.low %v888_v54, %v892_v55  ;;  %v14843_v10 = vcombine.low %v1016_v57, %v1020_v58  ;;  %v1036_v18 = vld [vmem:[%s18494_s24 + $0xeb0] sm:$0xff] }
 0x2e9   : > { %4133 = vmatprep.subr.bf16.mxu0 %v14684_v11  ;;  %4174 = vmatprep.subr.bf16.mxu1 %v14812_v13  ;;  %v14724_v11 = vcombine.high %v896_v1, %v900_v2  ;;  %v14852_v13 = vcombine.high %v1024_v5, %v1028_v8  ;;  %v912_v30 = vld [vmem:[%s18494_s24 + $0xad0] sm:$0xff] }
 0x2ea   : > { %v916_v32 = vld [vmem:[%s18494_s24 + $0xaf0] sm:$0xff] }
 0x2eb   : > { %v924_v26 = vld [vmem:[%s18494_s24 + $0xb30] sm:$0xff] }
 0x2ec   : > { %4134 = vmatpush1.bf16.msra.mxu0 %v14683_v21  ;;  %4175 = vmatpush1.bf16.msra.mxu1 %v14811_v23  ;;  %v14723_v21 = vcombine.low %v896_v1, %v900_v2  ;;  %v14851_v23 = vcombine.low %v1024_v5, %v1028_v8  ;;  %v1048_v27 = vld [vmem:[%s18494_s24 + $0xf10] sm:$0xff] }
 0x2ed   : > { %4135 = vmatprep.subr.bf16.mxu0 %v14692_v24  ;;  %4176 = vmatprep.subr.bf16.mxu1 %v14820_v29  ;;  %v14732_v24 = vcombine.high %v904_v14, %v908_v16  ;;  %v14860_v29 = vcombine.high %v1032_v17, %v1036_v18  ;;  %v1064_v54 = vld [vmem:[%s18494_s24 + $0xf90] sm:$0xff] }
 0x2ee   : > { %v3831_v41 = vpop.f32.mrb[4].mxu0  ;;  %v3872_v31 = vpop.f32.mrb[4].mxu1  ;;  %v1068_v55 = vld [vmem:[%s18494_s24 + $0xfb0] sm:$0xff] }
 0x2ef   : > { %v3832_v28 = vadd.f32 %v3831_v41, %v18888_v62  ;;  %v3833_v34 = vpop.f32.mrb[5].mxu0  ;;  %v3874_v45 = vpop.f32.mrb[5].mxu1  ;;  %v14827_v62 = vcombine.low %v1000_v33, %v1004_v35  ;;  %v1040_v33 = vld [vmem:[%s18494_s24 + $0xed0] sm:$0xff]  ;;  %v14891_v8 = vcombine.low %v1064_v54, %v1068_v55 }
 0x2f0   : > { %v3834_v44 = vadd.f32 %v3833_v34, %v18890_v3  ;;  %v3835_v46 = vpop.f32.mrb[6].mxu0  ;;  %4136 = vmatpush1.bf16.msra.mxu0 %v14691_v36  ;;  %v3876_v49 = vpop.f32.mrb[6].mxu1  ;;  %4177 = vmatpush1.bf16.msra.mxu1 %v14819_v38  ;;  %v1044_v35 = vld [vmem:[%s18494_s24 + $0xef0] sm:$0xff]  ;;  %v14731_v36 = vcombine.low %v904_v14, %v908_v16  ;;  %v14859_v38 = vcombine.low %v1032_v17, %v1036_v18  ;;  %v697_v14 = vld [vmem:[%s18494_s24 + $0x418] sm:$0xff] }
 0x2f1   : > { %v18962_v48 = vadd.f32 %v3872_v31, %v3832_v28  ;;  %v3836_v50 = vpop.f32.mrb[7].mxu0  ;;  %4137 = vmatprep.subr.bf16.mxu0 %v14700_v39  ;;  %v3877_v3 = vpop.f32.mrb[7].mxu1  ;;  %4178 = vmatprep.subr.bf16.mxu1 %v14828_v25  ;;  %v14740_v39 = vcombine.high %v912_v30, %v916_v32  ;;  %v14868_v41 = vcombine.high %v1040_v33, %v1044_v35  ;;  %v920_v25 = vld [vmem:[%s18494_s24 + $0xb10] sm:$0xff]  ;;  %v701_v16 = vld [vmem:[%s18494_s24 + $0x438] sm:$0xff] }
 0x2f2   : > { %v18964_v52 = vadd.f32 %v3874_v45, %v3834_v44  ;;  %v1052_v28 = vld [vmem:[%s18494_s24 + $0xf30] sm:$0xff]  ;;  %v14739_v31 = vcombine.low %v912_v30, %v916_v32  ;;  %v14867_v34 = vcombine.low %v1040_v33, %v1044_v35  ;;  %v14748_v37 = vcombine.high %v920_v25, %v924_v26  ;;  %v705_v30 = vld [vmem:[%s18494_s24 + $0x458] sm:$0xff] }
 0x2f3   : > { %v14876_v40 = vcombine.high %v1048_v27, %v1052_v28  ;;  %v928_v44 = vld [vmem:[%s18494_s24 + $0xb50] sm:$0xff]  ;;  %v14747_v49 = vcombine.low %v920_v25, %v924_v26  ;;  %v14875_v50 = vcombine.low %v1048_v27, %v1052_v28  ;;  %v709_v32 = vld [vmem:[%s18494_s24 + $0x478] sm:$0xff]  ;;  %v14525_v35 = vcombine.low %v697_v14, %v701_v16 }
 0x2f4   : > { %4138 = vmatpush1.bf16.msra.mxu0 %v14699_v47  ;;  %4179 = vmatpush1.bf16.msra.mxu1 %v14827_v62  ;;  %v932_v45 = vld [vmem:[%s18494_s24 + $0xb70] sm:$0xff]  ;;  %v713_v25 = vld [vmem:[%s18494_s24 + $0x498] sm:$0xff]  ;;  %v14533_v28 = vcombine.low %v705_v30, %v709_v32 }
 0x2f5   : > { %4139 = vmatprep.subr.bf16.mxu0 %v14708_v51  ;;  %4180 = vmatprep.subr.bf16.mxu1 %v14836_v53  ;;  %v1056_v46 = vld [vmem:[%s18494_s24 + $0xf50] sm:$0xff]  ;;  %v14756_v62 = vcombine.high %v928_v44, %v932_v45  ;;  %v14755_v57 = vcombine.low %v928_v44, %v932_v45  ;;  %v717_v26 = vld [vmem:[%s18494_s24 + $0x4b8] sm:$0xff] }
 0x2f6   : > { %v1060_v47 = vld [vmem:[%s18494_s24 + $0xf70] sm:$0xff]  ;;  %v721_v44 = vld [vmem:[%s18494_s24 + $0x4d8] sm:$0xff] }
 0x2f7   : > { %v14884_v51 = vcombine.high %v1056_v46, %v1060_v47  ;;  %v936_v3 = vld [vmem:[%s18494_s24 + $0xb90] sm:$0xff]  ;;  %v14883_v58 = vcombine.low %v1056_v46, %v1060_v47  ;;  %v725_v45 = vld [vmem:[%s18494_s24 + $0x4f8] sm:$0xff]  ;;  %v14541_v47 = vcombine.low %v713_v25, %v717_v26 }
 0x2f8   : > { %4140 = vmatpush1.bf16.msra.mxu0 %v14707_v59  ;;  %4181 = vmatpush1.bf16.msra.mxu1 %v14835_v61  ;;  %v940_v53 = vld [vmem:[%s18494_s24 + $0xbb0] sm:$0xff]  ;;  %v14892_v61 = vcombine.high %v1064_v54, %v1068_v55  ;;  %v19026_v54 = vsub.s32 6, %v18854_v6  ;;  %v14549_v55 = vcombine.low %v721_v44, %v725_v45 }
 0x2f9   : > { %4141 = vmatprep.subr.bf16.mxu0 %v14716_v63  ;;  %4182 = vmatprep.subr.bf16.mxu1 %v14844_v0  ;;  %v14764_v59 = vcombine.high %v936_v3, %v940_v53  ;;  %v944_v63 = vld [vmem:[%s18494_s24 + $0xbd0] sm:$0xff]  ;;  %v14763_v5 = vcombine.low %v936_v3, %v940_v53  ;;  %v729_v3 = vld [vmem:[%s18494_s24 + $0x518] sm:$0xff]  ;;  %v19023_v53 = vsub.s32 4, %v18854_v6 }
 0x2fa   : > { %v948_v0 = vld [vmem:[%s18494_s24 + $0xbf0] sm:$0xff] }
 0x2fb   : > { %v1072_v1 = vld [vmem:[%s18494_s24 + $0xfd0] sm:$0xff]  ;;  %v14771_v17 = vcombine.low %v944_v63, %v948_v0 }
 0x2fc   : > { %4142 = vmatpush1.bf16.msra.mxu0 %v14715_v9  ;;  %4183 = vmatpush1.bf16.msra.mxu1 %v14843_v10  ;;  %v1076_v2 = vld [vmem:[%s18494_s24 + $0xff0] sm:$0xff]  ;;  %v14772_v9 = vcombine.high %v944_v63, %v948_v0  ;;  %v1094_v63 = vrot.slane %v18862_v19, %v19023_v53  ;;  %v737_v0 = vld [vmem:[%s18494_s24 + $0x558] sm:$0xff] }
 0x2fd   : > { %4143 = vmatprep.subr.bf16.mxu0 %v14724_v11  ;;  %4184 = vmatprep.subr.bf16.mxu1 %v14852_v13  ;;  %v14900_v10 = vcombine.high %v1072_v1, %v1076_v2  ;;  %v569_v11 = vld [vmem:[%s18494_s24 + $0x18] sm:$0xff]  ;;  %v14899_v18 = vcombine.low %v1072_v1, %v1076_v2  ;;  %v1098_v2 = vrot.slane %v18862_v19, %v19026_v54 }
 0x2fe   : > { %v573_v13 = vld [vmem:[%s18494_s24 + $0x38] sm:$0xff] }
 0x2ff   : > { %v14397_v33 = vcombine.low %v569_v11, %v573_v13  ;;  %v741_v1 = vld [vmem:[%s18494_s24 + $0x578] sm:$0xff] }
 0x300   : > { %4144 = vmatpush1.bf16.msra.mxu0 %v14723_v21  ;;  %4185 = vmatpush1.bf16.msra.mxu1 %v14851_v23  ;;  %v14398_v21 = vcombine.high %v569_v11, %v573_v13  ;;  %v14526_v23 = vcombine.high %v697_v14, %v701_v16  ;;  %v621_v11 = vld [vmem:[%s18494_s24 + $0x1b8] sm:$0xff]  ;;  %v1134_v13 = vrot.slane %v1094_v63, %v18865_v20 }
 0x301   : > { %4145 = vmatprep.subr.bf16.mxu0 %v14732_v24  ;;  %4186 = vmatprep.subr.bf16.mxu1 %v14860_v29  ;;  %v577_v24 = vld [vmem:[%s18494_s24 + $0x58] sm:$0xff] }
 0x302   : > { %v581_v29 = vld [vmem:[%s18494_s24 + $0x78] sm:$0xff] }
 0x303   : > { %v14405_v27 = vcombine.low %v577_v24, %v581_v29  ;;  %v745_v14 = vld [vmem:[%s18494_s24 + $0x598] sm:$0xff] }
 0x304   : > { %4146 = vmatpush1.bf16.msra.mxu0 %v14731_v36  ;;  %4187 = vmatpush1.bf16.msra.mxu1 %v14859_v38  ;;  %v14406_v36 = vcombine.high %v577_v24, %v581_v29  ;;  %v14534_v38 = vcombine.high %v705_v30, %v709_v32  ;;  %v749_v16 = vld [vmem:[%s18494_s24 + $0x5b8] sm:$0xff] }
 0x305   : > { %4147 = vmatprep.subr.bf16.mxu0 %v14740_v39  ;;  %4188 = vmatprep.subr.bf16.mxu1 %v14868_v41  ;;  %v585_v39 = vld [vmem:[%s18494_s24 + $0x98] sm:$0xff]  ;;  %v14574_v24 = vcombine.high %v745_v14, %v749_v16 }
 0x306   : > { %v589_v41 = vld [vmem:[%s18494_s24 + $0xb8] sm:$0xff] }
 0x307   : > { %v14413_v46 = vcombine.low %v585_v39, %v589_v41  ;;  %v625_v29 = vld [vmem:[%s18494_s24 + $0x1d8] sm:$0xff] }
 0x308   : > { %4148 = vmatpush1.bf16.msra.mxu0 %v14739_v31  ;;  %4189 = vmatpush1.bf16.msra.mxu1 %v14867_v34  ;;  %v14414_v31 = vcombine.high %v585_v39, %v589_v41  ;;  %v14542_v34 = vcombine.high %v713_v25, %v717_v26  ;;  %v629_v30 = vld [vmem:[%s18494_s24 + $0x1f8] sm:$0xff] }
 0x309   : > { %4149 = vmatprep.subr.bf16.mxu0 %v14748_v37  ;;  %4190 = vmatprep.subr.bf16.mxu1 %v14876_v40  ;;  %v593_v37 = vld [vmem:[%s18494_s24 + $0xd8] sm:$0xff] }
 0x30a   : > { %v597_v40 = vld [vmem:[%s18494_s24 + $0xf8] sm:$0xff] }
 0x30c   : > { %4150 = vmatpush1.bf16.msra.mxu0 %v14747_v49  ;;  %4191 = vmatpush1.bf16.msra.mxu1 %v14875_v50  ;;  %v14422_v49 = vcombine.high %v593_v37, %v597_v40  ;;  %v14550_v50 = vcombine.high %v721_v44, %v725_v45 }
 0x30d   : > { %4151 = vmatprep.subr.bf16.mxu0 %v14756_v62  ;;  %4192 = vmatprep.subr.bf16.mxu1 %v14884_v51  ;;  %v601_v62 = vld [vmem:[%s18494_s24 + $0x118] sm:$0xff] }
 0x30e   : > { %v605_v51 = vld [vmem:[%s18494_s24 + $0x138] sm:$0xff] }
 0x30f   : > { %v14429_v6 = vcombine.low %v601_v62, %v605_v51 }
 0x310   : > { %4152 = vmatpush1.bf16.msra.mxu0 %v14755_v57  ;;  %4193 = vmatpush1.bf16.msra.mxu1 %v14883_v58  ;;  %v14430_v57 = vcombine.high %v601_v62, %v605_v51  ;;  %v14453_v62 = vcombine.low %v625_v29, %v629_v30 }
 0x311   : > { %4153 = vmatprep.subr.bf16.mxu0 %v14764_v59  ;;  %4194 = vmatprep.subr.bf16.mxu1 %v14892_v61  ;;  %v609_v59 = vld [vmem:[%s18494_s24 + $0x158] sm:$0xff] }
 0x312   : > { %v613_v61 = vld [vmem:[%s18494_s24 + $0x178] sm:$0xff] }
 0x313   : > { %v14437_v19 = vcombine.low %v609_v59, %v613_v61 }
 0x314   : > { %4154 = vmatpush1.bf16.msra.mxu0 %v14763_v5  ;;  %4195 = vmatpush1.bf16.msra.mxu1 %v14891_v8  ;;  %v14438_v8 = vcombine.high %v609_v59, %v613_v61 }
 0x315   : > { %4155 = vmatprep.subr.bf16.mxu0 %v14772_v9  ;;  %4196 = vmatprep.subr.bf16.mxu1 %v14900_v10  ;;  %v14566_v9 = vcombine.high %v737_v0, %v741_v1  ;;  %v617_v10 = vld [vmem:[%s18494_s24 + $0x198] sm:$0xff] }
 0x316   : > { %v14445_v26 = vcombine.low %v617_v10, %v621_v11 }
 0x318   : > { %4156 = vmatpush1.bf16.msra.mxu0 %v14771_v17  ;;  %4197 = vmatpush1.bf16.msra.mxu1 %v14899_v18  ;;  %v1138_v17 = vrot.slane %v1098_v2, %v18865_v20  ;;  %v14565_v18 = vcombine.low %v737_v0, %v741_v1  ;;  %v649_v1 = vld [vmem:[%s18494_s24 + $0x298] sm:$0xff] }
 0x319   : > { %4207 = vmatprep.subr.bf16.mxu0 %v14398_v21  ;;  %4248 = vmatprep.subr.bf16.mxu1 %v14526_v23  ;;  %v14446_v21 = vcombine.high %v617_v10, %v621_v11  ;;  %v777_v2 = vld [vmem:[%s18494_s24 + $0x698] sm:$0xff] }
 0x31b   : > { %4158 = vmatmul.mubr.bf16.vlgmr.msra.gmra.mrb[20].mxu0 %v18701_v12  ;;  %4199 = vmatmul.mubr.bf16.vlgmr.msra.gmra.mrb[20].mxu1 %v18705_v15 }
 0x31c   : > { %4208 = vmatpush1.bf16.msra.mxu0 %v14397_v33  ;;  %4249 = vmatpush1.bf16.msra.mxu1 %v14525_v35 }
 0x31d   : > { %4209 = vmatprep.subr.bf16.mxu0 %v14406_v36  ;;  %4250 = vmatprep.subr.bf16.mxu1 %v14534_v38  ;;  %v753_v36 = vld [vmem:[%s18494_s24 + $0x5d8] sm:$0xff] }
 0x31e   : > { %4239 = vmatprep.mubr.bf16.mxu0 %v18579_v42  ;;  %4280 = vmatprep.mubr.bf16.mxu1 %v18581_v43  ;;  %v733_v42 = vld [vmem:[%s18494_s24 + $0x538] sm:$0xff]  ;;  %v14421_v43 = vcombine.low %v593_v37, %v597_v40  ;;  %v14454_v37 = vcombine.high %v625_v29, %v629_v30 }
 0x31f   : > { %v14558_v58 = vcombine.high %v729_v3, %v733_v42  ;;  %v14557_v5 = vcombine.low %v729_v3, %v733_v42  ;;  %v757_v38 = vld [vmem:[%s18494_s24 + $0x5f8] sm:$0xff] }
 0x320   : > { %4210 = vmatpush1.bf16.msra.mxu0 %v14405_v27  ;;  %4251 = vmatpush1.bf16.msra.mxu1 %v14533_v28  ;;  %v14582_v45 = vcombine.high %v753_v36, %v757_v38  ;;  %v14581_v51 = vcombine.low %v753_v36, %v757_v38  ;;  %v669_v29 = vld [vmem:[%s18494_s24 + $0x338] sm:$0xff] }
 0x321   : > { %4211 = vmatprep.subr.bf16.mxu0 %v14414_v31  ;;  %4252 = vmatprep.subr.bf16.mxu1 %v14542_v34  ;;  %v14573_v34 = vcombine.low %v745_v14, %v749_v16  ;;  %v661_v14 = vld [vmem:[%s18494_s24 + $0x2f8] sm:$0xff] }
 0x322   : > { %v785_v16 = vld [vmem:[%s18494_s24 + $0x6d8] sm:$0xff] }
 0x323   : > { %v793_v30 = vld [vmem:[%s18494_s24 + $0x718] sm:$0xff] }
 0x324   : > { %4212 = vmatpush1.bf16.msra.mxu0 %v14413_v46  ;;  %4253 = vmatpush1.bf16.msra.mxu1 %v14541_v47  ;;  %v633_v46 = vld [vmem:[%s18494_s24 + $0x218] sm:$0xff] }
 0x325   : > { %4213 = vmatprep.subr.bf16.mxu0 %v14422_v49  ;;  %4254 = vmatprep.subr.bf16.mxu1 %v14550_v50  ;;  %v637_v47 = vld [vmem:[%s18494_s24 + $0x238] sm:$0xff] }
 0x326   : > { %v761_v49 = vld [vmem:[%s18494_s24 + $0x618] sm:$0xff]  ;;  %v14462_v3 = vcombine.high %v633_v46, %v637_v47  ;;  %v14461_v59 = vcombine.low %v633_v46, %v637_v47 }
 0x327   : > { %v765_v50 = vld [vmem:[%s18494_s24 + $0x638] sm:$0xff] }
 0x328   : > { %4214 = vmatpush1.bf16.msra.mxu0 %v14421_v43  ;;  %4255 = vmatpush1.bf16.msra.mxu1 %v14549_v55  ;;  %v14590_v42 = vcombine.high %v761_v49, %v765_v50  ;;  %v641_v43 = vld [vmem:[%s18494_s24 + $0x258] sm:$0xff]  ;;  %v14589_v61 = vcombine.low %v761_v49, %v765_v50 }
 0x329   : > { %4215 = vmatprep.subr.bf16.mxu0 %v14430_v57  ;;  %4256 = vmatprep.subr.bf16.mxu1 %v14558_v58  ;;  %v645_v55 = vld [vmem:[%s18494_s24 + $0x278] sm:$0xff] }
 0x32a   : > { %v769_v57 = vld [vmem:[%s18494_s24 + $0x658] sm:$0xff]  ;;  %v14470_v63 = vcombine.high %v641_v43, %v645_v55 }
 0x32b   : > { %v773_v58 = vld [vmem:[%s18494_s24 + $0x678] sm:$0xff] }
 0x32c   : > { %4216 = vmatpush1.bf16.msra.mxu0 %v14429_v6  ;;  %4257 = vmatpush1.bf16.msra.mxu1 %v14557_v5  ;;  %v14598_v0 = vcombine.high %v769_v57, %v773_v58  ;;  %v653_v6 = vld [vmem:[%s18494_s24 + $0x2b8] sm:$0xff] }
 0x32d   : > { %4217 = vmatprep.subr.bf16.mxu0 %v14438_v8  ;;  %4258 = vmatprep.subr.bf16.mxu1 %v14566_v9  ;;  %v781_v5 = vld [vmem:[%s18494_s24 + $0x6b8] sm:$0xff]  ;;  %v14469_v8 = vcombine.low %v641_v43, %v645_v55  ;;  %v14597_v9 = vcombine.low %v769_v57, %v773_v58  ;;  %v14478_v10 = vcombine.high %v649_v1, %v653_v6 }
 0x32e   : > { %v3913_v23 = vpop.f32.mrb[8].mxu0  ;;  %v3954_v33 = vpop.f32.mrb[8].mxu1  ;;  %v14606_v11 = vcombine.high %v777_v2, %v781_v5  ;;  %v809_v46 = vld [vmem:[%s18494_s24 + $0x798] sm:$0xff] }
 0x32f   : > { %v3914_v32 = vadd.f32 %v3913_v23, %v1134_v13  ;;  %v3915_v35 = vpop.f32.mrb[9].mxu0  ;;  %v3956_v41 = vpop.f32.mrb[9].mxu1  ;;  %v657_v13 = vld [vmem:[%s18494_s24 + $0x2d8] sm:$0xff] }
 0x330   : > { %v3916_v39 = vadd.f32 %v3915_v35, %v1138_v17  ;;  %v3917_v25 = vpop.f32.mrb[10].mxu0  ;;  %4218 = vmatpush1.bf16.msra.mxu0 %v14437_v19  ;;  %v3958_v28 = vpop.f32.mrb[10].mxu1  ;;  %4259 = vmatpush1.bf16.msra.mxu1 %v14565_v18  ;;  %v789_v17 = vld [vmem:[%s18494_s24 + $0x6f8] sm:$0xff]  ;;  %v14477_v19 = vcombine.low %v649_v1, %v653_v6  ;;  %v14605_v18 = vcombine.low %v777_v2, %v781_v5 }
 0x331   : > { %v19046_v27 = vadd.f32 %v3954_v33, %v3914_v32  ;;  %v3918_v31 = vpop.f32.mrb[11].mxu0  ;;  %4219 = vmatprep.subr.bf16.mxu0 %v14446_v21  ;;  %v3959_v44 = vpop.f32.mrb[11].mxu1  ;;  %4260 = vmatprep.subr.bf16.mxu1 %v14574_v24  ;;  %v14486_v21 = vcombine.high %v657_v13, %v661_v14  ;;  %v14614_v23 = vcombine.high %v785_v16, %v789_v17  ;;  %v665_v24 = vld [vmem:[%s18494_s24 + $0x318] sm:$0xff] }
 0x332   : > { %v19048_v40 = vadd.f32 %v3956_v41, %v3916_v39  ;;  %v797_v32 = vld [vmem:[%s18494_s24 + $0x738] sm:$0xff]  ;;  %v14485_v33 = vcombine.low %v657_v13, %v661_v14  ;;  %v14613_v35 = vcombine.low %v785_v16, %v789_v17  ;;  %v14494_v36 = vcombine.high %v665_v24, %v669_v29 }
 0x333   : > { %v14622_v38 = vcombine.high %v793_v30, %v797_v32  ;;  %v673_v39 = vld [vmem:[%s18494_s24 + $0x358] sm:$0xff]  ;;  %v14493_v28 = vcombine.low %v665_v24, %v669_v29  ;;  %v14621_v31 = vcombine.low %v793_v30, %v797_v32 }
 0x334   : > { %4220 = vmatpush1.bf16.msra.mxu0 %v14445_v26  ;;  %4261 = vmatpush1.bf16.msra.mxu1 %v14573_v34  ;;  %v677_v41 = vld [vmem:[%s18494_s24 + $0x378] sm:$0xff] }
 0x335   : > { %4221 = vmatprep.subr.bf16.mxu0 %v14454_v37  ;;  %4262 = vmatprep.subr.bf16.mxu1 %v14582_v45  ;;  %v801_v25 = vld [vmem:[%s18494_s24 + $0x758] sm:$0xff]  ;;  %v14502_v34 = vcombine.high %v673_v39, %v677_v41  ;;  %v14501_v49 = vcombine.low %v673_v39, %v677_v41 }
 0x336   : > { %v805_v26 = vld [vmem:[%s18494_s24 + $0x778] sm:$0xff] }
 0x337   : > { %v14630_v37 = vcombine.high %v801_v25, %v805_v26  ;;  %v681_v44 = vld [vmem:[%s18494_s24 + $0x398] sm:$0xff]  ;;  %v14629_v50 = vcombine.low %v801_v25, %v805_v26 }
 0x338   : > { %4222 = vmatpush1.bf16.msra.mxu0 %v14453_v62  ;;  %4263 = vmatpush1.bf16.msra.mxu1 %v14581_v51  ;;  %v685_v45 = vld [vmem:[%s18494_s24 + $0x3b8] sm:$0xff] }
 0x339   : > { %4223 = vmatprep.subr.bf16.mxu0 %v14462_v3  ;;  %4264 = vmatprep.subr.bf16.mxu1 %v14590_v42  ;;  %v813_v47 = vld [vmem:[%s18494_s24 + $0x7b8] sm:$0xff]  ;;  %v14510_v62 = vcombine.high %v681_v44, %v685_v45  ;;  %v14509_v57 = vcombine.low %v681_v44, %v685_v45 }
 0x33a   : > { %v14638_v51 = vcombine.high %v809_v46, %v813_v47  ;;  %v689_v3 = vld [vmem:[%s18494_s24 + $0x3d8] sm:$0xff]  ;;  %v14637_v58 = vcombine.low %v809_v46, %v813_v47 }
 0x33b   : > { %v693_v42 = vld [vmem:[%s18494_s24 + $0x3f8] sm:$0xff] }
 0x33c   : > { %4224 = vmatpush1.bf16.msra.mxu0 %v14461_v59  ;;  %4265 = vmatpush1.bf16.msra.mxu1 %v14589_v61  ;;  %v817_v43 = vld [vmem:[%s18494_s24 + $0x7d8] sm:$0xff]  ;;  %v14518_v59 = vcombine.high %v689_v3, %v693_v42  ;;  %v14517_v2 = vcombine.low %v689_v3, %v693_v42 }
 0x33d   : > { %4225 = vmatprep.subr.bf16.mxu0 %v14470_v63  ;;  %4266 = vmatprep.subr.bf16.mxu1 %v14598_v0  ;;  %v821_v55 = vld [vmem:[%s18494_s24 + $0x7f8] sm:$0xff] }
 0x33e   : > { %v14646_v61 = vcombine.high %v817_v43, %v821_v55  ;;  %v825_v63 = vld [vmem:[%s18494_s24 + $0x818] sm:$0xff]  ;;  %v14645_v5 = vcombine.low %v817_v43, %v821_v55 }
 0x33f   : > { %v829_v0 = vld [vmem:[%s18494_s24 + $0x838] sm:$0xff] }
 0x340   : > { %4226 = vmatpush1.bf16.msra.mxu0 %v14469_v8  ;;  %4267 = vmatpush1.bf16.msra.mxu1 %v14597_v9  ;;  %v953_v1 = vld [vmem:[%s18494_s24 + $0xc18] sm:$0xff]  ;;  %v14654_v8 = vcombine.high %v825_v63, %v829_v0  ;;  %v14653_v16 = vcombine.low %v825_v63, %v829_v0 }
 0x341   : > { %4227 = vmatprep.subr.bf16.mxu0 %v14478_v10  ;;  %4268 = vmatprep.subr.bf16.mxu1 %v14606_v11  ;;  %v957_v6 = vld [vmem:[%s18494_s24 + $0xc38] sm:$0xff] }
 0x342   : > { %v14782_v9 = vcombine.high %v953_v1, %v957_v6  ;;  %v833_v10 = vld [vmem:[%s18494_s24 + $0x858] sm:$0xff]  ;;  %v14781_v17 = vcombine.low %v953_v1, %v957_v6 }
 0x343   : > { %v837_v11 = vld [vmem:[%s18494_s24 + $0x878] sm:$0xff] }
 0x344   : > { %4228 = vmatpush1.bf16.msra.mxu0 %v14477_v19  ;;  %4269 = vmatpush1.bf16.msra.mxu1 %v14605_v18  ;;  %v961_v13 = vld [vmem:[%s18494_s24 + $0xc58] sm:$0xff]  ;;  %v14662_v19 = vcombine.high %v833_v10, %v837_v11  ;;  %v14661_v30 = vcombine.low %v833_v10, %v837_v11 }
 0x345   : > { %4229 = vmatprep.subr.bf16.mxu0 %v14486_v21  ;;  %4270 = vmatprep.subr.bf16.mxu1 %v14614_v23  ;;  %v965_v14 = vld [vmem:[%s18494_s24 + $0xc78] sm:$0xff] }
 0x346   : > { %v14790_v18 = vcombine.high %v961_v13, %v965_v14  ;;  %v841_v21 = vld [vmem:[%s18494_s24 + $0x898] sm:$0xff]  ;;  %v14789_v32 = vcombine.low %v961_v13, %v965_v14 }
 0x347   : > { %v845_v23 = vld [vmem:[%s18494_s24 + $0x8b8] sm:$0xff] }
 0x348   : > { %4230 = vmatpush1.bf16.msra.mxu0 %v14485_v33  ;;  %4271 = vmatpush1.bf16.msra.mxu1 %v14613_v35  ;;  %v969_v24 = vld [vmem:[%s18494_s24 + $0xc98] sm:$0xff]  ;;  %v14670_v33 = vcombine.high %v841_v21, %v845_v23 }
 0x349   : > { %4231 = vmatprep.subr.bf16.mxu0 %v14494_v36  ;;  %4272 = vmatprep.subr.bf16.mxu1 %v14622_v38  ;;  %v973_v29 = vld [vmem:[%s18494_s24 + $0xcb8] sm:$0xff] }
 0x34a   : > { %v14798_v35 = vcombine.high %v969_v24, %v973_v29  ;;  %v849_v36 = vld [vmem:[%s18494_s24 + $0x8d8] sm:$0xff]  ;;  %v14797_v41 = vcombine.low %v969_v24, %v973_v29 }
 0x34b   : > { %v853_v38 = vld [vmem:[%s18494_s24 + $0x8f8] sm:$0xff] }
 0x34c   : > { %4232 = vmatpush1.bf16.msra.mxu0 %v14493_v28  ;;  %4273 = vmatpush1.bf16.msra.mxu1 %v14621_v31  ;;  %v981_v39 = vld [vmem:[%s18494_s24 + $0xcf8] sm:$0xff]  ;;  %v14678_v25 = vcombine.high %v849_v36, %v853_v38 }
 0x34d   : > { %4233 = vmatprep.subr.bf16.mxu0 %v14502_v34  ;;  %4274 = vmatprep.subr.bf16.mxu1 %v14630_v37  ;;  %v857_v28 = vld [vmem:[%s18494_s24 + $0x918] sm:$0xff]  ;;  %v14677_v37 = vcombine.low %v849_v36, %v853_v38 }
 0x34e   : > { %v861_v31 = vld [vmem:[%s18494_s24 + $0x938] sm:$0xff] }
 0x34f   : > { %v985_v34 = vld [vmem:[%s18494_s24 + $0xd18] sm:$0xff]  ;;  %v14686_v44 = vcombine.high %v857_v28, %v861_v31 }
 0x350   : > { %4234 = vmatpush1.bf16.msra.mxu0 %v14501_v49  ;;  %4275 = vmatpush1.bf16.msra.mxu1 %v14629_v50  ;;  %v865_v46 = vld [vmem:[%s18494_s24 + $0x958] sm:$0xff] }
 0x351   : > { %4235 = vmatprep.subr.bf16.mxu0 %v14510_v62  ;;  %4276 = vmatprep.subr.bf16.mxu1 %v14638_v51  ;;  %v869_v47 = vld [vmem:[%s18494_s24 + $0x978] sm:$0xff]  ;;  %v14685_v62 = vcombine.low %v857_v28, %v861_v31 }
 0x352   : > { %v993_v49 = vld [vmem:[%s18494_s24 + $0xd58] sm:$0xff]  ;;  %v14694_v3 = vcombine.high %v865_v46, %v869_v47 }
 0x353   : > { %v997_v50 = vld [vmem:[%s18494_s24 + $0xd78] sm:$0xff] }
 0x354   : > { %4236 = vmatpush1.bf16.msra.mxu0 %v14509_v57  ;;  %4277 = vmatpush1.bf16.msra.mxu1 %v14637_v58  ;;  %v14822_v42 = vcombine.high %v993_v49, %v997_v50  ;;  %v873_v43 = vld [vmem:[%s18494_s24 + $0x998] sm:$0xff] }
 0x355   : > { %4237 = vmatprep.subr.bf16.mxu0 %v14518_v59  ;;  %4278 = vmatprep.subr.bf16.mxu1 %v14646_v61  ;;  %v877_v55 = vld [vmem:[%s18494_s24 + $0x9b8] sm:$0xff]  ;;  %v14693_v59 = vcombine.low %v865_v46, %v869_v47  ;;  %v14821_v61 = vcombine.low %v993_v49, %v997_v50 }
 0x356   : > { %v1001_v57 = vld [vmem:[%s18494_s24 + $0xd98] sm:$0xff]  ;;  %v14702_v63 = vcombine.high %v873_v43, %v877_v55 }
 0x357   : > { %v1005_v58 = vld [vmem:[%s18494_s24 + $0xdb8] sm:$0xff] }
 0x358   : > { %4238 = vmatpush1.bf16.msra.mxu0 %v14517_v2  ;;  %4279 = vmatpush1.bf16.msra.mxu1 %v14645_v5  ;;  %v14830_v1 = vcombine.high %v1001_v57, %v1005_v58  ;;  %v881_v6 = vld [vmem:[%s18494_s24 + $0x9d8] sm:$0xff] }
 0x359   : > { %4289 = vmatprep.subr.bf16.mxu0 %v14654_v8  ;;  %4330 = vmatprep.subr.bf16.mxu1 %v14782_v9  ;;  %v885_v2 = vld [vmem:[%s18494_s24 + $0x9f8] sm:$0xff] }
 0x35a   : > { %v1009_v10 = vld [vmem:[%s18494_s24 + $0xdd8] sm:$0xff]  ;;  %v14709_v36 = vcombine.low %v881_v6, %v885_v2 }
 0x35b   : > { %4240 = vmatmul.mubr.bf16.vlgmr.msra.gmra.mrb[24].mxu0 %v18625_v56  ;;  %4281 = vmatmul.mubr.bf16.vlgmr.msra.gmra.mrb[24].mxu1 %v18629_v60  ;;  %v977_v56 = vld [vmem:[%s18494_s24 + $0xcd8] sm:$0xff]  ;;  %v14669_v60 = vcombine.low %v841_v21, %v845_v23  ;;  %v14710_v23 = vcombine.high %v881_v6, %v885_v2 }
 0x35c   : > { %4290 = vmatpush1.bf16.msra.mxu0 %v14653_v16  ;;  %4331 = vmatpush1.bf16.msra.mxu1 %v14781_v17  ;;  %v14806_v26 = vcombine.high %v977_v56, %v981_v39  ;;  %v1013_v11 = vld [vmem:[%s18494_s24 + $0xdf8] sm:$0xff]  ;;  %v14701_v17 = vcombine.low %v873_v43, %v877_v55 }
 0x35d   : > { %4291 = vmatprep.subr.bf16.mxu0 %v14662_v19  ;;  %4332 = vmatprep.subr.bf16.mxu1 %v14790_v18  ;;  %v14838_v29 = vcombine.high %v1009_v10, %v1013_v11  ;;  %v14837_v38 = vcombine.low %v1009_v10, %v1013_v11  ;;  %v1057_v10 = vld [vmem:[%s18494_s24 + $0xf58] sm:$0xff] }
 0x35e   : > { %4321 = vmatprep.mubr.bf16.mxu0 %v18633_v4  ;;  %4362 = vmatprep.mubr.bf16.mxu1 %v18638_v7  ;;  %v989_v4 = vld [vmem:[%s18494_s24 + $0xd38] sm:$0xff]  ;;  %v14805_v7 = vcombine.low %v977_v56, %v981_v39 }
 0x35f   : > { %v14814_v45 = vcombine.high %v985_v34, %v989_v4  ;;  %v14813_v51 = vcombine.low %v985_v34, %v989_v4  ;;  %v1061_v11 = vld [vmem:[%s18494_s24 + $0xf78] sm:$0xff] }
 0x360   : > { %4292 = vmatpush1.bf16.msra.mxu0 %v14661_v30  ;;  %4333 = vmatpush1.bf16.msra.mxu1 %v14789_v32  ;;  %v889_v30 = vld [vmem:[%s18494_s24 + $0xa18] sm:$0xff] }
 0x361   : > { %4293 = vmatprep.subr.bf16.mxu0 %v14670_v33  ;;  %4334 = vmatprep.subr.bf16.mxu1 %v14798_v35  ;;  %v893_v32 = vld [vmem:[%s18494_s24 + $0xa38] sm:$0xff] }
 0x362   : > { %v1017_v33 = vld [vmem:[%s18494_s24 + $0xe18] sm:$0xff]  ;;  %v14718_v56 = vcombine.high %v889_v30, %v893_v32  ;;  %v14717_v28 = vcombine.low %v889_v30, %v893_v32 }
 0x363   : > { %v1021_v35 = vld [vmem:[%s18494_s24 + $0xe38] sm:$0xff] }
 0x364   : > { %4294 = vmatpush1.bf16.msra.mxu0 %v14669_v60  ;;  %4335 = vmatpush1.bf16.msra.mxu1 %v14797_v41  ;;  %v14846_v39 = vcombine.high %v1017_v33, %v1021_v35  ;;  %v897_v60 = vld [vmem:[%s18494_s24 + $0xa58] sm:$0xff]  ;;  %v14845_v31 = vcombine.low %v1017_v33, %v1021_v35 }
 0x365   : > { %4295 = vmatprep.subr.bf16.mxu0 %v14678_v25  ;;  %4336 = vmatprep.subr.bf16.mxu1 %v14806_v26  ;;  %v901_v41 = vld [vmem:[%s18494_s24 + $0xa78] sm:$0xff] }
 0x366   : > { %v1025_v25 = vld [vmem:[%s18494_s24 + $0xe58] sm:$0xff]  ;;  %v14726_v34 = vcombine.high %v897_v60, %v901_v41  ;;  %v14725_v46 = vcombine.low %v897_v60, %v901_v41 }
 0x367   : > { %v1029_v26 = vld [vmem:[%s18494_s24 + $0xe78] sm:$0xff] }
 0x368   : > { %4296 = vmatpush1.bf16.msra.mxu0 %v14677_v37  ;;  %4337 = vmatpush1.bf16.msra.mxu1 %v14805_v7  ;;  %v14854_v4 = vcombine.high %v1025_v25, %v1029_v26  ;;  %v905_v37 = vld [vmem:[%s18494_s24 + $0xa98] sm:$0xff]  ;;  %v14853_v47 = vcombine.low %v1025_v25, %v1029_v26  ;;  %v4387_v25 = vld [vmem:[%s18509_s12 + $0x80] sm:$0xff]  ;;  %v4388_v26 = vld [vmem:[%s18509_s12 + $0x88] sm:$0xff] }
 0x369   : > { %4297 = vmatprep.subr.bf16.mxu0 %v14686_v44  ;;  %4338 = vmatprep.subr.bf16.mxu1 %v14814_v45  ;;  %v909_v7 = vld [vmem:[%s18494_s24 + $0xab8] sm:$0xff] }
 0x36a   : > { %v1033_v44 = vld [vmem:[%s18494_s24 + $0xe98] sm:$0xff]  ;;  %v14734_v49 = vcombine.high %v905_v37, %v909_v7  ;;  %v14733_v43 = vcombine.low %v905_v37, %v909_v7  ;;  %v17715_v37 = vpack.c.bf16 %v4388_v26, %v4387_v25  ;;  %v4371_v7 = vld [vmem:[%s18509_s12] sm:$0xff] }
 0x36b   : > { %v1037_v45 = vld [vmem:[%s18494_s24 + $0xeb8] sm:$0xff] }
 0x36c   : > { %4298 = vmatpush1.bf16.msra.mxu0 %v14685_v62  ;;  %4339 = vmatpush1.bf16.msra.mxu1 %v14813_v51  ;;  %v14862_v50 = vcombine.high %v1033_v44, %v1037_v45  ;;  %v913_v62 = vld [vmem:[%s18494_s24 + $0xad8] sm:$0xff]  ;;  %v14861_v55 = vcombine.low %v1033_v44, %v1037_v45  ;;  %v4372_v44 = vld [vmem:[%s18509_s12 + $0x8] sm:$0xff]  ;;  %v4403_v45 = vld [vmem:[%s18509_s12 + $0x100] sm:$0xff] }
 0x36d   : > { %4299 = vmatprep.subr.bf16.mxu0 %v14694_v3  ;;  %4340 = vmatprep.subr.bf16.mxu1 %v14822_v42  ;;  %v917_v51 = vld [vmem:[%s18494_s24 + $0xaf8] sm:$0xff] }
 0x36e   : > { %v3995_v0 = vpop.f32.mrb[12].mxu0  ;;  %v4036_v8 = vpop.f32.mrb[12].mxu1  ;;  %v1041_v3 = vld [vmem:[%s18494_s24 + $0xed8] sm:$0xff] }
 0x36f   : > { %v3996_v5 = vadd.f32 %v3995_v0, %v19046_v27  ;;  %v3997_v9 = vpop.f32.mrb[13].mxu0  ;;  %v4038_v14 = vpop.f32.mrb[13].mxu1  ;;  %v14829_v27 = vcombine.low %v1001_v57, %v1005_v58  ;;  %v1045_v42 = vld [vmem:[%s18494_s24 + $0xef8] sm:$0xff]  ;;  %v14742_v57 = vcombine.high %v913_v62, %v917_v51 }
 0x370   : > { %v3998_v13 = vadd.f32 %v3997_v9, %v19048_v40  ;;  %v3999_v16 = vpop.f32.mrb[14].mxu0  ;;  %4300 = vmatpush1.bf16.msra.mxu0 %v14693_v59  ;;  %v4040_v18 = vpop.f32.mrb[14].mxu1  ;;  %4341 = vmatpush1.bf16.msra.mxu1 %v14821_v61  ;;  %v14870_v58 = vcombine.high %v1041_v3, %v1045_v42  ;;  %v921_v59 = vld [vmem:[%s18494_s24 + $0xb18] sm:$0xff]  ;;  %v14869_v6 = vcombine.low %v1041_v3, %v1045_v42 }
 0x371   : > { %v19120_v19 = vadd.f32 %v4036_v8, %v3996_v5  ;;  %v4000_v21 = vpop.f32.mrb[15].mxu0  ;;  %4301 = vmatprep.subr.bf16.mxu0 %v14702_v63  ;;  %v4041_v40 = vpop.f32.mrb[15].mxu1  ;;  %4342 = vmatprep.subr.bf16.mxu1 %v14830_v1  ;;  %v925_v61 = vld [vmem:[%s18494_s24 + $0xb38] sm:$0xff]  ;;  %v14741_v1 = vcombine.low %v913_v62, %v917_v51  ;;  %v4421_v62 = vld [vmem:[%s18509_s12 + $0x190] sm:$0xff]  ;;  %v17717_v3 = vpack.c.bf16 %v4372_v44, %v4371_v7  ;;  %v4412_v7 = vld [vmem:[%s18509_s12 + $0x148] sm:$0xff] }
 0x372   : > { %v19122_v24 = vadd.f32 %v4038_v14, %v3998_v13  ;;  %v1049_v63 = vld [vmem:[%s18494_s24 + $0xf18] sm:$0xff]  ;;  %v14750_v2 = vcombine.high %v921_v59, %v925_v61  ;;  %v14749_v13 = vcombine.low %v921_v59, %v925_v61  ;;  %v4397_v44 = vld [vmem:[%s18509_s12 + $0xd0] sm:$0xff] }
 0x373   : > { %v1053_v0 = vld [vmem:[%s18494_s24 + $0xf38] sm:$0xff] }
 0x374   : > { %4302 = vmatpush1.bf16.msra.mxu0 %v14701_v17  ;;  %4343 = vmatpush1.bf16.msra.mxu1 %v14829_v27  ;;  %v14878_v5 = vcombine.high %v1049_v63, %v1053_v0  ;;  %v929_v8 = vld [vmem:[%s18494_s24 + $0xb58] sm:$0xff]  ;;  %v14877_v14 = vcombine.low %v1049_v63, %v1053_v0  ;;  %v14886_v17 = vcombine.high %v1057_v10, %v1061_v11  ;;  %v4391_v63 = vld [vmem:[%s18509_s12 + $0xa0] sm:$0xff]  ;;  %v4392_v0 = vld [vmem:[%s18509_s12 + $0xa8] sm:$0xff] }
 0x375   : > { %4303 = vmatprep.subr.bf16.mxu0 %v14710_v23  ;;  %4344 = vmatprep.subr.bf16.mxu1 %v14838_v29  ;;  %v933_v9 = vld [vmem:[%s18494_s24 + $0xb78] sm:$0xff]  ;;  %v14885_v29 = vcombine.low %v1057_v10, %v1061_v11  ;;  %v4376_v10 = vld [vmem:[%s18509_s12 + $0x28] sm:$0xff]  ;;  %v4407_v11 = vld [vmem:[%s18509_s12 + $0x120] sm:$0xff] }
 0x376   : > { %v14758_v16 = vcombine.high %v929_v8, %v933_v9  ;;  %v937_v18 = vld [vmem:[%s18494_s24 + $0xb98] sm:$0xff]  ;;  %v14757_v40 = vcombine.low %v929_v8, %v933_v9  ;;  %v17723_v8 = vpack.c.bf16 %v4392_v0, %v4391_v63  ;;  %v4375_v9 = vld [vmem:[%s18509_s12 + $0x20] sm:$0xff] }
 0x377   : > { %v941_v21 = vld [vmem:[%s18494_s24 + $0xbb8] sm:$0xff]  ;;  %v4431_v0 = vld [vmem:[%s18509_s12 + $0x1e0] sm:$0xff] }
 0x378   : > { %4304 = vmatpush1.bf16.msra.mxu0 %v14709_v36  ;;  %4345 = vmatpush1.bf16.msra.mxu1 %v14837_v38  ;;  %v1065_v27 = vld [vmem:[%s18494_s24 + $0xf98] sm:$0xff]  ;;  %v14766_v30 = vcombine.high %v937_v18, %v941_v21 }
 0x379   : > { %4305 = vmatprep.subr.bf16.mxu0 %v14718_v56  ;;  %4346 = vmatprep.subr.bf16.mxu1 %v14846_v39  ;;  %v1069_v23 = vld [vmem:[%s18494_s24 + $0xfb8] sm:$0xff]  ;;  %v14765_v56 = vcombine.low %v937_v18, %v941_v21 }
 0x37a   : > { %v14894_v32 = vcombine.high %v1065_v27, %v1069_v23  ;;  %v945_v33 = vld [vmem:[%s18494_s24 + $0xbd8] sm:$0xff]  ;;  %v14893_v39 = vcombine.low %v1065_v27, %v1069_v23  ;;  %v17725_v27 = vpack.c.bf16 %v4376_v10, %v4375_v9  ;;  %v4383_v9 = vld [vmem:[%s18509_s12 + $0x60] sm:$0xff]  ;;  %v4384_v10 = vld [vmem:[%s18509_s12 + $0x68] sm:$0xff] }
 0x37b   : > { %v949_v35 = vld [vmem:[%s18494_s24 + $0xbf8] sm:$0xff] }
 0x37c   : > { %4306 = vmatpush1.bf16.msra.mxu0 %v14717_v28  ;;  %4347 = vmatpush1.bf16.msra.mxu1 %v14845_v31  ;;  %v1073_v36 = vld [vmem:[%s18494_s24 + $0xfd8] sm:$0xff]  ;;  %v14774_v60 = vcombine.high %v945_v33, %v949_v35  ;;  %v4419_v28 = vld [vmem:[%s18509_s12 + $0x180] sm:$0xff]  ;;  %v4420_v31 = vld [vmem:[%s18509_s12 + $0x188] sm:$0xff] }
 0x37d   : > { %4307 = vmatprep.subr.bf16.mxu0 %v14726_v34  ;;  %4348 = vmatprep.subr.bf16.mxu1 %v14854_v4  ;;  %v1077_v38 = vld [vmem:[%s18494_s24 + $0xff8] sm:$0xff]  ;;  %v14773_v34 = vcombine.low %v945_v33, %v949_v35 }
 0x37e   : > { %v14902_v41 = vcombine.high %v1073_v36, %v1077_v38  ;;  %v14901_v4 = vcombine.low %v1073_v36, %v1077_v38  ;;  %v4422_v51 = vld [vmem:[%s18509_s12 + $0x198] sm:$0xff]  ;;  %v4395_v36 = vld [vmem:[%s18509_s12 + $0xc0] sm:$0xff]  ;;  %v4396_v38 = vld [vmem:[%s18509_s12 + $0xc8] sm:$0xff] }
 0x37f   : > { %v17751_v59 = vpack.c.bf16 %v4422_v51, %v4421_v62  ;;  %v4406_v61 = vld [vmem:[%s18509_s12 + $0x118] sm:$0xff] }
 0x380   : > { %4308 = vmatpush1.bf16.msra.mxu0 %v14725_v46  ;;  %4349 = vmatpush1.bf16.msra.mxu1 %v14853_v47  ;;  %v17747_v46 = vpack.c.bf16 %v4420_v31, %v4419_v28  ;;  %v4404_v47 = vld [vmem:[%s18509_s12 + $0x108] sm:$0xff]  ;;  %v4426_v18 = vld [vmem:[%s18509_s12 + $0x1b8] sm:$0xff]  ;;  %v17731_v28 = vpack.c.bf16 %v4396_v38, %v4395_v36  ;;  %v4379_v31 = vld [vmem:[%s18509_s12 + $0x40] sm:$0xff] }
 0x381   : > { %4309 = vmatprep.subr.bf16.mxu0 %v14734_v49  ;;  %4350 = vmatprep.subr.bf16.mxu1 %v14862_v50  ;;  %v4389_v49 = vld [vmem:[%s18509_s12 + $0x90] sm:$0xff]  ;;  %v4390_v50 = vld [vmem:[%s18509_s12 + $0x98] sm:$0xff]  ;;  %v17749_v42 = vpack.c.bf16 %v4404_v47, %v4403_v45 }
 0x382   : > { %v18249_v21 = vld [vmem:[#allocation2 + $0x18] sm:$0xff]  ;;  %v4429_v47 = vld [vmem:[%s18509_s12 + $0x1d0] sm:$0xff] }
 0x383   : > { %v4410_v35 = vld [vmem:[%s18509_s12 + $0x138] sm:$0xff] }
 0x384   : > { %4310 = vmatpush1.bf16.msra.mxu0 %v14733_v43  ;;  %4351 = vmatpush1.bf16.msra.mxu1 %v14861_v55  ;;  %v17719_v43 = vpack.c.bf16 %v4390_v50, %v4389_v49  ;;  %v4373_v55 = vld [vmem:[%s18509_s12 + $0x10] sm:$0xff]  ;;  %v4398_v45 = vld [vmem:[%s18509_s12 + $0xd8] sm:$0xff] }
 0x385   : > { %4311 = vmatprep.subr.bf16.mxu0 %v14742_v57  ;;  %4352 = vmatprep.subr.bf16.mxu1 %v14870_v58  ;;  %v4374_v57 = vld [vmem:[%s18509_s12 + $0x18] sm:$0xff]  ;;  %v4405_v58 = vld [vmem:[%s18509_s12 + $0x110] sm:$0xff] }
 0x386   : > { %v4430_v49 = vld [vmem:[%s18509_s12 + $0x1d8] sm:$0xff] }
 0x388   : > { %4312 = vmatpush1.bf16.msra.mxu0 %v14741_v1  ;;  %4353 = vmatpush1.bf16.msra.mxu1 %v14869_v6  ;;  %v4423_v1 = vld [vmem:[%s18509_s12 + $0x1a0] sm:$0xff]  ;;  %v4424_v6 = vld [vmem:[%s18509_s12 + $0x1a8] sm:$0xff] }
 0x389   : > { %4313 = vmatprep.subr.bf16.mxu0 %v14750_v2  ;;  %4354 = vmatprep.subr.bf16.mxu1 %v14878_v5  ;;  %v17721_v2 = vpack.c.bf16 %v4374_v57, %v4373_v55  ;;  %v17753_v5 = vpack.c.bf16 %v4406_v61, %v4405_v58  ;;  %v4413_v55 = vld [vmem:[%s18509_s12 + $0x150] sm:$0xff]  ;;  %v17767_v57 = vpack.c.bf16 %v4430_v49, %v4429_v47  ;;  %v4414_v58 = vld [vmem:[%s18509_s12 + $0x158] sm:$0xff]  ;;  %v4400_v61 = vld [vmem:[%s18509_s12 + $0xe8] sm:$0xff] }
 0x38a   : > { %v4435_v49 = vld [vmem:[%s18509_s12 + $0x200] sm:$0xff] }
 0x38c   : > { %4314 = vmatpush1.bf16.msra.mxu0 %v14749_v13  ;;  %4355 = vmatpush1.bf16.msra.mxu1 %v14877_v14  ;;  %v17755_v13 = vpack.c.bf16 %v4424_v6, %v4423_v1  ;;  %v4393_v14 = vld [vmem:[%s18509_s12 + $0xb0] sm:$0xff]  ;;  %v4432_v1 = vld [vmem:[%s18509_s12 + $0x1e8] sm:$0xff] }
 0x38d   : > { %4315 = vmatprep.subr.bf16.mxu0 %v14758_v16  ;;  %4356 = vmatprep.subr.bf16.mxu1 %v14886_v17  ;;  %v4394_v16 = vld [vmem:[%s18509_s12 + $0xb8] sm:$0xff]  ;;  %v4425_v17 = vld [vmem:[%s18509_s12 + $0x1b0] sm:$0xff] }
 0x38e   : > { %v17759_v33 = vpack.c.bf16 %v4426_v18, %v4425_v17 }
 0x390   : > { %4316 = vmatpush1.bf16.msra.mxu0 %v14757_v40  ;;  %4357 = vmatpush1.bf16.msra.mxu1 %v14885_v29  ;;  %v17727_v40 = vpack.c.bf16 %v4394_v16, %v4393_v14  ;;  %v4377_v29 = vld [vmem:[%s18509_s12 + $0x30] sm:$0xff]  ;;  %v4416_v14 = vld [vmem:[%s18509_s12 + $0x168] sm:$0xff] }
 0x391   : > { %4317 = vmatprep.subr.bf16.mxu0 %v14766_v30  ;;  %4358 = vmatprep.subr.bf16.mxu1 %v14894_v32  ;;  %v4378_v30 = vld [vmem:[%s18509_s12 + $0x38] sm:$0xff]  ;;  %v4409_v32 = vld [vmem:[%s18509_s12 + $0x130] sm:$0xff] }
 0x392   : > { %v17729_v25 = vpack.c.bf16 %v4378_v30, %v4377_v29  ;;  %v17761_v26 = vpack.c.bf16 %v4410_v35, %v4409_v32  ;;  %v4401_v16 = vld [vmem:[%s18509_s12 + $0xf0] sm:$0xff]  ;;  %v17741_v32 = vpack.c.bf16 %v4384_v10, %v4383_v9  ;;  %v18251_v9 = vld [vmem:[#allocation2] sm:$0xff] }
 0x393   : > { %v4487_v10 = vld [vmem:[%s18509_s12 + $0x3a0] sm:$0xff] }
 0x394   : > { %4318 = vmatpush1.bf16.msra.mxu0 %v14765_v56  ;;  %4359 = vmatpush1.bf16.msra.mxu1 %v14893_v39  ;;  %v4427_v56 = vld [vmem:[%s18509_s12 + $0x1c0] sm:$0xff]  ;;  %v4428_v39 = vld [vmem:[%s18509_s12 + $0x1c8] sm:$0xff] }
 0x395   : > { %4319 = vmatprep.subr.bf16.mxu0 %v14774_v60  ;;  %4360 = vmatprep.subr.bf16.mxu1 %v14902_v41  ;;  %v18250_v60 = vld [vmem:[%s18504_s20] sm:$0xff] }
 0x396   : > { %v19195_v41 = vunpack.c.h.bf16 %v18250_v60  ;;  %v4386_v60 = vld [vmem:[%s18509_s12 + $0x78] sm:$0xff] }
 0x398   : > { %4320 = vmatpush1.bf16.msra.mxu0 %v14773_v34  ;;  %4361 = vmatpush1.bf16.msra.mxu1 %v14901_v4  ;;  %v4380_v34 = vld [vmem:[%s18509_s12 + $0x48] sm:$0xff]  ;;  %v4411_v4 = vld [vmem:[%s18509_s12 + $0x140] sm:$0xff]  ;;  %v1106_v62 = vrot.slane %v19195_v41, %v18868_v22 }
 0x399   : > { %17716 = vmatprep.subr.bf16.mxu0 %v17715_v37  ;;  %17748 = vmatprep.subr.bf16.mxu1 %v17747_v46  ;;  %v17763_v37 = vpack.c.bf16 %v4428_v39, %v4427_v56  ;;  %v1102_v46 = vrot.slane %v19195_v41, %v18865_v20  ;;  %v17733_v50 = vpack.c.bf16 %v4380_v34, %v4379_v31  ;;  %v4385_v39 = vld [vmem:[%s18509_s12 + $0x70] sm:$0xff]  ;;  %v4418_v34 = vld [vmem:[%s18509_s12 + $0x178] sm:$0xff] }
 0x39a   : > { %v17765_v51 = vpack.c.bf16 %v4412_v7, %v4411_v4  ;;  %v1146_v6 = vrot.slane %v1106_v62, %v18865_v20  ;;  %v4451_v4 = vld [vmem:[%s18509_s12 + $0x280] sm:$0xff] }
 0x39b   : > { %4322 = vmatmul.mubr.bf16.vlgmr.msra.gmra.mrb[28].mxu0 %v18701_v12  ;;  %4363 = vmatmul.mubr.bf16.vlgmr.msra.gmra.mrb[28].mxu1 %v18705_v15  ;;  %v4408_v12 = vld [vmem:[%s18509_s12 + $0x128] sm:$0xff]  ;;  %v1142_v63 = vrot.slane %v1102_v46, %v18865_v20  ;;  %v4483_v7 = vld [vmem:[%s18509_s12 + $0x380] sm:$0xff] }
 0x39c   : > { %17718 = vmatpush3.bf16.msra.mxu0 %v17717_v3  ;;  %17750 = vmatpush3.bf16.msra.mxu1 %v17749_v42  ;;  %v18248_v15 = vld [vmem:[#allocation2 + $0x8] sm:$0xff]  ;;  %v17757_v23 = vpack.c.bf16 %v4408_v12, %v4407_v11  ;;  %v17735_v3 = vpack.c.bf16 %v4398_v45, %v4397_v44  ;;  %v4381_v42 = vld [vmem:[%s18509_s12 + $0x50] sm:$0xff]  ;;  %v4415_v11 = vld [vmem:[%s18509_s12 + $0x160] sm:$0xff]  ;;  %v17771_v12 = vpack.c.bf16 %v4432_v1, %v4431_v0 }
 0x39d   : > { %17720 = vmatprep.subr.bf16.mxu0 %v17719_v43  ;;  %17752 = vmatprep.subr.bf16.mxu1 %v17751_v59  ;;  %v4382_v43 = vld [vmem:[%s18509_s12 + $0x58] sm:$0xff]  ;;  %v4399_v59 = vld [vmem:[%s18509_s12 + $0xe0] sm:$0xff]  ;;  %v17773_v38 = vpack.c.bf16 %v4416_v14, %v4415_v11  ;;  %v4484_v44 = vld [vmem:[%s18509_s12 + $0x388] sm:$0xff]  ;;  %v17745_v45 = vpack.c.bf16 %v4386_v60, %v4385_v39 }
 0x39e   : > { %4563 = vmatprep.mubr.f32.mxu0 %v18248_v15  ;;  %4633 = vmatprep.mubr.f32.mxu1 %v18249_v21  ;;  %v4402_v15 = vld [vmem:[%s18509_s12 + $0xf8] sm:$0xff]  ;;  %v4467_v62 = vld [vmem:[%s18509_s12 + $0x300] sm:$0xff]  ;;  %v4469_v1 = vld [vmem:[%s18509_s12 + $0x310] sm:$0xff] }
 0x39f   : > { %v17743_v56 = vpack.c.bf16 %v4402_v15, %v4401_v16  ;;  %v4438_v0 = vld [vmem:[%s18509_s12 + $0x218] sm:$0xff]  ;;  %v4488_v11 = vld [vmem:[%s18509_s12 + $0x3a8] sm:$0xff]  ;;  %v4439_v15 = vld [vmem:[%s18509_s12 + $0x220] sm:$0xff] }
 0x3a0   : > { %17722 = vmatpush3.bf16.msra.mxu0 %v17721_v2  ;;  %17754 = vmatpush3.bf16.msra.mxu1 %v17753_v5  ;;  %v17737_v2 = vpack.c.bf16 %v4382_v43, %v4381_v42  ;;  %v17769_v5 = vpack.c.bf16 %v4414_v58, %v4413_v55  ;;  %v4453_v42 = vld [vmem:[%s18509_s12 + $0x290] sm:$0xff]  ;;  %v4454_v43 = vld [vmem:[%s18509_s12 + $0x298] sm:$0xff] }
 0x3a1   : > { %17724 = vmatprep.subr.bf16.mxu0 %v17723_v8  ;;  %17756 = vmatprep.subr.bf16.mxu1 %v17755_v13  ;;  %v17739_v8 = vpack.c.bf16 %v4400_v61, %v4399_v59  ;;  %v4485_v55 = vld [vmem:[%s18509_s12 + $0x390] sm:$0xff]  ;;  %v17783_v61 = vpack.c.bf16 %v4454_v43, %v4453_v42  ;;  %v4442_v60 = vld [vmem:[%s18509_s12 + $0x238] sm:$0xff] }
 0x3a2   : > { %v4441_v39 = vld [vmem:[%s18509_s12 + $0x230] sm:$0xff]  ;;  %v4462_v42 = vld [vmem:[%s18509_s12 + $0x2d8] sm:$0xff] }
 0x3a3   : > { %v4493_v43 = vld [vmem:[%s18509_s12 + $0x3d0] sm:$0xff] }
 0x3a4   : > { %17726 = vmatpush3.bf16.msra.mxu0 %v17725_v27  ;;  %17758 = vmatpush3.bf16.msra.mxu1 %v17757_v23  ;;  %v4433_v27 = vld [vmem:[%s18509_s12 + $0x1f0] sm:$0xff]  ;;  %v4434_v23 = vld [vmem:[%s18509_s12 + $0x1f8] sm:$0xff] }
 0x3a5   : > { %17728 = vmatprep.subr.bf16.mxu0 %v17727_v40  ;;  %17760 = vmatprep.subr.bf16.mxu1 %v17759_v33  ;;  %v17775_v31 = vpack.c.bf16 %v4434_v23, %v4433_v27  ;;  %v4472_v27 = vld [vmem:[%s18509_s12 + $0x328] sm:$0xff]  ;;  %v4457_v23 = vld [vmem:[%s18509_s12 + $0x2b0] sm:$0xff] }
 0x3a8   : > { %17730 = vmatpush3.bf16.msra.mxu0 %v17729_v25  ;;  %17762 = vmatpush3.bf16.msra.mxu1 %v17761_v26  ;;  %v4417_v25 = vld [vmem:[%s18509_s12 + $0x170] sm:$0xff] }
 0x3a9   : > { %17732 = vmatprep.subr.bf16.mxu0 %v17731_v28  ;;  %17764 = vmatprep.subr.bf16.mxu1 %v17763_v37  ;;  %v4452_v37 = vld [vmem:[%s18509_s12 + $0x288] sm:$0xff]  ;;  %v17777_v46 = vpack.c.bf16 %v4418_v34, %v4417_v25  ;;  %v4473_v25 = vld [vmem:[%s18509_s12 + $0x330] sm:$0xff]  ;;  %v4459_v34 = vld [vmem:[%s18509_s12 + $0x2c0] sm:$0xff] }
 0x3aa   : > { %v17779_v47 = vpack.c.bf16 %v4452_v37, %v4451_v4  ;;  %v4460_v4 = vld [vmem:[%s18509_s12 + $0x2c8] sm:$0xff]  ;;  %v4491_v37 = vld [vmem:[%s18509_s12 + $0x3c0] sm:$0xff] }
 0x3ac   : > { %17734 = vmatpush3.bf16.msra.mxu0 %v17733_v50  ;;  %17766 = vmatpush3.bf16.msra.mxu1 %v17765_v51  ;;  %v4436_v50 = vld [vmem:[%s18509_s12 + $0x208] sm:$0xff]  ;;  %v17811_v51 = vpack.c.bf16 %v4484_v44, %v4483_v7  ;;  %v17793_v44 = vpack.c.bf16 %v4442_v60, %v4441_v39 }
 0x3ad   : > { %17736 = vmatprep.subr.bf16.mxu0 %v17735_v3  ;;  %17768 = vmatprep.subr.bf16.mxu1 %v17767_v57  ;;  %v4468_v3 = vld [vmem:[%s18509_s12 + $0x308] sm:$0xff]  ;;  %v4486_v57 = vld [vmem:[%s18509_s12 + $0x398] sm:$0xff]  ;;  %v17781_v58 = vpack.c.bf16 %v4436_v50, %v4435_v49  ;;  %v4475_v50 = vld [vmem:[%s18509_s12 + $0x340] sm:$0xff] }
 0x3ae   : > { %v4077_v13 = vpop.f32.mrb[16].mxu0  ;;  %v4118_v18 = vpop.f32.mrb[16].mxu1  ;;  %v17813_v59 = vpack.c.bf16 %v4468_v3, %v4467_v62  ;;  %v4492_v7 = vld [vmem:[%s18509_s12 + $0x3c8] sm:$0xff]  ;;  %v4461_v3 = vld [vmem:[%s18509_s12 + $0x2d0] sm:$0xff] }
 0x3af   : > { %v4078_v17 = vadd.f32 %v4077_v13, %v1142_v63  ;;  %v4079_v21 = vpop.f32.mrb[17].mxu0  ;;  %v4120_v29 = vpop.f32.mrb[17].mxu1  ;;  %v4437_v63 = vld [vmem:[%s18509_s12 + $0x210] sm:$0xff]  ;;  %v4444_v49 = vld [vmem:[%s18509_s12 + $0x248] sm:$0xff]  ;;  %v17827_v62 = vpack.c.bf16 %v4492_v7, %v4491_v37 }
 0x3b0   : > { %v4080_v40 = vadd.f32 %v4079_v21, %v1146_v6  ;;  %v4081_v30 = vpop.f32.mrb[18].mxu0  ;;  %17738 = vmatpush3.bf16.msra.mxu0 %v17737_v2  ;;  %v4122_v35 = vpop.f32.mrb[18].mxu1  ;;  %17770 = vmatpush3.bf16.msra.mxu1 %v17769_v5  ;;  %v17815_v6 = vpack.c.bf16 %v4486_v57, %v4485_v55  ;;  %v4470_v2 = vld [vmem:[%s18509_s12 + $0x318] sm:$0xff]  ;;  %v4455_v5 = vld [vmem:[%s18509_s12 + $0x2a0] sm:$0xff]  ;;  %v18252_v13 = vld [vmem:[#allocation2 + $0x10] sm:$0xff]  ;;  %v17819_v21 = vpack.c.bf16 %v4488_v11, %v4487_v10 }
 0x3b1   : > { %v19227_v33 = vadd.f32 %v4118_v18, %v4078_v17  ;;  %v4082_v36 = vpop.f32.mrb[19].mxu0  ;;  %17740 = vmatprep.subr.bf16.mxu0 %v17739_v8  ;;  %v4123_v28 = vpop.f32.mrb[19].mxu1  ;;  %17772 = vmatprep.subr.bf16.mxu1 %v17771_v12  ;;  %v4456_v8 = vld [vmem:[%s18509_s12 + $0x2a8] sm:$0xff]  ;;  %v17785_v12 = vpack.c.bf16 %v4438_v0, %v4437_v63  ;;  %v17817_v14 = vpack.c.bf16 %v4470_v2, %v4469_v1  ;;  %v4471_v18 = vld [vmem:[%s18509_s12 + $0x320] sm:$0xff]  ;;  %v4489_v30 = vld [vmem:[%s18509_s12 + $0x3b0] sm:$0xff] }
 0x3b2   : > { %v19232_v26 = vadd.f32 %v4120_v29, %v4080_v40  ;;  %v17787_v16 = vpack.c.bf16 %v4456_v8, %v4455_v5  ;;  %v4440_v17 = vld [vmem:[%s18509_s12 + $0x228] sm:$0xff]  ;;  %v4458_v40 = vld [vmem:[%s18509_s12 + $0x2b8] sm:$0xff]  ;;  %v4477_v0 = vld [vmem:[%s18509_s12 + $0x350] sm:$0xff] }
 0x3b3   : > { %v18253_v29 = vld [vmem:[#allocation2 + $0x28] sm:$0xff]  ;;  %v18254_v35 = vld [vmem:[#allocation2 + $0x38] sm:$0xff]  ;;  %v17789_v36 = vpack.c.bf16 %v4440_v17, %v4439_v15  ;;  %v4463_v2 = vld [vmem:[%s18509_s12 + $0x2e0] sm:$0xff] }
 0x3b4   : > { %17742 = vmatpush3.bf16.msra.mxu0 %v17741_v32  ;;  %17774 = vmatpush3.bf16.msra.mxu1 %v17773_v38  ;;  %v4490_v32 = vld [vmem:[%s18509_s12 + $0x3b8] sm:$0xff]  ;;  %v17821_v38 = vpack.c.bf16 %v4472_v27, %v4471_v18  ;;  %v4464_v5 = vld [vmem:[%s18509_s12 + $0x2e8] sm:$0xff]  ;;  %v4495_v8 = vld [vmem:[%s18509_s12 + $0x3e0] sm:$0xff] }
 0x3b5   : > { %17744 = vmatprep.subr.bf16.mxu0 %v17743_v56  ;;  %17776 = vmatprep.subr.bf16.mxu1 %v17775_v31  ;;  %v17791_v56 = vpack.c.bf16 %v4458_v40, %v4457_v23  ;;  %v17823_v28 = vpack.c.bf16 %v4490_v32, %v4489_v30  ;;  %v4474_v31 = vld [vmem:[%s18509_s12 + $0x338] sm:$0xff]  ;;  %v4480_v17 = vld [vmem:[%s18509_s12 + $0x368] sm:$0xff]  ;;  %v4465_v18 = vld [vmem:[%s18509_s12 + $0x2f0] sm:$0xff] }
 0x3b6   : > { %v4494_v55 = vld [vmem:[%s18509_s12 + $0x3d8] sm:$0xff]  ;;  %v4497_v27 = vld [vmem:[%s18509_s12 + $0x3f0] sm:$0xff] }
 0x3b7   : > { %v4446_v63 = vld [vmem:[%s18509_s12 + $0x258] sm:$0xff]  ;;  %v17831_v1 = vpack.c.bf16 %v4494_v55, %v4493_v43  ;;  %v4449_v32 = vld [vmem:[%s18509_s12 + $0x270] sm:$0xff] }
 0x3b8   : > { %17746 = vmatpush3.bf16.msra.mxu0 %v17745_v45  ;;  %17778 = vmatpush3.bf16.msra.mxu1 %v17777_v46  ;;  %v17825_v45 = vpack.c.bf16 %v4474_v31, %v4473_v25  ;;  %v17795_v46 = vpack.c.bf16 %v4460_v4, %v4459_v34  ;;  %v4498_v23 = vld [vmem:[%s18509_s12 + $0x3f8] sm:$0xff]  ;;  %v18255_v25 = vld [vmem:[#allocation2 + $0x20] sm:$0xff] }
 0x3b9   : > { %17780 = vmatprep.subr.bf16.mxu0 %v17779_v47  ;;  %17812 = vmatprep.subr.bf16.mxu1 %v17811_v51  ;;  %v4443_v47 = vld [vmem:[%s18509_s12 + $0x240] sm:$0xff]  ;;  %v4476_v51 = vld [vmem:[%s18509_s12 + $0x348] sm:$0xff]  ;;  %v4790_v43 = vld [vmem:[%s18514_s16 + $0x58] sm:$0xff] }
 0x3ba   : > { %v17797_v57 = vpack.c.bf16 %v4444_v49, %v4443_v47 }
 0x3bb   : > { %4564 = vmatmul.mubr.f32.vlgmr.msra.gmra.mrb[32].mxu0 %v18251_v9  ;;  %4634 = vmatmul.mubr.f32.vlgmr.msra.gmra.mrb[32].mxu1 %v18252_v13  ;;  %v4496_v9 = vld [vmem:[%s18509_s12 + $0x3e8] sm:$0xff]  ;;  %v17803_v13 = vpack.c.bf16 %v4464_v5, %v4463_v2 }
 0x3bc   : > { %17782 = vmatpush3.bf16.msra.mxu0 %v17781_v58  ;;  %17814 = vmatpush3.bf16.msra.mxu1 %v17813_v59  ;;  %v17829_v58 = vpack.c.bf16 %v4476_v51, %v4475_v50  ;;  %v17799_v59 = vpack.c.bf16 %v4462_v42, %v4461_v3  ;;  %v17835_v15 = vpack.c.bf16 %v4496_v9, %v4495_v8  ;;  %v4780_v51 = vld [vmem:[%s18514_s16 + $0x8] sm:$0xff] }
 0x3bd   : > { %17784 = vmatprep.subr.bf16.mxu0 %v17783_v61  ;;  %17816 = vmatprep.subr.bf16.mxu1 %v17815_v6  ;;  %v4445_v61 = vld [vmem:[%s18509_s12 + $0x250] sm:$0xff]  ;;  %v4478_v6 = vld [vmem:[%s18509_s12 + $0x358] sm:$0xff]  ;;  %v4788_v3 = vld [vmem:[%s18514_s16 + $0x48] sm:$0xff] }
 0x3be   : > { %4703 = vmatprep.mubr.f32.mxu0 %v18253_v29  ;;  %4773 = vmatprep.mubr.f32.mxu1 %v18254_v35  ;;  %v17801_v10 = vpack.c.bf16 %v4446_v63, %v4445_v61  ;;  %v17833_v11 = vpack.c.bf16 %v4478_v6, %v4477_v0  ;;  %v4450_v35 = vld [vmem:[%s18509_s12 + $0x278] sm:$0xff]  ;;  %v17843_v42 = vpack.c.bf16 %v4788_v3, %v4780_v51  ;;  %v4779_v61 = vld [vmem:[%s18514_s16] sm:$0xff]  ;;  %v4781_v0 = vld [vmem:[%s18514_s16 + $0x10] sm:$0xff] }
 0x3bf   : > { %v17809_v39 = vpack.c.bf16 %v4450_v35, %v4449_v32  ;;  %v4787_v63 = vld [vmem:[%s18514_s16 + $0x40] sm:$0xff]  ;;  %v4789_v6 = vld [vmem:[%s18514_s16 + $0x50] sm:$0xff] }
 0x3c0   : > { %17786 = vmatpush3.bf16.msra.mxu0 %v17785_v12  ;;  %17818 = vmatpush3.bf16.msra.mxu1 %v17817_v14  ;;  %v4447_v12 = vld [vmem:[%s18509_s12 + $0x260] sm:$0xff]  ;;  %v4448_v14 = vld [vmem:[%s18509_s12 + $0x268] sm:$0xff]  ;;  %v17853_v5 = vpack.c.bf16 %v4789_v6, %v4781_v0  ;;  %v4797_v32 = vld [vmem:[%s18514_s16 + $0x90] sm:$0xff] }
 0x3c1   : > { %17788 = vmatprep.subr.bf16.mxu0 %v17787_v16  ;;  %17820 = vmatprep.subr.bf16.mxu1 %v17819_v21  ;;  %v4479_v16 = vld [vmem:[%s18509_s12 + $0x360] sm:$0xff]  ;;  %v4466_v21 = vld [vmem:[%s18509_s12 + $0x2f8] sm:$0xff]  ;;  %v17805_v40 = vpack.c.bf16 %v4448_v14, %v4447_v12  ;;  %v4805_v35 = vld [vmem:[%s18514_s16 + $0xd0] sm:$0xff] }
 0x3c2   : > { %v17837_v29 = vpack.c.bf16 %v4480_v17, %v4479_v16  ;;  %v17807_v30 = vpack.c.bf16 %v4466_v21, %v4465_v18  ;;  %v4806_v17 = vld [vmem:[%s18514_s16 + $0xd8] sm:$0xff]  ;;  %v4795_v18 = vld [vmem:[%s18514_s16 + $0x80] sm:$0xff] }
 0x3c3   : > { %v4803_v21 = vld [vmem:[%s18514_s16 + $0xc0] sm:$0xff] }
 0x3c4   : > { %17790 = vmatpush3.bf16.msra.mxu0 %v17789_v36  ;;  %17822 = vmatpush3.bf16.msra.mxu1 %v17821_v38  ;;  %v17839_v36 = vpack.c.bf16 %v4498_v23, %v4497_v27  ;;  %v4481_v38 = vld [vmem:[%s18509_s12 + $0x370] sm:$0xff] }
 0x3c5   : > { %17792 = vmatprep.subr.bf16.mxu0 %v17791_v56  ;;  %17824 = vmatprep.subr.bf16.mxu1 %v17823_v28  ;;  %v4482_v56 = vld [vmem:[%s18509_s12 + $0x378] sm:$0xff]  ;;  %v18256_v28 = vld [vmem:[#allocation2 + $0x30] sm:$0xff] }
 0x3c6   : > { %v17841_v60 = vpack.c.bf16 %v4482_v56, %v4481_v38  ;;  %v17857_v56 = vpack.c.bf16 %v4805_v35, %v4797_v32  ;;  %v4809_v32 = vld [vmem:[%s18514_s16 + $0xf0] sm:$0xff]  ;;  %v14907_v35 = vld [vmem:[%s18494_s24 + $0x1000] sm:$0xff] }
 0x3c8   : > { %17794 = vmatpush3.bf16.msra.mxu0 %v17793_v44  ;;  %17826 = vmatpush3.bf16.msra.mxu1 %v17825_v45 }
 0x3c9   : > { %17796 = vmatprep.subr.bf16.mxu0 %v17795_v46  ;;  %17828 = vmatprep.subr.bf16.mxu1 %v17827_v62 }
 0x3cc   : > { %17798 = vmatpush3.bf16.msra.mxu0 %v17797_v57  ;;  %17830 = vmatpush3.bf16.msra.mxu1 %v17829_v58  ;;  %v1114_v57 = vrot.slane %v19195_v41, %v19026_v54 }
 0x3cd   : > { %17800 = vmatprep.subr.bf16.mxu0 %v17799_v59  ;;  %17832 = vmatprep.subr.bf16.mxu1 %v17831_v1  ;;  %v17845_v1 = vpack.c.bf16 %v4787_v63, %v4779_v61 }
 0x3ce   : > { %v1154_v59 = vrot.slane %v1114_v57, %v18865_v20 }
 0x3d0   : > { %17802 = vmatpush3.bf16.msra.mxu0 %v17801_v10  ;;  %17834 = vmatpush3.bf16.msra.mxu1 %v17833_v11  ;;  %v4804_v11 = vld [vmem:[%s18514_s16 + $0xc8] sm:$0xff] }
 0x3d1   : > { %17804 = vmatprep.subr.bf16.mxu0 %v17803_v13  ;;  %17836 = vmatprep.subr.bf16.mxu1 %v17835_v15  ;;  %v4798_v13 = vld [vmem:[%s18514_s16 + $0x98] sm:$0xff] }
 0x3d4   : > { %17806 = vmatpush3.bf16.msra.mxu0 %v17805_v40  ;;  %17838 = vmatpush3.bf16.msra.mxu1 %v17837_v29  ;;  %v17855_v29 = vpack.c.bf16 %v4806_v17, %v4798_v13 }
 0x3d5   : > { %17808 = vmatprep.subr.bf16.mxu0 %v17807_v30  ;;  %17840 = vmatprep.subr.bf16.mxu1 %v17839_v36  ;;  %v17849_v30 = vpack.c.bf16 %v4803_v21, %v4795_v18  ;;  %v4799_v21 = vld [vmem:[%s18514_s16 + $0xa0] sm:$0xff] }
 0x3d8   : > { %17810 = vmatpush3.bf16.msra.mxu0 %v17809_v39  ;;  %17842 = vmatpush3.bf16.msra.mxu1 %v17841_v60  ;;  %v4784_v39 = vld [vmem:[%s18514_s16 + $0x28] sm:$0xff] }
 0x3d9   : > { %17844 = vmatprep.subr.bf16.mxu0 %v17843_v42  ;;  %v4792_v60 = vld [vmem:[%s18514_s16 + $0x68] sm:$0xff] }
 0x3db   : > { %4704 = vmatmul.mubr.f32.vlgmr.msra.gmra.mrb[34].mxu0 %v18255_v25  ;;  %4774 = vmatmul.mubr.f32.vlgmr.msra.gmra.mrb[34].mxu1 %v18256_v28  ;;  %v4786_v25 = vld [vmem:[%s18514_s16 + $0x38] sm:$0xff]  ;;  %v17859_v28 = vpack.c.bf16 %v4792_v60, %v4784_v39 }
 0x3dc   : > { %17846 = vmatpush1.bf16.msra.mxu0 %v17845_v1 }
 0x3ee   : > { %v4159_v31 = vpop.f32.mrb[20].mxu0  ;;  %v4200_v4 = vpop.f32.mrb[20].mxu1 }
 0x3ef   : > { %v4160_v34 = vadd.f32 %v4159_v31, %v19227_v33  ;;  %v4161_v37 = vpop.f32.mrb[21].mxu0  ;;  %v4202_v44 = vpop.f32.mrb[21].mxu1  ;;  %v4782_v33 = vld [vmem:[%s18514_s16 + $0x18] sm:$0xff] }
 0x3f0   : > { %v4162_v7 = vadd.f32 %v4161_v37, %v19232_v26  ;;  %v4163_v45 = vpop.f32.mrb[22].mxu0  ;;  %v4204_v47 = vpop.f32.mrb[22].mxu1  ;;  %v17851_v55 = vpack.c.bf16 %v4790_v43, %v4782_v33  ;;  %v1110_v26 = vrot.slane %v19195_v41, %v19023_v53  ;;  %v4796_v41 = vld [vmem:[%s18514_s16 + $0x88] sm:$0xff]  ;;  %v4794_v31 = vld [vmem:[%s18514_s16 + $0x78] sm:$0xff] }
 0x3f1   : > { %v19301_v46 = vadd.f32 %v4200_v4, %v4160_v34  ;;  %v4164_v49 = vpop.f32.mrb[23].mxu0  ;;  %v4205_v62 = vpop.f32.mrb[23].mxu1  ;;  %v17847_v15 = vpack.c.bf16 %v4804_v11, %v4796_v41  ;;  %v18366_v34 = vmov 0.0   ;;  %v17867_v4 = vpack.c.bf16 %v4794_v31, %v4786_v25  ;;  %v4793_v41 = vld [vmem:[%s18514_s16 + $0x70] sm:$0xff]  ;;  %v4800_v11 = vld [vmem:[%s18514_s16 + $0xa8] sm:$0xff]  ;;  %v14915_v31 = vld [vmem:[%s18494_s24 + $0x1040] sm:$0xff] }
 0x3f2   : > { %v19303_v50 = vadd.f32 %v4202_v44, %v4162_v7  ;;  %17852 = vmatprep.subr.bf16.mxu1 %v17851_v55  ;;  %v1150_v58 = vrot.slane %v1110_v26, %v18865_v20  ;;  %4879 = vmatprep.mubr.f32.mxu0 %v18366_v34 }
 0x3f3   : > { %17854 = vmatpush1.bf16.msra.mxu1 %v17853_v5  ;;  %17848 = vmatprep.subr.bf16.mxu0 %v17847_v15  ;;  %v4791_v5 = vld [vmem:[%s18514_s16 + $0x60] sm:$0xff] }
 0x3f4   : > { %17856 = vmatprep.subr.bf16.mxu1 %v17855_v29  ;;  %17850 = vmatpush1.bf16.msra.mxu0 %v17849_v30  ;;  %v4801_v30 = vld [vmem:[%s18514_s16 + $0xb0] sm:$0xff] }
 0x3f5   : > { %4950 = vmatprep.mubr.f32.mxu1 %v18366_v34  ;;  %17860 = vmatprep.subr.bf16.mxu0 %v17859_v28  ;;  %v17873_v60 = vpack.c.bf16 %v4809_v32, %v4801_v30  ;;  %v14959_v30 = vld [vmem:[%s18494_s24 + $0x11a0] sm:$0xff] }
 0x3f6   : > { %v15083_v32 = vld [vmem:[%s18494_s24 + $0x1580] sm:$0xff] }
 0x3f7   : > { %17858 = vmatpush1.bf16.msra.mxu1 %v17857_v56  ;;  %v15039_v56 = vld [vmem:[%s18494_s24 + $0x1420] sm:$0xff] }
 0x3f8   : > { %17868 = vmatprep.subr.bf16.mxu1 %v17867_v4  ;;  %v14919_v4 = vld [vmem:[%s18494_s24 + $0x1060] sm:$0xff] }
 0x42e   : > { %v4241_v2 = vpop.f32.mrb[24].mxu0  ;;  %v4282_v9 = vpop.f32.mrb[24].mxu1 }
 0x42f   : > { %v4242_v8 = vadd.f32 %v4241_v2, %v1150_v58  ;;  %v4243_v10 = vpop.f32.mrb[25].mxu0  ;;  %v4284_v14 = vpop.f32.mrb[25].mxu1  ;;  %v4783_v2 = vld [vmem:[%s18514_s16 + $0x20] sm:$0xff] }
 0x430   : > { %v4244_v12 = vadd.f32 %v4243_v10, %v1154_v59  ;;  %v4245_v16 = vpop.f32.mrb[26].mxu0  ;;  %v4286_v23 = vpop.f32.mrb[26].mxu1  ;;  %v4785_v10 = vld [vmem:[%s18514_s16 + $0x30] sm:$0xff]  ;;  %v17861_v17 = vpack.c.bf16 %v4791_v5, %v4783_v2 }
 0x431   : > { %v4283_v27 = vadd.f32 %v4282_v9, %v4242_v8  ;;  %v4246_v40 = vpop.f32.mrb[27].mxu0  ;;  %v4287_v38 = vpop.f32.mrb[27].mxu1  ;;  %v4810_v16 = vld [vmem:[%s18514_s16 + $0xf8] sm:$0xff]  ;;  %v17869_v18 = vpack.c.bf16 %v4793_v41, %v4785_v10  ;;  %v15067_v10 = vld [vmem:[%s18494_s24 + $0x1500] sm:$0xff] }
 0x432   : > { %v4285_v36 = vadd.f32 %v4284_v14, %v4244_v12  ;;  %v4808_v12 = vld [vmem:[%s18514_s16 + $0xe8] sm:$0xff]  ;;  %v4802_v14 = vld [vmem:[%s18514_s16 + $0xb8] sm:$0xff]  ;;  %v15035_v38 = vld [vmem:[%s18494_s24 + $0x1400] sm:$0xff] }
 0x433   : > { %v17863_v40 = vpack.c.bf16 %v4808_v12, %v4800_v11  ;;  %v17871_v29 = vpack.c.bf16 %v4810_v16, %v4802_v14  ;;  %v15549_v28 = vcombine.high %v15035_v38, %v15039_v56  ;;  %v15071_v41 = vld [vmem:[%s18494_s24 + $0x1520] sm:$0xff] }
 0x434   : > { %v15581_v14 = vcombine.high %v15067_v10, %v15071_v41  ;;  %v14947_v16 = vld [vmem:[%s18494_s24 + $0x1140] sm:$0xff] }
 0x46e   : > { %v4323_v37 = vpop.f32.mrb[28].mxu0  ;;  %v4364_v44 = vpop.f32.mrb[28].mxu1 }
 0x46f   : > { %v4324_v7 = vadd.f32 %v4323_v37, %v4283_v27  ;;  %v4325_v45 = vpop.f32.mrb[29].mxu0  ;;  %v4366_v49 = vpop.f32.mrb[29].mxu1  ;;  %v4807_v27 = vld [vmem:[%s18514_s16 + $0xe0] sm:$0xff] }
 0x470   : > { %v4326_v47 = vadd.f32 %v4325_v45, %v4285_v36  ;;  %v4327_v62 = vpop.f32.mrb[30].mxu0  ;;  %v4368_v3 = vpop.f32.mrb[30].mxu1  ;;  %v14911_v36 = vld [vmem:[%s18494_s24 + $0x1020] sm:$0xff]  ;;  %v17865_v39 = vpack.c.bf16 %v4807_v27, %v4799_v21  ;;  %v15548_v45 = vcombine.low %v15035_v38, %v15039_v56  ;;  %v15580_v27 = vcombine.low %v15067_v10, %v15071_v41 }
 0x471   : > { %v19333_v51 = vadd.f32 %v4364_v44, %v4324_v7  ;;  %v4328_v33 = vpop.f32.mrb[31].mxu0  ;;  %v4369_v43 = vpop.f32.mrb[31].mxu1  ;;  %v15421_v25 = vcombine.high %v14907_v35, %v14911_v36  ;;  %v15043_v37 = vld [vmem:[%s18494_s24 + $0x1440] sm:$0xff]  ;;  %v15420_v44 = vcombine.low %v14907_v35, %v14911_v36 }
 0x472   : > { %v19335_v42 = vadd.f32 %v4366_v49, %v4326_v47  ;;  %v15047_v7 = vld [vmem:[%s18494_s24 + $0x1460] sm:$0xff]  ;;  %v15429_v47 = vcombine.high %v14915_v31, %v14919_v4 }
 0x473   : > { %v15557_v49 = vcombine.high %v15043_v37, %v15047_v7  ;;  %v14923_v62 = vld [vmem:[%s18494_s24 + $0x1080] sm:$0xff] }
 0x474   : > { %v14927_v3 = vld [vmem:[%s18494_s24 + $0x10a0] sm:$0xff] }
 0x475   : > { %v15051_v33 = vld [vmem:[%s18494_s24 + $0x1480] sm:$0xff] }
 0x476   : > { %v15055_v43 = vld [vmem:[%s18494_s24 + $0x14a0] sm:$0xff] }
 0x477   : > { %v15087_v35 = vld [vmem:[%s18494_s24 + $0x15a0] sm:$0xff] }
 0x48e   : > { %v17327_v55 = vpop.f32.mrb[32].mxu0  ;;  %v17362_v26 = vpop.f32.mrb[32].mxu1 }
 0x48f   : > { %v17328_v57 = vpop.f32.mrb[33].mxu0  ;;  %v17363_v59 = vpop.f32.mrb[33].mxu1 }
 0x490   : > { %v17329_v58 = vadd.f32 %v17328_v57, %v17327_v55  ;;  %v17364_v61 = vadd.f32 %v17363_v59, %v17362_v26  ;;  %v15428_v55 = vcombine.low %v14915_v31, %v14919_v4  ;;  %v15556_v26 = vcombine.low %v15043_v37, %v15047_v7  ;;  %v14931_v59 = vld [vmem:[%s18494_s24 + $0x10c0] sm:$0xff] }
 0x491   : > { %v15437_v57 = vcombine.high %v14923_v62, %v14927_v3  ;;  %v15095_v31 = vld [vmem:[%s18494_s24 + $0x15e0] sm:$0xff]  ;;  %v15596_v37 = vcombine.low %v15083_v32, %v15087_v35 }
 0x492   : > { %v4636_v63 = vadd.f32 %v17364_v61, %v17329_v58  ;;  %v15565_v58 = vcombine.high %v15051_v33, %v15055_v43  ;;  %v14935_v61 = vld [vmem:[%s18494_s24 + $0x10e0] sm:$0xff] }
 0x493   : > { %v15445_v2 = vcombine.high %v14931_v59, %v14935_v61  ;;  %v15444_v11 = vcombine.low %v14931_v59, %v14935_v61  ;;  %v15111_v59 = vld [vmem:[%s18494_s24 + $0x1660] sm:$0xff] }
 0x4ae   : > { %v17397_v0 = vpop.f32.mrb[34].mxu0  ;;  %v17432_v6 = vpop.f32.mrb[34].mxu1 }
 0x4af   : > { %v17398_v1 = vpop.f32.mrb[35].mxu0  ;;  %v17433_v9 = vpop.f32.mrb[35].mxu1 }
 0x4b0   : > { %v17399_v8 = vadd.f32 %v17398_v1, %v17397_v0  ;;  %v17434_v13 = vadd.f32 %v17433_v9, %v17432_v6  ;;  %v15063_v0 = vld [vmem:[%s18494_s24 + $0x14e0] sm:$0xff]  ;;  %v15436_v1 = vcombine.low %v14923_v62, %v14927_v3  ;;  %v15564_v6 = vcombine.low %v15051_v33, %v15055_v43 }
 0x4b1   : > { %v14943_v9 = vld [vmem:[%s18494_s24 + $0x1120] sm:$0xff] }
 0x4b2   : > { %v4706_v15 = vadd.f32 %v17399_v8, %v4636_v63  ;;  %v15059_v63 = vld [vmem:[%s18494_s24 + $0x14c0] sm:$0xff] }
 0x4b3   : > { %v15573_v5 = vcombine.high %v15059_v63, %v15063_v0  ;;  %v14939_v8 = vld [vmem:[%s18494_s24 + $0x1100] sm:$0xff] }
 0x4b4   : > { %v4776_v23 = vadd.f32 %v17434_v13, %v4706_v15  ;;  %v15572_v13 = vcombine.low %v15059_v63, %v15063_v0  ;;  %v15453_v12 = vcombine.high %v14939_v8, %v14943_v9  ;;  %v14951_v15 = vld [vmem:[%s18494_s24 + $0x1160] sm:$0xff]  ;;  %v15452_v21 = vcombine.low %v14939_v8, %v14943_v9 }
 0x4b5   : > { %v15460_v36 = vcombine.low %v14947_v16, %v14951_v15  ;;  %v15103_v62 = vld [vmem:[%s18494_s24 + $0x1620] sm:$0xff] }
 0x4b6   : > { %14903 = vmatmul.mubr.msk.f32.vlgmr.msra.gmra.mrb[36].mxu0 %vm4811_vm0, %v4776_v23  ;;  %14904 = vmatmul.mubr.msk.f32.vlgmr.msra.gmra.mrb[36].mxu1 %vm4811_vm0, %v4776_v23  ;;  %v15119_v8 = vld [vmem:[%s18494_s24 + $0x16a0] sm:$0xff] }
 0x4b7   : > { %17862 = vmatpush1.bf16.msra.mxu0 %v17861_v17  ;;  %17870 = vmatpush1.bf16.msra.mxu1 %v17869_v18  ;;  %v15075_v17 = vld [vmem:[%s18494_s24 + $0x1540] sm:$0xff] }
 0x4b8   : > { %17864 = vmatprep.subr.bf16.mxu0 %v17863_v40  ;;  %17872 = vmatprep.subr.bf16.mxu1 %v17871_v29  ;;  %v15079_v18 = vld [vmem:[%s18494_s24 + $0x1560] sm:$0xff] }
 0x4b9   : > { %5021 = vmatprep.mubr.f32.mxu0 %v18366_v34  ;;  %5092 = vmatprep.mubr.f32.mxu1 %v18366_v34  ;;  %v15589_v40 = vcombine.high %v15075_v17, %v15079_v18  ;;  %v14955_v29 = vld [vmem:[%s18494_s24 + $0x1180] sm:$0xff]  ;;  %v15588_v38 = vcombine.low %v15075_v17, %v15079_v18 }
 0x4ba   : > { %v15469_v56 = vcombine.high %v14955_v29, %v14959_v30  ;;  %v15468_v4 = vcombine.low %v14955_v29, %v14959_v30  ;;  %v15135_v29 = vld [vmem:[%s18494_s24 + $0x1720] sm:$0xff] }
 0x4bb   : > { %17866 = vmatpush1.bf16.msra.mxu0 %v17865_v39  ;;  %17874 = vmatpush1.bf16.msra.mxu1 %v17873_v60  ;;  %v15597_v39 = vcombine.high %v15083_v32, %v15087_v35  ;;  %v14963_v60 = vld [vmem:[%s18494_s24 + $0x11c0] sm:$0xff] }
 0x4bc   : > { %8282 = vmatprep.subr.bf16.mxu0 %v15421_v25  ;;  %8323 = vmatprep.subr.bf16.mxu1 %v15549_v28  ;;  %v14967_v25 = vld [vmem:[%s18494_s24 + $0x11e0] sm:$0xff] }
 0x4bd   : > { %v15091_v28 = vld [vmem:[%s18494_s24 + $0x15c0] sm:$0xff]  ;;  %v15477_v7 = vcombine.high %v14963_v60, %v14967_v25  ;;  %v15476_v3 = vcombine.low %v14963_v60, %v14967_v25 }
 0x4be   : > { %14905 = vmatmul.mubr.msk.f32.vlgmr.msra.gmra.mrb[38].mxu0 %vm4811_vm0, %v4776_v23  ;;  %14906 = vmatmul.mubr.msk.f32.vlgmr.msra.gmra.mrb[38].mxu1 %vm4811_vm0, %v4776_v23  ;;  %v15461_v23 = vcombine.high %v14947_v16, %v14951_v15  ;;  %v15604_v33 = vcombine.low %v15091_v28, %v15095_v31  ;;  %v15127_v16 = vld [vmem:[%s18494_s24 + $0x16e0] sm:$0xff] }
 0x4bf   : > { %8283 = vmatpush1.bf16.msra.mxu0 %v15420_v44  ;;  %8324 = vmatpush1.bf16.msra.mxu1 %v15548_v45  ;;  %v15605_v44 = vcombine.high %v15091_v28, %v15095_v31  ;;  %v14971_v45 = vld [vmem:[%s18494_s24 + $0x1200] sm:$0xff] }
 0x4c0   : > { %8284 = vmatprep.subr.bf16.mxu0 %v15429_v47  ;;  %8325 = vmatprep.subr.bf16.mxu1 %v15557_v49  ;;  %v14975_v47 = vld [vmem:[%s18494_s24 + $0x1220] sm:$0xff] }
 0x4c1   : > { %v15099_v49 = vld [vmem:[%s18494_s24 + $0x1600] sm:$0xff]  ;;  %v15485_v43 = vcombine.high %v14971_v45, %v14975_v47  ;;  %v15484_v61 = vcombine.low %v14971_v45, %v14975_v47 }
 0x4c2   : > { %v15612_v63 = vcombine.low %v15099_v49, %v15103_v62  ;;  %v15143_v60 = vld [vmem:[%s18494_s24 + $0x1760] sm:$0xff] }
 0x4c3   : > { %8285 = vmatpush1.bf16.msra.mxu0 %v15428_v55  ;;  %8326 = vmatpush1.bf16.msra.mxu1 %v15556_v26  ;;  %v15613_v55 = vcombine.high %v15099_v49, %v15103_v62  ;;  %v14979_v26 = vld [vmem:[%s18494_s24 + $0x1240] sm:$0xff] }
 0x4c4   : > { %8286 = vmatprep.subr.bf16.mxu0 %v15437_v57  ;;  %8327 = vmatprep.subr.bf16.mxu1 %v15565_v58  ;;  %v14983_v57 = vld [vmem:[%s18494_s24 + $0x1260] sm:$0xff] }
 0x4c5   : > { %v15107_v58 = vld [vmem:[%s18494_s24 + $0x1640] sm:$0xff]  ;;  %v15493_v0 = vcombine.high %v14979_v26, %v14983_v57  ;;  %v15492_v9 = vcombine.low %v14979_v26, %v14983_v57 }
 0x4c6   : > { %v15620_v10 = vcombine.low %v15107_v58, %v15111_v59  ;;  %v15023_v45 = vld [vmem:[%s18494_s24 + $0x13a0] sm:$0xff] }
 0x4c7   : > { %8287 = vmatpush1.bf16.msra.mxu0 %v15436_v1  ;;  %8328 = vmatpush1.bf16.msra.mxu1 %v15564_v6  ;;  %v15621_v1 = vcombine.high %v15107_v58, %v15111_v59  ;;  %v14987_v6 = vld [vmem:[%s18494_s24 + $0x1280] sm:$0xff] }
 0x4c8   : > { %8288 = vmatprep.subr.bf16.mxu0 %v15445_v2  ;;  %8329 = vmatprep.subr.bf16.mxu1 %v15573_v5  ;;  %v14991_v2 = vld [vmem:[%s18494_s24 + $0x12a0] sm:$0xff] }
 0x4c9   : > { %v15115_v5 = vld [vmem:[%s18494_s24 + $0x1680] sm:$0xff]  ;;  %v15501_v41 = vcombine.high %v14987_v6, %v14991_v2  ;;  %v15500_v15 = vcombine.low %v14987_v6, %v14991_v2 }
 0x4ca   : > { %v15628_v17 = vcombine.low %v15115_v5, %v15119_v8  ;;  %v15147_v47 = vld [vmem:[%s18494_s24 + $0x1780] sm:$0xff] }
 0x4cb   : > { %8289 = vmatpush1.bf16.msra.mxu0 %v15444_v11  ;;  %8330 = vmatpush1.bf16.msra.mxu1 %v15572_v13  ;;  %v15629_v11 = vcombine.high %v15115_v5, %v15119_v8  ;;  %v14995_v13 = vld [vmem:[%s18494_s24 + $0x12c0] sm:$0xff] }
 0x4cc   : > { %8290 = vmatprep.subr.bf16.mxu0 %v15453_v12  ;;  %8331 = vmatprep.subr.bf16.mxu1 %v15581_v14  ;;  %v14999_v12 = vld [vmem:[%s18494_s24 + $0x12e0] sm:$0xff] }
 0x4cd   : > { %v15123_v14 = vld [vmem:[%s18494_s24 + $0x16c0] sm:$0xff]  ;;  %v15509_v18 = vcombine.high %v14995_v13, %v14999_v12  ;;  %v15508_v30 = vcombine.low %v14995_v13, %v14999_v12 }
 0x4ce   : > { %v15636_v32 = vcombine.low %v15123_v14, %v15127_v16  ;;  %v15151_v62 = vld [vmem:[%s18494_s24 + $0x17a0] sm:$0xff] }
 0x4cf   : > { %8291 = vmatpush1.bf16.msra.mxu0 %v15452_v21  ;;  %8332 = vmatpush1.bf16.msra.mxu1 %v15580_v27  ;;  %v15637_v21 = vcombine.high %v15123_v14, %v15127_v16  ;;  %v15003_v27 = vld [vmem:[%s18494_s24 + $0x1300] sm:$0xff] }
 0x4d0   : > { %8292 = vmatprep.subr.bf16.mxu0 %v15461_v23  ;;  %8333 = vmatprep.subr.bf16.mxu1 %v15589_v40  ;;  %v15007_v23 = vld [vmem:[%s18494_s24 + $0x1320] sm:$0xff] }
 0x4d1   : > { %v15131_v40 = vld [vmem:[%s18494_s24 + $0x1700] sm:$0xff]  ;;  %v15517_v35 = vcombine.high %v15003_v27, %v15007_v23  ;;  %v15516_v25 = vcombine.low %v15003_v27, %v15007_v23 }
 0x4d2   : > { %v15644_v28 = vcombine.low %v15131_v40, %v15135_v29  ;;  %v15031_v26 = vld [vmem:[%s18494_s24 + $0x13e0] sm:$0xff] }
 0x4d3   : > { %8293 = vmatpush1.bf16.msra.mxu0 %v15460_v36  ;;  %8334 = vmatpush1.bf16.msra.mxu1 %v15588_v38  ;;  %v15645_v36 = vcombine.high %v15131_v40, %v15135_v29  ;;  %v15011_v38 = vld [vmem:[%s18494_s24 + $0x1340] sm:$0xff] }
 0x4d4   : > { %8294 = vmatprep.subr.bf16.mxu0 %v15469_v56  ;;  %8335 = vmatprep.subr.bf16.mxu1 %v15597_v39  ;;  %v15015_v56 = vld [vmem:[%s18494_s24 + $0x1360] sm:$0xff] }
 0x4d5   : > { %v15139_v39 = vld [vmem:[%s18494_s24 + $0x1740] sm:$0xff]  ;;  %v15525_v31 = vcombine.high %v15011_v38, %v15015_v56 }
 0x4d6   : > { %v15155_v57 = vld [vmem:[%s18494_s24 + $0x17c0] sm:$0xff] }
 0x4d7   : > { %8295 = vmatpush1.bf16.msra.mxu0 %v15468_v4  ;;  %8336 = vmatpush1.bf16.msra.mxu1 %v15596_v37  ;;  %v15653_v4 = vcombine.high %v15139_v39, %v15143_v60  ;;  %v15524_v37 = vcombine.low %v15011_v38, %v15015_v56  ;;  %v15159_v59 = vld [vmem:[%s18494_s24 + $0x17e0] sm:$0xff] }
 0x4d8   : > { %8296 = vmatprep.subr.bf16.mxu0 %v15477_v7  ;;  %8337 = vmatprep.subr.bf16.mxu1 %v15605_v44  ;;  %v15652_v7 = vcombine.low %v15139_v39, %v15143_v60  ;;  %v15019_v44 = vld [vmem:[%s18494_s24 + $0x1380] sm:$0xff] }
 0x4d9   : > { %v15533_v49 = vcombine.high %v15019_v44, %v15023_v45  ;;  %v15167_v6 = vld [vmem:[%s18494_s24 + $0x1820] sm:$0xff] }
 0x4da   : > { %v15291_v2 = vld [vmem:[%s18494_s24 + $0x1c00] sm:$0xff] }
 0x4db   : > { %8297 = vmatpush1.bf16.msra.mxu0 %v15476_v3  ;;  %8338 = vmatpush1.bf16.msra.mxu1 %v15604_v33  ;;  %v15532_v3 = vcombine.low %v15019_v44, %v15023_v45  ;;  %v15660_v33 = vcombine.low %v15147_v47, %v15151_v62  ;;  %v15295_v8 = vld [vmem:[%s18494_s24 + $0x1c20] sm:$0xff] }
 0x4dc   : > { %8298 = vmatprep.subr.bf16.mxu0 %v15485_v43  ;;  %8339 = vmatprep.subr.bf16.mxu1 %v15613_v55  ;;  %v15661_v43 = vcombine.high %v15147_v47, %v15151_v62  ;;  %v15027_v55 = vld [vmem:[%s18494_s24 + $0x13c0] sm:$0xff] }
 0x4dd   : > { %v15541_v58 = vcombine.high %v15027_v55, %v15031_v26  ;;  %v15171_v29 = vld [vmem:[%s18494_s24 + $0x1840] sm:$0xff] }
 0x4de   : > { %v15303_v38 = vld [vmem:[%s18494_s24 + $0x1c60] sm:$0xff] }
 0x4df   : > { %8299 = vmatpush1.bf16.msra.mxu0 %v15484_v61  ;;  %8340 = vmatpush1.bf16.msra.mxu1 %v15612_v63  ;;  %v15540_v61 = vcombine.low %v15027_v55, %v15031_v26  ;;  %v15668_v63 = vcombine.low %v15155_v57, %v15159_v59  ;;  %v15179_v45 = vld [vmem:[%s18494_s24 + $0x1880] sm:$0xff] }
 0x4e0   : > { %8300 = vmatprep.subr.bf16.mxu0 %v15493_v0  ;;  %8341 = vmatprep.subr.bf16.mxu1 %v15621_v1  ;;  %v15669_v0 = vcombine.high %v15155_v57, %v15159_v59  ;;  %v15163_v1 = vld [vmem:[%s18494_s24 + $0x1800] sm:$0xff] }
 0x4e1   : > { %v15677_v5 = vcombine.high %v15163_v1, %v15167_v6  ;;  %v15183_v62 = vld [vmem:[%s18494_s24 + $0x18a0] sm:$0xff] }
 0x4e3   : > { %8301 = vmatpush1.bf16.msra.mxu0 %v15492_v9  ;;  %8342 = vmatpush1.bf16.msra.mxu1 %v15620_v10  ;;  %v15676_v9 = vcombine.low %v15163_v1, %v15167_v6  ;;  %v15804_v10 = vcombine.low %v15291_v2, %v15295_v8  ;;  %v15191_v1 = vld [vmem:[%s18494_s24 + $0x18e0] sm:$0xff] }
 0x4e4   : > { %8302 = vmatprep.subr.bf16.mxu0 %v15501_v41  ;;  %8343 = vmatprep.subr.bf16.mxu1 %v15629_v11  ;;  %v15805_v41 = vcombine.high %v15291_v2, %v15295_v8  ;;  %v15315_v6 = vld [vmem:[%s18494_s24 + $0x1cc0] sm:$0xff] }
 0x4e7   : > { %8303 = vmatpush1.bf16.msra.mxu0 %v15500_v15  ;;  %8344 = vmatpush1.bf16.msra.mxu1 %v15628_v17 }
 0x4e8   : > { %8304 = vmatprep.subr.bf16.mxu0 %v15509_v18  ;;  %8345 = vmatprep.subr.bf16.mxu1 %v15637_v21 }
 0x4eb   : > { %8305 = vmatpush1.bf16.msra.mxu0 %v15508_v30  ;;  %8346 = vmatpush1.bf16.msra.mxu1 %v15636_v32 }
 0x4ec   : > { %8306 = vmatprep.subr.bf16.mxu0 %v15517_v35  ;;  %8347 = vmatprep.subr.bf16.mxu1 %v15645_v36  ;;  %v15175_v35 = vld [vmem:[%s18494_s24 + $0x1860] sm:$0xff] }
 0x4ed   : > { %v15299_v36 = vld [vmem:[%s18494_s24 + $0x1c40] sm:$0xff]  ;;  %v15685_v60 = vcombine.high %v15171_v29, %v15175_v35  ;;  %v15684_v26 = vcombine.low %v15171_v29, %v15175_v35 }
 0x4ee   : > { %v15812_v59 = vcombine.low %v15299_v36, %v15303_v38 }
 0x4ef   : > { %8307 = vmatpush1.bf16.msra.mxu0 %v15516_v25  ;;  %8348 = vmatpush1.bf16.msra.mxu1 %v15644_v28  ;;  %v15813_v25 = vcombine.high %v15299_v36, %v15303_v38  ;;  %v15211_v38 = vld [vmem:[%s18494_s24 + $0x1980] sm:$0xff] }
 0x4f0   : > { %8308 = vmatprep.subr.bf16.mxu0 %v15525_v31  ;;  %8349 = vmatprep.subr.bf16.mxu1 %v15653_v4 }
 0x4f3   : > { %8309 = vmatpush1.bf16.msra.mxu0 %v15524_v37  ;;  %8350 = vmatpush1.bf16.msra.mxu1 %v15652_v7 }
 0x4f4   : > { %8310 = vmatprep.subr.bf16.mxu0 %v15533_v49  ;;  %8351 = vmatprep.subr.bf16.mxu1 %v15661_v43 }
 0x4f7   : > { %8311 = vmatpush1.bf16.msra.mxu0 %v15532_v3  ;;  %8352 = vmatpush1.bf16.msra.mxu1 %v15660_v33  ;;  %v15307_v3 = vld [vmem:[%s18494_s24 + $0x1c80] sm:$0xff] }
 0x4f8   : > { %8312 = vmatprep.subr.bf16.mxu0 %v15541_v58  ;;  %8353 = vmatprep.subr.bf16.mxu1 %v15669_v0  ;;  %v15311_v33 = vld [vmem:[%s18494_s24 + $0x1ca0] sm:$0xff] }
 0x4f9   : > { %v15820_v8 = vcombine.low %v15307_v3, %v15311_v33 }
 0x4fb   : > { %8313 = vmatpush1.bf16.msra.mxu0 %v15540_v61  ;;  %8354 = vmatpush1.bf16.msra.mxu1 %v15668_v63  ;;  %v15187_v61 = vld [vmem:[%s18494_s24 + $0x18c0] sm:$0xff] }
 0x4fc   : > { %8364 = vmatprep.subr.bf16.mxu0 %v15677_v5  ;;  %8405 = vmatprep.subr.bf16.mxu1 %v15805_v41  ;;  %v15195_v41 = vld [vmem:[%s18494_s24 + $0x1900] sm:$0xff] }
 0x589   : > { %v4881_v11 = vpop.f32.mrb[36].mxu0  ;;  %v4952_v13 = vpop.f32.mrb[36].mxu1 }
 0x58a   : > { %v5099_v12 = vmul.f32 0.03125, %v4881_v11  ;;  %v5101_v14 = vmul.f32 0.03125, %v4952_v13  ;;  %v4883_v16 = vpop.f32.mrb[37].mxu0  ;;  %v4954_v15 = vpop.f32.mrb[37].mxu1  ;;  %v15199_v11 = vld [vmem:[%s18494_s24 + $0x1920] sm:$0xff] }
 0x58b   : > { %v5100_v17 = vmul.f32 0.03125, %v4883_v16  ;;  %v5102_v18 = vmul.f32 0.03125, %v4954_v15  ;;  %v15323_v13 = vld [vmem:[%s18494_s24 + $0x1d00] sm:$0xff]  ;;  %v15709_v15 = vcombine.high %v15195_v41, %v15199_v11 }
 0x58c   : > { %v5107_v21 = vadd.f32 %v5099_v12, %v18962_v48  ;;  %v5109_v27 = vadd.f32 %v5101_v14, %v19120_v19  ;;  %v15327_v12 = vld [vmem:[%s18494_s24 + $0x1d20] sm:$0xff]  ;;  %v15700_v14 = vcombine.low %v15187_v61, %v15191_v1 }
 0x58d   : > { %v5108_v23 = vadd.f32 %v5100_v17, %v18964_v52  ;;  %v5110_v40 = vadd.f32 %v5102_v18, %v19122_v24  ;;  %v15837_v17 = vcombine.high %v15323_v13, %v15327_v12  ;;  %v15203_v18 = vld [vmem:[%s18494_s24 + $0x1940] sm:$0xff]  ;;  %v15836_v29 = vcombine.low %v15323_v13, %v15327_v12 }
 0x58e   : > { %v19428_v30 = vmax.f32 %v5107_v21, 0.0  ;;  %v19430_v32 = vmax.f32 %v5109_v27, 0.0  ;;  %v15207_v21 = vld [vmem:[%s18494_s24 + $0x1960] sm:$0xff] }
 0x58f   : > { %v19435_v56 = vmax.f32 %v5108_v23, 0.0  ;;  %v19437_v39 = vmax.f32 %v5110_v40, 0.0  ;;  %v15331_v27 = vld [vmem:[%s18494_s24 + $0x1d40] sm:$0xff]  ;;  %v15708_v40 = vcombine.low %v15195_v41, %v15199_v11  ;;  %v15717_v35 = vcombine.high %v15203_v18, %v15207_v21 }
 0x590   : > { %v19449_v28 = vpack.c.bf16 %v19428_v30, %v19428_v30  ;;  %v19453_v31 = vpack.c.bf16 %v19430_v32, %v19430_v32  ;;  %v15335_v23 = vld [vmem:[%s18494_s24 + $0x1d60] sm:$0xff] }
 0x591   : > { %v19441_v48 = vpack.c.bf16 %v19435_v56, %v19435_v56  ;;  %v19445_v52 = vpack.c.bf16 %v19437_v39, %v19437_v39  ;;  %v5023_v19 = vpop.f32.mrb[38].mxu0  ;;  %v5094_v24 = vpop.f32.mrb[38].mxu1  ;;  %v15845_v36 = vcombine.high %v15331_v27, %v15335_v23  ;;  %v15243_v12 = vld [vmem:[%s18494_s24 + $0x1a80] sm:$0xff] }
 0x592   : > { %v5103_v4 = vmul.f32 0.03125, %v5023_v19  ;;  %v5105_v37 = vmul.f32 0.03125, %v5094_v24  ;;  %v5025_v7 = vpop.f32.mrb[39].mxu0  ;;  %v5096_v44 = vpop.f32.mrb[39].mxu1  ;;  %v15215_v19 = vld [vmem:[%s18494_s24 + $0x19a0] sm:$0xff] }
 0x593   : > { %v5104_v47 = vmul.f32 0.03125, %v5025_v7  ;;  %v5106_v49 = vmul.f32 0.03125, %v5096_v44  ;;  %8314 = vmatprep.mubr.bf16.mxu0 %v19441_v48  ;;  %8355 = vmatprep.mubr.bf16.mxu1 %v19445_v52  ;;  %v15339_v24 = vld [vmem:[%s18494_s24 + $0x1d80] sm:$0xff] }
 0x594   : > { %v19462_v43 = vadd.f32 %v5103_v4, %v19301_v46  ;;  %v19465_v55 = vadd.f32 %v5105_v37, %v19333_v51  ;;  %8315 = vmatmul.mubr.bf16.vlgmr.msra.gmra.mrb[40].mxu0 %v19449_v28  ;;  %8356 = vmatmul.mubr.bf16.vlgmr.msra.gmra.mrb[40].mxu1 %v19453_v31  ;;  %v15693_v46 = vcombine.high %v15179_v45, %v15183_v62  ;;  %v15219_v44 = vld [vmem:[%s18494_s24 + $0x19c0] sm:$0xff] }
 0x595   : > { %v5112_v57 = vadd.f32 %v5104_v47, %v19303_v50  ;;  %v5114_v58 = vadd.f32 %v5106_v49, %v19335_v42  ;;  %8365 = vmatpush1.bf16.msra.mxu0 %v15676_v9  ;;  %8406 = vmatpush1.bf16.msra.mxu1 %v15804_v10  ;;  %v15821_v51 = vcombine.high %v15307_v3, %v15311_v33  ;;  %v15319_v50 = vld [vmem:[%s18494_s24 + $0x1ce0] sm:$0xff] }
 0x596   : > { %8366 = vmatprep.subr.bf16.mxu0 %v15685_v60  ;;  %8407 = vmatprep.subr.bf16.mxu1 %v15813_v25  ;;  %v15692_v42 = vcombine.low %v15179_v45, %v15183_v62  ;;  %v15701_v9 = vcombine.high %v15187_v61, %v15191_v1  ;;  %v15829_v10 = vcombine.high %v15315_v6, %v15319_v50  ;;  %v15343_v60 = vld [vmem:[%s18494_s24 + $0x1da0] sm:$0xff] }
 0x597   : > { %v19472_v63 = vmax.f32 %v5112_v57, 0.0  ;;  %v19474_v0 = vmax.f32 %v5114_v58, 0.0  ;;  %v15828_v16 = vcombine.low %v15315_v6, %v15319_v50  ;;  %v15716_v25 = vcombine.low %v15203_v18, %v15207_v21  ;;  %v15223_v45 = vld [vmem:[%s18494_s24 + $0x19e0] sm:$0xff] }
 0x598   : > { %v15844_v4 = vcombine.low %v15331_v27, %v15335_v23  ;;  %v15725_v37 = vcombine.high %v15211_v38, %v15215_v19  ;;  %v15853_v7 = vcombine.high %v15339_v24, %v15343_v60  ;;  %v15347_v47 = vld [vmem:[%s18494_s24 + $0x1dc0] sm:$0xff]  ;;  %v15724_v62 = vcombine.low %v15211_v38, %v15215_v19 }
 0x599   : > { %v19481_v2 = vpack.c.bf16 %v19472_v63, %v19472_v63  ;;  %v19485_v5 = vpack.c.bf16 %v19474_v0, %v19474_v0  ;;  %8367 = vmatpush1.bf16.msra.mxu0 %v15684_v26  ;;  %8408 = vmatpush1.bf16.msra.mxu1 %v15812_v59  ;;  %v15351_v49 = vld [vmem:[%s18494_s24 + $0x1de0] sm:$0xff]  ;;  %v15852_v3 = vcombine.low %v15339_v24, %v15343_v60 }
 0x59a   : > { %8368 = vmatprep.subr.bf16.mxu0 %v15693_v46  ;;  %8409 = vmatprep.subr.bf16.mxu1 %v15821_v51  ;;  %v15733_v33 = vcombine.high %v15219_v44, %v15223_v45  ;;  %v15861_v26 = vcombine.high %v15347_v47, %v15351_v49  ;;  %v15227_v57 = vld [vmem:[%s18494_s24 + $0x1a00] sm:$0xff]  ;;  %v15732_v51 = vcombine.low %v15219_v44, %v15223_v45 }
 0x59b   : > { %8396 = vmatprep.mubr.bf16.mxu0 %v19481_v2  ;;  %8437 = vmatprep.mubr.bf16.mxu1 %v19485_v5  ;;  %v15231_v58 = vld [vmem:[%s18494_s24 + $0x1a20] sm:$0xff]  ;;  %v15860_v61 = vcombine.low %v15347_v47, %v15351_v49 }
 0x59c   : > { %v15355_v59 = vld [vmem:[%s18494_s24 + $0x1e00] sm:$0xff]  ;;  %v15741_v1 = vcombine.high %v15227_v57, %v15231_v58 }
 0x59d   : > { %8369 = vmatpush1.bf16.msra.mxu0 %v15692_v42  ;;  %8410 = vmatpush1.bf16.msra.mxu1 %v15820_v8  ;;  %v15359_v46 = vld [vmem:[%s18494_s24 + $0x1e20] sm:$0xff] }
 0x59e   : > { %8370 = vmatprep.subr.bf16.mxu0 %v15701_v9  ;;  %8411 = vmatprep.subr.bf16.mxu1 %v15829_v10  ;;  %v15869_v6 = vcombine.high %v15355_v59, %v15359_v46  ;;  %v15235_v50 = vld [vmem:[%s18494_s24 + $0x1a40] sm:$0xff]  ;;  %v15740_v10 = vcombine.low %v15227_v57, %v15231_v58  ;;  %v15868_v41 = vcombine.low %v15355_v59, %v15359_v46 }
 0x59f   : > { %v15239_v42 = vld [vmem:[%s18494_s24 + $0x1a60] sm:$0xff] }
 0x5a0   : > { %v15363_v8 = vld [vmem:[%s18494_s24 + $0x1e40] sm:$0xff]  ;;  %v15749_v11 = vcombine.high %v15235_v50, %v15239_v42 }
 0x5a1   : > { %8371 = vmatpush1.bf16.msra.mxu0 %v15700_v14  ;;  %8412 = vmatpush1.bf16.msra.mxu1 %v15828_v16  ;;  %v15367_v9 = vld [vmem:[%s18494_s24 + $0x1e60] sm:$0xff] }
 0x5a2   : > { %8372 = vmatprep.subr.bf16.mxu0 %v15709_v15  ;;  %8413 = vmatprep.subr.bf16.mxu1 %v15837_v17  ;;  %v15877_v13 = vcombine.high %v15363_v8, %v15367_v9  ;;  %v15247_v14 = vld [vmem:[%s18494_s24 + $0x1aa0] sm:$0xff]  ;;  %v15748_v17 = vcombine.low %v15235_v50, %v15239_v42  ;;  %v15876_v18 = vcombine.low %v15363_v8, %v15367_v9 }
 0x5a3   : > { %v15371_v16 = vld [vmem:[%s18494_s24 + $0x1e80] sm:$0xff]  ;;  %v15757_v21 = vcombine.high %v15243_v12, %v15247_v14 }
 0x5a4   : > { %v15375_v15 = vld [vmem:[%s18494_s24 + $0x1ea0] sm:$0xff] }
 0x5a5   : > { %8373 = vmatpush1.bf16.msra.mxu0 %v15708_v40  ;;  %8414 = vmatpush1.bf16.msra.mxu1 %v15836_v29  ;;  %v15885_v27 = vcombine.high %v15371_v16, %v15375_v15  ;;  %v15251_v23 = vld [vmem:[%s18494_s24 + $0x1ac0] sm:$0xff]  ;;  %v15884_v38 = vcombine.low %v15371_v16, %v15375_v15  ;;  %v14908_v15 = vld [vmem:[%s18494_s24 + $0x1008] sm:$0xff] }
 0x5a6   : > { %8374 = vmatprep.subr.bf16.mxu0 %v15717_v35  ;;  %8415 = vmatprep.subr.bf16.mxu1 %v15845_v36  ;;  %v15255_v40 = vld [vmem:[%s18494_s24 + $0x1ae0] sm:$0xff]  ;;  %v15756_v36 = vcombine.low %v15243_v12, %v15247_v14 }
 0x5a7   : > { %v15379_v29 = vld [vmem:[%s18494_s24 + $0x1ec0] sm:$0xff]  ;;  %v15765_v19 = vcombine.high %v15251_v23, %v15255_v40 }
 0x5a8   : > { %v15383_v35 = vld [vmem:[%s18494_s24 + $0x1ee0] sm:$0xff] }
 0x5a9   : > { %8375 = vmatpush1.bf16.msra.mxu0 %v15716_v25  ;;  %8416 = vmatpush1.bf16.msra.mxu1 %v15844_v4  ;;  %v15893_v24 = vcombine.high %v15379_v29, %v15383_v35  ;;  %v15259_v60 = vld [vmem:[%s18494_s24 + $0x1b00] sm:$0xff]  ;;  %v15892_v44 = vcombine.low %v15379_v29, %v15383_v35  ;;  %v19545_v29 = vmax.f32 %v19465_v55, 0.0 }
 0x5aa   : > { %8376 = vmatprep.subr.bf16.mxu0 %v15725_v37  ;;  %8417 = vmatprep.subr.bf16.mxu1 %v15853_v7  ;;  %v15263_v25 = vld [vmem:[%s18494_s24 + $0x1b20] sm:$0xff]  ;;  %v15764_v7 = vcombine.low %v15251_v23, %v15255_v40  ;;  %v19542_v40 = vmax.f32 %v19462_v43, 0.0 }
 0x5ab   : > { %v15387_v4 = vld [vmem:[%s18494_s24 + $0x1f00] sm:$0xff]  ;;  %v15773_v45 = vcombine.high %v15259_v60, %v15263_v25  ;;  %v19557_v55 = vpack.c.bf16 %v19545_v29, %v19545_v29 }
 0x5ac   : > { %v15391_v37 = vld [vmem:[%s18494_s24 + $0x1f20] sm:$0xff]  ;;  %v19553_v43 = vpack.c.bf16 %v19542_v40, %v19542_v40 }
 0x5ad   : > { %8377 = vmatpush1.bf16.msra.mxu0 %v15724_v62  ;;  %8418 = vmatpush1.bf16.msra.mxu1 %v15852_v3  ;;  %v15901_v47 = vcombine.high %v15387_v4, %v15391_v37  ;;  %v15267_v49 = vld [vmem:[%s18494_s24 + $0x1b40] sm:$0xff]  ;;  %v15900_v57 = vcombine.low %v15387_v4, %v15391_v37 }
 0x5ae   : > { %8378 = vmatprep.subr.bf16.mxu0 %v15733_v33  ;;  %8419 = vmatprep.subr.bf16.mxu1 %v15861_v26  ;;  %v15271_v62 = vld [vmem:[%s18494_s24 + $0x1b60] sm:$0xff]  ;;  %v15772_v26 = vcombine.low %v15259_v60, %v15263_v25  ;;  %v15048_v60 = vld [vmem:[%s18494_s24 + $0x1468] sm:$0xff] }
 0x5af   : > { %v15395_v3 = vld [vmem:[%s18494_s24 + $0x1f40] sm:$0xff]  ;;  %v15781_v58 = vcombine.high %v15267_v49, %v15271_v62 }
 0x5b0   : > { %v15399_v33 = vld [vmem:[%s18494_s24 + $0x1f60] sm:$0xff] }
 0x5b1   : > { %8379 = vmatpush1.bf16.msra.mxu0 %v15732_v51  ;;  %8420 = vmatpush1.bf16.msra.mxu1 %v15860_v61  ;;  %v15909_v59 = vcombine.high %v15395_v3, %v15399_v33  ;;  %v15275_v46 = vld [vmem:[%s18494_s24 + $0x1b80] sm:$0xff]  ;;  %v15908_v50 = vcombine.low %v15395_v3, %v15399_v33 }
 0x5b2   : > { %8380 = vmatprep.subr.bf16.mxu0 %v15741_v1  ;;  %8421 = vmatprep.subr.bf16.mxu1 %v15869_v6  ;;  %v15279_v51 = vld [vmem:[%s18494_s24 + $0x1ba0] sm:$0xff]  ;;  %v15780_v6 = vcombine.low %v15267_v49, %v15271_v62  ;;  %v15056_v49 = vld [vmem:[%s18494_s24 + $0x14a8] sm:$0xff] }
 0x5b3   : > { %v15403_v61 = vld [vmem:[%s18494_s24 + $0x1f80] sm:$0xff]  ;;  %v15789_v42 = vcombine.high %v15275_v46, %v15279_v51 }
 0x5b4   : > { %v15407_v1 = vld [vmem:[%s18494_s24 + $0x1fa0] sm:$0xff] }
 0x5b5   : > { %8381 = vmatpush1.bf16.msra.mxu0 %v15740_v10  ;;  %8422 = vmatpush1.bf16.msra.mxu1 %v15868_v41  ;;  %v15917_v8 = vcombine.high %v15403_v61, %v15407_v1  ;;  %v15283_v9 = vld [vmem:[%s18494_s24 + $0x1bc0] sm:$0xff]  ;;  %v15916_v12 = vcombine.low %v15403_v61, %v15407_v1 }
 0x5b6   : > { %8382 = vmatprep.subr.bf16.mxu0 %v15749_v11  ;;  %8423 = vmatprep.subr.bf16.mxu1 %v15877_v13  ;;  %v15287_v10 = vld [vmem:[%s18494_s24 + $0x1be0] sm:$0xff]  ;;  %v15788_v13 = vcombine.low %v15275_v46, %v15279_v51  ;;  %v15064_v46 = vld [vmem:[%s18494_s24 + $0x14e8] sm:$0xff] }
 0x5b7   : > { %v15411_v41 = vld [vmem:[%s18494_s24 + $0x1fc0] sm:$0xff]  ;;  %v15797_v14 = vcombine.high %v15283_v9, %v15287_v10 }
 0x5b8   : > { %v15415_v11 = vld [vmem:[%s18494_s24 + $0x1fe0] sm:$0xff] }
 0x5b9   : > { %8383 = vmatpush1.bf16.msra.mxu0 %v15748_v17  ;;  %8424 = vmatpush1.bf16.msra.mxu1 %v15876_v18  ;;  %v15925_v16 = vcombine.high %v15411_v41, %v15415_v11  ;;  %v14912_v17 = vld [vmem:[%s18494_s24 + $0x1028] sm:$0xff]  ;;  %v15924_v23 = vcombine.low %v15411_v41, %v15415_v11 }
 0x5ba   : > { %8384 = vmatprep.subr.bf16.mxu0 %v15757_v21  ;;  %8425 = vmatprep.subr.bf16.mxu1 %v15885_v27  ;;  %v15036_v18 = vld [vmem:[%s18494_s24 + $0x1408] sm:$0xff]  ;;  %v15796_v27 = vcombine.low %v15283_v9, %v15287_v10  ;;  %v15423_v35 = vcombine.high %v14908_v15, %v14912_v17  ;;  %v15422_v25 = vcombine.low %v14908_v15, %v14912_v17 }
 0x5bb   : > { %v15040_v21 = vld [vmem:[%s18494_s24 + $0x1428] sm:$0xff] }
 0x5bc   : > { %v15550_v4 = vcombine.low %v15036_v18, %v15040_v21  ;;  %v15072_v9 = vld [vmem:[%s18494_s24 + $0x1528] sm:$0xff] }
 0x5bd   : > { %8385 = vmatpush1.bf16.msra.mxu0 %v15756_v36  ;;  %8426 = vmatpush1.bf16.msra.mxu1 %v15884_v38  ;;  %v15551_v36 = vcombine.high %v15036_v18, %v15040_v21  ;;  %v14916_v38 = vld [vmem:[%s18494_s24 + $0x1048] sm:$0xff] }
 0x5be   : > { %8386 = vmatprep.subr.bf16.mxu0 %v15765_v19  ;;  %8427 = vmatprep.subr.bf16.mxu1 %v15893_v24  ;;  %v14920_v19 = vld [vmem:[%s18494_s24 + $0x1068] sm:$0xff] }
 0x5bf   : > { %v15044_v24 = vld [vmem:[%s18494_s24 + $0x1448] sm:$0xff]  ;;  %v15431_v37 = vcombine.high %v14916_v38, %v14920_v19  ;;  %v15430_v62 = vcombine.low %v14916_v38, %v14920_v19 }
 0x5c0   : > { %v15558_v3 = vcombine.low %v15044_v24, %v15048_v60  ;;  %v15080_v15 = vld [vmem:[%s18494_s24 + $0x1568] sm:$0xff] }
 0x5c1   : > { %8387 = vmatpush1.bf16.msra.mxu0 %v15764_v7  ;;  %8428 = vmatpush1.bf16.msra.mxu1 %v15892_v44  ;;  %v15559_v7 = vcombine.high %v15044_v24, %v15048_v60  ;;  %v14924_v44 = vld [vmem:[%s18494_s24 + $0x1088] sm:$0xff] }
 0x5c2   : > { %8388 = vmatprep.subr.bf16.mxu0 %v15773_v45  ;;  %8429 = vmatprep.subr.bf16.mxu1 %v15901_v47  ;;  %v14928_v45 = vld [vmem:[%s18494_s24 + $0x10a8] sm:$0xff] }
 0x5c3   : > { %v15052_v47 = vld [vmem:[%s18494_s24 + $0x1488] sm:$0xff]  ;;  %v15439_v33 = vcombine.high %v14924_v44, %v14928_v45  ;;  %v15438_v51 = vcombine.low %v14924_v44, %v14928_v45 }
 0x5c4   : > { %v15566_v61 = vcombine.low %v15052_v47, %v15056_v49  ;;  %v15088_v38 = vld [vmem:[%s18494_s24 + $0x15a8] sm:$0xff] }
 0x5c5   : > { %8389 = vmatpush1.bf16.msra.mxu0 %v15772_v26  ;;  %8430 = vmatpush1.bf16.msra.mxu1 %v15900_v57  ;;  %v15567_v26 = vcombine.high %v15052_v47, %v15056_v49  ;;  %v14932_v57 = vld [vmem:[%s18494_s24 + $0x10c8] sm:$0xff] }
 0x5c6   : > { %8390 = vmatprep.subr.bf16.mxu0 %v15781_v58  ;;  %8431 = vmatprep.subr.bf16.mxu1 %v15909_v59  ;;  %v14936_v58 = vld [vmem:[%s18494_s24 + $0x10e8] sm:$0xff] }
 0x5c7   : > { %v15060_v59 = vld [vmem:[%s18494_s24 + $0x14c8] sm:$0xff]  ;;  %v15447_v1 = vcombine.high %v14932_v57, %v14936_v58  ;;  %v15446_v10 = vcombine.low %v14932_v57, %v14936_v58 }
 0x5c8   : > { %v15574_v41 = vcombine.low %v15060_v59, %v15064_v46  ;;  %v15096_v44 = vld [vmem:[%s18494_s24 + $0x15e8] sm:$0xff] }
 0x5c9   : > { %8391 = vmatpush1.bf16.msra.mxu0 %v15780_v6  ;;  %8432 = vmatpush1.bf16.msra.mxu1 %v15908_v50  ;;  %v15575_v6 = vcombine.high %v15060_v59, %v15064_v46  ;;  %v14940_v50 = vld [vmem:[%s18494_s24 + $0x1108] sm:$0xff] }
 0x5ca   : > { %8392 = vmatprep.subr.bf16.mxu0 %v15789_v42  ;;  %8433 = vmatprep.subr.bf16.mxu1 %v15917_v8  ;;  %v14944_v42 = vld [vmem:[%s18494_s24 + $0x1128] sm:$0xff] }
 0x5cb   : > { %v15068_v8 = vld [vmem:[%s18494_s24 + $0x1508] sm:$0xff]  ;;  %v15455_v11 = vcombine.high %v14940_v50, %v14944_v42  ;;  %v15454_v17 = vcombine.low %v14940_v50, %v14944_v42 }
 0x5cc   : > { %v15582_v18 = vcombine.low %v15068_v8, %v15072_v9  ;;  %v15104_v57 = vld [vmem:[%s18494_s24 + $0x1628] sm:$0xff] }
 0x5cd   : > { %8393 = vmatpush1.bf16.msra.mxu0 %v15788_v13  ;;  %8434 = vmatpush1.bf16.msra.mxu1 %v15916_v12  ;;  %v15583_v13 = vcombine.high %v15068_v8, %v15072_v9  ;;  %v14948_v12 = vld [vmem:[%s18494_s24 + $0x1148] sm:$0xff] }
 0x5ce   : > { %8394 = vmatprep.subr.bf16.mxu0 %v15797_v14  ;;  %8435 = vmatprep.subr.bf16.mxu1 %v15925_v16  ;;  %v14952_v14 = vld [vmem:[%s18494_s24 + $0x1168] sm:$0xff] }
 0x5cf   : > { %v15076_v16 = vld [vmem:[%s18494_s24 + $0x1548] sm:$0xff]  ;;  %v15463_v21 = vcombine.high %v14948_v12, %v14952_v14  ;;  %v15462_v19 = vcombine.low %v14948_v12, %v14952_v14 }
 0x5d0   : > { %v15590_v24 = vcombine.low %v15076_v16, %v15080_v15  ;;  %v15112_v50 = vld [vmem:[%s18494_s24 + $0x1668] sm:$0xff] }
 0x5d1   : > { %8395 = vmatpush1.bf16.msra.mxu0 %v15796_v27  ;;  %8436 = vmatpush1.bf16.msra.mxu1 %v15924_v23  ;;  %v15591_v27 = vcombine.high %v15076_v16, %v15080_v15  ;;  %v14956_v23 = vld [vmem:[%s18494_s24 + $0x1188] sm:$0xff] }
 0x5d2   : > { %8446 = vmatprep.subr.bf16.mxu0 %v15423_v35  ;;  %8487 = vmatprep.subr.bf16.mxu1 %v15551_v36  ;;  %v14960_v35 = vld [vmem:[%s18494_s24 + $0x11a8] sm:$0xff] }
 0x5d3   : > { %v15084_v36 = vld [vmem:[%s18494_s24 + $0x1588] sm:$0xff]  ;;  %v15471_v60 = vcombine.high %v14956_v23, %v14960_v35  ;;  %v15470_v45 = vcombine.low %v14956_v23, %v14960_v35 }
 0x5d4   : > { %8397 = vmatmul.mubr.bf16.vlgmr.msra.gmra.mrb[44].mxu0 %v19553_v43  ;;  %8438 = vmatmul.mubr.bf16.vlgmr.msra.gmra.mrb[44].mxu1 %v19557_v55  ;;  %v15598_v47 = vcombine.low %v15084_v36, %v15088_v38  ;;  %v15120_v12 = vld [vmem:[%s18494_s24 + $0x16a8] sm:$0xff] }
 0x5d5   : > { %8447 = vmatpush1.bf16.msra.mxu0 %v15422_v25  ;;  %8478 = vmatprep.mubr.bf16.mxu0 %v19441_v48  ;;  %v15599_v25 = vcombine.high %v15084_v36, %v15088_v38  ;;  %v15128_v23 = vld [vmem:[%s18494_s24 + $0x16e8] sm:$0xff] }
 0x5d6   : > { %8488 = vmatpush1.bf16.msra.mxu1 %v15550_v4  ;;  %8519 = vmatprep.mubr.bf16.mxu1 %v19445_v52  ;;  %v14964_v4 = vld [vmem:[%s18494_s24 + $0x11c8] sm:$0xff] }
 0x5d7   : > { %8448 = vmatprep.subr.bf16.mxu0 %v15431_v37  ;;  %8489 = vmatprep.subr.bf16.mxu1 %v15559_v7  ;;  %v14968_v37 = vld [vmem:[%s18494_s24 + $0x11e8] sm:$0xff] }
 0x5d8   : > { %v15092_v7 = vld [vmem:[%s18494_s24 + $0x15c8] sm:$0xff]  ;;  %v15479_v49 = vcombine.high %v14964_v4, %v14968_v37  ;;  %v15478_v58 = vcombine.low %v14964_v4, %v14968_v37 }
 0x5d9   : > { %8449 = vmatpush1.bf16.msra.mxu0 %v15430_v62  ;;  %v15607_v62 = vcombine.high %v15092_v7, %v15096_v44  ;;  %v15606_v59 = vcombine.low %v15092_v7, %v15096_v44  ;;  %v15136_v4 = vld [vmem:[%s18494_s24 + $0x1728] sm:$0xff] }
 0x5da   : > { %8490 = vmatpush1.bf16.msra.mxu1 %v15558_v3  ;;  %8450 = vmatprep.subr.bf16.mxu0 %v15439_v33  ;;  %v14972_v3 = vld [vmem:[%s18494_s24 + $0x1208] sm:$0xff] }
 0x5db   : > { %8491 = vmatprep.subr.bf16.mxu1 %v15567_v26  ;;  %v14976_v33 = vld [vmem:[%s18494_s24 + $0x1228] sm:$0xff] }
 0x5dc   : > { %v15100_v26 = vld [vmem:[%s18494_s24 + $0x1608] sm:$0xff]  ;;  %v15487_v46 = vcombine.high %v14972_v3, %v14976_v33  ;;  %v15486_v42 = vcombine.low %v14972_v3, %v14976_v33 }
 0x5dd   : > { %8451 = vmatpush1.bf16.msra.mxu0 %v15438_v51  ;;  %v15615_v51 = vcombine.high %v15100_v26, %v15104_v57  ;;  %v15614_v8 = vcombine.low %v15100_v26, %v15104_v57  ;;  %v15144_v3 = vld [vmem:[%s18494_s24 + $0x1768] sm:$0xff] }
 0x5de   : > { %8492 = vmatpush1.bf16.msra.mxu1 %v15566_v61  ;;  %8452 = vmatprep.subr.bf16.mxu0 %v15447_v1  ;;  %v14980_v61 = vld [vmem:[%s18494_s24 + $0x1248] sm:$0xff] }
 0x5df   : > { %8493 = vmatprep.subr.bf16.mxu1 %v15575_v6  ;;  %v14984_v1 = vld [vmem:[%s18494_s24 + $0x1268] sm:$0xff] }
 0x5e0   : > { %v15108_v6 = vld [vmem:[%s18494_s24 + $0x1648] sm:$0xff]  ;;  %v15495_v9 = vcombine.high %v14980_v61, %v14984_v1  ;;  %v15494_v14 = vcombine.low %v14980_v61, %v14984_v1 }
 0x5e1   : > { %8453 = vmatpush1.bf16.msra.mxu0 %v15446_v10  ;;  %v15623_v10 = vcombine.high %v15108_v6, %v15112_v50  ;;  %v15622_v16 = vcombine.low %v15108_v6, %v15112_v50  ;;  %v15152_v61 = vld [vmem:[%s18494_s24 + $0x17a8] sm:$0xff] }
 0x5e2   : > { %8494 = vmatpush1.bf16.msra.mxu1 %v15574_v41  ;;  %8454 = vmatprep.subr.bf16.mxu0 %v15455_v11  ;;  %v14988_v41 = vld [vmem:[%s18494_s24 + $0x1288] sm:$0xff] }
 0x5e3   : > { %8495 = vmatprep.subr.bf16.mxu1 %v15583_v13  ;;  %v14992_v11 = vld [vmem:[%s18494_s24 + $0x12a8] sm:$0xff] }
 0x5e4   : > { %v15116_v13 = vld [vmem:[%s18494_s24 + $0x1688] sm:$0xff]  ;;  %v15503_v15 = vcombine.high %v14988_v41, %v14992_v11  ;;  %v15502_v35 = vcombine.low %v14988_v41, %v14992_v11 }
 0x5e5   : > { %8455 = vmatpush1.bf16.msra.mxu0 %v15454_v17  ;;  %v15631_v17 = vcombine.high %v15116_v13, %v15120_v12  ;;  %v15630_v36 = vcombine.low %v15116_v13, %v15120_v12  ;;  %v15160_v41 = vld [vmem:[%s18494_s24 + $0x17e8] sm:$0xff] }
 0x5e6   : > { %8496 = vmatpush1.bf16.msra.mxu1 %v15582_v18  ;;  %8456 = vmatprep.subr.bf16.mxu0 %v15463_v21  ;;  %v14996_v18 = vld [vmem:[%s18494_s24 + $0x12c8] sm:$0xff] }
 0x5e7   : > { %8497 = vmatprep.subr.bf16.mxu1 %v15591_v27  ;;  %v15000_v21 = vld [vmem:[%s18494_s24 + $0x12e8] sm:$0xff] }
 0x5e8   : > { %v15124_v27 = vld [vmem:[%s18494_s24 + $0x16c8] sm:$0xff]  ;;  %v15511_v38 = vcombine.high %v14996_v18, %v15000_v21  ;;  %v15510_v37 = vcombine.low %v14996_v18, %v15000_v21 }
 0x5e9   : > { %8457 = vmatpush1.bf16.msra.mxu0 %v15462_v19  ;;  %v15639_v19 = vcombine.high %v15124_v27, %v15128_v23  ;;  %v15638_v7 = vcombine.low %v15124_v27, %v15128_v23  ;;  %v15296_v18 = vld [vmem:[%s18494_s24 + $0x1c28] sm:$0xff] }
 0x5ea   : > { %8498 = vmatpush1.bf16.msra.mxu1 %v15590_v24  ;;  %8458 = vmatprep.subr.bf16.mxu0 %v15471_v60  ;;  %v15004_v24 = vld [vmem:[%s18494_s24 + $0x1308] sm:$0xff] }
 0x5eb   : > { %8499 = vmatprep.subr.bf16.mxu1 %v15599_v25  ;;  %v15008_v60 = vld [vmem:[%s18494_s24 + $0x1328] sm:$0xff] }
 0x5ec   : > { %v15132_v25 = vld [vmem:[%s18494_s24 + $0x1708] sm:$0xff]  ;;  %v15519_v44 = vcombine.high %v15004_v24, %v15008_v60  ;;  %v15518_v33 = vcombine.low %v15004_v24, %v15008_v60 }
 0x5ed   : > { %8459 = vmatpush1.bf16.msra.mxu0 %v15470_v45  ;;  %v15647_v45 = vcombine.high %v15132_v25, %v15136_v4  ;;  %v15646_v26 = vcombine.low %v15132_v25, %v15136_v4  ;;  %v15300_v24 = vld [vmem:[%s18494_s24 + $0x1c48] sm:$0xff] }
 0x5ee   : > { %8500 = vmatpush1.bf16.msra.mxu1 %v15598_v47  ;;  %8460 = vmatprep.subr.bf16.mxu0 %v15479_v49  ;;  %v15012_v47 = vld [vmem:[%s18494_s24 + $0x1348] sm:$0xff] }
 0x5ef   : > { %8501 = vmatprep.subr.bf16.mxu1 %v15607_v62  ;;  %v15016_v49 = vld [vmem:[%s18494_s24 + $0x1368] sm:$0xff] }
 0x5f0   : > { %v15140_v62 = vld [vmem:[%s18494_s24 + $0x1748] sm:$0xff]  ;;  %v15527_v57 = vcombine.high %v15012_v47, %v15016_v49  ;;  %v15526_v1 = vcombine.low %v15012_v47, %v15016_v49 }
 0x5f1   : > { %8461 = vmatpush1.bf16.msra.mxu0 %v15478_v58  ;;  %v15655_v58 = vcombine.high %v15140_v62, %v15144_v3  ;;  %v15654_v6 = vcombine.low %v15140_v62, %v15144_v3  ;;  %v15304_v60 = vld [vmem:[%s18494_s24 + $0x1c68] sm:$0xff] }
 0x5f2   : > { %8502 = vmatpush1.bf16.msra.mxu1 %v15606_v59  ;;  %8462 = vmatprep.subr.bf16.mxu0 %v15487_v46  ;;  %v15020_v59 = vld [vmem:[%s18494_s24 + $0x1388] sm:$0xff]  ;;  %v15814_v62 = vcombine.low %v15300_v24, %v15304_v60 }
 0x5f3   : > { %8503 = vmatprep.subr.bf16.mxu1 %v15615_v51  ;;  %v15024_v46 = vld [vmem:[%s18494_s24 + $0x13a8] sm:$0xff] }
 0x5f4   : > { %v15148_v51 = vld [vmem:[%s18494_s24 + $0x1788] sm:$0xff]  ;;  %v15535_v50 = vcombine.high %v15020_v59, %v15024_v46  ;;  %v15534_v11 = vcombine.low %v15020_v59, %v15024_v46 }
 0x5f5   : > { %8463 = vmatpush1.bf16.msra.mxu0 %v15486_v42  ;;  %v15663_v42 = vcombine.high %v15148_v51, %v15152_v61  ;;  %v15662_v13 = vcombine.low %v15148_v51, %v15152_v61  ;;  %v15312_v47 = vld [vmem:[%s18494_s24 + $0x1ca8] sm:$0xff] }
 0x5f6   : > { %8504 = vmatpush1.bf16.msra.mxu1 %v15614_v8  ;;  %8464 = vmatprep.subr.bf16.mxu0 %v15495_v9  ;;  %v15028_v8 = vld [vmem:[%s18494_s24 + $0x13c8] sm:$0xff] }
 0x5f7   : > { %8505 = vmatprep.subr.bf16.mxu1 %v15623_v10  ;;  %v15032_v9 = vld [vmem:[%s18494_s24 + $0x13e8] sm:$0xff] }
 0x5f8   : > { %v15156_v10 = vld [vmem:[%s18494_s24 + $0x17c8] sm:$0xff]  ;;  %v15543_v12 = vcombine.high %v15028_v8, %v15032_v9  ;;  %v15542_v21 = vcombine.low %v15028_v8, %v15032_v9 }
 0x5f9   : > { %8465 = vmatpush1.bf16.msra.mxu0 %v15494_v14  ;;  %v15671_v14 = vcombine.high %v15156_v10, %v15160_v41  ;;  %v15670_v27 = vcombine.low %v15156_v10, %v15160_v41  ;;  %v15320_v59 = vld [vmem:[%s18494_s24 + $0x1ce8] sm:$0xff] }
 0x5fa   : > { %8506 = vmatpush1.bf16.msra.mxu1 %v15622_v16  ;;  %8466 = vmatprep.subr.bf16.mxu0 %v15503_v15  ;;  %v15164_v16 = vld [vmem:[%s18494_s24 + $0x1808] sm:$0xff] }
 0x5fb   : > { %8507 = vmatprep.subr.bf16.mxu1 %v15631_v17  ;;  %v15168_v15 = vld [vmem:[%s18494_s24 + $0x1828] sm:$0xff] }
 0x5fc   : > { %v15292_v17 = vld [vmem:[%s18494_s24 + $0x1c08] sm:$0xff]  ;;  %v15679_v23 = vcombine.high %v15164_v16, %v15168_v15 }
 0x5fd   : > { %8467 = vmatpush1.bf16.msra.mxu0 %v15502_v35  ;;  %v15807_v35 = vcombine.high %v15292_v17, %v15296_v18  ;;  %v15806_v25 = vcombine.low %v15292_v17, %v15296_v18  ;;  %v15328_v8 = vld [vmem:[%s18494_s24 + $0x1d28] sm:$0xff] }
 0x5fe   : > { %8508 = vmatpush1.bf16.msra.mxu1 %v15630_v36  ;;  %8468 = vmatprep.subr.bf16.mxu0 %v15511_v38  ;;  %v15172_v36 = vld [vmem:[%s18494_s24 + $0x1848] sm:$0xff] }
 0x5ff   : > { %8509 = vmatprep.subr.bf16.mxu1 %v15639_v19  ;;  %v15176_v38 = vld [vmem:[%s18494_s24 + $0x1868] sm:$0xff]  ;;  %v15678_v19 = vcombine.low %v15164_v16, %v15168_v15 }
 0x600   : > { %v15687_v4 = vcombine.high %v15172_v36, %v15176_v38  ;;  %v15686_v49 = vcombine.low %v15172_v36, %v15176_v38  ;;  %v15336_v16 = vld [vmem:[%s18494_s24 + $0x1d68] sm:$0xff] }
 0x601   : > { %8469 = vmatpush1.bf16.msra.mxu0 %v15510_v37  ;;  %v15180_v37 = vld [vmem:[%s18494_s24 + $0x1888] sm:$0xff] }
 0x602   : > { %8510 = vmatpush1.bf16.msra.mxu1 %v15638_v7  ;;  %8470 = vmatprep.subr.bf16.mxu0 %v15519_v44  ;;  %v15184_v7 = vld [vmem:[%s18494_s24 + $0x18a8] sm:$0xff]  ;;  %v15815_v44 = vcombine.high %v15300_v24, %v15304_v60 }
 0x603   : > { %8511 = vmatprep.subr.bf16.mxu1 %v15647_v45  ;;  %v15308_v45 = vld [vmem:[%s18494_s24 + $0x1c88] sm:$0xff]  ;;  %v15695_v3 = vcombine.high %v15180_v37, %v15184_v7  ;;  %v15694_v46 = vcombine.low %v15180_v37, %v15184_v7 }
 0x604   : > { %v15822_v51 = vcombine.low %v15308_v45, %v15312_v47  ;;  %v15344_v36 = vld [vmem:[%s18494_s24 + $0x1da8] sm:$0xff] }
 0x605   : > { %8471 = vmatpush1.bf16.msra.mxu0 %v15518_v33  ;;  %v15823_v33 = vcombine.high %v15308_v45, %v15312_v47  ;;  %v15348_v37 = vld [vmem:[%s18494_s24 + $0x1dc8] sm:$0xff] }
 0x606   : > { %8512 = vmatpush1.bf16.msra.mxu1 %v15646_v26  ;;  %8472 = vmatprep.subr.bf16.mxu0 %v15527_v57  ;;  %v15188_v26 = vld [vmem:[%s18494_s24 + $0x18c8] sm:$0xff] }
 0x607   : > { %8513 = vmatprep.subr.bf16.mxu1 %v15655_v58  ;;  %v15192_v57 = vld [vmem:[%s18494_s24 + $0x18e8] sm:$0xff] }
 0x608   : > { %v15316_v58 = vld [vmem:[%s18494_s24 + $0x1cc8] sm:$0xff]  ;;  %v15703_v61 = vcombine.high %v15188_v26, %v15192_v57  ;;  %v15702_v9 = vcombine.low %v15188_v26, %v15192_v57 }
 0x609   : > { %8473 = vmatpush1.bf16.msra.mxu0 %v15526_v1  ;;  %v15831_v1 = vcombine.high %v15316_v58, %v15320_v59  ;;  %v15830_v10 = vcombine.low %v15316_v58, %v15320_v59  ;;  %v15352_v7 = vld [vmem:[%s18494_s24 + $0x1de8] sm:$0xff] }
 0x60a   : > { %8514 = vmatpush1.bf16.msra.mxu1 %v15654_v6  ;;  %8474 = vmatprep.subr.bf16.mxu0 %v15535_v50  ;;  %v15196_v6 = vld [vmem:[%s18494_s24 + $0x1908] sm:$0xff]  ;;  %v15862_v58 = vcombine.low %v15348_v37, %v15352_v7 }
 0x60b   : > { %8515 = vmatprep.subr.bf16.mxu1 %v15663_v42  ;;  %v15200_v50 = vld [vmem:[%s18494_s24 + $0x1928] sm:$0xff] }
 0x60c   : > { %v15324_v42 = vld [vmem:[%s18494_s24 + $0x1d08] sm:$0xff]  ;;  %v15711_v41 = vcombine.high %v15196_v6, %v15200_v50  ;;  %v15710_v15 = vcombine.low %v15196_v6, %v15200_v50 }
 0x60d   : > { %8475 = vmatpush1.bf16.msra.mxu0 %v15534_v11  ;;  %v15839_v11 = vcombine.high %v15324_v42, %v15328_v8  ;;  %v15838_v17 = vcombine.low %v15324_v42, %v15328_v8  ;;  %v15360_v26 = vld [vmem:[%s18494_s24 + $0x1e28] sm:$0xff] }
 0x60e   : > { %8516 = vmatpush1.bf16.msra.mxu1 %v15662_v13  ;;  %8476 = vmatprep.subr.bf16.mxu0 %v15543_v12  ;;  %v15204_v13 = vld [vmem:[%s18494_s24 + $0x1948] sm:$0xff] }
 0x60f   : > { %8517 = vmatprep.subr.bf16.mxu1 %v15671_v14  ;;  %v15208_v12 = vld [vmem:[%s18494_s24 + $0x1968] sm:$0xff] }
 0x610   : > { %v15332_v14 = vld [vmem:[%s18494_s24 + $0x1d48] sm:$0xff]  ;;  %v15719_v18 = vcombine.high %v15204_v13, %v15208_v12  ;;  %v15718_v38 = vcombine.low %v15204_v13, %v15208_v12 }
 0x611   : > { %8477 = vmatpush1.bf16.msra.mxu0 %v15542_v21  ;;  %v15847_v21 = vcombine.high %v15332_v14, %v15336_v16  ;;  %v15368_v6 = vld [vmem:[%s18494_s24 + $0x1e68] sm:$0xff] }
 0x612   : > { %8518 = vmatpush1.bf16.msra.mxu1 %v15670_v27  ;;  %8528 = vmatprep.subr.bf16.mxu0 %v15679_v23  ;;  %v15212_v27 = vld [vmem:[%s18494_s24 + $0x1988] sm:$0xff] }
 0x613   : > { %8569 = vmatprep.subr.bf16.mxu1 %v15807_v35  ;;  %v15216_v23 = vld [vmem:[%s18494_s24 + $0x19a8] sm:$0xff] }
 0x614   : > { %8479 = vmatmul.mubr.bf16.vlgmr.msra.gmra.mrb[48].mxu0 %v19449_v28  ;;  %v15340_v35 = vld [vmem:[%s18494_s24 + $0x1d88] sm:$0xff]  ;;  %v15727_v24 = vcombine.high %v15212_v27, %v15216_v23 }
 0x615   : > { %8520 = vmatmul.mubr.bf16.vlgmr.msra.gmra.mrb[48].mxu1 %v19453_v31  ;;  %8529 = vmatpush1.bf16.msra.mxu0 %v15678_v19  ;;  %v15846_v19 = vcombine.low %v15332_v14, %v15336_v16  ;;  %v15855_v60 = vcombine.high %v15340_v35, %v15344_v36  ;;  %v15854_v45 = vcombine.low %v15340_v35, %v15344_v36  ;;  %v15376_v13 = vld [vmem:[%s18494_s24 + $0x1ea8] sm:$0xff] }
 0x616   : > { %8560 = vmatprep.mubr.bf16.mxu0 %v19481_v2  ;;  %8570 = vmatpush1.bf16.msra.mxu1 %v15806_v25  ;;  %v15220_v25 = vld [vmem:[%s18494_s24 + $0x19c8] sm:$0xff] }
 0x617   : > { %8601 = vmatprep.mubr.bf16.mxu1 %v19485_v5  ;;  %8530 = vmatprep.subr.bf16.mxu0 %v15687_v4  ;;  %v15224_v4 = vld [vmem:[%s18494_s24 + $0x19e8] sm:$0xff] }
 0x618   : > { %8571 = vmatprep.subr.bf16.mxu1 %v15815_v44  ;;  %v15726_v44 = vcombine.low %v15212_v27, %v15216_v23  ;;  %v15735_v47 = vcombine.high %v15220_v25, %v15224_v4  ;;  %v15734_v57 = vcombine.low %v15220_v25, %v15224_v4  ;;  %v15384_v27 = vld [vmem:[%s18494_s24 + $0x1ee8] sm:$0xff] }
 0x619   : > { %8531 = vmatpush1.bf16.msra.mxu0 %v15686_v49  ;;  %v15863_v49 = vcombine.high %v15348_v37, %v15352_v7  ;;  %v15392_v25 = vld [vmem:[%s18494_s24 + $0x1f28] sm:$0xff] }
 0x61a   : > { %8572 = vmatpush1.bf16.msra.mxu1 %v15814_v62  ;;  %8532 = vmatprep.subr.bf16.mxu0 %v15695_v3  ;;  %v15228_v62 = vld [vmem:[%s18494_s24 + $0x1a08] sm:$0xff] }
 0x61b   : > { %8573 = vmatprep.subr.bf16.mxu1 %v15823_v33  ;;  %v15232_v3 = vld [vmem:[%s18494_s24 + $0x1a28] sm:$0xff] }
 0x61c   : > { %v15356_v33 = vld [vmem:[%s18494_s24 + $0x1e08] sm:$0xff]  ;;  %v15743_v59 = vcombine.high %v15228_v62, %v15232_v3  ;;  %v15742_v50 = vcombine.low %v15228_v62, %v15232_v3 }
 0x61d   : > { %8533 = vmatpush1.bf16.msra.mxu0 %v15694_v46  ;;  %v15871_v46 = vcombine.high %v15356_v33, %v15360_v26  ;;  %v15870_v42 = vcombine.low %v15356_v33, %v15360_v26  ;;  %v15400_v62 = vld [vmem:[%s18494_s24 + $0x1f68] sm:$0xff] }
 0x61e   : > { %8574 = vmatpush1.bf16.msra.mxu1 %v15822_v51  ;;  %8534 = vmatprep.subr.bf16.mxu0 %v15703_v61  ;;  %v15236_v51 = vld [vmem:[%s18494_s24 + $0x1a48] sm:$0xff] }
 0x61f   : > { %8575 = vmatprep.subr.bf16.mxu1 %v15831_v1  ;;  %v15240_v61 = vld [vmem:[%s18494_s24 + $0x1a68] sm:$0xff] }
 0x620   : > { %v15364_v1 = vld [vmem:[%s18494_s24 + $0x1e48] sm:$0xff]  ;;  %v15751_v8 = vcombine.high %v15236_v51, %v15240_v61  ;;  %v15750_v12 = vcombine.low %v15236_v51, %v15240_v61 }
 0x621   : > { %8535 = vmatpush1.bf16.msra.mxu0 %v15702_v9  ;;  %v15879_v9 = vcombine.high %v15364_v1, %v15368_v6  ;;  %v15878_v14 = vcombine.low %v15364_v1, %v15368_v6  ;;  %v15408_v51 = vld [vmem:[%s18494_s24 + $0x1fa8] sm:$0xff] }
 0x622   : > { %8576 = vmatpush1.bf16.msra.mxu1 %v15830_v10  ;;  %8536 = vmatprep.subr.bf16.mxu0 %v15711_v41  ;;  %v15244_v10 = vld [vmem:[%s18494_s24 + $0x1a88] sm:$0xff] }
 0x623   : > { %8577 = vmatprep.subr.bf16.mxu1 %v15839_v11  ;;  %v15248_v41 = vld [vmem:[%s18494_s24 + $0x1aa8] sm:$0xff] }
 0x624   : > { %v15372_v11 = vld [vmem:[%s18494_s24 + $0x1e88] sm:$0xff]  ;;  %v15759_v16 = vcombine.high %v15244_v10, %v15248_v41  ;;  %v15758_v23 = vcombine.low %v15244_v10, %v15248_v41 }
 0x625   : > { %8537 = vmatpush1.bf16.msra.mxu0 %v15710_v15  ;;  %v15887_v15 = vcombine.high %v15372_v11, %v15376_v13  ;;  %v15886_v35 = vcombine.low %v15372_v11, %v15376_v13  ;;  %v15416_v10 = vld [vmem:[%s18494_s24 + $0x1fe8] sm:$0xff] }
 0x626   : > { %8578 = vmatpush1.bf16.msra.mxu1 %v15838_v17  ;;  %8538 = vmatprep.subr.bf16.mxu0 %v15719_v18  ;;  %v15252_v17 = vld [vmem:[%s18494_s24 + $0x1ac8] sm:$0xff] }
 0x627   : > { %8579 = vmatprep.subr.bf16.mxu1 %v15847_v21  ;;  %v15256_v18 = vld [vmem:[%s18494_s24 + $0x1ae8] sm:$0xff] }
 0x628   : > { %v15380_v21 = vld [vmem:[%s18494_s24 + $0x1ec8] sm:$0xff]  ;;  %v15767_v36 = vcombine.high %v15252_v17, %v15256_v18  ;;  %v15766_v4 = vcombine.low %v15252_v17, %v15256_v18  ;;  %v15041_v17 = vld [vmem:[%s18494_s24 + $0x1430] sm:$0xff] }
 0x629   : > { %8539 = vmatpush1.bf16.msra.mxu0 %v15718_v38  ;;  %v15895_v38 = vcombine.high %v15380_v21, %v15384_v27  ;;  %v15894_v37 = vcombine.low %v15380_v21, %v15384_v27 }
 0x62a   : > { %8580 = vmatpush1.bf16.msra.mxu1 %v15846_v19  ;;  %8540 = vmatprep.subr.bf16.mxu0 %v15727_v24  ;;  %v15260_v19 = vld [vmem:[%s18494_s24 + $0x1b08] sm:$0xff] }
 0x62b   : > { %8581 = vmatprep.subr.bf16.mxu1 %v15855_v60  ;;  %v15264_v24 = vld [vmem:[%s18494_s24 + $0x1b28] sm:$0xff] }
 0x62c   : > { %v15388_v60 = vld [vmem:[%s18494_s24 + $0x1f08] sm:$0xff]  ;;  %v15775_v7 = vcombine.high %v15260_v19, %v15264_v24  ;;  %v15774_v3 = vcombine.low %v15260_v19, %v15264_v24  ;;  %v15045_v19 = vld [vmem:[%s18494_s24 + $0x1450] sm:$0xff] }
 0x62d   : > { %8541 = vmatpush1.bf16.msra.mxu0 %v15726_v44  ;;  %v15903_v44 = vcombine.high %v15388_v60, %v15392_v25  ;;  %v15902_v33 = vcombine.low %v15388_v60, %v15392_v25  ;;  %v15049_v24 = vld [vmem:[%s18494_s24 + $0x1470] sm:$0xff] }
 0x62e   : > { %8582 = vmatpush1.bf16.msra.mxu1 %v15854_v45  ;;  %8542 = vmatprep.subr.bf16.mxu0 %v15735_v47  ;;  %v15268_v45 = vld [vmem:[%s18494_s24 + $0x1b48] sm:$0xff] }
 0x62f   : > { %8583 = vmatprep.subr.bf16.mxu1 %v15863_v49  ;;  %v15272_v47 = vld [vmem:[%s18494_s24 + $0x1b68] sm:$0xff] }
 0x630   : > { %v15396_v49 = vld [vmem:[%s18494_s24 + $0x1f48] sm:$0xff]  ;;  %v15783_v26 = vcombine.high %v15268_v45, %v15272_v47  ;;  %v15782_v61 = vcombine.low %v15268_v45, %v15272_v47  ;;  %v15057_v45 = vld [vmem:[%s18494_s24 + $0x14b0] sm:$0xff] }
 0x631   : > { %8543 = vmatpush1.bf16.msra.mxu0 %v15734_v57  ;;  %v15911_v57 = vcombine.high %v15396_v49, %v15400_v62  ;;  %v15910_v1 = vcombine.low %v15396_v49, %v15400_v62  ;;  %v15560_v49 = vcombine.low %v15045_v19, %v15049_v24 }
 0x632   : > { %8584 = vmatpush1.bf16.msra.mxu1 %v15862_v58  ;;  %8544 = vmatprep.subr.bf16.mxu0 %v15743_v59  ;;  %v15276_v58 = vld [vmem:[%s18494_s24 + $0x1b88] sm:$0xff] }
 0x633   : > { %8585 = vmatprep.subr.bf16.mxu1 %v15871_v46  ;;  %v15280_v59 = vld [vmem:[%s18494_s24 + $0x1ba8] sm:$0xff] }
 0x634   : > { %v15404_v46 = vld [vmem:[%s18494_s24 + $0x1f88] sm:$0xff]  ;;  %v15791_v6 = vcombine.high %v15276_v58, %v15280_v59  ;;  %v15790_v41 = vcombine.low %v15276_v58, %v15280_v59  ;;  %v15065_v58 = vld [vmem:[%s18494_s24 + $0x14f0] sm:$0xff] }
 0x635   : > { %8545 = vmatpush1.bf16.msra.mxu0 %v15742_v50  ;;  %v15919_v50 = vcombine.high %v15404_v46, %v15408_v51  ;;  %v15918_v11 = vcombine.low %v15404_v46, %v15408_v51  ;;  %v15419_v46 = vld [vmem:[%s18504_s20 + $0x8] sm:$0xff] }
 0x636   : > { %8586 = vmatpush1.bf16.msra.mxu1 %v15870_v42  ;;  %8546 = vmatprep.subr.bf16.mxu0 %v15751_v8  ;;  %v15284_v42 = vld [vmem:[%s18494_s24 + $0x1bc8] sm:$0xff] }
 0x637   : > { %8587 = vmatprep.subr.bf16.mxu1 %v15879_v9  ;;  %v15288_v8 = vld [vmem:[%s18494_s24 + $0x1be8] sm:$0xff] }
 0x638   : > { %v15412_v9 = vld [vmem:[%s18494_s24 + $0x1fc8] sm:$0xff]  ;;  %v15799_v13 = vcombine.high %v15284_v42, %v15288_v8  ;;  %v15798_v18 = vcombine.low %v15284_v42, %v15288_v8  ;;  %v15069_v42 = vld [vmem:[%s18494_s24 + $0x1510] sm:$0xff] }
 0x639   : > { %8547 = vmatpush1.bf16.msra.mxu0 %v15750_v12  ;;  %v15927_v12 = vcombine.high %v15412_v9, %v15416_v10  ;;  %v15926_v21 = vcombine.low %v15412_v9, %v15416_v10  ;;  %v15073_v8 = vld [vmem:[%s18494_s24 + $0x1530] sm:$0xff]  ;;  %v19712_v9 = vunpack.c.l.bf16 %v15419_v46 }
 0x63a   : > { %8588 = vmatpush1.bf16.msra.mxu1 %v15878_v14  ;;  %8548 = vmatprep.subr.bf16.mxu0 %v15759_v16  ;;  %v14909_v14 = vld [vmem:[%s18494_s24 + $0x1010] sm:$0xff] }
 0x63b   : > { %8589 = vmatprep.subr.bf16.mxu1 %v15887_v15  ;;  %v14913_v16 = vld [vmem:[%s18494_s24 + $0x1030] sm:$0xff] }
 0x63c   : > { %v15037_v15 = vld [vmem:[%s18494_s24 + $0x1410] sm:$0xff]  ;;  %v15425_v27 = vcombine.high %v14909_v14, %v14913_v16 }
 0x63d   : > { %8549 = vmatpush1.bf16.msra.mxu0 %v15758_v23  ;;  %v15553_v23 = vcombine.high %v15037_v15, %v15041_v17  ;;  %v15552_v60 = vcombine.low %v15037_v15, %v15041_v17  ;;  %v15077_v15 = vld [vmem:[%s18494_s24 + $0x1550] sm:$0xff] }
 0x63e   : > { %8590 = vmatpush1.bf16.msra.mxu1 %v15886_v35  ;;  %8550 = vmatprep.subr.bf16.mxu0 %v15767_v36  ;;  %v14917_v35 = vld [vmem:[%s18494_s24 + $0x1050] sm:$0xff] }
 0x63f   : > { %8591 = vmatprep.subr.bf16.mxu1 %v15895_v38  ;;  %v14921_v36 = vld [vmem:[%s18494_s24 + $0x1070] sm:$0xff]  ;;  %v15424_v38 = vcombine.low %v14909_v14, %v14913_v16  ;;  %v5653_v16 = vrot.slane %v19712_v9, %v18865_v20 }
 0x640   : > { %v15433_v25 = vcombine.high %v14917_v35, %v14921_v36  ;;  %v15432_v47 = vcombine.low %v14917_v35, %v14921_v36  ;;  %v14953_v14 = vld [vmem:[%s18494_s24 + $0x1170] sm:$0xff] }
 0x641   : > { %8551 = vmatpush1.bf16.msra.mxu0 %v15766_v4  ;;  %v14925_v4 = vld [vmem:[%s18494_s24 + $0x1090] sm:$0xff] }
 0x642   : > { %8592 = vmatpush1.bf16.msra.mxu1 %v15894_v37  ;;  %8552 = vmatprep.subr.bf16.mxu0 %v15775_v7  ;;  %v14929_v37 = vld [vmem:[%s18494_s24 + $0x10b0] sm:$0xff]  ;;  %v15561_v7 = vcombine.high %v15045_v19, %v15049_v24  ;;  %v5693_v19 = vrot.slane %v5653_v16, %v18865_v20 }
 0x643   : > { %8593 = vmatprep.subr.bf16.mxu1 %v15903_v44  ;;  %v15053_v44 = vld [vmem:[%s18494_s24 + $0x1490] sm:$0xff]  ;;  %v15441_v62 = vcombine.high %v14925_v4, %v14929_v37  ;;  %v15440_v59 = vcombine.low %v14925_v4, %v14929_v37 }
 0x644   : > { %v15568_v51 = vcombine.low %v15053_v44, %v15057_v45  ;;  %v15081_v17 = vld [vmem:[%s18494_s24 + $0x1570] sm:$0xff] }
 0x645   : > { %8553 = vmatpush1.bf16.msra.mxu0 %v15774_v3  ;;  %v15569_v3 = vcombine.high %v15053_v44, %v15057_v45  ;;  %v15593_v35 = vcombine.high %v15077_v15, %v15081_v17  ;;  %v14957_v36 = vld [vmem:[%s18494_s24 + $0x1190] sm:$0xff]  ;;  %v15592_v37 = vcombine.low %v15077_v15, %v15081_v17 }
 0x646   : > { %8594 = vmatpush1.bf16.msra.mxu1 %v15902_v33  ;;  %8554 = vmatprep.subr.bf16.mxu0 %v15783_v26  ;;  %v14933_v33 = vld [vmem:[%s18494_s24 + $0x10d0] sm:$0xff] }
 0x647   : > { %8595 = vmatprep.subr.bf16.mxu1 %v15911_v57  ;;  %v14937_v26 = vld [vmem:[%s18494_s24 + $0x10f0] sm:$0xff] }
 0x648   : > { %v15061_v57 = vld [vmem:[%s18494_s24 + $0x14d0] sm:$0xff]  ;;  %v15448_v10 = vcombine.low %v14933_v33, %v14937_v26 }
 0x649   : > { %8555 = vmatpush1.bf16.msra.mxu0 %v15782_v61  ;;  %v15449_v61 = vcombine.high %v14933_v33, %v14937_v26  ;;  %v15085_v24 = vld [vmem:[%s18494_s24 + $0x1590] sm:$0xff] }
 0x64a   : > { %8596 = vmatpush1.bf16.msra.mxu1 %v15910_v1  ;;  %8556 = vmatprep.subr.bf16.mxu0 %v15791_v6  ;;  %v15577_v1 = vcombine.high %v15061_v57, %v15065_v58  ;;  %v14941_v6 = vld [vmem:[%s18494_s24 + $0x1110] sm:$0xff] }
 0x64b   : > { %8597 = vmatprep.subr.bf16.mxu1 %v15919_v50  ;;  %v14945_v50 = vld [vmem:[%s18494_s24 + $0x1130] sm:$0xff] }
 0x64d   : > { %8557 = vmatpush1.bf16.msra.mxu0 %v15790_v41  ;;  %v15576_v41 = vcombine.low %v15061_v57, %v15065_v58  ;;  %v15093_v57 = vld [vmem:[%s18494_s24 + $0x15d0] sm:$0xff] }
 0x64e   : > { %8598 = vmatpush1.bf16.msra.mxu1 %v15918_v11  ;;  %8558 = vmatprep.subr.bf16.mxu0 %v15799_v13  ;;  %v15457_v11 = vcombine.high %v14941_v6, %v14945_v50  ;;  %v15585_v13 = vcombine.high %v15069_v42, %v15073_v8  ;;  %v15097_v58 = vld [vmem:[%s18494_s24 + $0x15f0] sm:$0xff] }
 0x64f   : > { %8599 = vmatprep.subr.bf16.mxu1 %v15927_v12  ;;  %v14949_v12 = vld [vmem:[%s18494_s24 + $0x1150] sm:$0xff]  ;;  %v15608_v15 = vcombine.low %v15093_v57, %v15097_v58 }
 0x651   : > { %8559 = vmatpush1.bf16.msra.mxu0 %v15798_v18  ;;  %v15456_v18 = vcombine.low %v14941_v6, %v14945_v50 }
 0x652   : > { %8600 = vmatpush1.bf16.msra.mxu1 %v15926_v21  ;;  %8610 = vmatprep.subr.bf16.mxu0 %v15425_v27  ;;  %v5657_v21 = vrot.slane %v19712_v9, %v18868_v22  ;;  %v15584_v27 = vcombine.low %v15069_v42, %v15073_v8 }
 0x653   : > { %8651 = vmatprep.subr.bf16.mxu1 %v15553_v23  ;;  %v15465_v23 = vcombine.high %v14949_v12, %v14953_v14 }
 0x654   : > { %8561 = vmatmul.mubr.bf16.vlgmr.msra.gmra.mrb[52].mxu0 %v19553_v43  ;;  %v5697_v4 = vrot.slane %v5657_v21, %v18865_v20  ;;  %v14981_v21 = vld [vmem:[%s18494_s24 + $0x1250] sm:$0xff] }
 0x655   : > { %8602 = vmatmul.mubr.bf16.vlgmr.msra.gmra.mrb[52].mxu1 %v19557_v55  ;;  %8611 = vmatpush1.bf16.msra.mxu0 %v15424_v38  ;;  %v14961_v38 = vld [vmem:[%s18494_s24 + $0x11b0] sm:$0xff] }
 0x656   : > { %8642 = vmatprep.mubr.bf16.mxu0 %v19441_v48  ;;  %8652 = vmatpush1.bf16.msra.mxu1 %v15552_v60  ;;  %v15089_v60 = vld [vmem:[%s18494_s24 + $0x15b0] sm:$0xff] }
 0x657   : > { %8683 = vmatprep.mubr.bf16.mxu1 %v19445_v52  ;;  %8612 = vmatprep.subr.bf16.mxu0 %v15433_v25  ;;  %v15464_v25 = vcombine.low %v14949_v12, %v14953_v14  ;;  %v15600_v42 = vcombine.low %v15085_v24, %v15089_v60  ;;  %v15101_v12 = vld [vmem:[%s18494_s24 + $0x1610] sm:$0xff] }
 0x658   : > { %8653 = vmatprep.subr.bf16.mxu1 %v15561_v7  ;;  %v15473_v7 = vcombine.high %v14957_v36, %v14961_v38  ;;  %v15105_v14 = vld [vmem:[%s18494_s24 + $0x1630] sm:$0xff] }
 0x659   : > { %8613 = vmatpush1.bf16.msra.mxu0 %v15432_v47  ;;  %v15601_v47 = vcombine.high %v15085_v24, %v15089_v60  ;;  %v14989_v60 = vld [vmem:[%s18494_s24 + $0x1290] sm:$0xff] }
 0x65a   : > { %8654 = vmatpush1.bf16.msra.mxu1 %v15560_v49  ;;  %8614 = vmatprep.subr.bf16.mxu0 %v15441_v62  ;;  %v14965_v49 = vld [vmem:[%s18494_s24 + $0x11d0] sm:$0xff] }
 0x65b   : > { %8655 = vmatprep.subr.bf16.mxu1 %v15569_v3  ;;  %v14969_v62 = vld [vmem:[%s18494_s24 + $0x11f0] sm:$0xff] }
 0x65c   : > { %v15481_v8 = vcombine.high %v14965_v49, %v14969_v62  ;;  %v15480_v16 = vcombine.low %v14965_v49, %v14969_v62  ;;  %v14997_v49 = vld [vmem:[%s18494_s24 + $0x12d0] sm:$0xff] }
 0x65d   : > { %8615 = vmatpush1.bf16.msra.mxu0 %v15440_v59  ;;  %v15001_v62 = vld [vmem:[%s18494_s24 + $0x12f0] sm:$0xff] }
 0x65e   : > { %8656 = vmatpush1.bf16.msra.mxu1 %v15568_v51  ;;  %8616 = vmatprep.subr.bf16.mxu0 %v15449_v61  ;;  %v15472_v61 = vcombine.low %v14957_v36, %v14961_v38  ;;  %v15616_v38 = vcombine.low %v15101_v12, %v15105_v14 }
 0x65f   : > { %8657 = vmatprep.subr.bf16.mxu1 %v15577_v1 }
 0x661   : > { %8617 = vmatpush1.bf16.msra.mxu0 %v15448_v10 }
 0x662   : > { %8658 = vmatpush1.bf16.msra.mxu1 %v15576_v41  ;;  %8618 = vmatprep.subr.bf16.mxu0 %v15457_v11  ;;  %v15609_v41 = vcombine.high %v15093_v57, %v15097_v58  ;;  %v14973_v11 = vld [vmem:[%s18494_s24 + $0x1210] sm:$0xff]  ;;  %v15513_v58 = vcombine.high %v14997_v49, %v15001_v62 }
 0x663   : > { %8659 = vmatprep.subr.bf16.mxu1 %v15585_v13  ;;  %v14977_v13 = vld [vmem:[%s18494_s24 + $0x1230] sm:$0xff] }
 0x664   : > { %v15489_v17 = vcombine.high %v14973_v11, %v14977_v13  ;;  %v15488_v36 = vcombine.low %v14973_v11, %v14977_v13  ;;  %v15013_v11 = vld [vmem:[%s18494_s24 + $0x1350] sm:$0xff] }
 0x665   : > { %8619 = vmatpush1.bf16.msra.mxu0 %v15456_v18  ;;  %v15617_v18 = vcombine.high %v15101_v12, %v15105_v14  ;;  %v15017_v13 = vld [vmem:[%s18494_s24 + $0x1370] sm:$0xff] }
 0x666   : > { %8660 = vmatpush1.bf16.msra.mxu1 %v15584_v27  ;;  %8620 = vmatprep.subr.bf16.mxu0 %v15465_v23  ;;  %v14985_v27 = vld [vmem:[%s18494_s24 + $0x1270] sm:$0xff] }
 0x667   : > { %v8316_v44 = vpop.f32.mrb[40].mxu0  ;;  %v8357_v45 = vpop.f32.mrb[40].mxu1  ;;  %8661 = vmatprep.subr.bf16.mxu1 %v15593_v35  ;;  %v15109_v23 = vld [vmem:[%s18494_s24 + $0x1650] sm:$0xff] }
 0x668   : > { %v8317_v3 = vadd.f32 %v8316_v44, %v5693_v19  ;;  %v8318_v33 = vpop.f32.mrb[41].mxu0  ;;  %v8359_v26 = vpop.f32.mrb[41].mxu1  ;;  %v15113_v35 = vld [vmem:[%s18494_s24 + $0x1670] sm:$0xff]  ;;  %v15497_v19 = vcombine.high %v14981_v21, %v14985_v27 }
 0x669   : > { %v8319_v59 = vadd.f32 %v8318_v33, %v5697_v4  ;;  %8621 = vmatpush1.bf16.msra.mxu0 %v15464_v25  ;;  %v8320_v46 = vpop.f32.mrb[42].mxu0  ;;  %v8361_v51 = vpop.f32.mrb[42].mxu1  ;;  %v15625_v24 = vcombine.high %v15109_v23, %v15113_v35  ;;  %v14993_v25 = vld [vmem:[%s18494_s24 + $0x12b0] sm:$0xff]  ;;  %v15624_v44 = vcombine.low %v15109_v23, %v15113_v35 }
 0x66a   : > { %v19732_v1 = vadd.f32 %v8357_v45, %v8317_v3  ;;  %8662 = vmatpush1.bf16.msra.mxu1 %v15592_v37  ;;  %v8321_v6 = vpop.f32.mrb[43].mxu0  ;;  %v8362_v50 = vpop.f32.mrb[43].mxu1  ;;  %8622 = vmatprep.subr.bf16.mxu0 %v15473_v7  ;;  %v15117_v4 = vld [vmem:[%s18494_s24 + $0x1690] sm:$0xff]  ;;  %v15496_v7 = vcombine.low %v14981_v21, %v14985_v27  ;;  %v15505_v45 = vcombine.high %v14989_v60, %v14993_v25 }
 0x66b   : > { %v19734_v10 = vadd.f32 %v8359_v26, %v8319_v59  ;;  %8663 = vmatprep.subr.bf16.mxu1 %v15601_v47  ;;  %v15121_v37 = vld [vmem:[%s18494_s24 + $0x16b0] sm:$0xff]  ;;  %v15504_v26 = vcombine.low %v14989_v60, %v14993_v25  ;;  %v15512_v50 = vcombine.low %v14997_v49, %v15001_v62 }
 0x66c   : > { %v15633_v47 = vcombine.high %v15117_v4, %v15121_v37  ;;  %v15125_v3 = vld [vmem:[%s18494_s24 + $0x16d0] sm:$0xff]  ;;  %v15632_v57 = vcombine.low %v15117_v4, %v15121_v37 }
 0x66d   : > { %8623 = vmatpush1.bf16.msra.mxu0 %v15472_v61  ;;  %v15129_v33 = vld [vmem:[%s18494_s24 + $0x16f0] sm:$0xff] }
 0x66e   : > { %8664 = vmatpush1.bf16.msra.mxu1 %v15600_v42  ;;  %8624 = vmatprep.subr.bf16.mxu0 %v15481_v8  ;;  %v15641_v59 = vcombine.high %v15125_v3, %v15129_v33  ;;  %v15005_v46 = vld [vmem:[%s18494_s24 + $0x1310] sm:$0xff]  ;;  %v15640_v42 = vcombine.low %v15125_v3, %v15129_v33 }
 0x66f   : > { %8665 = vmatprep.subr.bf16.mxu1 %v15609_v41  ;;  %v15009_v51 = vld [vmem:[%s18494_s24 + $0x1330] sm:$0xff] }
 0x670   : > { %v15133_v61 = vld [vmem:[%s18494_s24 + $0x1710] sm:$0xff]  ;;  %v15521_v8 = vcombine.high %v15005_v46, %v15009_v51 }
 0x671   : > { %8625 = vmatpush1.bf16.msra.mxu0 %v15480_v16  ;;  %v15137_v6 = vld [vmem:[%s18494_s24 + $0x1730] sm:$0xff]  ;;  %v15520_v16 = vcombine.low %v15005_v46, %v15009_v51 }
 0x672   : > { %8666 = vmatpush1.bf16.msra.mxu1 %v15608_v15  ;;  %8626 = vmatprep.subr.bf16.mxu0 %v15489_v17  ;;  %v15649_v41 = vcombine.high %v15133_v61, %v15137_v6  ;;  %v15141_v12 = vld [vmem:[%s18494_s24 + $0x1750] sm:$0xff]  ;;  %v15648_v15 = vcombine.low %v15133_v61, %v15137_v6  ;;  %v15529_v17 = vcombine.high %v15013_v11, %v15017_v13 }
 0x673   : > { %8667 = vmatprep.subr.bf16.mxu1 %v15617_v18  ;;  %v15145_v14 = vld [vmem:[%s18494_s24 + $0x1770] sm:$0xff] }
 0x674   : > { %v15657_v18 = vcombine.high %v15141_v12, %v15145_v14  ;;  %v15021_v21 = vld [vmem:[%s18494_s24 + $0x1390] sm:$0xff] }
 0x675   : > { %8627 = vmatpush1.bf16.msra.mxu0 %v15488_v36  ;;  %v15025_v27 = vld [vmem:[%s18494_s24 + $0x13b0] sm:$0xff]  ;;  %v15528_v36 = vcombine.low %v15013_v11, %v15017_v13 }
 0x676   : > { %8668 = vmatpush1.bf16.msra.mxu1 %v15616_v38  ;;  %8628 = vmatprep.subr.bf16.mxu0 %v15497_v19  ;;  %v15149_v23 = vld [vmem:[%s18494_s24 + $0x1790] sm:$0xff]  ;;  %v15656_v38 = vcombine.low %v15141_v12, %v15145_v14  ;;  %v15537_v19 = vcombine.high %v15021_v21, %v15025_v27 }
 0x677   : > { %8669 = vmatprep.subr.bf16.mxu1 %v15625_v24  ;;  %v15153_v35 = vld [vmem:[%s18494_s24 + $0x17b0] sm:$0xff] }
 0x678   : > { %v15665_v24 = vcombine.high %v15149_v23, %v15153_v35  ;;  %v15029_v60 = vld [vmem:[%s18494_s24 + $0x13d0] sm:$0xff] }
 0x679   : > { %8629 = vmatpush1.bf16.msra.mxu0 %v15496_v7  ;;  %v15033_v25 = vld [vmem:[%s18494_s24 + $0x13f0] sm:$0xff]  ;;  %v15536_v7 = vcombine.low %v15021_v21, %v15025_v27 }
 0x67a   : > { %8670 = vmatpush1.bf16.msra.mxu1 %v15624_v44  ;;  %8630 = vmatprep.subr.bf16.mxu0 %v15505_v45  ;;  %v15157_v4 = vld [vmem:[%s18494_s24 + $0x17d0] sm:$0xff]  ;;  %v15664_v44 = vcombine.low %v15149_v23, %v15153_v35  ;;  %v15545_v45 = vcombine.high %v15029_v60, %v15033_v25 }
 0x67b   : > { %8671 = vmatprep.subr.bf16.mxu1 %v15633_v47  ;;  %v15161_v37 = vld [vmem:[%s18494_s24 + $0x17f0] sm:$0xff] }
 0x67c   : > { %v15673_v47 = vcombine.high %v15157_v4, %v15161_v37  ;;  %v15165_v49 = vld [vmem:[%s18494_s24 + $0x1810] sm:$0xff] }
 0x67d   : > { %8631 = vmatpush1.bf16.msra.mxu0 %v15504_v26  ;;  %v15169_v62 = vld [vmem:[%s18494_s24 + $0x1830] sm:$0xff]  ;;  %v15544_v26 = vcombine.low %v15029_v60, %v15033_v25 }
 0x67e   : > { %8672 = vmatpush1.bf16.msra.mxu1 %v15632_v57  ;;  %8632 = vmatprep.subr.bf16.mxu0 %v15513_v58  ;;  %v15293_v3 = vld [vmem:[%s18494_s24 + $0x1c10] sm:$0xff]  ;;  %v15672_v57 = vcombine.low %v15157_v4, %v15161_v37  ;;  %v15681_v58 = vcombine.high %v15165_v49, %v15169_v62  ;;  %v15680_v61 = vcombine.low %v15165_v49, %v15169_v62 }
 0x67f   : > { %8673 = vmatprep.subr.bf16.mxu1 %v15641_v59  ;;  %v15297_v33 = vld [vmem:[%s18494_s24 + $0x1c30] sm:$0xff] }
 0x680   : > { %v15809_v59 = vcombine.high %v15293_v3, %v15297_v33  ;;  %v15173_v46 = vld [vmem:[%s18494_s24 + $0x1850] sm:$0xff] }
 0x681   : > { %8633 = vmatpush1.bf16.msra.mxu0 %v15512_v50  ;;  %v15177_v51 = vld [vmem:[%s18494_s24 + $0x1870] sm:$0xff] }
 0x682   : > { %8674 = vmatpush1.bf16.msra.mxu1 %v15640_v42  ;;  %8634 = vmatprep.subr.bf16.mxu0 %v15521_v8  ;;  %v15301_v6 = vld [vmem:[%s18494_s24 + $0x1c50] sm:$0xff]  ;;  %v15808_v42 = vcombine.low %v15293_v3, %v15297_v33  ;;  %v15689_v8 = vcombine.high %v15173_v46, %v15177_v51 }
 0x683   : > { %8675 = vmatprep.subr.bf16.mxu1 %v15649_v41  ;;  %v15305_v50 = vld [vmem:[%s18494_s24 + $0x1c70] sm:$0xff] }
 0x684   : > { %v15181_v41 = vld [vmem:[%s18494_s24 + $0x1890] sm:$0xff]  ;;  %v15817_v13 = vcombine.high %v15301_v6, %v15305_v50 }
 0x685   : > { %8635 = vmatpush1.bf16.msra.mxu0 %v15520_v16  ;;  %v15185_v11 = vld [vmem:[%s18494_s24 + $0x18b0] sm:$0xff]  ;;  %v15688_v16 = vcombine.low %v15173_v46, %v15177_v51 }
 0x686   : > { %8676 = vmatpush1.bf16.msra.mxu1 %v15648_v15  ;;  %8636 = vmatprep.subr.bf16.mxu0 %v15529_v17  ;;  %v15309_v12 = vld [vmem:[%s18494_s24 + $0x1c90] sm:$0xff]  ;;  %v15816_v15 = vcombine.low %v15301_v6, %v15305_v50  ;;  %v15697_v17 = vcombine.high %v15181_v41, %v15185_v11 }
 0x687   : > { %8677 = vmatprep.subr.bf16.mxu1 %v15657_v18  ;;  %v15313_v14 = vld [vmem:[%s18494_s24 + $0x1cb0] sm:$0xff] }
 0x688   : > { %v15825_v18 = vcombine.high %v15309_v12, %v15313_v14  ;;  %v15189_v21 = vld [vmem:[%s18494_s24 + $0x18d0] sm:$0xff] }
 0x689   : > { %8637 = vmatpush1.bf16.msra.mxu0 %v15528_v36  ;;  %v15193_v27 = vld [vmem:[%s18494_s24 + $0x18f0] sm:$0xff]  ;;  %v15696_v36 = vcombine.low %v15181_v41, %v15185_v11 }
 0x68a   : > { %8678 = vmatpush1.bf16.msra.mxu1 %v15656_v38  ;;  %8638 = vmatprep.subr.bf16.mxu0 %v15537_v19  ;;  %v15317_v23 = vld [vmem:[%s18494_s24 + $0x1cd0] sm:$0xff]  ;;  %v15824_v38 = vcombine.low %v15309_v12, %v15313_v14  ;;  %v15705_v19 = vcombine.high %v15189_v21, %v15193_v27 }
 0x68b   : > { %8679 = vmatprep.subr.bf16.mxu1 %v15665_v24  ;;  %v15321_v35 = vld [vmem:[%s18494_s24 + $0x1cf0] sm:$0xff] }
 0x68c   : > { %v15833_v24 = vcombine.high %v15317_v23, %v15321_v35  ;;  %v15197_v60 = vld [vmem:[%s18494_s24 + $0x1910] sm:$0xff] }
 0x68d   : > { %8639 = vmatpush1.bf16.msra.mxu0 %v15536_v7  ;;  %v15201_v25 = vld [vmem:[%s18494_s24 + $0x1930] sm:$0xff]  ;;  %v15704_v7 = vcombine.low %v15189_v21, %v15193_v27 }
 0x68e   : > { %8680 = vmatpush1.bf16.msra.mxu1 %v15664_v44  ;;  %8640 = vmatprep.subr.bf16.mxu0 %v15545_v45  ;;  %v15325_v4 = vld [vmem:[%s18494_s24 + $0x1d10] sm:$0xff]  ;;  %v15832_v44 = vcombine.low %v15317_v23, %v15321_v35  ;;  %v15713_v45 = vcombine.high %v15197_v60, %v15201_v25 }
 0x68f   : > { %8681 = vmatprep.subr.bf16.mxu1 %v15673_v47  ;;  %v15329_v37 = vld [vmem:[%s18494_s24 + $0x1d30] sm:$0xff] }
 0x690   : > { %v15841_v47 = vcombine.high %v15325_v4, %v15329_v37  ;;  %v15205_v49 = vld [vmem:[%s18494_s24 + $0x1950] sm:$0xff] }
 0x691   : > { %8641 = vmatpush1.bf16.msra.mxu0 %v15544_v26  ;;  %v15209_v62 = vld [vmem:[%s18494_s24 + $0x1970] sm:$0xff]  ;;  %v15712_v26 = vcombine.low %v15197_v60, %v15201_v25 }
 0x692   : > { %8682 = vmatpush1.bf16.msra.mxu1 %v15672_v57  ;;  %8692 = vmatprep.subr.bf16.mxu0 %v15681_v58  ;;  %v15333_v3 = vld [vmem:[%s18494_s24 + $0x1d50] sm:$0xff]  ;;  %v15840_v57 = vcombine.low %v15325_v4, %v15329_v37  ;;  %v15721_v58 = vcombine.high %v15205_v49, %v15209_v62  ;;  %v15720_v50 = vcombine.low %v15205_v49, %v15209_v62 }
 0x693   : > { %8733 = vmatprep.subr.bf16.mxu1 %v15809_v59  ;;  %v15337_v33 = vld [vmem:[%s18494_s24 + $0x1d70] sm:$0xff] }
 0x694   : > { %8643 = vmatmul.mubr.bf16.vlgmr.msra.gmra.mrb[56].mxu0 %v19449_v28  ;;  %v15849_v59 = vcombine.high %v15333_v3, %v15337_v33  ;;  %v15213_v46 = vld [vmem:[%s18494_s24 + $0x1990] sm:$0xff] }
 0x695   : > { %8684 = vmatmul.mubr.bf16.vlgmr.msra.gmra.mrb[56].mxu1 %v19453_v31  ;;  %8693 = vmatpush1.bf16.msra.mxu0 %v15680_v61  ;;  %v15217_v51 = vld [vmem:[%s18494_s24 + $0x19b0] sm:$0xff] }
 0x696   : > { %8724 = vmatprep.mubr.bf16.mxu0 %v19481_v2  ;;  %8734 = vmatpush1.bf16.msra.mxu1 %v15808_v42  ;;  %v15341_v61 = vld [vmem:[%s18494_s24 + $0x1d90] sm:$0xff]  ;;  %v15848_v42 = vcombine.low %v15333_v3, %v15337_v33 }
 0x697   : > { %8765 = vmatprep.mubr.bf16.mxu1 %v19485_v5  ;;  %8694 = vmatprep.subr.bf16.mxu0 %v15689_v8  ;;  %v15345_v6 = vld [vmem:[%s18494_s24 + $0x1db0] sm:$0xff]  ;;  %v15729_v8 = vcombine.high %v15213_v46, %v15217_v51 }
 0x698   : > { %8735 = vmatprep.subr.bf16.mxu1 %v15817_v13  ;;  %v15857_v13 = vcombine.high %v15341_v61, %v15345_v6  ;;  %v15221_v12 = vld [vmem:[%s18494_s24 + $0x19d0] sm:$0xff] }
 0x699   : > { %8695 = vmatpush1.bf16.msra.mxu0 %v15688_v16  ;;  %v15225_v14 = vld [vmem:[%s18494_s24 + $0x19f0] sm:$0xff] }
 0x69a   : > { %8736 = vmatpush1.bf16.msra.mxu1 %v15816_v15  ;;  %8696 = vmatprep.subr.bf16.mxu0 %v15697_v17  ;;  %v15353_v21 = vld [vmem:[%s18494_s24 + $0x1df0] sm:$0xff]  ;;  %v15737_v60 = vcombine.high %v15221_v12, %v15225_v14 }
 0x69b   : > { %8737 = vmatprep.subr.bf16.mxu1 %v15825_v18  ;;  %v15349_v18 = vld [vmem:[%s18494_s24 + $0x1dd0] sm:$0xff] }
 0x69c   : > { %v15229_v4 = vld [vmem:[%s18494_s24 + $0x1a10] sm:$0xff] }
 0x69d   : > { %8697 = vmatpush1.bf16.msra.mxu0 %v15696_v36  ;;  %v15728_v36 = vcombine.low %v15213_v46, %v15217_v51  ;;  %v15233_v37 = vld [vmem:[%s18494_s24 + $0x1a30] sm:$0xff] }
 0x69e   : > { %8738 = vmatpush1.bf16.msra.mxu1 %v15824_v38  ;;  %8698 = vmatprep.subr.bf16.mxu0 %v15705_v19  ;;  %v15745_v49 = vcombine.high %v15229_v4, %v15233_v37  ;;  %v15237_v3 = vld [vmem:[%s18494_s24 + $0x1a50] sm:$0xff] }
 0x69f   : > { %8739 = vmatprep.subr.bf16.mxu1 %v15833_v24  ;;  %v15241_v33 = vld [vmem:[%s18494_s24 + $0x1a70] sm:$0xff] }
 0x6a0   : > { %v15753_v46 = vcombine.high %v15237_v3, %v15241_v33 }
 0x6a1   : > { %8699 = vmatpush1.bf16.msra.mxu0 %v15704_v7  ;;  %v15357_v7 = vld [vmem:[%s18494_s24 + $0x1e10] sm:$0xff] }
 0x6a2   : > { %8740 = vmatpush1.bf16.msra.mxu1 %v15832_v44  ;;  %8700 = vmatprep.subr.bf16.mxu0 %v15713_v45  ;;  %v15361_v44 = vld [vmem:[%s18494_s24 + $0x1e30] sm:$0xff]  ;;  %v15736_v45 = vcombine.low %v15221_v12, %v15225_v14 }
 0x6a3   : > { %8741 = vmatprep.subr.bf16.mxu1 %v15841_v47  ;;  %v15864_v47 = vcombine.low %v15349_v18, %v15353_v21  ;;  %v15873_v62 = vcombine.high %v15357_v7, %v15361_v44  ;;  %v15253_v12 = vld [vmem:[%s18494_s24 + $0x1ad0] sm:$0xff] }
 0x6a4   : > { %v15257_v14 = vld [vmem:[%s18494_s24 + $0x1af0] sm:$0xff] }
 0x6a5   : > { %8701 = vmatpush1.bf16.msra.mxu0 %v15712_v26  ;;  %v15365_v26 = vld [vmem:[%s18494_s24 + $0x1e50] sm:$0xff] }
 0x6a6   : > { %8742 = vmatpush1.bf16.msra.mxu1 %v15840_v57  ;;  %8702 = vmatprep.subr.bf16.mxu0 %v15721_v58  ;;  %v15369_v57 = vld [vmem:[%s18494_s24 + $0x1e70] sm:$0xff]  ;;  %v15744_v58 = vcombine.low %v15229_v4, %v15233_v37 }
 0x6a7   : > { %v8398_v41 = vpop.f32.mrb[44].mxu0  ;;  %v8439_v11 = vpop.f32.mrb[44].mxu1  ;;  %8743 = vmatprep.subr.bf16.mxu1 %v15849_v59  ;;  %v15872_v59 = vcombine.low %v15357_v7, %v15361_v44  ;;  %v15881_v51 = vcombine.high %v15365_v26, %v15369_v57  ;;  %v15269_v4 = vld [vmem:[%s18494_s24 + $0x1b50] sm:$0xff] }
 0x6a8   : > { %v8399_v16 = vadd.f32 %v8398_v41, %v19732_v1  ;;  %v8400_v15 = vpop.f32.mrb[45].mxu0  ;;  %v8441_v17 = vpop.f32.mrb[45].mxu1  ;;  %v15856_v1 = vcombine.low %v15341_v61, %v15345_v6  ;;  %v15245_v61 = vld [vmem:[%s18494_s24 + $0x1a90] sm:$0xff]  ;;  %v15880_v41 = vcombine.low %v15365_v26, %v15369_v57 }
 0x6a9   : > { %v8401_v27 = vadd.f32 %v8400_v15, %v19734_v10  ;;  %v8402_v23 = vpop.f32.mrb[46].mxu0  ;;  %v8443_v35 = vpop.f32.mrb[46].mxu1  ;;  %8703 = vmatpush1.bf16.msra.mxu0 %v15720_v50  ;;  %v15865_v10 = vcombine.high %v15349_v18, %v15353_v21  ;;  %v15249_v6 = vld [vmem:[%s18494_s24 + $0x1ab0] sm:$0xff]  ;;  %v15769_v21 = vcombine.high %v15253_v12, %v15257_v14 }
 0x6aa   : > { %v19806_v38 = vadd.f32 %v8439_v11, %v8399_v16  ;;  %8744 = vmatpush1.bf16.msra.mxu1 %v15848_v42  ;;  %v8403_v19 = vpop.f32.mrb[47].mxu0  ;;  %v8444_v24 = vpop.f32.mrb[47].mxu1  ;;  %8704 = vmatprep.subr.bf16.mxu0 %v15729_v8  ;;  %v15373_v50 = vld [vmem:[%s18494_s24 + $0x1e90] sm:$0xff]  ;;  %v15752_v8 = vcombine.low %v15237_v3, %v15241_v33  ;;  %v15761_v11 = vcombine.high %v15245_v61, %v15249_v6 }
 0x6ab   : > { %v19808_v25 = vadd.f32 %v8441_v17, %v8401_v27  ;;  %8745 = vmatprep.subr.bf16.mxu1 %v15857_v13  ;;  %v15377_v42 = vld [vmem:[%s18494_s24 + $0x1eb0] sm:$0xff]  ;;  %v15760_v17 = vcombine.low %v15245_v61, %v15249_v6  ;;  %v15768_v24 = vcombine.low %v15253_v12, %v15257_v14  ;;  %v14910_v12 = vld [vmem:[%s18494_s24 + $0x1018] sm:$0xff] }
 0x6ac   : > { %v15889_v13 = vcombine.high %v15373_v50, %v15377_v42  ;;  %v15381_v16 = vld [vmem:[%s18494_s24 + $0x1ed0] sm:$0xff]  ;;  %v15888_v18 = vcombine.low %v15373_v50, %v15377_v42  ;;  %v14914_v14 = vld [vmem:[%s18494_s24 + $0x1038] sm:$0xff] }
 0x6ad   : > { %8705 = vmatpush1.bf16.msra.mxu0 %v15728_v36  ;;  %v15385_v15 = vld [vmem:[%s18494_s24 + $0x1ef0] sm:$0xff] }
 0x6ae   : > { %8746 = vmatpush1.bf16.msra.mxu1 %v15856_v1  ;;  %8706 = vmatprep.subr.bf16.mxu0 %v15737_v60  ;;  %v15897_v27 = vcombine.high %v15381_v16, %v15385_v15  ;;  %v15261_v23 = vld [vmem:[%s18494_s24 + $0x1b10] sm:$0xff]  ;;  %v15896_v1 = vcombine.low %v15381_v16, %v15385_v15  ;;  %v15038_v16 = vld [vmem:[%s18494_s24 + $0x1418] sm:$0xff] }
 0x6af   : > { %8747 = vmatprep.subr.bf16.mxu1 %v15865_v10  ;;  %v15265_v35 = vld [vmem:[%s18494_s24 + $0x1b30] sm:$0xff]  ;;  %v15042_v15 = vld [vmem:[%s18494_s24 + $0x1438] sm:$0xff] }
 0x6b0   : > { %v15389_v36 = vld [vmem:[%s18494_s24 + $0x1f10] sm:$0xff]  ;;  %v15777_v60 = vcombine.high %v15261_v23, %v15265_v35 }
 0x6b1   : > { %8707 = vmatpush1.bf16.msra.mxu0 %v15736_v45  ;;  %v15393_v19 = vld [vmem:[%s18494_s24 + $0x1f30] sm:$0xff]  ;;  %v15776_v45 = vcombine.low %v15261_v23, %v15265_v35  ;;  %v14918_v23 = vld [vmem:[%s18494_s24 + $0x1058] sm:$0xff] }
 0x6b2   : > { %8748 = vmatpush1.bf16.msra.mxu1 %v15864_v47  ;;  %8708 = vmatprep.subr.bf16.mxu0 %v15745_v49  ;;  %v15905_v10 = vcombine.high %v15389_v36, %v15393_v19  ;;  %v15273_v37 = vld [vmem:[%s18494_s24 + $0x1b70] sm:$0xff]  ;;  %v15904_v47 = vcombine.low %v15389_v36, %v15393_v19  ;;  %v14922_v35 = vld [vmem:[%s18494_s24 + $0x1078] sm:$0xff]  ;;  %v15426_v36 = vcombine.low %v14910_v12, %v14914_v14 }
 0x6b3   : > { %8749 = vmatprep.subr.bf16.mxu1 %v15873_v62  ;;  %v15397_v7 = vld [vmem:[%s18494_s24 + $0x1f50] sm:$0xff]  ;;  %v15785_v49 = vcombine.high %v15269_v4, %v15273_v37  ;;  %v15046_v19 = vld [vmem:[%s18494_s24 + $0x1458] sm:$0xff] }
 0x6b4   : > { %v15401_v44 = vld [vmem:[%s18494_s24 + $0x1f70] sm:$0xff] }
 0x6b5   : > { %8709 = vmatpush1.bf16.msra.mxu0 %v15744_v58  ;;  %v15913_v62 = vcombine.high %v15397_v7, %v15401_v44  ;;  %v15277_v3 = vld [vmem:[%s18494_s24 + $0x1b90] sm:$0xff]  ;;  %v15784_v58 = vcombine.low %v15269_v4, %v15273_v37  ;;  %v14930_v4 = vld [vmem:[%s18494_s24 + $0x10b8] sm:$0xff] }
 0x6b6   : > { %8750 = vmatpush1.bf16.msra.mxu1 %v15872_v59  ;;  %8710 = vmatprep.subr.bf16.mxu0 %v15753_v46  ;;  %v15281_v33 = vld [vmem:[%s18494_s24 + $0x1bb0] sm:$0xff]  ;;  %v15912_v59 = vcombine.low %v15397_v7, %v15401_v44  ;;  %v15054_v7 = vld [vmem:[%s18494_s24 + $0x1498] sm:$0xff] }
 0x6b7   : > { %8751 = vmatprep.subr.bf16.mxu1 %v15881_v51  ;;  %v15405_v26 = vld [vmem:[%s18494_s24 + $0x1f90] sm:$0xff]  ;;  %v15793_v46 = vcombine.high %v15277_v3, %v15281_v33  ;;  %v15058_v44 = vld [vmem:[%s18494_s24 + $0x14b8] sm:$0xff] }
 0x6b8   : > { %v15409_v57 = vld [vmem:[%s18494_s24 + $0x1fb0] sm:$0xff] }
 0x6b9   : > { %8711 = vmatpush1.bf16.msra.mxu0 %v15752_v8  ;;  %v15921_v51 = vcombine.high %v15405_v26, %v15409_v57  ;;  %v15285_v61 = vld [vmem:[%s18494_s24 + $0x1bd0] sm:$0xff]  ;;  %v15792_v8 = vcombine.low %v15277_v3, %v15281_v33  ;;  %v14934_v3 = vld [vmem:[%s18494_s24 + $0x10d8] sm:$0xff] }
 0x6ba   : > { %8752 = vmatpush1.bf16.msra.mxu1 %v15880_v41  ;;  %8712 = vmatprep.subr.bf16.mxu0 %v15761_v11  ;;  %v15289_v6 = vld [vmem:[%s18494_s24 + $0x1bf0] sm:$0xff]  ;;  %v15920_v41 = vcombine.low %v15405_v26, %v15409_v57  ;;  %v14938_v33 = vld [vmem:[%s18494_s24 + $0x10f8] sm:$0xff] }
 0x6bb   : > { %8753 = vmatprep.subr.bf16.mxu1 %v15889_v13  ;;  %v15413_v50 = vld [vmem:[%s18494_s24 + $0x1fd0] sm:$0xff]  ;;  %v15801_v11 = vcombine.high %v15285_v61, %v15289_v6  ;;  %v15062_v26 = vld [vmem:[%s18494_s24 + $0x14d8] sm:$0xff] }
 0x6bc   : > { %v15417_v42 = vld [vmem:[%s18494_s24 + $0x1ff0] sm:$0xff]  ;;  %v15066_v57 = vld [vmem:[%s18494_s24 + $0x14f8] sm:$0xff] }
 0x6bd   : > { %8713 = vmatpush1.bf16.msra.mxu0 %v15760_v17  ;;  %v15929_v13 = vcombine.high %v15413_v50, %v15417_v42  ;;  %v15800_v17 = vcombine.low %v15285_v61, %v15289_v6  ;;  %v15070_v61 = vld [vmem:[%s18494_s24 + $0x1518] sm:$0xff] }
 0x6be   : > { %8754 = vmatpush1.bf16.msra.mxu1 %v15888_v18  ;;  %8714 = vmatprep.subr.bf16.mxu0 %v15769_v21  ;;  %v15928_v18 = vcombine.low %v15413_v50, %v15417_v42  ;;  %v15427_v21 = vcombine.high %v14910_v12, %v14914_v14  ;;  %v15074_v6 = vld [vmem:[%s18494_s24 + $0x1538] sm:$0xff]  ;;  %v15450_v50 = vcombine.low %v14934_v3, %v14938_v33 }
 0x6bf   : > { %8755 = vmatprep.subr.bf16.mxu1 %v15897_v27  ;;  %v15555_v27 = vcombine.high %v15038_v16, %v15042_v15  ;;  %v15578_v42 = vcombine.low %v15062_v26, %v15066_v57  ;;  %v5661_v12 = vrot.slane %v19712_v9, %v19023_v53  ;;  %v15078_v14 = vld [vmem:[%s18494_s24 + $0x1558] sm:$0xff] }
 0x6c1   : > { %8715 = vmatpush1.bf16.msra.mxu0 %v15768_v24  ;;  %v15050_v24 = vld [vmem:[%s18494_s24 + $0x1478] sm:$0xff] }
 0x6c2   : > { %8756 = vmatpush1.bf16.msra.mxu1 %v15896_v1  ;;  %8716 = vmatprep.subr.bf16.mxu0 %v15777_v60  ;;  %v15554_v1 = vcombine.low %v15038_v16, %v15042_v15  ;;  %v15435_v60 = vcombine.high %v14918_v23, %v14922_v35  ;;  %v15563_v37 = vcombine.high %v15046_v19, %v15050_v24  ;;  %v15082_v16 = vld [vmem:[%s18494_s24 + $0x1578] sm:$0xff] }
 0x6c3   : > { %8757 = vmatprep.subr.bf16.mxu1 %v15905_v10  ;;  %v14926_v10 = vld [vmem:[%s18494_s24 + $0x1098] sm:$0xff] }
 0x6c5   : > { %8717 = vmatpush1.bf16.msra.mxu0 %v15776_v45  ;;  %v15434_v45 = vcombine.low %v14918_v23, %v14922_v35  ;;  %v14958_v23 = vld [vmem:[%s18494_s24 + $0x1198] sm:$0xff] }
 0x6c6   : > { %8758 = vmatpush1.bf16.msra.mxu1 %v15904_v47  ;;  %8718 = vmatprep.subr.bf16.mxu0 %v15785_v49  ;;  %v15562_v47 = vcombine.low %v15046_v19, %v15050_v24  ;;  %v15443_v49 = vcombine.high %v14926_v10, %v14930_v4  ;;  %v14962_v35 = vld [vmem:[%s18494_s24 + $0x11b8] sm:$0xff] }
 0x6c7   : > { %8759 = vmatprep.subr.bf16.mxu1 %v15913_v62  ;;  %v15571_v62 = vcombine.high %v15054_v7, %v15058_v44  ;;  %v15086_v19 = vld [vmem:[%s18494_s24 + $0x1598] sm:$0xff] }
 0x6c8   : > { %v15090_v24 = vld [vmem:[%s18494_s24 + $0x15b8] sm:$0xff] }
 0x6c9   : > { %8719 = vmatpush1.bf16.msra.mxu0 %v15784_v58  ;;  %v15442_v58 = vcombine.low %v14926_v10, %v14930_v4  ;;  %v15475_v10 = vcombine.high %v14958_v23, %v14962_v35 }
 0x6ca   : > { %8760 = vmatpush1.bf16.msra.mxu1 %v15912_v59  ;;  %8720 = vmatprep.subr.bf16.mxu0 %v15793_v46  ;;  %v15451_v59 = vcombine.high %v14934_v3, %v14938_v33  ;;  %v14942_v46 = vld [vmem:[%s18494_s24 + $0x1118] sm:$0xff] }
 0x6cb   : > { %8761 = vmatprep.subr.bf16.mxu1 %v15921_v51  ;;  %v14946_v51 = vld [vmem:[%s18494_s24 + $0x1138] sm:$0xff] }
 0x6cc   : > { %v15458_v15 = vcombine.low %v14942_v46, %v14946_v51  ;;  %v15098_v3 = vld [vmem:[%s18494_s24 + $0x15f8] sm:$0xff] }
 0x6cd   : > { %8721 = vmatpush1.bf16.msra.mxu0 %v15792_v8  ;;  %v15459_v8 = vcombine.high %v14942_v46, %v14946_v51  ;;  %v15602_v46 = vcombine.low %v15086_v19, %v15090_v24 }
 0x6ce   : > { %8762 = vmatpush1.bf16.msra.mxu1 %v15920_v41  ;;  %8722 = vmatprep.subr.bf16.mxu0 %v15801_v11  ;;  %v15587_v41 = vcombine.high %v15070_v61, %v15074_v6  ;;  %v14950_v11 = vld [vmem:[%s18494_s24 + $0x1158] sm:$0xff] }
 0x6cf   : > { %8763 = vmatprep.subr.bf16.mxu1 %v15929_v13  ;;  %v14954_v13 = vld [vmem:[%s18494_s24 + $0x1178] sm:$0xff] }
 0x6d1   : > { %8723 = vmatpush1.bf16.msra.mxu0 %v15800_v17  ;;  %v5665_v17 = vrot.slane %v19712_v9, %v19026_v54  ;;  %v15466_v9 = vcombine.low %v14950_v11, %v14954_v13 }
 0x6d2   : > { %8764 = vmatpush1.bf16.msra.mxu1 %v15928_v18  ;;  %8774 = vmatprep.subr.bf16.mxu0 %v15427_v21  ;;  %v15586_v18 = vcombine.low %v15070_v61, %v15074_v6  ;;  %v15467_v21 = vcombine.high %v14950_v11, %v14954_v13  ;;  %v15106_v11 = vld [vmem:[%s18494_s24 + $0x1638] sm:$0xff] }
 0x6d3   : > { %8815 = vmatprep.subr.bf16.mxu1 %v15555_v27  ;;  %v15595_v27 = vcombine.high %v15078_v14, %v15082_v16 }
 0x6d4   : > { %8725 = vmatmul.mubr.bf16.vlgmr.msra.gmra.mrb[60].mxu0 %v19553_v43 }
 0x6d5   : > { %8766 = vmatmul.mubr.bf16.vlgmr.msra.gmra.mrb[60].mxu1 %v19557_v55  ;;  %8775 = vmatpush1.bf16.msra.mxu0 %v15426_v36  ;;  %v5701_v36 = vrot.slane %v5661_v12, %v18865_v20 }
 0x6d6   : > { %8806 = vmatprep.mubr.bf16.mxu0 %v19441_v48  ;;  %8816 = vmatpush1.bf16.msra.mxu1 %v15554_v1  ;;  %v15570_v48 = vcombine.low %v15054_v7, %v15058_v44  ;;  %v5705_v1 = vrot.slane %v5665_v17, %v18865_v20  ;;  %v14966_v7 = vld [vmem:[%s18494_s24 + $0x11d8] sm:$0xff] }
 0x6d7   : > { %8847 = vmatprep.mubr.bf16.mxu1 %v19445_v52  ;;  %8776 = vmatprep.subr.bf16.mxu0 %v15435_v60  ;;  %v15579_v52 = vcombine.high %v15062_v26, %v15066_v57  ;;  %v15594_v60 = vcombine.low %v15078_v14, %v15082_v16  ;;  %v14970_v44 = vld [vmem:[%s18494_s24 + $0x11f8] sm:$0xff] }
 0x6d8   : > { %8817 = vmatprep.subr.bf16.mxu1 %v15563_v37  ;;  %v15603_v37 = vcombine.high %v15086_v19, %v15090_v24  ;;  %v15483_v51 = vcombine.high %v14966_v7, %v14970_v44  ;;  %v15482_v13 = vcombine.low %v14966_v7, %v14970_v44  ;;  %v14986_v17 = vld [vmem:[%s18494_s24 + $0x1278] sm:$0xff] }
 0x6d9   : > { %8777 = vmatpush1.bf16.msra.mxu0 %v15434_v45  ;;  %v14990_v19 = vld [vmem:[%s18494_s24 + $0x1298] sm:$0xff] }
 0x6da   : > { %8818 = vmatpush1.bf16.msra.mxu1 %v15562_v47  ;;  %8778 = vmatprep.subr.bf16.mxu0 %v15443_v49  ;;  %v14994_v24 = vld [vmem:[%s18494_s24 + $0x12b8] sm:$0xff] }
 0x6db   : > { %8819 = vmatprep.subr.bf16.mxu1 %v15571_v62  ;;  %v15094_v62 = vld [vmem:[%s18494_s24 + $0x15d8] sm:$0xff] }
 0x6dc   : > { %v15610_v12 = vcombine.low %v15094_v62, %v15098_v3  ;;  %v14998_v7 = vld [vmem:[%s18494_s24 + $0x12d8] sm:$0xff] }
 0x6dd   : > { %8779 = vmatpush1.bf16.msra.mxu0 %v15442_v58  ;;  %v15474_v58 = vcombine.low %v14958_v23, %v14962_v35  ;;  %v15002_v44 = vld [vmem:[%s18494_s24 + $0x12f8] sm:$0xff] }
 0x6de   : > { %8820 = vmatpush1.bf16.msra.mxu1 %v15570_v48  ;;  %8780 = vmatprep.subr.bf16.mxu0 %v15451_v59 }
 0x6df   : > { %8821 = vmatprep.subr.bf16.mxu1 %v15579_v52 }
 0x6e1   : > { %8781 = vmatpush1.bf16.msra.mxu0 %v15450_v50  ;;  %v15611_v50 = vcombine.high %v15094_v62, %v15098_v3  ;;  %v15515_v3 = vcombine.high %v14998_v7, %v15002_v44 }
 0x6e2   : > { %8822 = vmatpush1.bf16.msra.mxu1 %v15578_v42  ;;  %8782 = vmatprep.subr.bf16.mxu0 %v15459_v8  ;;  %v14974_v42 = vld [vmem:[%s18494_s24 + $0x1218] sm:$0xff] }
 0x6e3   : > { %8823 = vmatprep.subr.bf16.mxu1 %v15587_v41  ;;  %v14978_v8 = vld [vmem:[%s18494_s24 + $0x1238] sm:$0xff] }
 0x6e4   : > { %v15102_v41 = vld [vmem:[%s18494_s24 + $0x1618] sm:$0xff]  ;;  %v15491_v14 = vcombine.high %v14974_v42, %v14978_v8 }
 0x6e5   : > { %8783 = vmatpush1.bf16.msra.mxu0 %v15458_v15  ;;  %v15619_v16 = vcombine.high %v15102_v41, %v15106_v11  ;;  %v14982_v15 = vld [vmem:[%s18494_s24 + $0x1258] sm:$0xff]  ;;  %v15618_v23 = vcombine.low %v15102_v41, %v15106_v11 }
 0x6e6   : > { %8824 = vmatpush1.bf16.msra.mxu1 %v15586_v18  ;;  %8784 = vmatprep.subr.bf16.mxu0 %v15467_v21  ;;  %v15110_v18 = vld [vmem:[%s18494_s24 + $0x1658] sm:$0xff]  ;;  %v15499_v35 = vcombine.high %v14982_v15, %v14986_v17 }
 0x6e7   : > { %v8480_v4 = vpop.f32.mrb[48].mxu0  ;;  %8825 = vmatprep.subr.bf16.mxu1 %v15595_v27  ;;  %v15114_v21 = vld [vmem:[%s18494_s24 + $0x1678] sm:$0xff]  ;;  %v15490_v27 = vcombine.low %v14974_v42, %v14978_v8 }
 0x6e8   : > { %v8481_v45 = vadd.f32 %v8480_v4, %v5701_v36  ;;  %v8521_v47 = vpop.f32.mrb[48].mxu1  ;;  %v8482_v49 = vpop.f32.mrb[49].mxu0  ;;  %v15627_v36 = vcombine.high %v15110_v18, %v15114_v21  ;;  %v15507_v4 = vcombine.high %v14990_v19, %v14994_v24  ;;  %v15018_v42 = vld [vmem:[%s18494_s24 + $0x1378] sm:$0xff] }
 0x6e9   : > { %v8483_v33 = vadd.f32 %v8482_v49, %v5705_v1  ;;  %v8523_v26 = vpop.f32.mrb[49].mxu1  ;;  %v8484_v57 = vpop.f32.mrb[50].mxu0  ;;  %8785 = vmatpush1.bf16.msra.mxu0 %v15466_v9  ;;  %v15118_v1 = vld [vmem:[%s18494_s24 + $0x1698] sm:$0xff]  ;;  %v15506_v49 = vcombine.low %v14990_v19, %v14994_v24 }
 0x6ea   : > { %v19884_v48 = vadd.f32 %v8521_v47, %v8481_v45  ;;  %v8525_v59 = vpop.f32.mrb[50].mxu1  ;;  %8826 = vmatpush1.bf16.msra.mxu1 %v15594_v60  ;;  %v8485_v52 = vpop.f32.mrb[51].mxu0  ;;  %8786 = vmatprep.subr.bf16.mxu0 %v15475_v10  ;;  %v15122_v9 = vld [vmem:[%s18494_s24 + $0x16b8] sm:$0xff]  ;;  %v15498_v60 = vcombine.low %v14982_v15, %v14986_v17  ;;  %v15626_v10 = vcombine.low %v15110_v18, %v15114_v21 }
 0x6eb   : > { %v19886_v61 = vadd.f32 %v8523_v26, %v8483_v33  ;;  %v8526_v6 = vpop.f32.mrb[51].mxu1  ;;  %8827 = vmatprep.subr.bf16.mxu1 %v15603_v37  ;;  %v15635_v37 = vcombine.high %v15118_v1, %v15122_v9  ;;  %v15126_v45 = vld [vmem:[%s18494_s24 + $0x16d8] sm:$0xff]  ;;  %v15634_v62 = vcombine.low %v15118_v1, %v15122_v9  ;;  %v15514_v52 = vcombine.low %v14998_v7, %v15002_v44 }
 0x6ec   : > { %v15130_v47 = vld [vmem:[%s18494_s24 + $0x16f8] sm:$0xff] }
 0x6ed   : > { %8787 = vmatpush1.bf16.msra.mxu0 %v15474_v58  ;;  %v15643_v33 = vcombine.high %v15126_v45, %v15130_v47  ;;  %v15006_v26 = vld [vmem:[%s18494_s24 + $0x1318] sm:$0xff] }
 0x6ee   : > { %8828 = vmatpush1.bf16.msra.mxu1 %v15602_v46  ;;  %8788 = vmatprep.subr.bf16.mxu0 %v15483_v51  ;;  %v15010_v57 = vld [vmem:[%s18494_s24 + $0x1338] sm:$0xff]  ;;  %v15642_v46 = vcombine.low %v15126_v45, %v15130_v47 }
 0x6ef   : > { %8829 = vmatprep.subr.bf16.mxu1 %v15611_v50  ;;  %v15134_v58 = vld [vmem:[%s18494_s24 + $0x1718] sm:$0xff]  ;;  %v15523_v51 = vcombine.high %v15006_v26, %v15010_v57  ;;  %v15522_v11 = vcombine.low %v15006_v26, %v15010_v57 }
 0x6f0   : > { %v15138_v59 = vld [vmem:[%s18494_s24 + $0x1738] sm:$0xff] }
 0x6f1   : > { %8789 = vmatpush1.bf16.msra.mxu0 %v15482_v13  ;;  %v15651_v6 = vcombine.high %v15134_v58, %v15138_v59  ;;  %v15014_v50 = vld [vmem:[%s18494_s24 + $0x1358] sm:$0xff]  ;;  %v15650_v13 = vcombine.low %v15134_v58, %v15138_v59 }
 0x6f2   : > { %8830 = vmatpush1.bf16.msra.mxu1 %v15610_v12  ;;  %8790 = vmatprep.subr.bf16.mxu0 %v15491_v14  ;;  %v15142_v8 = vld [vmem:[%s18494_s24 + $0x1758] sm:$0xff]  ;;  %v15531_v12 = vcombine.high %v15014_v50, %v15018_v42  ;;  %v15530_v21 = vcombine.low %v15014_v50, %v15018_v42 }
 0x6f3   : > { %8831 = vmatprep.subr.bf16.mxu1 %v15619_v16  ;;  %v15146_v41 = vld [vmem:[%s18494_s24 + $0x1778] sm:$0xff] }
 0x6f4   : > { %v15659_v14 = vcombine.high %v15142_v8, %v15146_v41  ;;  %v15022_v16 = vld [vmem:[%s18494_s24 + $0x1398] sm:$0xff] }
 0x6f5   : > { %8791 = vmatpush1.bf16.msra.mxu0 %v15490_v27  ;;  %v15026_v15 = vld [vmem:[%s18494_s24 + $0x13b8] sm:$0xff]  ;;  %v15658_v27 = vcombine.low %v15142_v8, %v15146_v41 }
 0x6f6   : > { %8832 = vmatpush1.bf16.msra.mxu1 %v15618_v23  ;;  %8792 = vmatprep.subr.bf16.mxu0 %v15499_v35  ;;  %v15150_v17 = vld [vmem:[%s18494_s24 + $0x1798] sm:$0xff]  ;;  %v15539_v23 = vcombine.high %v15022_v16, %v15026_v15  ;;  %v15538_v9 = vcombine.low %v15022_v16, %v15026_v15 }
 0x6f7   : > { %8833 = vmatprep.subr.bf16.mxu1 %v15627_v36  ;;  %v15154_v18 = vld [vmem:[%s18494_s24 + $0x17b8] sm:$0xff] }
 0x6f8   : > { %v15667_v35 = vcombine.high %v15150_v17, %v15154_v18  ;;  %v15030_v36 = vld [vmem:[%s18494_s24 + $0x13d8] sm:$0xff] }
 0x6f9   : > { %8793 = vmatpush1.bf16.msra.mxu0 %v15498_v60  ;;  %v15034_v19 = vld [vmem:[%s18494_s24 + $0x13f8] sm:$0xff]  ;;  %v15666_v60 = vcombine.low %v15150_v17, %v15154_v18 }
 0x6fa   : > { %8834 = vmatpush1.bf16.msra.mxu1 %v15626_v10  ;;  %8794 = vmatprep.subr.bf16.mxu0 %v15507_v4  ;;  %v15158_v24 = vld [vmem:[%s18494_s24 + $0x17d8] sm:$0xff]  ;;  %v15547_v10 = vcombine.high %v15030_v36, %v15034_v19  ;;  %v15546_v47 = vcombine.low %v15030_v36, %v15034_v19 }
 0x6fb   : > { %8835 = vmatprep.subr.bf16.mxu1 %v15635_v37  ;;  %v15162_v1 = vld [vmem:[%s18494_s24 + $0x17f8] sm:$0xff] }
 0x6fc   : > { %v15675_v4 = vcombine.high %v15158_v24, %v15162_v1  ;;  %v15166_v37 = vld [vmem:[%s18494_s24 + $0x1818] sm:$0xff] }
 0x6fd   : > { %8795 = vmatpush1.bf16.msra.mxu0 %v15506_v49  ;;  %v15170_v7 = vld [vmem:[%s18494_s24 + $0x1838] sm:$0xff]  ;;  %v15674_v49 = vcombine.low %v15158_v24, %v15162_v1 }
 0x6fe   : > { %8836 = vmatpush1.bf16.msra.mxu1 %v15634_v62  ;;  %8796 = vmatprep.subr.bf16.mxu0 %v15515_v3  ;;  %v15294_v44 = vld [vmem:[%s18494_s24 + $0x1c18] sm:$0xff]  ;;  %v15683_v62 = vcombine.high %v15166_v37, %v15170_v7  ;;  %v15682_v57 = vcombine.low %v15166_v37, %v15170_v7 }
 0x6ff   : > { %8837 = vmatprep.subr.bf16.mxu1 %v15643_v33  ;;  %v15298_v45 = vld [vmem:[%s18494_s24 + $0x1c38] sm:$0xff] }
 0x700   : > { %v15811_v3 = vcombine.high %v15294_v44, %v15298_v45  ;;  %v15174_v33 = vld [vmem:[%s18494_s24 + $0x1858] sm:$0xff] }
 0x701   : > { %8797 = vmatpush1.bf16.msra.mxu0 %v15514_v52  ;;  %v15178_v26 = vld [vmem:[%s18494_s24 + $0x1878] sm:$0xff]  ;;  %v15810_v52 = vcombine.low %v15294_v44, %v15298_v45 }
 0x702   : > { %8838 = vmatpush1.bf16.msra.mxu1 %v15642_v46  ;;  %8798 = vmatprep.subr.bf16.mxu0 %v15523_v51  ;;  %v15302_v58 = vld [vmem:[%s18494_s24 + $0x1c58] sm:$0xff]  ;;  %v15691_v46 = vcombine.high %v15174_v33, %v15178_v26  ;;  %v15690_v41 = vcombine.low %v15174_v33, %v15178_v26 }
 0x703   : > { %8839 = vmatprep.subr.bf16.mxu1 %v15651_v6  ;;  %v15306_v59 = vld [vmem:[%s18494_s24 + $0x1c78] sm:$0xff] }
 0x704   : > { %v15182_v51 = vld [vmem:[%s18494_s24 + $0x1898] sm:$0xff]  ;;  %v15819_v50 = vcombine.high %v15302_v58, %v15306_v59 }
 0x705   : > { %8799 = vmatpush1.bf16.msra.mxu0 %v15522_v11  ;;  %v15186_v6 = vld [vmem:[%s18494_s24 + $0x18b8] sm:$0xff]  ;;  %v15818_v11 = vcombine.low %v15302_v58, %v15306_v59 }
 0x706   : > { %8840 = vmatpush1.bf16.msra.mxu1 %v15650_v13  ;;  %8800 = vmatprep.subr.bf16.mxu0 %v15531_v12  ;;  %v15310_v42 = vld [vmem:[%s18494_s24 + $0x1c98] sm:$0xff]  ;;  %v15699_v13 = vcombine.high %v15182_v51, %v15186_v6  ;;  %v15698_v15 = vcombine.low %v15182_v51, %v15186_v6 }
 0x707   : > { %8841 = vmatprep.subr.bf16.mxu1 %v15659_v14  ;;  %v15314_v8 = vld [vmem:[%s18494_s24 + $0x1cb8] sm:$0xff] }
 0x708   : > { %v15190_v12 = vld [vmem:[%s18494_s24 + $0x18d8] sm:$0xff] }
 0x709   : > { %8801 = vmatpush1.bf16.msra.mxu0 %v15530_v21  ;;  %v15194_v14 = vld [vmem:[%s18494_s24 + $0x18f8] sm:$0xff] }
 0x70a   : > { %8842 = vmatpush1.bf16.msra.mxu1 %v15658_v27  ;;  %8802 = vmatprep.subr.bf16.mxu0 %v15539_v23  ;;  %v15318_v16 = vld [vmem:[%s18494_s24 + $0x1cd8] sm:$0xff]  ;;  %v15707_v17 = vcombine.high %v15190_v12, %v15194_v14 }
 0x70b   : > { %8843 = vmatprep.subr.bf16.mxu1 %v15667_v35  ;;  %v15198_v18 = vld [vmem:[%s18494_s24 + $0x1918] sm:$0xff]  ;;  %v15706_v35 = vcombine.low %v15190_v12, %v15194_v14 }
 0x70c   : > { %v15202_v21 = vld [vmem:[%s18494_s24 + $0x1938] sm:$0xff] }
 0x70d   : > { %8803 = vmatpush1.bf16.msra.mxu0 %v15538_v9  ;;  %v15326_v27 = vld [vmem:[%s18494_s24 + $0x1d18] sm:$0xff]  ;;  %v15715_v19 = vcombine.high %v15198_v18, %v15202_v21 }
 0x70e   : > { %8844 = vmatpush1.bf16.msra.mxu1 %v15666_v60  ;;  %8804 = vmatprep.subr.bf16.mxu0 %v15547_v10  ;;  %v15330_v23 = vld [vmem:[%s18494_s24 + $0x1d38] sm:$0xff] }
 0x70f   : > { %8845 = vmatprep.subr.bf16.mxu1 %v15675_v4  ;;  %v15843_v24 = vcombine.high %v15326_v27, %v15330_v23  ;;  %v15206_v1 = vld [vmem:[%s18494_s24 + $0x1958] sm:$0xff]  ;;  %v15714_v4 = vcombine.low %v15198_v18, %v15202_v21  ;;  %v15842_v37 = vcombine.low %v15326_v27, %v15330_v23 }
 0x710   : > { %v15210_v9 = vld [vmem:[%s18494_s24 + $0x1978] sm:$0xff] }
 0x711   : > { %8805 = vmatpush1.bf16.msra.mxu0 %v15546_v47  ;;  %v15334_v60 = vld [vmem:[%s18494_s24 + $0x1d58] sm:$0xff]  ;;  %v15723_v7 = vcombine.high %v15206_v1, %v15210_v9 }
 0x712   : > { %8846 = vmatpush1.bf16.msra.mxu1 %v15674_v49  ;;  %8856 = vmatprep.subr.bf16.mxu0 %v15683_v62  ;;  %v15338_v10 = vld [vmem:[%s18494_s24 + $0x1d78] sm:$0xff] }
 0x713   : > { %8897 = vmatprep.subr.bf16.mxu1 %v15811_v3  ;;  %v15851_v44 = vcombine.high %v15334_v60, %v15338_v10  ;;  %v15214_v45 = vld [vmem:[%s18494_s24 + $0x1998] sm:$0xff]  ;;  %v15722_v3 = vcombine.low %v15206_v1, %v15210_v9  ;;  %v15850_v33 = vcombine.low %v15334_v60, %v15338_v10 }
 0x714   : > { %8807 = vmatmul.mubr.bf16.vlgmr.msra.gmra.mrb[64].mxu0 %v19449_v28  ;;  %v15827_v28 = vcombine.high %v15310_v42, %v15314_v8  ;;  %v15218_v47 = vld [vmem:[%s18494_s24 + $0x19b8] sm:$0xff] }
 0x715   : > { %8848 = vmatmul.mubr.bf16.vlgmr.msra.gmra.mrb[64].mxu1 %v19453_v31  ;;  %8857 = vmatpush1.bf16.msra.mxu0 %v15682_v57  ;;  %v15322_v31 = vld [vmem:[%s18494_s24 + $0x1cf8] sm:$0xff]  ;;  %v15731_v26 = vcombine.high %v15214_v45, %v15218_v47 }
 0x716   : > { %8888 = vmatprep.mubr.bf16.mxu0 %v19481_v2  ;;  %8898 = vmatpush1.bf16.msra.mxu1 %v15810_v52  ;;  %v15826_v2 = vcombine.low %v15310_v42, %v15314_v8  ;;  %v15834_v36 = vcombine.low %v15318_v16, %v15322_v31  ;;  %v15342_v49 = vld [vmem:[%s18494_s24 + $0x1d98] sm:$0xff] }
 0x717   : > { %8929 = vmatprep.mubr.bf16.mxu1 %v19485_v5  ;;  %8858 = vmatprep.subr.bf16.mxu0 %v15691_v46  ;;  %v15835_v5 = vcombine.high %v15318_v16, %v15322_v31  ;;  %v15346_v62 = vld [vmem:[%s18494_s24 + $0x1db8] sm:$0xff] }
 0x718   : > { %8899 = vmatprep.subr.bf16.mxu1 %v15819_v50  ;;  %v15859_v58 = vcombine.high %v15342_v49, %v15346_v62  ;;  %v15222_v59 = vld [vmem:[%s18494_s24 + $0x19d8] sm:$0xff] }
 0x719   : > { %8859 = vmatpush1.bf16.msra.mxu0 %v15690_v41  ;;  %v15226_v52 = vld [vmem:[%s18494_s24 + $0x19f8] sm:$0xff] }
 0x71a   : > { %8900 = vmatpush1.bf16.msra.mxu1 %v15818_v11  ;;  %8860 = vmatprep.subr.bf16.mxu0 %v15699_v13  ;;  %v15350_v50 = vld [vmem:[%s18494_s24 + $0x1dd8] sm:$0xff]  ;;  %v15730_v13 = vcombine.low %v15214_v45, %v15218_v47  ;;  %v15739_v16 = vcombine.high %v15222_v59, %v15226_v52  ;;  %v15738_v21 = vcombine.low %v15222_v59, %v15226_v52 }
 0x71b   : > { %8901 = vmatprep.subr.bf16.mxu1 %v15827_v28  ;;  %v15354_v42 = vld [vmem:[%s18494_s24 + $0x1df8] sm:$0xff] }
 0x71c   : > { %v15362_v18 = vld [vmem:[%s18494_s24 + $0x1e38] sm:$0xff]  ;;  %v15866_v27 = vcombine.low %v15350_v50, %v15354_v42 }
 0x71d   : > { %8861 = vmatpush1.bf16.msra.mxu0 %v15698_v15  ;;  %v15867_v15 = vcombine.high %v15350_v50, %v15354_v42  ;;  %v15370_v1 = vld [vmem:[%s18494_s24 + $0x1e78] sm:$0xff] }
 0x71e   : > { %8902 = vmatpush1.bf16.msra.mxu1 %v15826_v2  ;;  %8862 = vmatprep.subr.bf16.mxu0 %v15707_v17  ;;  %v15230_v2 = vld [vmem:[%s18494_s24 + $0x1a18] sm:$0xff] }
 0x71f   : > { %8903 = vmatprep.subr.bf16.mxu1 %v15835_v5  ;;  %v15234_v17 = vld [vmem:[%s18494_s24 + $0x1a38] sm:$0xff] }
 0x720   : > { %v15358_v5 = vld [vmem:[%s18494_s24 + $0x1e18] sm:$0xff]  ;;  %v15747_v23 = vcombine.high %v15230_v2, %v15234_v17  ;;  %v15746_v9 = vcombine.low %v15230_v2, %v15234_v17 }
 0x721   : > { %8863 = vmatpush1.bf16.msra.mxu0 %v15706_v35  ;;  %v15875_v35 = vcombine.high %v15358_v5, %v15362_v18  ;;  %v15874_v60 = vcombine.low %v15358_v5, %v15362_v18  ;;  %v15378_v45 = vld [vmem:[%s18494_s24 + $0x1eb8] sm:$0xff] }
 0x722   : > { %8904 = vmatpush1.bf16.msra.mxu1 %v15834_v36  ;;  %8864 = vmatprep.subr.bf16.mxu0 %v15715_v19  ;;  %v15238_v36 = vld [vmem:[%s18494_s24 + $0x1a58] sm:$0xff] }
 0x723   : > { %8905 = vmatprep.subr.bf16.mxu1 %v15843_v24  ;;  %v15242_v19 = vld [vmem:[%s18494_s24 + $0x1a78] sm:$0xff] }
 0x724   : > { %v15366_v24 = vld [vmem:[%s18494_s24 + $0x1e58] sm:$0xff]  ;;  %v15755_v10 = vcombine.high %v15238_v36, %v15242_v19  ;;  %v15754_v47 = vcombine.low %v15238_v36, %v15242_v19 }
 0x725   : > { %8865 = vmatpush1.bf16.msra.mxu0 %v15714_v4  ;;  %v15883_v4 = vcombine.high %v15366_v24, %v15370_v1  ;;  %v15266_v50 = vld [vmem:[%s18494_s24 + $0x1b38] sm:$0xff] }
 0x726   : > { %8906 = vmatpush1.bf16.msra.mxu1 %v15842_v37  ;;  %8866 = vmatprep.subr.bf16.mxu0 %v15723_v7  ;;  %v15246_v37 = vld [vmem:[%s18494_s24 + $0x1a98] sm:$0xff] }
 0x727   : > { %v8562_v57 = vpop.f32.mrb[52].mxu0  ;;  %8907 = vmatprep.subr.bf16.mxu1 %v15851_v44  ;;  %v15250_v7 = vld [vmem:[%s18494_s24 + $0x1ab8] sm:$0xff] }
 0x728   : > { %v8563_v46 = vadd.f32 %v8562_v57, %v19884_v48  ;;  %v8603_v51 = vpop.f32.mrb[52].mxu1  ;;  %v8564_v6 = vpop.f32.mrb[53].mxu0  ;;  %v15858_v48 = vcombine.low %v15342_v49, %v15346_v62  ;;  %v15374_v44 = vld [vmem:[%s18494_s24 + $0x1e98] sm:$0xff]  ;;  %v15882_v49 = vcombine.low %v15366_v24, %v15370_v1  ;;  %v15763_v62 = vcombine.high %v15246_v37, %v15250_v7 }
 0x729   : > { %v8565_v8 = vadd.f32 %v8564_v6, %v19886_v61  ;;  %v8605_v41 = vpop.f32.mrb[53].mxu1  ;;  %v8566_v11 = vpop.f32.mrb[54].mxu0  ;;  %8867 = vmatpush1.bf16.msra.mxu0 %v15722_v3  ;;  %v15891_v3 = vcombine.high %v15374_v44, %v15378_v45  ;;  %v15382_v57 = vld [vmem:[%s18494_s24 + $0x1ed8] sm:$0xff]  ;;  %v15762_v59 = vcombine.low %v15246_v37, %v15250_v7  ;;  %v15890_v52 = vcombine.low %v15374_v44, %v15378_v45  ;;  %v15948_v45 = vld [vmem:[%s18509_s12 + $0x480] sm:$0xff] }
 0x72a   : > { %v19958_v28 = vadd.f32 %v8603_v51, %v8563_v46  ;;  %v8607_v12 = vpop.f32.mrb[54].mxu1  ;;  %8908 = vmatpush1.bf16.msra.mxu1 %v15850_v33  ;;  %v8567_v14 = vpop.f32.mrb[55].mxu0  ;;  %8868 = vmatprep.subr.bf16.mxu0 %v15731_v26  ;;  %v15254_v33 = vld [vmem:[%s18494_s24 + $0x1ad8] sm:$0xff] }
 0x72b   : > { %v19960_v31 = vadd.f32 %v8605_v41, %v8565_v8  ;;  %v8608_v61 = vpop.f32.mrb[55].mxu1  ;;  %8909 = vmatprep.subr.bf16.mxu1 %v15859_v58  ;;  %v15258_v26 = vld [vmem:[%s18494_s24 + $0x1af8] sm:$0xff] }
 0x72c   : > { %v15386_v58 = vld [vmem:[%s18494_s24 + $0x1ef8] sm:$0xff]  ;;  %v15771_v46 = vcombine.high %v15254_v33, %v15258_v26  ;;  %v15770_v41 = vcombine.low %v15254_v33, %v15258_v26 }
 0x72d   : > { %8869 = vmatpush1.bf16.msra.mxu0 %v15730_v13  ;;  %v15899_v51 = vcombine.high %v15382_v57, %v15386_v58  ;;  %v15262_v6 = vld [vmem:[%s18494_s24 + $0x1b18] sm:$0xff]  ;;  %v15898_v11 = vcombine.low %v15382_v57, %v15386_v58  ;;  %v15932_v57 = vld [vmem:[%s18509_s12 + $0x400] sm:$0xff]  ;;  %v15933_v58 = vld [vmem:[%s18509_s12 + $0x408] sm:$0xff] }
 0x72e   : > { %8910 = vmatpush1.bf16.msra.mxu1 %v15858_v48  ;;  %8870 = vmatprep.subr.bf16.mxu0 %v15739_v16  ;;  %v15390_v42 = vld [vmem:[%s18494_s24 + $0x1f18] sm:$0xff]  ;;  %v15779_v13 = vcombine.high %v15262_v6, %v15266_v50 }
 0x72f   : > { %8911 = vmatprep.subr.bf16.mxu1 %v15867_v15  ;;  %v15394_v8 = vld [vmem:[%s18494_s24 + $0x1f38] sm:$0xff]  ;;  %v15778_v15 = vcombine.low %v15262_v6, %v15266_v50  ;;  %v17877_v50 = vpack.c.bf16 %v15933_v58, %v15932_v57  ;;  %v15940_v58 = vld [vmem:[%s18509_s12 + $0x440] sm:$0xff] }
 0x730   : > { %v15907_v12 = vcombine.high %v15390_v42, %v15394_v8  ;;  %v15270_v14 = vld [vmem:[%s18494_s24 + $0x1b58] sm:$0xff]  ;;  %v15906_v2 = vcombine.low %v15390_v42, %v15394_v8  ;;  %v15982_v42 = vld [vmem:[%s18509_s12 + $0x590] sm:$0xff] }
 0x731   : > { %8871 = vmatpush1.bf16.msra.mxu0 %v15738_v21  ;;  %v15274_v48 = vld [vmem:[%s18494_s24 + $0x1b78] sm:$0xff] }
 0x732   : > { %8912 = vmatpush1.bf16.msra.mxu1 %v15866_v27  ;;  %8872 = vmatprep.subr.bf16.mxu0 %v15747_v23  ;;  %v15398_v16 = vld [vmem:[%s18494_s24 + $0x1f58] sm:$0xff]  ;;  %v15787_v17 = vcombine.high %v15270_v14, %v15274_v48 }
 0x733   : > { %8913 = vmatprep.subr.bf16.mxu1 %v15875_v35  ;;  %v15402_v61 = vld [vmem:[%s18494_s24 + $0x1f78] sm:$0xff]  ;;  %v15786_v35 = vcombine.low %v15270_v14, %v15274_v48 }
 0x734   : > { %v15915_v5 = vcombine.high %v15398_v16, %v15402_v61  ;;  %v15278_v18 = vld [vmem:[%s18494_s24 + $0x1b98] sm:$0xff]  ;;  %v15914_v36 = vcombine.low %v15398_v16, %v15402_v61  ;;  %v15952_v16 = vld [vmem:[%s18509_s12 + $0x4a0] sm:$0xff]  ;;  %v15953_v61 = vld [vmem:[%s18509_s12 + $0x4a8] sm:$0xff] }
 0x735   : > { %8873 = vmatpush1.bf16.msra.mxu0 %v15746_v9  ;;  %v15282_v21 = vld [vmem:[%s18494_s24 + $0x1bb8] sm:$0xff] }
 0x736   : > { %8914 = vmatpush1.bf16.msra.mxu1 %v15874_v60  ;;  %8874 = vmatprep.subr.bf16.mxu0 %v15755_v10  ;;  %v15406_v27 = vld [vmem:[%s18494_s24 + $0x1f98] sm:$0xff]  ;;  %v15795_v19 = vcombine.high %v15278_v18, %v15282_v21 }
 0x737   : > { %8915 = vmatprep.subr.bf16.mxu1 %v15883_v4  ;;  %v15410_v23 = vld [vmem:[%s18494_s24 + $0x1fb8] sm:$0xff]  ;;  %v15794_v4 = vcombine.low %v15278_v18, %v15282_v21  ;;  %v17883_v21 = vpack.c.bf16 %v15953_v61, %v15952_v16  ;;  %v15974_v61 = vld [vmem:[%s18509_s12 + $0x550] sm:$0xff] }
 0x738   : > { %v15923_v24 = vcombine.high %v15406_v27, %v15410_v23  ;;  %v15286_v1 = vld [vmem:[%s18494_s24 + $0x1bd8] sm:$0xff]  ;;  %v15922_v37 = vcombine.low %v15406_v27, %v15410_v23  ;;  %v15936_v27 = vld [vmem:[%s18509_s12 + $0x420] sm:$0xff]  ;;  %v15937_v23 = vld [vmem:[%s18509_s12 + $0x428] sm:$0xff] }
 0x739   : > { %8875 = vmatpush1.bf16.msra.mxu0 %v15754_v47  ;;  %v15290_v9 = vld [vmem:[%s18494_s24 + $0x1bf8] sm:$0xff]  ;;  %v15949_v47 = vld [vmem:[%s18509_s12 + $0x488] sm:$0xff] }
 0x73a   : > { %8916 = vmatpush1.bf16.msra.mxu1 %v15882_v49  ;;  %8876 = vmatprep.subr.bf16.mxu0 %v15763_v62  ;;  %v15414_v60 = vld [vmem:[%s18494_s24 + $0x1fd8] sm:$0xff]  ;;  %v15803_v7 = vcombine.high %v15286_v1, %v15290_v9  ;;  %v15980_v49 = vld [vmem:[%s18509_s12 + $0x580] sm:$0xff]  ;;  %v15981_v62 = vld [vmem:[%s18509_s12 + $0x588] sm:$0xff]  ;;  %v17875_v26 = vpack.c.bf16 %v15949_v47, %v15948_v45 }
 0x73b   : > { %8917 = vmatprep.subr.bf16.mxu1 %v15891_v3  ;;  %v15418_v10 = vld [vmem:[%s18494_s24 + $0x1ff8] sm:$0xff]  ;;  %v15802_v3 = vcombine.low %v15286_v1, %v15290_v9  ;;  %v17885_v1 = vpack.c.bf16 %v15937_v23, %v15936_v27  ;;  %v15957_v45 = vld [vmem:[%s18509_s12 + $0x4c8] sm:$0xff]  ;;  %v15988_v47 = vld [vmem:[%s18509_s12 + $0x5c0] sm:$0xff] }
 0x73c   : > { %v15931_v44 = vcombine.high %v15414_v60, %v15418_v10  ;;  %v15930_v33 = vcombine.low %v15414_v60, %v15418_v10  ;;  %v15951_v6 = vld [vmem:[%s18509_s12 + $0x498] sm:$0xff]  ;;  %v15938_v60 = vld [vmem:[%s18509_s12 + $0x430] sm:$0xff]  ;;  %v15993_v27 = vld [vmem:[%s18509_s12 + $0x5e8] sm:$0xff] }
 0x73d   : > { %8877 = vmatpush1.bf16.msra.mxu0 %v15762_v59  ;;  %v17907_v59 = vpack.c.bf16 %v15981_v62, %v15980_v49  ;;  %v15983_v8 = vld [vmem:[%s18509_s12 + $0x598] sm:$0xff]  ;;  %v15989_v49 = vld [vmem:[%s18509_s12 + $0x5c8] sm:$0xff] }
 0x73e   : > { %8918 = vmatpush1.bf16.msra.mxu1 %v15890_v52  ;;  %8878 = vmatprep.subr.bf16.mxu0 %v15771_v46  ;;  %v15964_v52 = vld [vmem:[%s18509_s12 + $0x500] sm:$0xff]  ;;  %v15965_v46 = vld [vmem:[%s18509_s12 + $0x508] sm:$0xff]  ;;  %v15967_v48 = vld [vmem:[%s18509_s12 + $0x518] sm:$0xff] }
 0x73f   : > { %8919 = vmatprep.subr.bf16.mxu1 %v15899_v51  ;;  %v15950_v51 = vld [vmem:[%s18509_s12 + $0x490] sm:$0xff]  ;;  %v15939_v10 = vld [vmem:[%s18509_s12 + $0x438] sm:$0xff]  ;;  %v18257_v62 = vld [vmem:[%s18504_s20 + $0x8] sm:$0xff] }
 0x740   : > { %v17879_v14 = vpack.c.bf16 %v15951_v6, %v15950_v51  ;;  %v15973_v51 = vld [vmem:[%s18509_s12 + $0x548] sm:$0xff]  ;;  %v15958_v6 = vld [vmem:[%s18509_s12 + $0x4d0] sm:$0xff]  ;;  %v15943_v16 = vld [vmem:[%s18509_s12 + $0x458] sm:$0xff] }
 0x741   : > { %8879 = vmatpush1.bf16.msra.mxu0 %v15770_v41  ;;  %v17909_v41 = vpack.c.bf16 %v15965_v46, %v15964_v52  ;;  %v15972_v52 = vld [vmem:[%s18509_s12 + $0x540] sm:$0xff]  ;;  %v17923_v46 = vpack.c.bf16 %v15989_v49, %v15988_v47 }
 0x742   : > { %8920 = vmatpush1.bf16.msra.mxu1 %v15898_v11  ;;  %8880 = vmatprep.subr.bf16.mxu0 %v15779_v13  ;;  %v15934_v11 = vld [vmem:[%s18509_s12 + $0x410] sm:$0xff]  ;;  %v15935_v13 = vld [vmem:[%s18509_s12 + $0x418] sm:$0xff] }
 0x743   : > { %8921 = vmatprep.subr.bf16.mxu1 %v15907_v12  ;;  %v15966_v12 = vld [vmem:[%s18509_s12 + $0x510] sm:$0xff] }
 0x744   : > { %v17913_v18 = vpack.c.bf16 %v15967_v48, %v15966_v12  ;;  %v17925_v12 = vpack.c.bf16 %v15973_v51, %v15972_v52  ;;  %v15942_v48 = vld [vmem:[%s18509_s12 + $0x450] sm:$0xff] }
 0x745   : > { %8881 = vmatpush1.bf16.msra.mxu0 %v15778_v15  ;;  %v17911_v15 = vpack.c.bf16 %v15983_v8, %v15982_v42  ;;  %v15990_v8 = vld [vmem:[%s18509_s12 + $0x5d0] sm:$0xff] }
 0x746   : > { %8922 = vmatpush1.bf16.msra.mxu1 %v15906_v2  ;;  %8882 = vmatprep.subr.bf16.mxu0 %v15787_v17  ;;  %v15984_v2 = vld [vmem:[%s18509_s12 + $0x5a0] sm:$0xff]  ;;  %v15985_v17 = vld [vmem:[%s18509_s12 + $0x5a8] sm:$0xff]  ;;  %v15946_v52 = vld [vmem:[%s18509_s12 + $0x470] sm:$0xff] }
 0x747   : > { %8923 = vmatprep.subr.bf16.mxu1 %v15915_v5  ;;  %v17881_v5 = vpack.c.bf16 %v15935_v13, %v15934_v11  ;;  %v15978_v51 = vld [vmem:[%s18509_s12 + $0x570] sm:$0xff] }
 0x749   : > { %8883 = vmatpush1.bf16.msra.mxu0 %v15786_v35  ;;  %v17915_v35 = vpack.c.bf16 %v15985_v17, %v15984_v2  ;;  %v15975_v2 = vld [vmem:[%s18509_s12 + $0x558] sm:$0xff]  ;;  %v15960_v17 = vld [vmem:[%s18509_s12 + $0x4e0] sm:$0xff] }
 0x74a   : > { %8924 = vmatpush1.bf16.msra.mxu1 %v15914_v36  ;;  %8884 = vmatprep.subr.bf16.mxu0 %v15795_v19  ;;  %v15954_v36 = vld [vmem:[%s18509_s12 + $0x4b0] sm:$0xff]  ;;  %v15955_v19 = vld [vmem:[%s18509_s12 + $0x4b8] sm:$0xff] }
 0x74b   : > { %8925 = vmatprep.subr.bf16.mxu1 %v15923_v24  ;;  %v15987_v24 = vld [vmem:[%s18509_s12 + $0x5b8] sm:$0xff]  ;;  %v17887_v9 = vpack.c.bf16 %v15955_v19, %v15954_v36  ;;  %v15944_v36 = vld [vmem:[%s18509_s12 + $0x460] sm:$0xff]  ;;  %v15945_v19 = vld [vmem:[%s18509_s12 + $0x468] sm:$0xff] }
 0x74d   : > { %8885 = vmatpush1.bf16.msra.mxu0 %v15794_v4  ;;  %v15970_v4 = vld [vmem:[%s18509_s12 + $0x530] sm:$0xff] }
 0x74e   : > { %8926 = vmatpush1.bf16.msra.mxu1 %v15922_v37  ;;  %8886 = vmatprep.subr.bf16.mxu0 %v15803_v7  ;;  %v15971_v7 = vld [vmem:[%s18509_s12 + $0x538] sm:$0xff] }
 0x74f   : > { %8927 = vmatprep.subr.bf16.mxu1 %v15931_v44  ;;  %v15956_v44 = vld [vmem:[%s18509_s12 + $0x4c0] sm:$0xff] }
 0x750   : > { %v17891_v57 = vpack.c.bf16 %v15957_v45, %v15956_v44  ;;  %v15995_v44 = vld [vmem:[%s18509_s12 + $0x5f8] sm:$0xff] }
 0x751   : > { %8887 = vmatpush1.bf16.msra.mxu0 %v15802_v3  ;;  %v20035_v3 = vunpack.c.h.bf16 %v18257_v62  ;;  %v17901_v62 = vpack.c.bf16 %v15945_v19, %v15944_v36  ;;  %v15999_v36 = vld [vmem:[%s18509_s12 + $0x618] sm:$0xff]  ;;  %v16030_v19 = vld [vmem:[%s18509_s12 + $0x710] sm:$0xff] }
 0x752   : > { %8928 = vmatpush1.bf16.msra.mxu1 %v15930_v33  ;;  %17876 = vmatprep.subr.bf16.mxu0 %v17875_v26  ;;  %v17889_v33 = vpack.c.bf16 %v15939_v10, %v15938_v60  ;;  %v17921_v26 = vpack.c.bf16 %v15971_v7, %v15970_v4  ;;  %v15963_v60 = vld [vmem:[%s18509_s12 + $0x4f8] sm:$0xff]  ;;  %v15994_v7 = vld [vmem:[%s18509_s12 + $0x5f0] sm:$0xff] }
 0x753   : > { %17908 = vmatprep.subr.bf16.mxu1 %v17907_v59  ;;  %v15941_v59 = vld [vmem:[%s18509_s12 + $0x448] sm:$0xff]  ;;  %v5669_v42 = vrot.slane %v20035_v3, %v18865_v20  ;;  %v5673_v13 = vrot.slane %v20035_v3, %v18868_v22 }
 0x754   : > { %8889 = vmatmul.mubr.bf16.vlgmr.msra.gmra.mrb[68].mxu0 %v19553_v43  ;;  %v15968_v43 = vld [vmem:[%s18509_s12 + $0x520] sm:$0xff]  ;;  %v17893_v11 = vpack.c.bf16 %v15941_v59, %v15940_v58 }
 0x755   : > { %8930 = vmatmul.mubr.bf16.vlgmr.msra.gmra.mrb[68].mxu1 %v19557_v55  ;;  %17878 = vmatpush3.bf16.msra.mxu0 %v17877_v50  ;;  %v15969_v55 = vld [vmem:[%s18509_s12 + $0x528] sm:$0xff]  ;;  %v15959_v50 = vld [vmem:[%s18509_s12 + $0x4d8] sm:$0xff]  ;;  %v5713_v23 = vrot.slane %v5673_v13, %v18865_v20  ;;  %v16044_v13 = vld [vmem:[%s18509_s12 + $0x780] sm:$0xff] }
 0x756   : > { %9131 = vmatprep.mubr.f32.mxu0 %v19435_v56  ;;  %17910 = vmatpush3.bf16.msra.mxu1 %v17909_v41  ;;  %v15986_v56 = vld [vmem:[%s18509_s12 + $0x5b0] sm:$0xff]  ;;  %v15991_v41 = vld [vmem:[%s18509_s12 + $0x5d8] sm:$0xff] }
 0x757   : > { %9201 = vmatprep.mubr.f32.mxu1 %v19437_v39  ;;  %17880 = vmatprep.subr.bf16.mxu0 %v17879_v14  ;;  %v17917_v39 = vpack.c.bf16 %v15969_v55, %v15968_v43  ;;  %v17919_v37 = vpack.c.bf16 %v15987_v24, %v15986_v56  ;;  %v17895_v14 = vpack.c.bf16 %v15959_v50, %v15958_v6  ;;  %v15976_v56 = vld [vmem:[%s18509_s12 + $0x560] sm:$0xff] }
 0x758   : > { %17912 = vmatprep.subr.bf16.mxu1 %v17911_v15  ;;  %v17927_v15 = vpack.c.bf16 %v15991_v41, %v15990_v8  ;;  %v17897_v43 = vpack.c.bf16 %v15943_v16, %v15942_v48  ;;  %v15979_v8 = vld [vmem:[%s18509_s12 + $0x578] sm:$0xff]  ;;  %v16012_v41 = vld [vmem:[%s18509_s12 + $0x680] sm:$0xff] }
 0x759   : > { %17882 = vmatpush3.bf16.msra.mxu0 %v17881_v5  ;;  %v15961_v5 = vld [vmem:[%s18509_s12 + $0x4e8] sm:$0xff]  ;;  %v17937_v48 = vpack.c.bf16 %v15979_v8, %v15978_v51 }
 0x75a   : > { %17914 = vmatpush3.bf16.msra.mxu1 %v17913_v18  ;;  %17884 = vmatprep.subr.bf16.mxu0 %v17883_v21  ;;  %v5709_v18 = vrot.slane %v5669_v42, %v18865_v20  ;;  %v15992_v21 = vld [vmem:[%s18509_s12 + $0x5e0] sm:$0xff]  ;;  %v17899_v55 = vpack.c.bf16 %v15961_v5, %v15960_v17  ;;  %v17935_v42 = vpack.c.bf16 %v15995_v44, %v15994_v7  ;;  %v16029_v5 = vld [vmem:[%s18509_s12 + $0x708] sm:$0xff] }
 0x75b   : > { %17916 = vmatprep.subr.bf16.mxu1 %v17915_v35  ;;  %v17929_v35 = vpack.c.bf16 %v15975_v2, %v15974_v61  ;;  %v15996_v61 = vld [vmem:[%s18509_s12 + $0x600] sm:$0xff]  ;;  %v16021_v8 = vld [vmem:[%s18509_s12 + $0x6c8] sm:$0xff] }
 0x75c   : > { %v16028_v17 = vld [vmem:[%s18509_s12 + $0x700] sm:$0xff] }
 0x75d   : > { %17886 = vmatpush3.bf16.msra.mxu0 %v17885_v1  ;;  %v17931_v1 = vpack.c.bf16 %v15993_v27, %v15992_v21  ;;  %v16015_v21 = vld [vmem:[%s18509_s12 + $0x698] sm:$0xff]  ;;  %v16000_v44 = vld [vmem:[%s18509_s12 + $0x620] sm:$0xff] }
 0x75e   : > { %17918 = vmatpush3.bf16.msra.mxu1 %v17917_v39  ;;  %17888 = vmatprep.subr.bf16.mxu0 %v17887_v9  ;;  %v15977_v39 = vld [vmem:[%s18509_s12 + $0x568] sm:$0xff]  ;;  %v15962_v9 = vld [vmem:[%s18509_s12 + $0x4f0] sm:$0xff] }
 0x75f   : > { %17920 = vmatprep.subr.bf16.mxu1 %v17919_v37  ;;  %v17933_v58 = vpack.c.bf16 %v15977_v39, %v15976_v56  ;;  %v17903_v59 = vpack.c.bf16 %v15963_v60, %v15962_v9  ;;  %v16017_v39 = vld [vmem:[%s18509_s12 + $0x6a8] sm:$0xff]  ;;  %v16048_v60 = vld [vmem:[%s18509_s12 + $0x7a0] sm:$0xff] }
 0x761   : > { %17890 = vmatpush3.bf16.msra.mxu0 %v17889_v33 }
 0x762   : > { %17922 = vmatpush3.bf16.msra.mxu1 %v17921_v26  ;;  %17892 = vmatprep.subr.bf16.mxu0 %v17891_v57 }
 0x763   : > { %17924 = vmatprep.subr.bf16.mxu1 %v17923_v46  ;;  %v15947_v46 = vld [vmem:[%s18509_s12 + $0x478] sm:$0xff] }
 0x765   : > { %17894 = vmatpush3.bf16.msra.mxu0 %v17893_v11  ;;  %v16013_v11 = vld [vmem:[%s18509_s12 + $0x688] sm:$0xff] }
 0x766   : > { %17926 = vmatpush3.bf16.msra.mxu1 %v17925_v12  ;;  %17896 = vmatprep.subr.bf16.mxu0 %v17895_v14  ;;  %v16045_v12 = vld [vmem:[%s18509_s12 + $0x788] sm:$0xff]  ;;  %v17905_v14 = vpack.c.bf16 %v15947_v46, %v15946_v52  ;;  %v17939_v16 = vpack.c.bf16 %v16013_v11, %v16012_v41  ;;  %v16003_v52 = vld [vmem:[%s18509_s12 + $0x638] sm:$0xff]  ;;  %v16034_v46 = vld [vmem:[%s18509_s12 + $0x730] sm:$0xff] }
 0x767   : > { %v8644_v24 = vpop.f32.mrb[56].mxu0  ;;  %17928 = vmatprep.subr.bf16.mxu1 %v17927_v15  ;;  %v15997_v15 = vld [vmem:[%s18509_s12 + $0x608] sm:$0xff]  ;;  %v17971_v2 = vpack.c.bf16 %v16045_v12, %v16044_v13  ;;  %v16052_v41 = vld [vmem:[%s18509_s12 + $0x7c0] sm:$0xff] }
 0x768   : > { %v8645_v10 = vadd.f32 %v8644_v24, %v5709_v18  ;;  %v8685_v4 = vpop.f32.mrb[56].mxu1  ;;  %v8646_v37 = vpop.f32.mrb[57].mxu0  ;;  %v16014_v18 = vld [vmem:[%s18509_s12 + $0x690] sm:$0xff]  ;;  %v17941_v27 = vpack.c.bf16 %v15997_v15, %v15996_v61  ;;  %v16031_v24 = vld [vmem:[%s18509_s12 + $0x718] sm:$0xff]  ;;  %v16053_v11 = vld [vmem:[%s18509_s12 + $0x7c8] sm:$0xff] }
 0x769   : > { %v8647_v45 = vadd.f32 %v8646_v37, %v5713_v23  ;;  %v8687_v47 = vpop.f32.mrb[57].mxu1  ;;  %v8648_v49 = vpop.f32.mrb[58].mxu0  ;;  %17898 = vmatpush3.bf16.msra.mxu0 %v17897_v43  ;;  %v16046_v23 = vld [vmem:[%s18509_s12 + $0x790] sm:$0xff]  ;;  %v16047_v43 = vld [vmem:[%s18509_s12 + $0x798] sm:$0xff]  ;;  %v17943_v56 = vpack.c.bf16 %v16015_v21, %v16014_v18  ;;  %v17977_v37 = vpack.c.bf16 %v16031_v24, %v16030_v19  ;;  %v16036_v61 = vld [vmem:[%s18509_s12 + $0x740] sm:$0xff]  ;;  %v17987_v15 = vpack.c.bf16 %v16053_v11, %v16052_v41 }
 0x76a   : > { %v20067_v33 = vadd.f32 %v8685_v4, %v8645_v10  ;;  %v8689_v26 = vpop.f32.mrb[58].mxu1  ;;  %17930 = vmatpush3.bf16.msra.mxu1 %v17929_v35  ;;  %v8649_v57 = vpop.f32.mrb[59].mxu0  ;;  %17900 = vmatprep.subr.bf16.mxu0 %v17899_v55  ;;  %v17973_v35 = vpack.c.bf16 %v16029_v5, %v16028_v17  ;;  %v15998_v55 = vld [vmem:[%s18509_s12 + $0x610] sm:$0xff]  ;;  %v17975_v9 = vpack.c.bf16 %v16047_v43, %v16046_v23  ;;  %v16049_v10 = vld [vmem:[%s18509_s12 + $0x7a8] sm:$0xff]  ;;  %v16023_v5 = vld [vmem:[%s18509_s12 + $0x6d8] sm:$0xff] }
 0x76b   : > { %v20072_v6 = vadd.f32 %v8687_v47, %v8647_v45  ;;  %v8690_v50 = vpop.f32.mrb[59].mxu1  ;;  %17932 = vmatprep.subr.bf16.mxu1 %v17931_v1  ;;  %v16016_v1 = vld [vmem:[%s18509_s12 + $0x6a0] sm:$0xff]  ;;  %v17945_v4 = vpack.c.bf16 %v15999_v36, %v15998_v55  ;;  %v16001_v45 = vld [vmem:[%s18509_s12 + $0x628] sm:$0xff]  ;;  %v17979_v47 = vpack.c.bf16 %v16049_v10, %v16048_v60  ;;  %v16018_v49 = vld [vmem:[%s18509_s12 + $0x6b0] sm:$0xff] }
 0x76c   : > { %v17947_v7 = vpack.c.bf16 %v16017_v39, %v16016_v1  ;;  %v16051_v26 = vld [vmem:[%s18509_s12 + $0x7b8] sm:$0xff]  ;;  %v17949_v57 = vpack.c.bf16 %v16001_v45, %v16000_v44  ;;  %v16022_v17 = vld [vmem:[%s18509_s12 + $0x6d0] sm:$0xff]  ;;  %v16024_v24 = vld [vmem:[%s18509_s12 + $0x6e0] sm:$0xff] }
 0x76d   : > { %17902 = vmatpush3.bf16.msra.mxu0 %v17901_v62  ;;  %v16019_v62 = vld [vmem:[%s18509_s12 + $0x6b8] sm:$0xff]  ;;  %v16054_v18 = vld [vmem:[%s18509_s12 + $0x7d0] sm:$0xff]  ;;  %v17959_v43 = vpack.c.bf16 %v16023_v5, %v16022_v17  ;;  %v16025_v1 = vld [vmem:[%s18509_s12 + $0x6e8] sm:$0xff] }
 0x76e   : > { %17934 = vmatpush3.bf16.msra.mxu1 %v17933_v58  ;;  %17904 = vmatprep.subr.bf16.mxu0 %v17903_v59  ;;  %v17951_v58 = vpack.c.bf16 %v16019_v62, %v16018_v49  ;;  %v16002_v59 = vld [vmem:[%s18509_s12 + $0x630] sm:$0xff]  ;;  %v16035_v50 = vld [vmem:[%s18509_s12 + $0x738] sm:$0xff]  ;;  %v16056_v39 = vld [vmem:[%s18509_s12 + $0x7e0] sm:$0xff] }
 0x76f   : > { %17936 = vmatprep.subr.bf16.mxu1 %v17935_v42  ;;  %v16020_v42 = vld [vmem:[%s18509_s12 + $0x6c0] sm:$0xff]  ;;  %v17953_v13 = vpack.c.bf16 %v16003_v52, %v16002_v59  ;;  %v17985_v12 = vpack.c.bf16 %v16035_v50, %v16034_v46  ;;  %v16055_v21 = vld [vmem:[%s18509_s12 + $0x7d8] sm:$0xff]  ;;  %v16038_v36 = vld [vmem:[%s18509_s12 + $0x750] sm:$0xff] }
 0x770   : > { %v16007_v55 = vld [vmem:[%s18509_s12 + $0x658] sm:$0xff]  ;;  %v17991_v19 = vpack.c.bf16 %v16055_v21, %v16054_v18  ;;  %v16040_v44 = vld [vmem:[%s18509_s12 + $0x760] sm:$0xff]  ;;  %v16058_v49 = vld [vmem:[%s18509_s12 + $0x7f0] sm:$0xff]  ;;  %v5681_v21 = vrot.slane %v20035_v3, %v19026_v54 }
 0x771   : > { %17906 = vmatpush3.bf16.msra.mxu0 %v17905_v14  ;;  %v17955_v14 = vpack.c.bf16 %v16021_v8, %v16020_v42  ;;  %v16059_v62 = vld [vmem:[%s18509_s12 + $0x7f8] sm:$0xff]  ;;  %v16042_v52 = vld [vmem:[%s18509_s12 + $0x770] sm:$0xff] }
 0x772   : > { %17938 = vmatpush3.bf16.msra.mxu1 %v17937_v48  ;;  %17940 = vmatprep.subr.bf16.mxu0 %v17939_v16  ;;  %v16004_v48 = vld [vmem:[%s18509_s12 + $0x640] sm:$0xff]  ;;  %v16005_v16 = vld [vmem:[%s18509_s12 + $0x648] sm:$0xff]  ;;  %v17999_v59 = vpack.c.bf16 %v16059_v62, %v16058_v49  ;;  %v16043_v46 = vld [vmem:[%s18509_s12 + $0x778] sm:$0xff] }
 0x773   : > { %17972 = vmatprep.subr.bf16.mxu1 %v17971_v2  ;;  %v16037_v2 = vld [vmem:[%s18509_s12 + $0x748] sm:$0xff]  ;;  %v18001_v50 = vpack.c.bf16 %v16043_v46, %v16042_v52  ;;  %v16071_v5 = vld [vmem:[%s18514_s16 + $0x158] sm:$0xff]  ;;  %v16076_v49 = vld [vmem:[%s18514_s16 + $0x180] sm:$0xff] }
 0x774   : > { %9132 = vmatmul.mubr.f32.vlgmr.msra.gmra.mrb[72].mxu0 %v19428_v30  ;;  %v16032_v30 = vld [vmem:[%s18509_s12 + $0x720] sm:$0xff]  ;;  %v17989_v23 = vpack.c.bf16 %v16037_v2, %v16036_v61  ;;  %v16069_v2 = vld [vmem:[%s18514_s16 + $0x148] sm:$0xff] }
 0x775   : > { %9202 = vmatmul.mubr.f32.vlgmr.msra.gmra.mrb[72].mxu1 %v19430_v32  ;;  %17942 = vmatpush3.bf16.msra.mxu0 %v17941_v27  ;;  %v16033_v32 = vld [vmem:[%s18509_s12 + $0x728] sm:$0xff]  ;;  %v17957_v27 = vpack.c.bf16 %v16005_v16, %v16004_v48  ;;  %v16084_v62 = vld [vmem:[%s18514_s16 + $0x1c0] sm:$0xff] }
 0x776   : > { %9271 = vmatprep.mubr.f32.mxu0 %v19472_v63  ;;  %17974 = vmatpush3.bf16.msra.mxu1 %v17973_v35  ;;  %v16050_v63 = vld [vmem:[%s18509_s12 + $0x7b0] sm:$0xff]  ;;  %v16065_v46 = vld [vmem:[%s18514_s16 + $0x128] sm:$0xff] }
 0x777   : > { %9341 = vmatprep.mubr.f32.mxu1 %v19474_v0  ;;  %17944 = vmatprep.subr.bf16.mxu0 %v17943_v56  ;;  %v17981_v0 = vpack.c.bf16 %v16033_v32, %v16032_v30  ;;  %v17983_v51 = vpack.c.bf16 %v16051_v26, %v16050_v63  ;;  %v16006_v35 = vld [vmem:[%s18509_s12 + $0x650] sm:$0xff]  ;;  %v16039_v56 = vld [vmem:[%s18509_s12 + $0x758] sm:$0xff]  ;;  %v16041_v30 = vld [vmem:[%s18509_s12 + $0x768] sm:$0xff] }
 0x778   : > { %17976 = vmatprep.subr.bf16.mxu1 %v17975_v9  ;;  %v16057_v9 = vld [vmem:[%s18509_s12 + $0x7e8] sm:$0xff]  ;;  %v17961_v60 = vpack.c.bf16 %v16007_v55, %v16006_v35  ;;  %v17993_v10 = vpack.c.bf16 %v16039_v56, %v16038_v36  ;;  %v16027_v32 = vld [vmem:[%s18509_s12 + $0x6f8] sm:$0xff]  ;;  %v17997_v26 = vpack.c.bf16 %v16041_v30, %v16040_v44  ;;  %v16068_v35 = vld [vmem:[%s18514_s16 + $0x140] sm:$0xff] }
 0x779   : > { %17946 = vmatpush3.bf16.msra.mxu0 %v17945_v4  ;;  %v17963_v4 = vpack.c.bf16 %v16025_v1, %v16024_v24  ;;  %v17995_v45 = vpack.c.bf16 %v16057_v9, %v16056_v39  ;;  %v16062_v55 = vld [vmem:[%s18514_s16 + $0x110] sm:$0xff] }
 0x77a   : > { %17978 = vmatpush3.bf16.msra.mxu1 %v17977_v37  ;;  %17948 = vmatprep.subr.bf16.mxu0 %v17947_v7  ;;  %v16008_v37 = vld [vmem:[%s18509_s12 + $0x660] sm:$0xff]  ;;  %v16009_v7 = vld [vmem:[%s18509_s12 + $0x668] sm:$0xff]  ;;  %v16070_v56 = vld [vmem:[%s18514_s16 + $0x150] sm:$0xff] }
 0x77b   : > { %17980 = vmatprep.subr.bf16.mxu1 %v17979_v47  ;;  %v16026_v47 = vld [vmem:[%s18509_s12 + $0x6f0] sm:$0xff]  ;;  %v17965_v63 = vpack.c.bf16 %v16009_v7, %v16008_v37  ;;  %v16085_v37 = vld [vmem:[%s18514_s16 + $0x1c8] sm:$0xff]  ;;  %v16079_v7 = vld [vmem:[%s18514_s16 + $0x198] sm:$0xff] }
 0x77d   : > { %17950 = vmatpush3.bf16.msra.mxu0 %v17949_v57  ;;  %v17967_v57 = vpack.c.bf16 %v16027_v32, %v16026_v47  ;;  %v16087_v32 = vld [vmem:[%s18514_s16 + $0x1d8] sm:$0xff] }
 0x77e   : > { %17982 = vmatpush3.bf16.msra.mxu1 %v17981_v0  ;;  %17952 = vmatprep.subr.bf16.mxu0 %v17951_v58  ;;  %v16010_v0 = vld [vmem:[%s18509_s12 + $0x670] sm:$0xff]  ;;  %v16011_v58 = vld [vmem:[%s18509_s12 + $0x678] sm:$0xff] }
 0x77f   : > { %17984 = vmatprep.subr.bf16.mxu1 %v17983_v51  ;;  %v17969_v51 = vpack.c.bf16 %v16011_v58, %v16010_v0  ;;  %v18009_v0 = vpack.c.bf16 %v16084_v62, %v16076_v49  ;;  %v16078_v58 = vld [vmem:[%s18514_s16 + $0x190] sm:$0xff] }
 0x781   : > { %17954 = vmatpush3.bf16.msra.mxu0 %v17953_v13 }
 0x782   : > { %17986 = vmatpush3.bf16.msra.mxu1 %v17985_v12  ;;  %17956 = vmatprep.subr.bf16.mxu0 %v17955_v14 }
 0x783   : > { %17988 = vmatprep.subr.bf16.mxu1 %v17987_v15  ;;  %v16061_v15 = vld [vmem:[%s18514_s16 + $0x108] sm:$0xff] }
 0x784   : > { %v18003_v17 = vpack.c.bf16 %v16069_v2, %v16061_v15 }
 0x785   : > { %17958 = vmatpush3.bf16.msra.mxu0 %v17957_v27 }
 0x786   : > { %17990 = vmatpush3.bf16.msra.mxu1 %v17989_v23  ;;  %17960 = vmatprep.subr.bf16.mxu0 %v17959_v43  ;;  %v5721_v23 = vrot.slane %v5681_v21, %v18865_v20  ;;  %v16060_v43 = vld [vmem:[%s18514_s16 + $0x100] sm:$0xff] }
 0x787   : > { %17992 = vmatprep.subr.bf16.mxu1 %v17991_v19  ;;  %v18005_v19 = vpack.c.bf16 %v16068_v35, %v16060_v43 }
 0x789   : > { %17962 = vmatpush3.bf16.msra.mxu0 %v17961_v60 }
 0x78a   : > { %17994 = vmatpush3.bf16.msra.mxu1 %v17993_v10  ;;  %17964 = vmatprep.subr.bf16.mxu0 %v17963_v4  ;;  %v16077_v4 = vld [vmem:[%s18514_s16 + $0x188] sm:$0xff] }
 0x78b   : > { %17996 = vmatprep.subr.bf16.mxu1 %v17995_v45  ;;  %v18007_v47 = vpack.c.bf16 %v16085_v37, %v16077_v4  ;;  %v16089_v4 = vld [vmem:[%s18514_s16 + $0x1e8] sm:$0xff]  ;;  %v16083_v37 = vld [vmem:[%s18514_s16 + $0x1b8] sm:$0xff] }
 0x78d   : > { %17966 = vmatpush3.bf16.msra.mxu0 %v17965_v63 }
 0x78e   : > { %17998 = vmatpush3.bf16.msra.mxu1 %v17997_v26  ;;  %17968 = vmatprep.subr.bf16.mxu0 %v17967_v57  ;;  %v18015_v57 = vpack.c.bf16 %v16087_v32, %v16079_v7  ;;  %v16091_v7 = vld [vmem:[%s18514_s16 + $0x1f8] sm:$0xff]  ;;  %v16088_v32 = vld [vmem:[%s18514_s16 + $0x1e0] sm:$0xff] }
 0x78f   : > { %18000 = vmatprep.subr.bf16.mxu1 %v17999_v59  ;;  %v16086_v59 = vld [vmem:[%s18514_s16 + $0x1d0] sm:$0xff] }
 0x790   : > { %v18017_v52 = vpack.c.bf16 %v16086_v59, %v16078_v58  ;;  %v16100_v58 = vld [vmem:[%s18494_s24 + $0x2020] sm:$0xff] }
 0x791   : > { %17970 = vmatpush3.bf16.msra.mxu0 %v17969_v51  ;;  %v16073_v51 = vld [vmem:[%s18514_s16 + $0x168] sm:$0xff]  ;;  %v16224_v59 = vld [vmem:[%s18494_s24 + $0x2400] sm:$0xff] }
 0x792   : > { %18002 = vmatpush3.bf16.msra.mxu1 %v18001_v50  ;;  %18004 = vmatprep.subr.bf16.mxu0 %v18003_v17  ;;  %v16067_v50 = vld [vmem:[%s18514_s16 + $0x138] sm:$0xff] }
 0x794   : > { %9272 = vmatmul.mubr.f32.vlgmr.msra.gmra.mrb[74].mxu0 %v19542_v40 }
 0x795   : > { %9342 = vmatmul.mubr.f32.vlgmr.msra.gmra.mrb[74].mxu1 %v19545_v29  ;;  %9447 = vmatprep.mubr.f32.mxu0 %v18366_v34 }
 0x796   : > { %9518 = vmatprep.mubr.f32.mxu1 %v18366_v34  ;;  %18006 = vmatpush1.bf16.msra.mxu0 %v18005_v19 }
 0x797   : > { %18008 = vmatprep.subr.bf16.mxu0 %v18007_v47  ;;  %v16080_v47 = vld [vmem:[%s18514_s16 + $0x1a0] sm:$0xff] }
 0x79a   : > { %18010 = vmatpush1.bf16.msra.mxu0 %v18009_v0  ;;  %v16096_v0 = vld [vmem:[%s18494_s24 + $0x2000] sm:$0xff] }
 0x7a7   : > { %v8726_v42 = vpop.f32.mrb[60].mxu0 }
 0x7a8   : > { %v8727_v8 = vadd.f32 %v8726_v42, %v20067_v33  ;;  %v8767_v41 = vpop.f32.mrb[60].mxu1  ;;  %v8728_v11 = vpop.f32.mrb[61].mxu0  ;;  %v16063_v33 = vld [vmem:[%s18514_s16 + $0x118] sm:$0xff]  ;;  %v18019_v42 = vpack.c.bf16 %v16073_v51, %v16065_v46  ;;  %v18025_v46 = vpack.c.bf16 %v16088_v32, %v16080_v47 }
 0x7a9   : > { %v8729_v13 = vadd.f32 %v8728_v11, %v20072_v6  ;;  %v8769_v12 = vpop.f32.mrb[61].mxu1  ;;  %v8730_v14 = vpop.f32.mrb[62].mxu0  ;;  %v18011_v18 = vpack.c.bf16 %v16071_v5, %v16063_v33  ;;  %v5677_v6 = vrot.slane %v20035_v3, %v19023_v53  ;;  %v18013_v3 = vpack.c.bf16 %v16070_v56, %v16062_v55  ;;  %v16064_v56 = vld [vmem:[%s18514_s16 + $0x120] sm:$0xff] }
 0x7aa   : > { %v20149_v40 = vadd.f32 %v8767_v41, %v8727_v8  ;;  %v8771_v48 = vpop.f32.mrb[62].mxu1  ;;  %v8731_v29 = vpop.f32.mrb[63].mxu0  ;;  %v16075_v8 = vld [vmem:[%s18514_s16 + $0x178] sm:$0xff]  ;;  %18020 = vmatprep.subr.bf16.mxu0 %v18019_v42 }
 0x7ab   : > { %v20151_v16 = vadd.f32 %v8769_v12, %v8729_v13  ;;  %v8772_v61 = vpop.f32.mrb[63].mxu1  ;;  %18012 = vmatprep.subr.bf16.mxu1 %v18011_v18  ;;  %v5717_v27 = vrot.slane %v5677_v6, %v18865_v20  ;;  %v18027_v41 = vpack.c.bf16 %v16075_v8, %v16067_v50  ;;  %v16610_v50 = vcombine.high %v16096_v0, %v16100_v58  ;;  %v16104_v8 = vld [vmem:[%s18494_s24 + $0x2040] sm:$0xff] }
 0x7ac   : > { %18014 = vmatpush1.bf16.msra.mxu1 %v18013_v3  ;;  %v16066_v3 = vld [vmem:[%s18514_s16 + $0x130] sm:$0xff] }
 0x7ad   : > { %18016 = vmatprep.subr.bf16.mxu1 %v18015_v57  ;;  %v16090_v57 = vld [vmem:[%s18514_s16 + $0x1f0] sm:$0xff] }
 0x7b0   : > { %18018 = vmatpush1.bf16.msra.mxu1 %v18017_v52  ;;  %v16228_v52 = vld [vmem:[%s18494_s24 + $0x2420] sm:$0xff] }
 0x7b1   : > { %18028 = vmatprep.subr.bf16.mxu1 %v18027_v41  ;;  %v16738_v42 = vcombine.high %v16224_v59, %v16228_v52  ;;  %v16108_v41 = vld [vmem:[%s18494_s24 + $0x2060] sm:$0xff] }
 0x7e7   : > { %v8808_v36 = vpop.f32.mrb[64].mxu0 }
 0x7e8   : > { %v8809_v24 = vadd.f32 %v8808_v36, %v5717_v27  ;;  %v8849_v1 = vpop.f32.mrb[64].mxu1  ;;  %v8810_v39 = vpop.f32.mrb[65].mxu0 }
 0x7e9   : > { %v8811_v9 = vadd.f32 %v8810_v39, %v5721_v23  ;;  %v8851_v60 = vpop.f32.mrb[65].mxu1  ;;  %v8812_v10 = vpop.f32.mrb[66].mxu0 }
 0x7ea   : > { %v8850_v44 = vadd.f32 %v8849_v1, %v8809_v24  ;;  %v8853_v45 = vpop.f32.mrb[66].mxu1  ;;  %v8813_v30 = vpop.f32.mrb[67].mxu0  ;;  %v16072_v24 = vld [vmem:[%s18514_s16 + $0x160] sm:$0xff] }
 0x7eb   : > { %v8852_v63 = vadd.f32 %v8851_v60, %v8811_v9  ;;  %v8854_v26 = vpop.f32.mrb[67].mxu1  ;;  %v16074_v9 = vld [vmem:[%s18514_s16 + $0x170] sm:$0xff]  ;;  %v16081_v60 = vld [vmem:[%s18514_s16 + $0x1a8] sm:$0xff]  ;;  %v18021_v45 = vpack.c.bf16 %v16072_v24, %v16064_v56 }
 0x7ec   : > { %v18029_v30 = vpack.c.bf16 %v16074_v9, %v16066_v3  ;;  %v18023_v62 = vpack.c.bf16 %v16089_v4, %v16081_v60  ;;  %v16082_v26 = vld [vmem:[%s18514_s16 + $0x1b0] sm:$0xff]  ;;  %v16256_v3 = vld [vmem:[%s18494_s24 + $0x2500] sm:$0xff] }
 0x7ed   : > { %v18033_v51 = vpack.c.bf16 %v16090_v57, %v16082_v26  ;;  %v16260_v9 = vld [vmem:[%s18494_s24 + $0x2520] sm:$0xff] }
 0x7ee   : > { %v16769_v32 = vcombine.low %v16256_v3, %v16260_v9  ;;  %v16148_v26 = vld [vmem:[%s18494_s24 + $0x21a0] sm:$0xff] }
 0x7ef   : > { %v16272_v57 = vld [vmem:[%s18494_s24 + $0x2580] sm:$0xff] }
 0x827   : > { %v8890_v11 = vpop.f32.mrb[68].mxu0 }
 0x828   : > { %v8891_v13 = vadd.f32 %v8890_v11, %v8850_v44  ;;  %v8931_v12 = vpop.f32.mrb[68].mxu1  ;;  %v8892_v14 = vpop.f32.mrb[69].mxu0  ;;  %v16232_v11 = vld [vmem:[%s18494_s24 + $0x2440] sm:$0xff] }
 0x829   : > { %v8893_v48 = vadd.f32 %v8892_v14, %v8852_v63  ;;  %v8933_v29 = vpop.f32.mrb[69].mxu1  ;;  %v8894_v61 = vpop.f32.mrb[70].mxu0  ;;  %v18031_v63 = vpack.c.bf16 %v16091_v7, %v16083_v37  ;;  %v16737_v14 = vcombine.low %v16224_v59, %v16228_v52  ;;  %v16770_v37 = vcombine.high %v16256_v3, %v16260_v9  ;;  %v16136_v7 = vld [vmem:[%s18494_s24 + $0x2140] sm:$0xff] }
 0x82a   : > { %v20179_v15 = vadd.f32 %v8931_v12, %v8891_v13  ;;  %v8935_v2 = vpop.f32.mrb[70].mxu1  ;;  %v8895_v33 = vpop.f32.mrb[71].mxu0  ;;  %v16236_v13 = vld [vmem:[%s18494_s24 + $0x2460] sm:$0xff]  ;;  %v16609_v12 = vcombine.low %v16096_v0, %v16100_v58 }
 0x82b   : > { %v20181_v17 = vadd.f32 %v8933_v29, %v8893_v48  ;;  %v8936_v5 = vpop.f32.mrb[71].mxu1  ;;  %v16618_v48 = vcombine.high %v16104_v8, %v16108_v41  ;;  %v16746_v29 = vcombine.high %v16232_v11, %v16236_v13  ;;  %v16112_v61 = vld [vmem:[%s18494_s24 + $0x2080] sm:$0xff] }
 0x82c   : > { %v16116_v2 = vld [vmem:[%s18494_s24 + $0x20a0] sm:$0xff] }
 0x82d   : > { %v16240_v33 = vld [vmem:[%s18494_s24 + $0x2480] sm:$0xff] }
 0x82e   : > { %v16244_v5 = vld [vmem:[%s18494_s24 + $0x24a0] sm:$0xff] }
 0x82f   : > { %v16276_v0 = vld [vmem:[%s18494_s24 + $0x25a0] sm:$0xff] }
 0x847   : > { %v17467_v18 = vpop.f32.mrb[72].mxu0 }
 0x848   : > { %v17502_v6 = vpop.f32.mrb[72].mxu1  ;;  %v17468_v21 = vpop.f32.mrb[73].mxu0 }
 0x849   : > { %v17469_v27 = vadd.f32 %v17468_v21, %v17467_v18  ;;  %v17503_v23 = vpop.f32.mrb[73].mxu1  ;;  %v16617_v18 = vcombine.low %v16104_v8, %v16108_v41  ;;  %v16626_v21 = vcombine.high %v16112_v61, %v16116_v2  ;;  %v16284_v8 = vld [vmem:[%s18494_s24 + $0x25e0] sm:$0xff] }
 0x84a   : > { %v17504_v43 = vadd.f32 %v17503_v23, %v17502_v6  ;;  %v16745_v6 = vcombine.low %v16232_v11, %v16236_v13  ;;  %v16120_v23 = vld [vmem:[%s18494_s24 + $0x20c0] sm:$0xff]  ;;  %v16785_v11 = vcombine.low %v16272_v57, %v16276_v0 }
 0x84c   : > { %v9204_v35 = vadd.f32 %v17504_v43, %v17469_v27  ;;  %v16754_v27 = vcombine.high %v16240_v33, %v16244_v5  ;;  %v16124_v43 = vld [vmem:[%s18494_s24 + $0x20e0] sm:$0xff] }
 0x84d   : > { %v16634_v56 = vcombine.high %v16120_v23, %v16124_v43  ;;  %v16633_v60 = vcombine.low %v16120_v23, %v16124_v43  ;;  %v16300_v23 = vld [vmem:[%s18494_s24 + $0x2660] sm:$0xff] }
 0x867   : > { %v17537_v55 = vpop.f32.mrb[74].mxu0 }
 0x868   : > { %v17572_v36 = vpop.f32.mrb[74].mxu1  ;;  %v17538_v19 = vpop.f32.mrb[75].mxu0 }
 0x869   : > { %v17539_v1 = vadd.f32 %v17538_v19, %v17537_v55  ;;  %v17573_v39 = vpop.f32.mrb[75].mxu1  ;;  %v16252_v55 = vld [vmem:[%s18494_s24 + $0x24e0] sm:$0xff]  ;;  %v16753_v19 = vcombine.low %v16240_v33, %v16244_v5 }
 0x86a   : > { %v17574_v10 = vadd.f32 %v17573_v39, %v17572_v36  ;;  %v16625_v36 = vcombine.low %v16112_v61, %v16116_v2  ;;  %v16132_v39 = vld [vmem:[%s18494_s24 + $0x2120] sm:$0xff] }
 0x86b   : > { %v9274_v44 = vadd.f32 %v17539_v1, %v9204_v35  ;;  %v16248_v35 = vld [vmem:[%s18494_s24 + $0x24c0] sm:$0xff] }
 0x86c   : > { %v16762_v24 = vcombine.high %v16248_v35, %v16252_v55  ;;  %v16128_v1 = vld [vmem:[%s18494_s24 + $0x2100] sm:$0xff] }
 0x86d   : > { %v9344_v49 = vadd.f32 %v17574_v10, %v9274_v44  ;;  %v16761_v10 = vcombine.low %v16248_v35, %v16252_v55  ;;  %v16642_v4 = vcombine.high %v16128_v1, %v16132_v39  ;;  %v16140_v44 = vld [vmem:[%s18494_s24 + $0x2160] sm:$0xff]  ;;  %v16641_v47 = vcombine.low %v16128_v1, %v16132_v39 }
 0x86e   : > { %v16649_v58 = vcombine.low %v16136_v7, %v16140_v44  ;;  %v16292_v61 = vld [vmem:[%s18494_s24 + $0x2620] sm:$0xff] }
 0x86f   : > { %16092 = vmatmul.mubr.msk.f32.vlgmr.msra.gmra.mrb[76].mxu0 %vm4811_vm0, %v9344_v49  ;;  %16093 = vmatmul.mubr.msk.f32.vlgmr.msra.gmra.mrb[76].mxu1 %vm4811_vm0, %v9344_v49  ;;  %v16308_v1 = vld [vmem:[%s18494_s24 + $0x26a0] sm:$0xff] }
 0x870   : > { %18022 = vmatpush1.bf16.msra.mxu0 %v18021_v45  ;;  %18030 = vmatpush1.bf16.msra.mxu1 %v18029_v30  ;;  %v16264_v45 = vld [vmem:[%s18494_s24 + $0x2540] sm:$0xff] }
 0x871   : > { %18024 = vmatprep.subr.bf16.mxu0 %v18023_v62  ;;  %18032 = vmatprep.subr.bf16.mxu1 %v18031_v63  ;;  %v16268_v30 = vld [vmem:[%s18494_s24 + $0x2560] sm:$0xff] }
 0x872   : > { %9589 = vmatprep.mubr.f32.mxu0 %v18366_v34  ;;  %9660 = vmatprep.mubr.f32.mxu1 %v18366_v34  ;;  %v16778_v62 = vcombine.high %v16264_v45, %v16268_v30  ;;  %v16144_v63 = vld [vmem:[%s18494_s24 + $0x2180] sm:$0xff]  ;;  %v16777_v59 = vcombine.low %v16264_v45, %v16268_v30 }
 0x873   : > { %v16658_v52 = vcombine.high %v16144_v63, %v16148_v26  ;;  %v16657_v41 = vcombine.low %v16144_v63, %v16148_v26  ;;  %v16324_v63 = vld [vmem:[%s18494_s24 + $0x2720] sm:$0xff] }
 0x874   : > { %18026 = vmatpush1.bf16.msra.mxu0 %v18025_v46  ;;  %18034 = vmatpush1.bf16.msra.mxu1 %v18033_v51  ;;  %v16786_v46 = vcombine.high %v16272_v57, %v16276_v0  ;;  %v16152_v51 = vld [vmem:[%s18494_s24 + $0x21c0] sm:$0xff] }
 0x875   : > { %12850 = vmatprep.subr.bf16.mxu0 %v16610_v50  ;;  %12891 = vmatprep.subr.bf16.mxu1 %v16738_v42  ;;  %v16156_v50 = vld [vmem:[%s18494_s24 + $0x21e0] sm:$0xff] }
 0x876   : > { %v16280_v42 = vld [vmem:[%s18494_s24 + $0x25c0] sm:$0xff]  ;;  %v16666_v13 = vcombine.high %v16152_v51, %v16156_v50  ;;  %v16665_v2 = vcombine.low %v16152_v51, %v16156_v50 }
 0x877   : > { %16094 = vmatmul.mubr.msk.f32.vlgmr.msra.gmra.mrb[78].mxu0 %vm4811_vm0, %v9344_v49  ;;  %16095 = vmatmul.mubr.msk.f32.vlgmr.msra.gmra.mrb[78].mxu1 %vm4811_vm0, %v9344_v49  ;;  %v16650_v49 = vcombine.high %v16136_v7, %v16140_v44  ;;  %v16793_v33 = vcombine.low %v16280_v42, %v16284_v8  ;;  %v16316_v7 = vld [vmem:[%s18494_s24 + $0x26e0] sm:$0xff] }
 0x878   : > { %12851 = vmatpush1.bf16.msra.mxu0 %v16609_v12  ;;  %12892 = vmatpush1.bf16.msra.mxu1 %v16737_v14  ;;  %v16794_v12 = vcombine.high %v16280_v42, %v16284_v8  ;;  %v16160_v14 = vld [vmem:[%s18494_s24 + $0x2200] sm:$0xff] }
 0x879   : > { %12852 = vmatprep.subr.bf16.mxu0 %v16618_v48  ;;  %12893 = vmatprep.subr.bf16.mxu1 %v16746_v29  ;;  %v16164_v48 = vld [vmem:[%s18494_s24 + $0x2220] sm:$0xff] }
 0x87a   : > { %v16288_v29 = vld [vmem:[%s18494_s24 + $0x2600] sm:$0xff]  ;;  %v16674_v5 = vcombine.high %v16160_v14, %v16164_v48  ;;  %v16673_v43 = vcombine.low %v16160_v14, %v16164_v48 }
 0x87b   : > { %v16801_v35 = vcombine.low %v16288_v29, %v16292_v61  ;;  %v16332_v51 = vld [vmem:[%s18494_s24 + $0x2760] sm:$0xff] }
 0x87c   : > { %12853 = vmatpush1.bf16.msra.mxu0 %v16617_v18  ;;  %12894 = vmatpush1.bf16.msra.mxu1 %v16745_v6  ;;  %v16802_v18 = vcombine.high %v16288_v29, %v16292_v61  ;;  %v16168_v6 = vld [vmem:[%s18494_s24 + $0x2240] sm:$0xff] }
 0x87d   : > { %12854 = vmatprep.subr.bf16.mxu0 %v16626_v21  ;;  %12895 = vmatprep.subr.bf16.mxu1 %v16754_v27  ;;  %v16172_v21 = vld [vmem:[%s18494_s24 + $0x2260] sm:$0xff] }
 0x87e   : > { %v16296_v27 = vld [vmem:[%s18494_s24 + $0x2640] sm:$0xff]  ;;  %v16682_v55 = vcombine.high %v16168_v6, %v16172_v21  ;;  %v16681_v39 = vcombine.low %v16168_v6, %v16172_v21 }
 0x87f   : > { %v16809_v3 = vcombine.low %v16296_v27, %v16300_v23  ;;  %v16212_v14 = vld [vmem:[%s18494_s24 + $0x23a0] sm:$0xff] }
 0x880   : > { %12855 = vmatpush1.bf16.msra.mxu0 %v16625_v36  ;;  %12896 = vmatpush1.bf16.msra.mxu1 %v16753_v19  ;;  %v16810_v36 = vcombine.high %v16296_v27, %v16300_v23  ;;  %v16176_v19 = vld [vmem:[%s18494_s24 + $0x2280] sm:$0xff] }
 0x881   : > { %12856 = vmatprep.subr.bf16.mxu0 %v16634_v56  ;;  %12897 = vmatprep.subr.bf16.mxu1 %v16762_v24  ;;  %v16180_v56 = vld [vmem:[%s18494_s24 + $0x22a0] sm:$0xff] }
 0x882   : > { %v16304_v24 = vld [vmem:[%s18494_s24 + $0x2680] sm:$0xff]  ;;  %v16690_v9 = vcombine.high %v16176_v19, %v16180_v56  ;;  %v16689_v44 = vcombine.low %v16176_v19, %v16180_v56 }
 0x883   : > { %v16817_v45 = vcombine.low %v16304_v24, %v16308_v1  ;;  %v16336_v48 = vld [vmem:[%s18494_s24 + $0x2780] sm:$0xff] }
 0x884   : > { %12857 = vmatpush1.bf16.msra.mxu0 %v16633_v60  ;;  %12898 = vmatpush1.bf16.msra.mxu1 %v16761_v10  ;;  %v16818_v60 = vcombine.high %v16304_v24, %v16308_v1  ;;  %v16184_v10 = vld [vmem:[%s18494_s24 + $0x22c0] sm:$0xff] }
 0x885   : > { %12858 = vmatprep.subr.bf16.mxu0 %v16642_v4  ;;  %12899 = vmatprep.subr.bf16.mxu1 %v16770_v37  ;;  %v16188_v4 = vld [vmem:[%s18494_s24 + $0x22e0] sm:$0xff] }
 0x886   : > { %v16312_v37 = vld [vmem:[%s18494_s24 + $0x26c0] sm:$0xff]  ;;  %v16698_v30 = vcombine.high %v16184_v10, %v16188_v4  ;;  %v16697_v26 = vcombine.low %v16184_v10, %v16188_v4 }
 0x887   : > { %v16825_v57 = vcombine.low %v16312_v37, %v16316_v7  ;;  %v16340_v61 = vld [vmem:[%s18494_s24 + $0x27a0] sm:$0xff] }
 0x888   : > { %12859 = vmatpush1.bf16.msra.mxu0 %v16641_v47  ;;  %12900 = vmatpush1.bf16.msra.mxu1 %v16769_v32  ;;  %v16826_v47 = vcombine.high %v16312_v37, %v16316_v7  ;;  %v16192_v32 = vld [vmem:[%s18494_s24 + $0x2300] sm:$0xff] }
 0x889   : > { %12860 = vmatprep.subr.bf16.mxu0 %v16650_v49  ;;  %12901 = vmatprep.subr.bf16.mxu1 %v16778_v62  ;;  %v16196_v49 = vld [vmem:[%s18494_s24 + $0x2320] sm:$0xff] }
 0x88a   : > { %v16320_v62 = vld [vmem:[%s18494_s24 + $0x2700] sm:$0xff]  ;;  %v16706_v0 = vcombine.high %v16192_v32, %v16196_v49  ;;  %v16705_v50 = vcombine.low %v16192_v32, %v16196_v49 }
 0x88b   : > { %v16833_v42 = vcombine.low %v16320_v62, %v16324_v63  ;;  %v16220_v6 = vld [vmem:[%s18494_s24 + $0x23e0] sm:$0xff] }
 0x88c   : > { %12861 = vmatpush1.bf16.msra.mxu0 %v16649_v58  ;;  %12902 = vmatpush1.bf16.msra.mxu1 %v16777_v59  ;;  %v16834_v58 = vcombine.high %v16320_v62, %v16324_v63  ;;  %v16200_v59 = vld [vmem:[%s18494_s24 + $0x2340] sm:$0xff] }
 0x88d   : > { %12862 = vmatprep.subr.bf16.mxu0 %v16658_v52  ;;  %12903 = vmatprep.subr.bf16.mxu1 %v16786_v46  ;;  %v16204_v52 = vld [vmem:[%s18494_s24 + $0x2360] sm:$0xff] }
 0x88e   : > { %v16328_v46 = vld [vmem:[%s18494_s24 + $0x2740] sm:$0xff]  ;;  %v16714_v8 = vcombine.high %v16200_v59, %v16204_v52 }
 0x88f   : > { %v16344_v21 = vld [vmem:[%s18494_s24 + $0x27c0] sm:$0xff] }
 0x890   : > { %12863 = vmatpush1.bf16.msra.mxu0 %v16657_v41  ;;  %12904 = vmatpush1.bf16.msra.mxu1 %v16785_v11  ;;  %v16842_v41 = vcombine.high %v16328_v46, %v16332_v51  ;;  %v16713_v11 = vcombine.low %v16200_v59, %v16204_v52  ;;  %v16348_v23 = vld [vmem:[%s18494_s24 + $0x27e0] sm:$0xff] }
 0x891   : > { %12864 = vmatprep.subr.bf16.mxu0 %v16666_v13  ;;  %12905 = vmatprep.subr.bf16.mxu1 %v16794_v12  ;;  %v16841_v13 = vcombine.low %v16328_v46, %v16332_v51  ;;  %v16208_v12 = vld [vmem:[%s18494_s24 + $0x2380] sm:$0xff] }
 0x892   : > { %v16722_v29 = vcombine.high %v16208_v12, %v16212_v14  ;;  %v16356_v19 = vld [vmem:[%s18494_s24 + $0x2820] sm:$0xff] }
 0x893   : > { %v16480_v56 = vld [vmem:[%s18494_s24 + $0x2c00] sm:$0xff] }
 0x894   : > { %12865 = vmatpush1.bf16.msra.mxu0 %v16665_v2  ;;  %12906 = vmatpush1.bf16.msra.mxu1 %v16793_v33  ;;  %v16721_v2 = vcombine.low %v16208_v12, %v16212_v14  ;;  %v16849_v33 = vcombine.low %v16336_v48, %v16340_v61  ;;  %v16484_v1 = vld [vmem:[%s18494_s24 + $0x2c20] sm:$0xff] }
 0x895   : > { %12866 = vmatprep.subr.bf16.mxu0 %v16674_v5  ;;  %12907 = vmatprep.subr.bf16.mxu1 %v16802_v18  ;;  %v16850_v5 = vcombine.high %v16336_v48, %v16340_v61  ;;  %v16216_v18 = vld [vmem:[%s18494_s24 + $0x23c0] sm:$0xff] }
 0x896   : > { %v16730_v27 = vcombine.high %v16216_v18, %v16220_v6  ;;  %v16360_v63 = vld [vmem:[%s18494_s24 + $0x2840] sm:$0xff] }
 0x897   : > { %v16492_v59 = vld [vmem:[%s18494_s24 + $0x2c60] sm:$0xff] }
 0x898   : > { %12867 = vmatpush1.bf16.msra.mxu0 %v16673_v43  ;;  %12908 = vmatpush1.bf16.msra.mxu1 %v16801_v35  ;;  %v16729_v43 = vcombine.low %v16216_v18, %v16220_v6  ;;  %v16857_v35 = vcombine.low %v16344_v21, %v16348_v23  ;;  %v16368_v14 = vld [vmem:[%s18494_s24 + $0x2880] sm:$0xff] }
 0x899   : > { %12868 = vmatprep.subr.bf16.mxu0 %v16682_v55  ;;  %12909 = vmatprep.subr.bf16.mxu1 %v16810_v36  ;;  %v16858_v55 = vcombine.high %v16344_v21, %v16348_v23  ;;  %v16352_v36 = vld [vmem:[%s18494_s24 + $0x2800] sm:$0xff] }
 0x89a   : > { %v16866_v24 = vcombine.high %v16352_v36, %v16356_v19  ;;  %v16372_v61 = vld [vmem:[%s18494_s24 + $0x28a0] sm:$0xff] }
 0x89c   : > { %12869 = vmatpush1.bf16.msra.mxu0 %v16681_v39  ;;  %12910 = vmatpush1.bf16.msra.mxu1 %v16809_v3  ;;  %v16865_v39 = vcombine.low %v16352_v36, %v16356_v19  ;;  %v16993_v3 = vcombine.low %v16480_v56, %v16484_v1  ;;  %v16380_v36 = vld [vmem:[%s18494_s24 + $0x28e0] sm:$0xff] }
 0x89d   : > { %12870 = vmatprep.subr.bf16.mxu0 %v16690_v9  ;;  %12911 = vmatprep.subr.bf16.mxu1 %v16818_v60  ;;  %v16994_v9 = vcombine.high %v16480_v56, %v16484_v1  ;;  %v16504_v19 = vld [vmem:[%s18494_s24 + $0x2cc0] sm:$0xff] }
 0x8a0   : > { %12871 = vmatpush1.bf16.msra.mxu0 %v16689_v44  ;;  %12912 = vmatpush1.bf16.msra.mxu1 %v16817_v45 }
 0x8a1   : > { %12872 = vmatprep.subr.bf16.mxu0 %v16698_v30  ;;  %12913 = vmatprep.subr.bf16.mxu1 %v16826_v47 }
 0x8a4   : > { %12873 = vmatpush1.bf16.msra.mxu0 %v16697_v26  ;;  %12914 = vmatpush1.bf16.msra.mxu1 %v16825_v57 }
 0x8a5   : > { %12874 = vmatprep.subr.bf16.mxu0 %v16706_v0  ;;  %12915 = vmatprep.subr.bf16.mxu1 %v16834_v58  ;;  %v16364_v0 = vld [vmem:[%s18494_s24 + $0x2860] sm:$0xff] }
 0x8a6   : > { %v16488_v58 = vld [vmem:[%s18494_s24 + $0x2c40] sm:$0xff]  ;;  %v16874_v51 = vcombine.high %v16360_v63, %v16364_v0  ;;  %v16873_v6 = vcombine.low %v16360_v63, %v16364_v0 }
 0x8a7   : > { %v17001_v23 = vcombine.low %v16488_v58, %v16492_v59 }
 0x8a8   : > { %12875 = vmatpush1.bf16.msra.mxu0 %v16705_v50  ;;  %12916 = vmatpush1.bf16.msra.mxu1 %v16833_v42  ;;  %v17002_v50 = vcombine.high %v16488_v58, %v16492_v59  ;;  %v16400_v59 = vld [vmem:[%s18494_s24 + $0x2980] sm:$0xff] }
 0x8a9   : > { %12876 = vmatprep.subr.bf16.mxu0 %v16714_v8  ;;  %12917 = vmatprep.subr.bf16.mxu1 %v16842_v41 }
 0x8ac   : > { %12877 = vmatpush1.bf16.msra.mxu0 %v16713_v11  ;;  %12918 = vmatpush1.bf16.msra.mxu1 %v16841_v13 }
 0x8ad   : > { %12878 = vmatprep.subr.bf16.mxu0 %v16722_v29  ;;  %12919 = vmatprep.subr.bf16.mxu1 %v16850_v5 }
 0x8b0   : > { %12879 = vmatpush1.bf16.msra.mxu0 %v16721_v2  ;;  %12920 = vmatpush1.bf16.msra.mxu1 %v16849_v33  ;;  %v16496_v2 = vld [vmem:[%s18494_s24 + $0x2c80] sm:$0xff] }
 0x8b1   : > { %12880 = vmatprep.subr.bf16.mxu0 %v16730_v27  ;;  %12921 = vmatprep.subr.bf16.mxu1 %v16858_v55  ;;  %v16500_v33 = vld [vmem:[%s18494_s24 + $0x2ca0] sm:$0xff] }
 0x8b2   : > { %v17009_v1 = vcombine.low %v16496_v2, %v16500_v33 }
 0x8b4   : > { %12881 = vmatpush1.bf16.msra.mxu0 %v16729_v43  ;;  %12922 = vmatpush1.bf16.msra.mxu1 %v16857_v35  ;;  %v16376_v43 = vld [vmem:[%s18494_s24 + $0x28c0] sm:$0xff] }
 0x8b5   : > { %12932 = vmatprep.subr.bf16.mxu0 %v16866_v24  ;;  %12973 = vmatprep.subr.bf16.mxu1 %v16994_v9  ;;  %v16384_v9 = vld [vmem:[%s18494_s24 + $0x2900] sm:$0xff] }
 0x942   : > { %v9449_v60 = vpop.f32.mrb[76].mxu0  ;;  %v9520_v10 = vpop.f32.mrb[76].mxu1 }
 0x943   : > { %v9667_v4 = vmul.f32 0.03125, %v9449_v60  ;;  %v9669_v37 = vmul.f32 0.03125, %v9520_v10  ;;  %v9451_v7 = vpop.f32.mrb[77].mxu0  ;;  %v9522_v44 = vpop.f32.mrb[77].mxu1  ;;  %v16388_v60 = vld [vmem:[%s18494_s24 + $0x2920] sm:$0xff] }
 0x944   : > { %v9668_v45 = vmul.f32 0.03125, %v9451_v7  ;;  %v9670_v30 = vmul.f32 0.03125, %v9522_v44  ;;  %v16512_v10 = vld [vmem:[%s18494_s24 + $0x2d00] sm:$0xff]  ;;  %v16898_v44 = vcombine.high %v16384_v9, %v16388_v60 }
 0x945   : > { %v9675_v47 = vadd.f32 %v9667_v4, %v19806_v38  ;;  %v9677_v32 = vadd.f32 %v9669_v37, %v19958_v28  ;;  %v16516_v4 = vld [vmem:[%s18494_s24 + $0x2d20] sm:$0xff]  ;;  %v16889_v37 = vcombine.low %v16376_v43, %v16380_v36 }
 0x946   : > { %v9676_v49 = vadd.f32 %v9668_v45, %v19808_v25  ;;  %v9678_v62 = vadd.f32 %v9670_v30, %v19960_v31  ;;  %v17026_v45 = vcombine.high %v16512_v10, %v16516_v4  ;;  %v16392_v30 = vld [vmem:[%s18494_s24 + $0x2940] sm:$0xff]  ;;  %v17025_v63 = vcombine.low %v16512_v10, %v16516_v4 }
 0x947   : > { %v20274_v26 = vmax.f32 %v9675_v47, 0.0  ;;  %v20276_v57 = vmax.f32 %v9677_v32, 0.0  ;;  %v16396_v47 = vld [vmem:[%s18494_s24 + $0x2960] sm:$0xff] }
 0x948   : > { %v20281_v52 = vmax.f32 %v9676_v49, 0.0  ;;  %v20283_v46 = vmax.f32 %v9678_v62, 0.0  ;;  %v16520_v32 = vld [vmem:[%s18494_s24 + $0x2d40] sm:$0xff]  ;;  %v16897_v62 = vcombine.low %v16384_v9, %v16388_v60  ;;  %v16906_v0 = vcombine.high %v16392_v30, %v16396_v47 }
 0x949   : > { %v20295_v42 = vpack.c.bf16 %v20274_v26, %v20274_v26  ;;  %v20299_v8 = vpack.c.bf16 %v20276_v57, %v20276_v57  ;;  %v16524_v49 = vld [vmem:[%s18494_s24 + $0x2d60] sm:$0xff] }
 0x94a   : > { %v20287_v38 = vpack.c.bf16 %v20281_v52, %v20281_v52  ;;  %v20291_v25 = vpack.c.bf16 %v20283_v46, %v20283_v46  ;;  %v9591_v28 = vpop.f32.mrb[78].mxu0  ;;  %v9662_v31 = vpop.f32.mrb[78].mxu1  ;;  %v17034_v58 = vcombine.high %v16520_v32, %v16524_v49  ;;  %v16432_v4 = vld [vmem:[%s18494_s24 + $0x2a80] sm:$0xff] }
 0x94b   : > { %v9671_v41 = vmul.f32 0.03125, %v9591_v28  ;;  %v9673_v11 = vmul.f32 0.03125, %v9662_v31  ;;  %v9593_v13 = vpop.f32.mrb[79].mxu0  ;;  %v9664_v12 = vpop.f32.mrb[79].mxu1  ;;  %v16404_v28 = vld [vmem:[%s18494_s24 + $0x29a0] sm:$0xff] }
 0x94c   : > { %v9672_v48 = vmul.f32 0.03125, %v9593_v13  ;;  %v9674_v29 = vmul.f32 0.03125, %v9664_v12  ;;  %12882 = vmatprep.mubr.bf16.mxu0 %v20287_v38  ;;  %12923 = vmatprep.mubr.bf16.mxu1 %v20291_v25  ;;  %v16528_v31 = vld [vmem:[%s18494_s24 + $0x2d80] sm:$0xff] }
 0x94d   : > { %v20308_v5 = vadd.f32 %v9671_v41, %v20149_v40  ;;  %v20311_v18 = vadd.f32 %v9673_v11, %v20179_v15  ;;  %12883 = vmatmul.mubr.bf16.vlgmr.msra.gmra.mrb[80].mxu0 %v20295_v42  ;;  %12924 = vmatmul.mubr.bf16.vlgmr.msra.gmra.mrb[80].mxu1 %v20299_v8  ;;  %v16882_v40 = vcombine.high %v16368_v14, %v16372_v61  ;;  %v16408_v12 = vld [vmem:[%s18494_s24 + $0x29c0] sm:$0xff] }
 0x94e   : > { %v9680_v21 = vadd.f32 %v9672_v48, %v20151_v16  ;;  %v9682_v27 = vadd.f32 %v9674_v29, %v20181_v17  ;;  %12933 = vmatpush1.bf16.msra.mxu0 %v16865_v39  ;;  %12974 = vmatpush1.bf16.msra.mxu1 %v16993_v3  ;;  %v17010_v15 = vcombine.high %v16496_v2, %v16500_v33  ;;  %v16508_v16 = vld [vmem:[%s18494_s24 + $0x2ce0] sm:$0xff] }
 0x94f   : > { %12934 = vmatprep.subr.bf16.mxu0 %v16874_v51  ;;  %12975 = vmatprep.subr.bf16.mxu1 %v17002_v50  ;;  %v16881_v17 = vcombine.low %v16368_v14, %v16372_v61  ;;  %v16890_v39 = vcombine.high %v16376_v43, %v16380_v36  ;;  %v17018_v3 = vcombine.high %v16504_v19, %v16508_v16  ;;  %v16532_v51 = vld [vmem:[%s18494_s24 + $0x2da0] sm:$0xff] }
 0x950   : > { %v20318_v35 = vmax.f32 %v9680_v21, 0.0  ;;  %v20320_v55 = vmax.f32 %v9682_v27, 0.0  ;;  %v17017_v7 = vcombine.low %v16504_v19, %v16508_v16  ;;  %v16905_v50 = vcombine.low %v16392_v30, %v16396_v47  ;;  %v16412_v14 = vld [vmem:[%s18494_s24 + $0x29e0] sm:$0xff] }
 0x951   : > { %v17033_v41 = vcombine.low %v16520_v32, %v16524_v49  ;;  %v16914_v11 = vcombine.high %v16400_v59, %v16404_v28  ;;  %v17042_v13 = vcombine.high %v16528_v31, %v16532_v51  ;;  %v16536_v48 = vld [vmem:[%s18494_s24 + $0x2dc0] sm:$0xff]  ;;  %v16913_v61 = vcombine.low %v16400_v59, %v16404_v28 }
 0x952   : > { %v20327_v56 = vpack.c.bf16 %v20318_v35, %v20318_v35  ;;  %v20331_v24 = vpack.c.bf16 %v20320_v55, %v20320_v55  ;;  %12935 = vmatpush1.bf16.msra.mxu0 %v16873_v6  ;;  %12976 = vmatpush1.bf16.msra.mxu1 %v17001_v23  ;;  %v16540_v29 = vld [vmem:[%s18494_s24 + $0x2de0] sm:$0xff]  ;;  %v17041_v2 = vcombine.low %v16528_v31, %v16532_v51 }
 0x953   : > { %12936 = vmatprep.subr.bf16.mxu0 %v16882_v40  ;;  %12977 = vmatprep.subr.bf16.mxu1 %v17010_v15  ;;  %v16922_v33 = vcombine.high %v16408_v12, %v16412_v14  ;;  %v17050_v6 = vcombine.high %v16536_v48, %v16540_v29  ;;  %v16416_v21 = vld [vmem:[%s18494_s24 + $0x2a00] sm:$0xff]  ;;  %v16921_v15 = vcombine.low %v16408_v12, %v16412_v14 }
 0x954   : > { %12964 = vmatprep.mubr.bf16.mxu0 %v20327_v56  ;;  %13005 = vmatprep.mubr.bf16.mxu1 %v20331_v24  ;;  %v16420_v27 = vld [vmem:[%s18494_s24 + $0x2a20] sm:$0xff]  ;;  %v17049_v43 = vcombine.low %v16536_v48, %v16540_v29 }
 0x955   : > { %v16544_v23 = vld [vmem:[%s18494_s24 + $0x2e00] sm:$0xff]  ;;  %v16930_v36 = vcombine.high %v16416_v21, %v16420_v27 }
 0x956   : > { %12937 = vmatpush1.bf16.msra.mxu0 %v16881_v17  ;;  %12978 = vmatpush1.bf16.msra.mxu1 %v17009_v1  ;;  %v16548_v40 = vld [vmem:[%s18494_s24 + $0x2e20] sm:$0xff] }
 0x957   : > { %12938 = vmatprep.subr.bf16.mxu0 %v16890_v39  ;;  %12979 = vmatprep.subr.bf16.mxu1 %v17018_v3  ;;  %v17058_v19 = vcombine.high %v16544_v23, %v16548_v40  ;;  %v16424_v16 = vld [vmem:[%s18494_s24 + $0x2a40] sm:$0xff]  ;;  %v16929_v3 = vcombine.low %v16416_v21, %v16420_v27  ;;  %v17057_v9 = vcombine.low %v16544_v23, %v16548_v40 }
 0x958   : > { %v16428_v17 = vld [vmem:[%s18494_s24 + $0x2a60] sm:$0xff] }
 0x959   : > { %v16552_v1 = vld [vmem:[%s18494_s24 + $0x2e40] sm:$0xff]  ;;  %v16938_v60 = vcombine.high %v16424_v16, %v16428_v17 }
 0x95a   : > { %12939 = vmatpush1.bf16.msra.mxu0 %v16889_v37  ;;  %12980 = vmatpush1.bf16.msra.mxu1 %v17017_v7  ;;  %v16556_v39 = vld [vmem:[%s18494_s24 + $0x2e60] sm:$0xff] }
 0x95b   : > { %12940 = vmatprep.subr.bf16.mxu0 %v16898_v44  ;;  %12981 = vmatprep.subr.bf16.mxu1 %v17026_v45  ;;  %v17066_v10 = vcombine.high %v16552_v1, %v16556_v39  ;;  %v16436_v37 = vld [vmem:[%s18494_s24 + $0x2aa0] sm:$0xff]  ;;  %v16937_v45 = vcombine.low %v16424_v16, %v16428_v17  ;;  %v17065_v30 = vcombine.low %v16552_v1, %v16556_v39 }
 0x95c   : > { %v16560_v7 = vld [vmem:[%s18494_s24 + $0x2e80] sm:$0xff]  ;;  %v16946_v47 = vcombine.high %v16432_v4, %v16436_v37 }
 0x95d   : > { %v16564_v44 = vld [vmem:[%s18494_s24 + $0x2ea0] sm:$0xff] }
 0x95e   : > { %12941 = vmatpush1.bf16.msra.mxu0 %v16897_v62  ;;  %12982 = vmatpush1.bf16.msra.mxu1 %v17025_v63  ;;  %v17074_v32 = vcombine.high %v16560_v7, %v16564_v44  ;;  %v16440_v49 = vld [vmem:[%s18494_s24 + $0x2ac0] sm:$0xff]  ;;  %v17073_v59 = vcombine.low %v16560_v7, %v16564_v44  ;;  %v16097_v44 = vld [vmem:[%s18494_s24 + $0x2008] sm:$0xff] }
 0x95f   : > { %12942 = vmatprep.subr.bf16.mxu0 %v16906_v0  ;;  %12983 = vmatprep.subr.bf16.mxu1 %v17034_v58  ;;  %v16444_v62 = vld [vmem:[%s18494_s24 + $0x2ae0] sm:$0xff]  ;;  %v16945_v58 = vcombine.low %v16432_v4, %v16436_v37 }
 0x960   : > { %v16568_v63 = vld [vmem:[%s18494_s24 + $0x2ec0] sm:$0xff]  ;;  %v16954_v28 = vcombine.high %v16440_v49, %v16444_v62 }
 0x961   : > { %v16572_v0 = vld [vmem:[%s18494_s24 + $0x2ee0] sm:$0xff] }
 0x962   : > { %12943 = vmatpush1.bf16.msra.mxu0 %v16905_v50  ;;  %12984 = vmatpush1.bf16.msra.mxu1 %v17033_v41  ;;  %v17082_v31 = vcombine.high %v16568_v63, %v16572_v0  ;;  %v16448_v51 = vld [vmem:[%s18494_s24 + $0x2b00] sm:$0xff]  ;;  %v17081_v12 = vcombine.low %v16568_v63, %v16572_v0  ;;  %v20391_v63 = vmax.f32 %v20311_v18, 0.0 }
 0x963   : > { %12944 = vmatprep.subr.bf16.mxu0 %v16914_v11  ;;  %12985 = vmatprep.subr.bf16.mxu1 %v17042_v13  ;;  %v16452_v50 = vld [vmem:[%s18494_s24 + $0x2b20] sm:$0xff]  ;;  %v16953_v13 = vcombine.low %v16440_v49, %v16444_v62  ;;  %v20388_v62 = vmax.f32 %v20308_v5, 0.0 }
 0x964   : > { %v16576_v41 = vld [vmem:[%s18494_s24 + $0x2f00] sm:$0xff]  ;;  %v16962_v14 = vcombine.high %v16448_v51, %v16452_v50  ;;  %v20403_v18 = vpack.c.bf16 %v20391_v63, %v20391_v63 }
 0x965   : > { %v16580_v11 = vld [vmem:[%s18494_s24 + $0x2f20] sm:$0xff]  ;;  %v20399_v5 = vpack.c.bf16 %v20388_v62, %v20388_v62 }
 0x966   : > { %12945 = vmatpush1.bf16.msra.mxu0 %v16913_v61  ;;  %12986 = vmatpush1.bf16.msra.mxu1 %v17041_v2  ;;  %v17090_v48 = vcombine.high %v16576_v41, %v16580_v11  ;;  %v16456_v29 = vld [vmem:[%s18494_s24 + $0x2b40] sm:$0xff]  ;;  %v17089_v21 = vcombine.low %v16576_v41, %v16580_v11 }
 0x967   : > { %12946 = vmatprep.subr.bf16.mxu0 %v16922_v33  ;;  %12987 = vmatprep.subr.bf16.mxu1 %v17050_v6  ;;  %v16460_v61 = vld [vmem:[%s18494_s24 + $0x2b60] sm:$0xff]  ;;  %v16961_v6 = vcombine.low %v16448_v51, %v16452_v50  ;;  %v16237_v51 = vld [vmem:[%s18494_s24 + $0x2468] sm:$0xff] }
 0x968   : > { %v16584_v2 = vld [vmem:[%s18494_s24 + $0x2f40] sm:$0xff]  ;;  %v16970_v27 = vcombine.high %v16456_v29, %v16460_v61 }
 0x969   : > { %v16588_v33 = vld [vmem:[%s18494_s24 + $0x2f60] sm:$0xff] }
 0x96a   : > { %12947 = vmatpush1.bf16.msra.mxu0 %v16921_v15  ;;  %12988 = vmatpush1.bf16.msra.mxu1 %v17049_v43  ;;  %v17098_v23 = vcombine.high %v16584_v2, %v16588_v33  ;;  %v16464_v40 = vld [vmem:[%s18494_s24 + $0x2b80] sm:$0xff]  ;;  %v17097_v16 = vcombine.low %v16584_v2, %v16588_v33 }
 0x96b   : > { %12948 = vmatprep.subr.bf16.mxu0 %v16930_v36  ;;  %12989 = vmatprep.subr.bf16.mxu1 %v17058_v19  ;;  %v16468_v15 = vld [vmem:[%s18494_s24 + $0x2ba0] sm:$0xff]  ;;  %v16969_v19 = vcombine.low %v16456_v29, %v16460_v61  ;;  %v16245_v29 = vld [vmem:[%s18494_s24 + $0x24a8] sm:$0xff] }
 0x96c   : > { %v16592_v43 = vld [vmem:[%s18494_s24 + $0x2f80] sm:$0xff]  ;;  %v16978_v17 = vcombine.high %v16464_v40, %v16468_v15 }
 0x96d   : > { %v16596_v36 = vld [vmem:[%s18494_s24 + $0x2fa0] sm:$0xff] }
 0x96e   : > { %12949 = vmatpush1.bf16.msra.mxu0 %v16929_v3  ;;  %12990 = vmatpush1.bf16.msra.mxu1 %v17057_v9  ;;  %v17106_v1 = vcombine.high %v16592_v43, %v16596_v36  ;;  %v16472_v39 = vld [vmem:[%s18494_s24 + $0x2bc0] sm:$0xff]  ;;  %v17105_v4 = vcombine.low %v16592_v43, %v16596_v36 }
 0x96f   : > { %12950 = vmatprep.subr.bf16.mxu0 %v16938_v60  ;;  %12991 = vmatprep.subr.bf16.mxu1 %v17066_v10  ;;  %v16476_v3 = vld [vmem:[%s18494_s24 + $0x2be0] sm:$0xff]  ;;  %v16977_v10 = vcombine.low %v16464_v40, %v16468_v15  ;;  %v16253_v40 = vld [vmem:[%s18494_s24 + $0x24e8] sm:$0xff] }
 0x970   : > { %v16600_v9 = vld [vmem:[%s18494_s24 + $0x2fc0] sm:$0xff]  ;;  %v16986_v37 = vcombine.high %v16472_v39, %v16476_v3 }
 0x971   : > { %v16604_v60 = vld [vmem:[%s18494_s24 + $0x2fe0] sm:$0xff] }
 0x972   : > { %12951 = vmatpush1.bf16.msra.mxu0 %v16937_v45  ;;  %12992 = vmatpush1.bf16.msra.mxu1 %v17065_v30  ;;  %v17114_v7 = vcombine.high %v16600_v9, %v16604_v60  ;;  %v16101_v45 = vld [vmem:[%s18494_s24 + $0x2028] sm:$0xff]  ;;  %v17113_v49 = vcombine.low %v16600_v9, %v16604_v60 }
 0x973   : > { %12952 = vmatprep.subr.bf16.mxu0 %v16946_v47  ;;  %12993 = vmatprep.subr.bf16.mxu1 %v17074_v32  ;;  %v16225_v30 = vld [vmem:[%s18494_s24 + $0x2408] sm:$0xff]  ;;  %v16985_v32 = vcombine.low %v16472_v39, %v16476_v3  ;;  %v16612_v0 = vcombine.high %v16097_v44, %v16101_v45  ;;  %v16611_v50 = vcombine.low %v16097_v44, %v16101_v45 }
 0x974   : > { %v16229_v47 = vld [vmem:[%s18494_s24 + $0x2428] sm:$0xff] }
 0x975   : > { %v16739_v41 = vcombine.low %v16225_v30, %v16229_v47  ;;  %v16261_v39 = vld [vmem:[%s18494_s24 + $0x2528] sm:$0xff] }
 0x976   : > { %12953 = vmatpush1.bf16.msra.mxu0 %v16945_v58  ;;  %12994 = vmatpush1.bf16.msra.mxu1 %v17073_v59  ;;  %v16740_v58 = vcombine.high %v16225_v30, %v16229_v47  ;;  %v16105_v59 = vld [vmem:[%s18494_s24 + $0x2048] sm:$0xff] }
 0x977   : > { %12954 = vmatprep.subr.bf16.mxu0 %v16954_v28  ;;  %12995 = vmatprep.subr.bf16.mxu1 %v17082_v31  ;;  %v16109_v28 = vld [vmem:[%s18494_s24 + $0x2068] sm:$0xff] }
 0x978   : > { %v16233_v31 = vld [vmem:[%s18494_s24 + $0x2448] sm:$0xff]  ;;  %v16620_v11 = vcombine.high %v16105_v59, %v16109_v28  ;;  %v16619_v61 = vcombine.low %v16105_v59, %v16109_v28 }
 0x979   : > { %v16747_v2 = vcombine.low %v16233_v31, %v16237_v51  ;;  %v16269_v44 = vld [vmem:[%s18494_s24 + $0x2568] sm:$0xff] }
 0x97a   : > { %12955 = vmatpush1.bf16.msra.mxu0 %v16953_v13  ;;  %12996 = vmatpush1.bf16.msra.mxu1 %v17081_v12  ;;  %v16748_v13 = vcombine.high %v16233_v31, %v16237_v51  ;;  %v16113_v12 = vld [vmem:[%s18494_s24 + $0x2088] sm:$0xff] }
 0x97b   : > { %12956 = vmatprep.subr.bf16.mxu0 %v16962_v14  ;;  %12997 = vmatprep.subr.bf16.mxu1 %v17090_v48  ;;  %v16117_v14 = vld [vmem:[%s18494_s24 + $0x20a8] sm:$0xff] }
 0x97c   : > { %v16241_v48 = vld [vmem:[%s18494_s24 + $0x2488] sm:$0xff]  ;;  %v16628_v33 = vcombine.high %v16113_v12, %v16117_v14  ;;  %v16627_v15 = vcombine.low %v16113_v12, %v16117_v14 }
 0x97d   : > { %v16755_v43 = vcombine.low %v16241_v48, %v16245_v29  ;;  %v16277_v59 = vld [vmem:[%s18494_s24 + $0x25a8] sm:$0xff] }
 0x97e   : > { %12957 = vmatpush1.bf16.msra.mxu0 %v16961_v6  ;;  %12998 = vmatpush1.bf16.msra.mxu1 %v17089_v21  ;;  %v16756_v6 = vcombine.high %v16241_v48, %v16245_v29  ;;  %v16121_v21 = vld [vmem:[%s18494_s24 + $0x20c8] sm:$0xff] }
 0x97f   : > { %12958 = vmatprep.subr.bf16.mxu0 %v16970_v27  ;;  %12999 = vmatprep.subr.bf16.mxu1 %v17098_v23  ;;  %v16125_v27 = vld [vmem:[%s18494_s24 + $0x20e8] sm:$0xff] }
 0x980   : > { %v16249_v23 = vld [vmem:[%s18494_s24 + $0x24c8] sm:$0xff]  ;;  %v16636_v36 = vcombine.high %v16121_v21, %v16125_v27  ;;  %v16635_v3 = vcombine.low %v16121_v21, %v16125_v27 }
 0x981   : > { %v16763_v9 = vcombine.low %v16249_v23, %v16253_v40  ;;  %v16285_v12 = vld [vmem:[%s18494_s24 + $0x25e8] sm:$0xff] }
 0x982   : > { %12959 = vmatpush1.bf16.msra.mxu0 %v16969_v19  ;;  %13000 = vmatpush1.bf16.msra.mxu1 %v17097_v16  ;;  %v16764_v19 = vcombine.high %v16249_v23, %v16253_v40  ;;  %v16129_v16 = vld [vmem:[%s18494_s24 + $0x2108] sm:$0xff] }
 0x983   : > { %12960 = vmatprep.subr.bf16.mxu0 %v16978_v17  ;;  %13001 = vmatprep.subr.bf16.mxu1 %v17106_v1  ;;  %v16133_v17 = vld [vmem:[%s18494_s24 + $0x2128] sm:$0xff] }
 0x984   : > { %v16257_v1 = vld [vmem:[%s18494_s24 + $0x2508] sm:$0xff]  ;;  %v16644_v60 = vcombine.high %v16129_v16, %v16133_v17  ;;  %v16643_v45 = vcombine.low %v16129_v16, %v16133_v17 }
 0x985   : > { %v16771_v30 = vcombine.low %v16257_v1, %v16261_v39  ;;  %v16293_v21 = vld [vmem:[%s18494_s24 + $0x2628] sm:$0xff] }
 0x986   : > { %12961 = vmatpush1.bf16.msra.mxu0 %v16977_v10  ;;  %13002 = vmatpush1.bf16.msra.mxu1 %v17105_v4  ;;  %v16772_v10 = vcombine.high %v16257_v1, %v16261_v39  ;;  %v16137_v4 = vld [vmem:[%s18494_s24 + $0x2148] sm:$0xff] }
 0x987   : > { %12962 = vmatprep.subr.bf16.mxu0 %v16986_v37  ;;  %13003 = vmatprep.subr.bf16.mxu1 %v17114_v7  ;;  %v16141_v37 = vld [vmem:[%s18494_s24 + $0x2168] sm:$0xff] }
 0x988   : > { %v16265_v7 = vld [vmem:[%s18494_s24 + $0x2548] sm:$0xff]  ;;  %v16652_v47 = vcombine.high %v16137_v4, %v16141_v37  ;;  %v16651_v28 = vcombine.low %v16137_v4, %v16141_v37 }
 0x989   : > { %v16779_v31 = vcombine.low %v16265_v7, %v16269_v44  ;;  %v16301_v16 = vld [vmem:[%s18494_s24 + $0x2668] sm:$0xff] }
 0x98a   : > { %12963 = vmatpush1.bf16.msra.mxu0 %v16985_v32  ;;  %13004 = vmatpush1.bf16.msra.mxu1 %v17113_v49  ;;  %v16780_v32 = vcombine.high %v16265_v7, %v16269_v44  ;;  %v16145_v49 = vld [vmem:[%s18494_s24 + $0x2188] sm:$0xff] }
 0x98b   : > { %13014 = vmatprep.subr.bf16.mxu0 %v16612_v0  ;;  %13055 = vmatprep.subr.bf16.mxu1 %v16740_v58  ;;  %v16149_v0 = vld [vmem:[%s18494_s24 + $0x21a8] sm:$0xff] }
 0x98c   : > { %v16273_v58 = vld [vmem:[%s18494_s24 + $0x2588] sm:$0xff]  ;;  %v16660_v51 = vcombine.high %v16145_v49, %v16149_v0  ;;  %v16659_v14 = vcombine.low %v16145_v49, %v16149_v0 }
 0x98d   : > { %12965 = vmatmul.mubr.bf16.vlgmr.msra.gmra.mrb[84].mxu0 %v20399_v5  ;;  %13006 = vmatmul.mubr.bf16.vlgmr.msra.gmra.mrb[84].mxu1 %v20403_v18  ;;  %v16787_v48 = vcombine.low %v16273_v58, %v16277_v59  ;;  %v16309_v4 = vld [vmem:[%s18494_s24 + $0x26a8] sm:$0xff] }
 0x98e   : > { %13015 = vmatpush1.bf16.msra.mxu0 %v16611_v50  ;;  %13046 = vmatprep.mubr.bf16.mxu0 %v20287_v38  ;;  %v16788_v50 = vcombine.high %v16273_v58, %v16277_v59  ;;  %v16317_v49 = vld [vmem:[%s18494_s24 + $0x26e8] sm:$0xff] }
 0x98f   : > { %13056 = vmatpush1.bf16.msra.mxu1 %v16739_v41  ;;  %13087 = vmatprep.mubr.bf16.mxu1 %v20291_v25  ;;  %v16153_v41 = vld [vmem:[%s18494_s24 + $0x21c8] sm:$0xff] }
 0x990   : > { %13016 = vmatprep.subr.bf16.mxu0 %v16620_v11  ;;  %13057 = vmatprep.subr.bf16.mxu1 %v16748_v13  ;;  %v16157_v11 = vld [vmem:[%s18494_s24 + $0x21e8] sm:$0xff] }
 0x991   : > { %v16281_v13 = vld [vmem:[%s18494_s24 + $0x25c8] sm:$0xff]  ;;  %v16668_v29 = vcombine.high %v16153_v41, %v16157_v11  ;;  %v16667_v27 = vcombine.low %v16153_v41, %v16157_v11 }
 0x992   : > { %13017 = vmatpush1.bf16.msra.mxu0 %v16619_v61  ;;  %v16796_v61 = vcombine.high %v16281_v13, %v16285_v12  ;;  %v16795_v23 = vcombine.low %v16281_v13, %v16285_v12  ;;  %v16325_v41 = vld [vmem:[%s18494_s24 + $0x2728] sm:$0xff] }
 0x993   : > { %13058 = vmatpush1.bf16.msra.mxu1 %v16747_v2  ;;  %13018 = vmatprep.subr.bf16.mxu0 %v16628_v33  ;;  %v16161_v2 = vld [vmem:[%s18494_s24 + $0x2208] sm:$0xff] }
 0x994   : > { %13059 = vmatprep.subr.bf16.mxu1 %v16756_v6  ;;  %v16165_v33 = vld [vmem:[%s18494_s24 + $0x2228] sm:$0xff] }
 0x995   : > { %v16289_v6 = vld [vmem:[%s18494_s24 + $0x2608] sm:$0xff]  ;;  %v16676_v40 = vcombine.high %v16161_v2, %v16165_v33  ;;  %v16675_v17 = vcombine.low %v16161_v2, %v16165_v33 }
 0x996   : > { %13019 = vmatpush1.bf16.msra.mxu0 %v16627_v15  ;;  %v16804_v15 = vcombine.high %v16289_v6, %v16293_v21  ;;  %v16803_v1 = vcombine.low %v16289_v6, %v16293_v21  ;;  %v16333_v2 = vld [vmem:[%s18494_s24 + $0x2768] sm:$0xff] }
 0x997   : > { %13060 = vmatpush1.bf16.msra.mxu1 %v16755_v43  ;;  %13020 = vmatprep.subr.bf16.mxu0 %v16636_v36  ;;  %v16169_v43 = vld [vmem:[%s18494_s24 + $0x2248] sm:$0xff] }
 0x998   : > { %13061 = vmatprep.subr.bf16.mxu1 %v16764_v19  ;;  %v16173_v36 = vld [vmem:[%s18494_s24 + $0x2268] sm:$0xff] }
 0x999   : > { %v16297_v19 = vld [vmem:[%s18494_s24 + $0x2648] sm:$0xff]  ;;  %v16684_v39 = vcombine.high %v16169_v43, %v16173_v36  ;;  %v16683_v37 = vcombine.low %v16169_v43, %v16173_v36 }
 0x99a   : > { %13021 = vmatpush1.bf16.msra.mxu0 %v16635_v3  ;;  %v16812_v3 = vcombine.high %v16297_v19, %v16301_v16  ;;  %v16811_v7 = vcombine.low %v16297_v19, %v16301_v16  ;;  %v16341_v43 = vld [vmem:[%s18494_s24 + $0x27a8] sm:$0xff] }
 0x99b   : > { %13062 = vmatpush1.bf16.msra.mxu1 %v16763_v9  ;;  %13022 = vmatprep.subr.bf16.mxu0 %v16644_v60  ;;  %v16177_v9 = vld [vmem:[%s18494_s24 + $0x2288] sm:$0xff] }
 0x99c   : > { %13063 = vmatprep.subr.bf16.mxu1 %v16772_v10  ;;  %v16181_v60 = vld [vmem:[%s18494_s24 + $0x22a8] sm:$0xff] }
 0x99d   : > { %v16305_v10 = vld [vmem:[%s18494_s24 + $0x2688] sm:$0xff]  ;;  %v16692_v44 = vcombine.high %v16177_v9, %v16181_v60  ;;  %v16691_v0 = vcombine.low %v16177_v9, %v16181_v60 }
 0x99e   : > { %13023 = vmatpush1.bf16.msra.mxu0 %v16643_v45  ;;  %v16820_v45 = vcombine.high %v16305_v10, %v16309_v4  ;;  %v16819_v58 = vcombine.low %v16305_v10, %v16309_v4  ;;  %v16349_v9 = vld [vmem:[%s18494_s24 + $0x27e8] sm:$0xff] }
 0x99f   : > { %13064 = vmatpush1.bf16.msra.mxu1 %v16771_v30  ;;  %13024 = vmatprep.subr.bf16.mxu0 %v16652_v47  ;;  %v16185_v30 = vld [vmem:[%s18494_s24 + $0x22c8] sm:$0xff] }
 0x9a0   : > { %13065 = vmatprep.subr.bf16.mxu1 %v16780_v32  ;;  %v16189_v47 = vld [vmem:[%s18494_s24 + $0x22e8] sm:$0xff] }
 0x9a1   : > { %v16313_v32 = vld [vmem:[%s18494_s24 + $0x26c8] sm:$0xff]  ;;  %v16700_v59 = vcombine.high %v16185_v30, %v16189_v47  ;;  %v16699_v11 = vcombine.low %v16185_v30, %v16189_v47 }
 0x9a2   : > { %13025 = vmatpush1.bf16.msra.mxu0 %v16651_v28  ;;  %v16828_v28 = vcombine.high %v16313_v32, %v16317_v49  ;;  %v16827_v13 = vcombine.low %v16313_v32, %v16317_v49  ;;  %v16485_v30 = vld [vmem:[%s18494_s24 + $0x2c28] sm:$0xff] }
 0x9a3   : > { %13066 = vmatpush1.bf16.msra.mxu1 %v16779_v31  ;;  %13026 = vmatprep.subr.bf16.mxu0 %v16660_v51  ;;  %v16193_v31 = vld [vmem:[%s18494_s24 + $0x2308] sm:$0xff] }
 0x9a4   : > { %13067 = vmatprep.subr.bf16.mxu1 %v16788_v50  ;;  %v16197_v51 = vld [vmem:[%s18494_s24 + $0x2328] sm:$0xff] }
 0x9a5   : > { %v16321_v50 = vld [vmem:[%s18494_s24 + $0x2708] sm:$0xff]  ;;  %v16708_v12 = vcombine.high %v16193_v31, %v16197_v51  ;;  %v16707_v33 = vcombine.low %v16193_v31, %v16197_v51 }
 0x9a6   : > { %13027 = vmatpush1.bf16.msra.mxu0 %v16659_v14  ;;  %v16836_v14 = vcombine.high %v16321_v50, %v16325_v41  ;;  %v16835_v6 = vcombine.low %v16321_v50, %v16325_v41  ;;  %v16489_v31 = vld [vmem:[%s18494_s24 + $0x2c48] sm:$0xff] }
 0x9a7   : > { %13068 = vmatpush1.bf16.msra.mxu1 %v16787_v48  ;;  %13028 = vmatprep.subr.bf16.mxu0 %v16668_v29  ;;  %v16201_v48 = vld [vmem:[%s18494_s24 + $0x2348] sm:$0xff] }
 0x9a8   : > { %13069 = vmatprep.subr.bf16.mxu1 %v16796_v61  ;;  %v16205_v29 = vld [vmem:[%s18494_s24 + $0x2368] sm:$0xff] }
 0x9a9   : > { %v16329_v61 = vld [vmem:[%s18494_s24 + $0x2748] sm:$0xff]  ;;  %v16716_v21 = vcombine.high %v16201_v48, %v16205_v29  ;;  %v16715_v36 = vcombine.low %v16201_v48, %v16205_v29 }
 0x9aa   : > { %13029 = vmatpush1.bf16.msra.mxu0 %v16667_v27  ;;  %v16844_v27 = vcombine.high %v16329_v61, %v16333_v2  ;;  %v16843_v19 = vcombine.low %v16329_v61, %v16333_v2  ;;  %v16493_v51 = vld [vmem:[%s18494_s24 + $0x2c68] sm:$0xff] }
 0x9ab   : > { %13070 = vmatpush1.bf16.msra.mxu1 %v16795_v23  ;;  %13030 = vmatprep.subr.bf16.mxu0 %v16676_v40  ;;  %v16209_v23 = vld [vmem:[%s18494_s24 + $0x2388] sm:$0xff]  ;;  %v17003_v61 = vcombine.low %v16489_v31, %v16493_v51 }
 0x9ac   : > { %13071 = vmatprep.subr.bf16.mxu1 %v16804_v15  ;;  %v16213_v40 = vld [vmem:[%s18494_s24 + $0x23a8] sm:$0xff] }
 0x9ad   : > { %v16337_v15 = vld [vmem:[%s18494_s24 + $0x2788] sm:$0xff]  ;;  %v16724_v16 = vcombine.high %v16209_v23, %v16213_v40  ;;  %v16723_v60 = vcombine.low %v16209_v23, %v16213_v40 }
 0x9ae   : > { %13031 = vmatpush1.bf16.msra.mxu0 %v16675_v17  ;;  %v16852_v17 = vcombine.high %v16337_v15, %v16341_v43  ;;  %v16851_v10 = vcombine.low %v16337_v15, %v16341_v43  ;;  %v16501_v48 = vld [vmem:[%s18494_s24 + $0x2ca8] sm:$0xff] }
 0x9af   : > { %13072 = vmatpush1.bf16.msra.mxu1 %v16803_v1  ;;  %13032 = vmatprep.subr.bf16.mxu0 %v16684_v39  ;;  %v16217_v1 = vld [vmem:[%s18494_s24 + $0x23c8] sm:$0xff] }
 0x9b0   : > { %13073 = vmatprep.subr.bf16.mxu1 %v16812_v3  ;;  %v16221_v39 = vld [vmem:[%s18494_s24 + $0x23e8] sm:$0xff] }
 0x9b1   : > { %v16345_v3 = vld [vmem:[%s18494_s24 + $0x27c8] sm:$0xff]  ;;  %v16732_v4 = vcombine.high %v16217_v1, %v16221_v39  ;;  %v16731_v47 = vcombine.low %v16217_v1, %v16221_v39 }
 0x9b2   : > { %13033 = vmatpush1.bf16.msra.mxu0 %v16683_v37  ;;  %v16860_v37 = vcombine.high %v16345_v3, %v16349_v9  ;;  %v16859_v32 = vcombine.low %v16345_v3, %v16349_v9  ;;  %v16509_v23 = vld [vmem:[%s18494_s24 + $0x2ce8] sm:$0xff] }
 0x9b3   : > { %13074 = vmatpush1.bf16.msra.mxu1 %v16811_v7  ;;  %13034 = vmatprep.subr.bf16.mxu0 %v16692_v44  ;;  %v16353_v7 = vld [vmem:[%s18494_s24 + $0x2808] sm:$0xff] }
 0x9b4   : > { %13075 = vmatprep.subr.bf16.mxu1 %v16820_v45  ;;  %v16357_v44 = vld [vmem:[%s18494_s24 + $0x2828] sm:$0xff] }
 0x9b5   : > { %v16481_v45 = vld [vmem:[%s18494_s24 + $0x2c08] sm:$0xff]  ;;  %v16868_v49 = vcombine.high %v16353_v7, %v16357_v44 }
 0x9b6   : > { %13035 = vmatpush1.bf16.msra.mxu0 %v16691_v0  ;;  %v16996_v0 = vcombine.high %v16481_v45, %v16485_v30  ;;  %v16995_v50 = vcombine.low %v16481_v45, %v16485_v30  ;;  %v16517_v1 = vld [vmem:[%s18494_s24 + $0x2d28] sm:$0xff] }
 0x9b7   : > { %13076 = vmatpush1.bf16.msra.mxu1 %v16819_v58  ;;  %13036 = vmatprep.subr.bf16.mxu0 %v16700_v59  ;;  %v16361_v58 = vld [vmem:[%s18494_s24 + $0x2848] sm:$0xff] }
 0x9b8   : > { %13077 = vmatprep.subr.bf16.mxu1 %v16828_v28  ;;  %v16365_v59 = vld [vmem:[%s18494_s24 + $0x2868] sm:$0xff]  ;;  %v16867_v28 = vcombine.low %v16353_v7, %v16357_v44 }
 0x9b9   : > { %v16876_v41 = vcombine.high %v16361_v58, %v16365_v59  ;;  %v16875_v29 = vcombine.low %v16361_v58, %v16365_v59  ;;  %v16525_v7 = vld [vmem:[%s18494_s24 + $0x2d68] sm:$0xff] }
 0x9ba   : > { %13037 = vmatpush1.bf16.msra.mxu0 %v16699_v11  ;;  %v16369_v11 = vld [vmem:[%s18494_s24 + $0x2888] sm:$0xff] }
 0x9bb   : > { %13078 = vmatpush1.bf16.msra.mxu1 %v16827_v13  ;;  %13038 = vmatprep.subr.bf16.mxu0 %v16708_v12  ;;  %v16373_v13 = vld [vmem:[%s18494_s24 + $0x28a8] sm:$0xff]  ;;  %v17004_v12 = vcombine.high %v16489_v31, %v16493_v51 }
 0x9bc   : > { %13079 = vmatprep.subr.bf16.mxu1 %v16836_v14  ;;  %v16497_v14 = vld [vmem:[%s18494_s24 + $0x2c88] sm:$0xff]  ;;  %v16884_v2 = vcombine.high %v16369_v11, %v16373_v13  ;;  %v16883_v40 = vcombine.low %v16369_v11, %v16373_v13 }
 0x9bd   : > { %v17011_v15 = vcombine.low %v16497_v14, %v16501_v48  ;;  %v16533_v58 = vld [vmem:[%s18494_s24 + $0x2da8] sm:$0xff] }
 0x9be   : > { %13039 = vmatpush1.bf16.msra.mxu0 %v16707_v33  ;;  %v17012_v33 = vcombine.high %v16497_v14, %v16501_v48  ;;  %v16537_v11 = vld [vmem:[%s18494_s24 + $0x2dc8] sm:$0xff] }
 0x9bf   : > { %13080 = vmatpush1.bf16.msra.mxu1 %v16835_v6  ;;  %13040 = vmatprep.subr.bf16.mxu0 %v16716_v21  ;;  %v16377_v6 = vld [vmem:[%s18494_s24 + $0x28c8] sm:$0xff] }
 0x9c0   : > { %13081 = vmatprep.subr.bf16.mxu1 %v16844_v27  ;;  %v16381_v21 = vld [vmem:[%s18494_s24 + $0x28e8] sm:$0xff] }
 0x9c1   : > { %v16505_v27 = vld [vmem:[%s18494_s24 + $0x2cc8] sm:$0xff]  ;;  %v16892_v43 = vcombine.high %v16377_v6, %v16381_v21  ;;  %v16891_v39 = vcombine.low %v16377_v6, %v16381_v21 }
 0x9c2   : > { %13041 = vmatpush1.bf16.msra.mxu0 %v16715_v36  ;;  %v17020_v36 = vcombine.high %v16505_v27, %v16509_v23  ;;  %v17019_v3 = vcombine.low %v16505_v27, %v16509_v23  ;;  %v16541_v13 = vld [vmem:[%s18494_s24 + $0x2de8] sm:$0xff] }
 0x9c3   : > { %13082 = vmatpush1.bf16.msra.mxu1 %v16843_v19  ;;  %13042 = vmatprep.subr.bf16.mxu0 %v16724_v16  ;;  %v16385_v19 = vld [vmem:[%s18494_s24 + $0x2908] sm:$0xff]  ;;  %v17051_v27 = vcombine.low %v16537_v11, %v16541_v13 }
 0x9c4   : > { %13083 = vmatprep.subr.bf16.mxu1 %v16852_v17  ;;  %v16389_v16 = vld [vmem:[%s18494_s24 + $0x2928] sm:$0xff] }
 0x9c5   : > { %v16513_v17 = vld [vmem:[%s18494_s24 + $0x2d08] sm:$0xff]  ;;  %v16900_v9 = vcombine.high %v16385_v19, %v16389_v16  ;;  %v16899_v44 = vcombine.low %v16385_v19, %v16389_v16 }
 0x9c6   : > { %13043 = vmatpush1.bf16.msra.mxu0 %v16723_v60  ;;  %v17028_v60 = vcombine.high %v16513_v17, %v16517_v1  ;;  %v17027_v45 = vcombine.low %v16513_v17, %v16517_v1  ;;  %v16549_v6 = vld [vmem:[%s18494_s24 + $0x2e28] sm:$0xff] }
 0x9c7   : > { %13084 = vmatpush1.bf16.msra.mxu1 %v16851_v10  ;;  %13044 = vmatprep.subr.bf16.mxu0 %v16732_v4  ;;  %v16393_v10 = vld [vmem:[%s18494_s24 + $0x2948] sm:$0xff] }
 0x9c8   : > { %13085 = vmatprep.subr.bf16.mxu1 %v16860_v37  ;;  %v16397_v4 = vld [vmem:[%s18494_s24 + $0x2968] sm:$0xff] }
 0x9c9   : > { %v16521_v37 = vld [vmem:[%s18494_s24 + $0x2d48] sm:$0xff]  ;;  %v16908_v30 = vcombine.high %v16393_v10, %v16397_v4  ;;  %v16907_v59 = vcombine.low %v16393_v10, %v16397_v4 }
 0x9ca   : > { %13045 = vmatpush1.bf16.msra.mxu0 %v16731_v47  ;;  %v17036_v47 = vcombine.high %v16521_v37, %v16525_v7  ;;  %v16557_v19 = vld [vmem:[%s18494_s24 + $0x2e68] sm:$0xff] }
 0x9cb   : > { %13086 = vmatpush1.bf16.msra.mxu1 %v16859_v32  ;;  %13096 = vmatprep.subr.bf16.mxu0 %v16868_v49  ;;  %v16401_v32 = vld [vmem:[%s18494_s24 + $0x2988] sm:$0xff] }
 0x9cc   : > { %13137 = vmatprep.subr.bf16.mxu1 %v16996_v0  ;;  %v16405_v49 = vld [vmem:[%s18494_s24 + $0x29a8] sm:$0xff] }
 0x9cd   : > { %13047 = vmatmul.mubr.bf16.vlgmr.msra.gmra.mrb[88].mxu0 %v20295_v42  ;;  %v16529_v0 = vld [vmem:[%s18494_s24 + $0x2d88] sm:$0xff]  ;;  %v16916_v31 = vcombine.high %v16401_v32, %v16405_v49 }
 0x9ce   : > { %13088 = vmatmul.mubr.bf16.vlgmr.msra.gmra.mrb[88].mxu1 %v20299_v8  ;;  %13097 = vmatpush1.bf16.msra.mxu0 %v16867_v28  ;;  %v17035_v28 = vcombine.low %v16521_v37, %v16525_v7  ;;  %v17044_v51 = vcombine.high %v16529_v0, %v16533_v58  ;;  %v17043_v14 = vcombine.low %v16529_v0, %v16533_v58  ;;  %v16565_v10 = vld [vmem:[%s18494_s24 + $0x2ea8] sm:$0xff] }
 0x9cf   : > { %13128 = vmatprep.mubr.bf16.mxu0 %v20327_v56  ;;  %13138 = vmatpush1.bf16.msra.mxu1 %v16995_v50  ;;  %v16409_v50 = vld [vmem:[%s18494_s24 + $0x29c8] sm:$0xff] }
 0x9d0   : > { %13169 = vmatprep.mubr.bf16.mxu1 %v20331_v24  ;;  %13098 = vmatprep.subr.bf16.mxu0 %v16876_v41  ;;  %v16413_v41 = vld [vmem:[%s18494_s24 + $0x29e8] sm:$0xff] }
 0x9d1   : > { %13139 = vmatprep.subr.bf16.mxu1 %v17004_v12  ;;  %v16915_v12 = vcombine.low %v16401_v32, %v16405_v49  ;;  %v16924_v48 = vcombine.high %v16409_v50, %v16413_v41  ;;  %v16923_v21 = vcombine.low %v16409_v50, %v16413_v41  ;;  %v16573_v32 = vld [vmem:[%s18494_s24 + $0x2ee8] sm:$0xff] }
 0x9d2   : > { %13099 = vmatpush1.bf16.msra.mxu0 %v16875_v29  ;;  %v17052_v29 = vcombine.high %v16537_v11, %v16541_v13  ;;  %v16581_v50 = vld [vmem:[%s18494_s24 + $0x2f28] sm:$0xff] }
 0x9d3   : > { %13140 = vmatpush1.bf16.msra.mxu1 %v17003_v61  ;;  %13100 = vmatprep.subr.bf16.mxu0 %v16884_v2  ;;  %v16417_v61 = vld [vmem:[%s18494_s24 + $0x2a08] sm:$0xff] }
 0x9d4   : > { %13141 = vmatprep.subr.bf16.mxu1 %v17012_v33  ;;  %v16421_v2 = vld [vmem:[%s18494_s24 + $0x2a28] sm:$0xff] }
 0x9d5   : > { %v16545_v33 = vld [vmem:[%s18494_s24 + $0x2e08] sm:$0xff]  ;;  %v16932_v23 = vcombine.high %v16417_v61, %v16421_v2  ;;  %v16931_v16 = vcombine.low %v16417_v61, %v16421_v2 }
 0x9d6   : > { %13101 = vmatpush1.bf16.msra.mxu0 %v16883_v40  ;;  %v17060_v40 = vcombine.high %v16545_v33, %v16549_v6  ;;  %v17059_v17 = vcombine.low %v16545_v33, %v16549_v6  ;;  %v16589_v61 = vld [vmem:[%s18494_s24 + $0x2f68] sm:$0xff] }
 0x9d7   : > { %13142 = vmatpush1.bf16.msra.mxu1 %v17011_v15  ;;  %13102 = vmatprep.subr.bf16.mxu0 %v16892_v43  ;;  %v16425_v15 = vld [vmem:[%s18494_s24 + $0x2a48] sm:$0xff] }
 0x9d8   : > { %13143 = vmatprep.subr.bf16.mxu1 %v17020_v36  ;;  %v16429_v43 = vld [vmem:[%s18494_s24 + $0x2a68] sm:$0xff] }
 0x9d9   : > { %v16553_v36 = vld [vmem:[%s18494_s24 + $0x2e48] sm:$0xff]  ;;  %v16940_v1 = vcombine.high %v16425_v15, %v16429_v43  ;;  %v16939_v4 = vcombine.low %v16425_v15, %v16429_v43 }
 0x9da   : > { %13103 = vmatpush1.bf16.msra.mxu0 %v16891_v39  ;;  %v17068_v39 = vcombine.high %v16553_v36, %v16557_v19  ;;  %v17067_v37 = vcombine.low %v16553_v36, %v16557_v19  ;;  %v16597_v15 = vld [vmem:[%s18494_s24 + $0x2fa8] sm:$0xff] }
 0x9db   : > { %13144 = vmatpush1.bf16.msra.mxu1 %v17019_v3  ;;  %13104 = vmatprep.subr.bf16.mxu0 %v16900_v9  ;;  %v16433_v3 = vld [vmem:[%s18494_s24 + $0x2a88] sm:$0xff] }
 0x9dc   : > { %13145 = vmatprep.subr.bf16.mxu1 %v17028_v60  ;;  %v16437_v9 = vld [vmem:[%s18494_s24 + $0x2aa8] sm:$0xff] }
 0x9dd   : > { %v16561_v60 = vld [vmem:[%s18494_s24 + $0x2e88] sm:$0xff]  ;;  %v16948_v7 = vcombine.high %v16433_v3, %v16437_v9  ;;  %v16947_v49 = vcombine.low %v16433_v3, %v16437_v9 }
 0x9de   : > { %13105 = vmatpush1.bf16.msra.mxu0 %v16899_v44  ;;  %v17076_v44 = vcombine.high %v16561_v60, %v16565_v10  ;;  %v17075_v0 = vcombine.low %v16561_v60, %v16565_v10  ;;  %v16605_v3 = vld [vmem:[%s18494_s24 + $0x2fe8] sm:$0xff] }
 0x9df   : > { %13146 = vmatpush1.bf16.msra.mxu1 %v17027_v45  ;;  %13106 = vmatprep.subr.bf16.mxu0 %v16908_v30  ;;  %v16441_v45 = vld [vmem:[%s18494_s24 + $0x2ac8] sm:$0xff] }
 0x9e0   : > { %13147 = vmatprep.subr.bf16.mxu1 %v17036_v47  ;;  %v16445_v30 = vld [vmem:[%s18494_s24 + $0x2ae8] sm:$0xff] }
 0x9e1   : > { %v16569_v47 = vld [vmem:[%s18494_s24 + $0x2ec8] sm:$0xff]  ;;  %v16956_v58 = vcombine.high %v16441_v45, %v16445_v30  ;;  %v16955_v41 = vcombine.low %v16441_v45, %v16445_v30  ;;  %v16230_v45 = vld [vmem:[%s18494_s24 + $0x2430] sm:$0xff] }
 0x9e2   : > { %13107 = vmatpush1.bf16.msra.mxu0 %v16907_v59  ;;  %v17084_v59 = vcombine.high %v16569_v47, %v16573_v32  ;;  %v17083_v11 = vcombine.low %v16569_v47, %v16573_v32 }
 0x9e3   : > { %13148 = vmatpush1.bf16.msra.mxu1 %v17035_v28  ;;  %13108 = vmatprep.subr.bf16.mxu0 %v16916_v31  ;;  %v16449_v28 = vld [vmem:[%s18494_s24 + $0x2b08] sm:$0xff] }
 0x9e4   : > { %13149 = vmatprep.subr.bf16.mxu1 %v17044_v51  ;;  %v16453_v31 = vld [vmem:[%s18494_s24 + $0x2b28] sm:$0xff] }
 0x9e5   : > { %v16577_v51 = vld [vmem:[%s18494_s24 + $0x2f08] sm:$0xff]  ;;  %v16964_v13 = vcombine.high %v16449_v28, %v16453_v31  ;;  %v16963_v2 = vcombine.low %v16449_v28, %v16453_v31  ;;  %v16234_v28 = vld [vmem:[%s18494_s24 + $0x2450] sm:$0xff] }
 0x9e6   : > { %13109 = vmatpush1.bf16.msra.mxu0 %v16915_v12  ;;  %v17092_v12 = vcombine.high %v16577_v51, %v16581_v50  ;;  %v17091_v33 = vcombine.low %v16577_v51, %v16581_v50  ;;  %v16238_v31 = vld [vmem:[%s18494_s24 + $0x2470] sm:$0xff] }
 0x9e7   : > { %13150 = vmatpush1.bf16.msra.mxu1 %v17043_v14  ;;  %13110 = vmatprep.subr.bf16.mxu0 %v16924_v48  ;;  %v16457_v14 = vld [vmem:[%s18494_s24 + $0x2b48] sm:$0xff] }
 0x9e8   : > { %13151 = vmatprep.subr.bf16.mxu1 %v17052_v29  ;;  %v16461_v48 = vld [vmem:[%s18494_s24 + $0x2b68] sm:$0xff] }
 0x9e9   : > { %v16585_v29 = vld [vmem:[%s18494_s24 + $0x2f48] sm:$0xff]  ;;  %v16972_v6 = vcombine.high %v16457_v14, %v16461_v48  ;;  %v16971_v43 = vcombine.low %v16457_v14, %v16461_v48  ;;  %v16246_v14 = vld [vmem:[%s18494_s24 + $0x24b0] sm:$0xff] }
 0x9ea   : > { %13111 = vmatpush1.bf16.msra.mxu0 %v16923_v21  ;;  %v17100_v21 = vcombine.high %v16585_v29, %v16589_v61  ;;  %v17099_v36 = vcombine.low %v16585_v29, %v16589_v61  ;;  %v16749_v29 = vcombine.low %v16234_v28, %v16238_v31 }
 0x9eb   : > { %13152 = vmatpush1.bf16.msra.mxu1 %v17051_v27  ;;  %13112 = vmatprep.subr.bf16.mxu0 %v16932_v23  ;;  %v16465_v27 = vld [vmem:[%s18494_s24 + $0x2b88] sm:$0xff] }
 0x9ec   : > { %13153 = vmatprep.subr.bf16.mxu1 %v17060_v40  ;;  %v16469_v23 = vld [vmem:[%s18494_s24 + $0x2ba8] sm:$0xff] }
 0x9ed   : > { %v16593_v40 = vld [vmem:[%s18494_s24 + $0x2f88] sm:$0xff]  ;;  %v16980_v19 = vcombine.high %v16465_v27, %v16469_v23  ;;  %v16979_v9 = vcombine.low %v16465_v27, %v16469_v23  ;;  %v16254_v27 = vld [vmem:[%s18494_s24 + $0x24f0] sm:$0xff] }
 0x9ee   : > { %13113 = vmatpush1.bf16.msra.mxu0 %v16931_v16  ;;  %v17108_v16 = vcombine.high %v16593_v40, %v16597_v15  ;;  %v17107_v60 = vcombine.low %v16593_v40, %v16597_v15  ;;  %v16608_v40 = vld [vmem:[%s18504_s20 + $0x10] sm:$0xff] }
 0x9ef   : > { %13154 = vmatpush1.bf16.msra.mxu1 %v17059_v17  ;;  %13114 = vmatprep.subr.bf16.mxu0 %v16940_v1  ;;  %v16473_v17 = vld [vmem:[%s18494_s24 + $0x2bc8] sm:$0xff] }
 0x9f0   : > { %13155 = vmatprep.subr.bf16.mxu1 %v17068_v39  ;;  %v16477_v1 = vld [vmem:[%s18494_s24 + $0x2be8] sm:$0xff] }
 0x9f1   : > { %v16601_v39 = vld [vmem:[%s18494_s24 + $0x2fc8] sm:$0xff]  ;;  %v16988_v10 = vcombine.high %v16473_v17, %v16477_v1  ;;  %v16987_v30 = vcombine.low %v16473_v17, %v16477_v1  ;;  %v16258_v17 = vld [vmem:[%s18494_s24 + $0x2510] sm:$0xff] }
 0x9f2   : > { %13115 = vmatpush1.bf16.msra.mxu0 %v16939_v4  ;;  %v17116_v4 = vcombine.high %v16601_v39, %v16605_v3  ;;  %v17115_v47 = vcombine.low %v16601_v39, %v16605_v3  ;;  %v16262_v1 = vld [vmem:[%s18494_s24 + $0x2530] sm:$0xff]  ;;  %v20558_v39 = vunpack.c.l.bf16 %v16608_v40 }
 0x9f3   : > { %13156 = vmatpush1.bf16.msra.mxu1 %v17067_v37  ;;  %13116 = vmatprep.subr.bf16.mxu0 %v16948_v7  ;;  %v16098_v37 = vld [vmem:[%s18494_s24 + $0x2010] sm:$0xff] }
 0x9f4   : > { %13157 = vmatprep.subr.bf16.mxu1 %v17076_v44  ;;  %v16102_v7 = vld [vmem:[%s18494_s24 + $0x2030] sm:$0xff] }
 0x9f5   : > { %v16226_v44 = vld [vmem:[%s18494_s24 + $0x2410] sm:$0xff]  ;;  %v16614_v32 = vcombine.high %v16098_v37, %v16102_v7 }
 0x9f6   : > { %13117 = vmatpush1.bf16.msra.mxu0 %v16947_v49  ;;  %v16742_v49 = vcombine.high %v16226_v44, %v16230_v45  ;;  %v16741_v51 = vcombine.low %v16226_v44, %v16230_v45  ;;  %v16266_v44 = vld [vmem:[%s18494_s24 + $0x2550] sm:$0xff] }
 0x9f7   : > { %13158 = vmatpush1.bf16.msra.mxu1 %v17075_v0  ;;  %13118 = vmatprep.subr.bf16.mxu0 %v16956_v58  ;;  %v16106_v0 = vld [vmem:[%s18494_s24 + $0x2050] sm:$0xff] }
 0x9f8   : > { %13159 = vmatprep.subr.bf16.mxu1 %v17084_v59  ;;  %v16110_v58 = vld [vmem:[%s18494_s24 + $0x2070] sm:$0xff]  ;;  %v16613_v59 = vcombine.low %v16098_v37, %v16102_v7  ;;  %v10221_v7 = vrot.slane %v20558_v39, %v18865_v20 }
 0x9f9   : > { %v16622_v50 = vcombine.high %v16106_v0, %v16110_v58  ;;  %v16621_v48 = vcombine.low %v16106_v0, %v16110_v58  ;;  %v16142_v37 = vld [vmem:[%s18494_s24 + $0x2170] sm:$0xff] }
 0x9fa   : > { %13119 = vmatpush1.bf16.msra.mxu0 %v16955_v41  ;;  %v16114_v41 = vld [vmem:[%s18494_s24 + $0x2090] sm:$0xff] }
 0x9fb   : > { %13160 = vmatpush1.bf16.msra.mxu1 %v17083_v11  ;;  %13120 = vmatprep.subr.bf16.mxu0 %v16964_v13  ;;  %v16118_v11 = vld [vmem:[%s18494_s24 + $0x20b0] sm:$0xff]  ;;  %v16750_v13 = vcombine.high %v16234_v28, %v16238_v31  ;;  %v10261_v28 = vrot.slane %v10221_v7, %v18865_v20 }
 0x9fc   : > { %13161 = vmatprep.subr.bf16.mxu1 %v17092_v12  ;;  %v16242_v12 = vld [vmem:[%s18494_s24 + $0x2490] sm:$0xff]  ;;  %v16630_v61 = vcombine.high %v16114_v41, %v16118_v11  ;;  %v16629_v23 = vcombine.low %v16114_v41, %v16118_v11 }
 0x9fd   : > { %v16757_v15 = vcombine.low %v16242_v12, %v16246_v14  ;;  %v16270_v45 = vld [vmem:[%s18494_s24 + $0x2570] sm:$0xff] }
 0x9fe   : > { %13121 = vmatpush1.bf16.msra.mxu0 %v16963_v2  ;;  %v16758_v2 = vcombine.high %v16242_v12, %v16246_v14  ;;  %v16782_v0 = vcombine.high %v16266_v44, %v16270_v45  ;;  %v16146_v58 = vld [vmem:[%s18494_s24 + $0x2190] sm:$0xff]  ;;  %v16781_v11 = vcombine.low %v16266_v44, %v16270_v45 }
 0x9ff   : > { %13162 = vmatpush1.bf16.msra.mxu1 %v17091_v33  ;;  %13122 = vmatprep.subr.bf16.mxu0 %v16972_v6  ;;  %v16122_v33 = vld [vmem:[%s18494_s24 + $0x20d0] sm:$0xff] }
 0xa00   : > { %13163 = vmatprep.subr.bf16.mxu1 %v17100_v21  ;;  %v16126_v6 = vld [vmem:[%s18494_s24 + $0x20f0] sm:$0xff] }
 0xa01   : > { %v16250_v21 = vld [vmem:[%s18494_s24 + $0x24d0] sm:$0xff]  ;;  %v16637_v3 = vcombine.low %v16122_v33, %v16126_v6 }
 0xa02   : > { %13123 = vmatpush1.bf16.msra.mxu0 %v16971_v43  ;;  %v16638_v43 = vcombine.high %v16122_v33, %v16126_v6  ;;  %v16274_v31 = vld [vmem:[%s18494_s24 + $0x2590] sm:$0xff] }
 0xa03   : > { %13164 = vmatpush1.bf16.msra.mxu1 %v17099_v36  ;;  %13124 = vmatprep.subr.bf16.mxu0 %v16980_v19  ;;  %v16766_v36 = vcombine.high %v16250_v21, %v16254_v27  ;;  %v16130_v19 = vld [vmem:[%s18494_s24 + $0x2110] sm:$0xff] }
 0xa04   : > { %13165 = vmatprep.subr.bf16.mxu1 %v17108_v16  ;;  %v16134_v16 = vld [vmem:[%s18494_s24 + $0x2130] sm:$0xff] }
 0xa06   : > { %13125 = vmatpush1.bf16.msra.mxu0 %v16979_v9  ;;  %v16765_v9 = vcombine.low %v16250_v21, %v16254_v27  ;;  %v16282_v21 = vld [vmem:[%s18494_s24 + $0x25d0] sm:$0xff] }
 0xa07   : > { %13166 = vmatpush1.bf16.msra.mxu1 %v17107_v60  ;;  %13126 = vmatprep.subr.bf16.mxu0 %v16988_v10  ;;  %v16646_v60 = vcombine.high %v16130_v19, %v16134_v16  ;;  %v16774_v10 = vcombine.high %v16258_v17, %v16262_v1  ;;  %v16286_v27 = vld [vmem:[%s18494_s24 + $0x25f0] sm:$0xff] }
 0xa08   : > { %13167 = vmatprep.subr.bf16.mxu1 %v17116_v4  ;;  %v16138_v4 = vld [vmem:[%s18494_s24 + $0x2150] sm:$0xff]  ;;  %v16797_v44 = vcombine.low %v16282_v21, %v16286_v27 }
 0xa0a   : > { %13127 = vmatpush1.bf16.msra.mxu0 %v16987_v30  ;;  %v16645_v30 = vcombine.low %v16130_v19, %v16134_v16 }
 0xa0b   : > { %13168 = vmatpush1.bf16.msra.mxu1 %v17115_v47  ;;  %13178 = vmatprep.subr.bf16.mxu0 %v16614_v32  ;;  %v10225_v47 = vrot.slane %v20558_v39, %v18868_v22  ;;  %v16773_v32 = vcombine.low %v16258_v17, %v16262_v1 }
 0xa0c   : > { %13219 = vmatprep.subr.bf16.mxu1 %v16742_v49  ;;  %v16654_v49 = vcombine.high %v16138_v4, %v16142_v37 }
 0xa0d   : > { %13129 = vmatmul.mubr.bf16.vlgmr.msra.gmra.mrb[92].mxu0 %v20399_v5  ;;  %v10265_v41 = vrot.slane %v10225_v47, %v18865_v20  ;;  %v16170_v47 = vld [vmem:[%s18494_s24 + $0x2250] sm:$0xff] }
 0xa0e   : > { %13170 = vmatmul.mubr.bf16.vlgmr.msra.gmra.mrb[92].mxu1 %v20403_v18  ;;  %13179 = vmatpush1.bf16.msra.mxu0 %v16613_v59  ;;  %v16150_v59 = vld [vmem:[%s18494_s24 + $0x21b0] sm:$0xff] }
 0xa0f   : > { %13210 = vmatprep.mubr.bf16.mxu0 %v20287_v38  ;;  %13220 = vmatpush1.bf16.msra.mxu1 %v16741_v51  ;;  %v16278_v51 = vld [vmem:[%s18494_s24 + $0x25b0] sm:$0xff] }
 0xa10   : > { %13251 = vmatprep.mubr.bf16.mxu1 %v20291_v25  ;;  %13180 = vmatprep.subr.bf16.mxu0 %v16622_v50  ;;  %v16653_v50 = vcombine.low %v16138_v4, %v16142_v37  ;;  %v16789_v17 = vcombine.low %v16274_v31, %v16278_v51  ;;  %v16290_v4 = vld [vmem:[%s18494_s24 + $0x2610] sm:$0xff] }
 0xa11   : > { %13221 = vmatprep.subr.bf16.mxu1 %v16750_v13  ;;  %v16662_v13 = vcombine.high %v16146_v58, %v16150_v59  ;;  %v16294_v37 = vld [vmem:[%s18494_s24 + $0x2630] sm:$0xff] }
 0xa12   : > { %13181 = vmatpush1.bf16.msra.mxu0 %v16621_v48  ;;  %v16790_v48 = vcombine.high %v16274_v31, %v16278_v51  ;;  %v16178_v51 = vld [vmem:[%s18494_s24 + $0x2290] sm:$0xff] }
 0xa13   : > { %13222 = vmatpush1.bf16.msra.mxu1 %v16749_v29  ;;  %13182 = vmatprep.subr.bf16.mxu0 %v16630_v61  ;;  %v16154_v29 = vld [vmem:[%s18494_s24 + $0x21d0] sm:$0xff] }
 0xa14   : > { %13223 = vmatprep.subr.bf16.mxu1 %v16758_v2  ;;  %v16158_v61 = vld [vmem:[%s18494_s24 + $0x21f0] sm:$0xff] }
 0xa15   : > { %v16670_v1 = vcombine.high %v16154_v29, %v16158_v61  ;;  %v16669_v7 = vcombine.low %v16154_v29, %v16158_v61  ;;  %v16186_v29 = vld [vmem:[%s18494_s24 + $0x22d0] sm:$0xff] }
 0xa16   : > { %13183 = vmatpush1.bf16.msra.mxu0 %v16629_v23  ;;  %v16190_v61 = vld [vmem:[%s18494_s24 + $0x22f0] sm:$0xff] }
 0xa17   : > { %13224 = vmatpush1.bf16.msra.mxu1 %v16757_v15  ;;  %13184 = vmatprep.subr.bf16.mxu0 %v16638_v43  ;;  %v16661_v43 = vcombine.low %v16146_v58, %v16150_v59  ;;  %v16805_v59 = vcombine.low %v16290_v4, %v16294_v37 }
 0xa18   : > { %13225 = vmatprep.subr.bf16.mxu1 %v16766_v36 }
 0xa1a   : > { %13185 = vmatpush1.bf16.msra.mxu0 %v16637_v3 }
 0xa1b   : > { %13226 = vmatpush1.bf16.msra.mxu1 %v16765_v9  ;;  %13186 = vmatprep.subr.bf16.mxu0 %v16646_v60  ;;  %v16798_v9 = vcombine.high %v16282_v21, %v16286_v27  ;;  %v16162_v60 = vld [vmem:[%s18494_s24 + $0x2210] sm:$0xff]  ;;  %v16702_v27 = vcombine.high %v16186_v29, %v16190_v61 }
 0xa1c   : > { %13227 = vmatprep.subr.bf16.mxu1 %v16774_v10  ;;  %v16166_v10 = vld [vmem:[%s18494_s24 + $0x2230] sm:$0xff] }
 0xa1d   : > { %v16678_v45 = vcombine.high %v16162_v60, %v16166_v10  ;;  %v16677_v58 = vcombine.low %v16162_v60, %v16166_v10  ;;  %v16202_v60 = vld [vmem:[%s18494_s24 + $0x2350] sm:$0xff] }
 0xa1e   : > { %13187 = vmatpush1.bf16.msra.mxu0 %v16645_v30  ;;  %v16806_v30 = vcombine.high %v16290_v4, %v16294_v37  ;;  %v16206_v10 = vld [vmem:[%s18494_s24 + $0x2370] sm:$0xff] }
 0xa1f   : > { %13228 = vmatpush1.bf16.msra.mxu1 %v16773_v32  ;;  %13188 = vmatprep.subr.bf16.mxu0 %v16654_v49  ;;  %v16174_v32 = vld [vmem:[%s18494_s24 + $0x2270] sm:$0xff] }
 0xa20   : > { %v12884_v12 = vpop.f32.mrb[80].mxu0  ;;  %v12925_v14 = vpop.f32.mrb[80].mxu1  ;;  %13229 = vmatprep.subr.bf16.mxu1 %v16782_v0  ;;  %v16298_v49 = vld [vmem:[%s18494_s24 + $0x2650] sm:$0xff] }
 0xa21   : > { %v12885_v2 = vadd.f32 %v12884_v12, %v10261_v28  ;;  %v12886_v33 = vpop.f32.mrb[81].mxu0  ;;  %v12927_v6 = vpop.f32.mrb[81].mxu1  ;;  %v16302_v0 = vld [vmem:[%s18494_s24 + $0x2670] sm:$0xff]  ;;  %v16686_v28 = vcombine.high %v16170_v47, %v16174_v32 }
 0xa22   : > { %v12887_v23 = vadd.f32 %v12886_v33, %v10265_v41  ;;  %13189 = vmatpush1.bf16.msra.mxu0 %v16653_v50  ;;  %v12888_v40 = vpop.f32.mrb[82].mxu0  ;;  %v12929_v15 = vpop.f32.mrb[82].mxu1  ;;  %v16814_v31 = vcombine.high %v16298_v49, %v16302_v0  ;;  %v16182_v50 = vld [vmem:[%s18494_s24 + $0x22b0] sm:$0xff]  ;;  %v16813_v12 = vcombine.low %v16298_v49, %v16302_v0 }
 0xa23   : > { %v20578_v36 = vadd.f32 %v12925_v14, %v12885_v2  ;;  %13230 = vmatpush1.bf16.msra.mxu1 %v16781_v11  ;;  %v12889_v19 = vpop.f32.mrb[83].mxu0  ;;  %v12930_v16 = vpop.f32.mrb[83].mxu1  ;;  %13190 = vmatprep.subr.bf16.mxu0 %v16662_v13  ;;  %v16306_v41 = vld [vmem:[%s18494_s24 + $0x2690] sm:$0xff]  ;;  %v16685_v13 = vcombine.low %v16170_v47, %v16174_v32  ;;  %v16694_v14 = vcombine.high %v16178_v51, %v16182_v50 }
 0xa24   : > { %v20580_v3 = vadd.f32 %v12927_v6, %v12887_v23  ;;  %13231 = vmatprep.subr.bf16.mxu1 %v16790_v48  ;;  %v16310_v11 = vld [vmem:[%s18494_s24 + $0x26b0] sm:$0xff]  ;;  %v16693_v6 = vcombine.low %v16178_v51, %v16182_v50  ;;  %v16701_v16 = vcombine.low %v16186_v29, %v16190_v61 }
 0xa25   : > { %v16822_v48 = vcombine.high %v16306_v41, %v16310_v11  ;;  %v16314_v2 = vld [vmem:[%s18494_s24 + $0x26d0] sm:$0xff]  ;;  %v16821_v21 = vcombine.low %v16306_v41, %v16310_v11 }
 0xa26   : > { %13191 = vmatpush1.bf16.msra.mxu0 %v16661_v43  ;;  %v16318_v33 = vld [vmem:[%s18494_s24 + $0x26f0] sm:$0xff] }
 0xa27   : > { %13232 = vmatpush1.bf16.msra.mxu1 %v16789_v17  ;;  %13192 = vmatprep.subr.bf16.mxu0 %v16670_v1  ;;  %v16830_v23 = vcombine.high %v16314_v2, %v16318_v33  ;;  %v16194_v40 = vld [vmem:[%s18494_s24 + $0x2310] sm:$0xff]  ;;  %v16829_v17 = vcombine.low %v16314_v2, %v16318_v33 }
 0xa28   : > { %13233 = vmatprep.subr.bf16.mxu1 %v16798_v9  ;;  %v16198_v15 = vld [vmem:[%s18494_s24 + $0x2330] sm:$0xff] }
 0xa29   : > { %v16322_v43 = vld [vmem:[%s18494_s24 + $0x2710] sm:$0xff]  ;;  %v16710_v1 = vcombine.high %v16194_v40, %v16198_v15 }
 0xa2a   : > { %13193 = vmatpush1.bf16.msra.mxu0 %v16669_v7  ;;  %v16326_v19 = vld [vmem:[%s18494_s24 + $0x2730] sm:$0xff]  ;;  %v16709_v7 = vcombine.low %v16194_v40, %v16198_v15 }
 0xa2b   : > { %13234 = vmatpush1.bf16.msra.mxu1 %v16797_v44  ;;  %13194 = vmatprep.subr.bf16.mxu0 %v16678_v45  ;;  %v16838_v9 = vcombine.high %v16322_v43, %v16326_v19  ;;  %v16330_v4 = vld [vmem:[%s18494_s24 + $0x2750] sm:$0xff]  ;;  %v16837_v44 = vcombine.low %v16322_v43, %v16326_v19  ;;  %v16718_v45 = vcombine.high %v16202_v60, %v16206_v10 }
 0xa2c   : > { %13235 = vmatprep.subr.bf16.mxu1 %v16806_v30  ;;  %v16334_v37 = vld [vmem:[%s18494_s24 + $0x2770] sm:$0xff] }
 0xa2d   : > { %v16846_v30 = vcombine.high %v16330_v4, %v16334_v37  ;;  %v16210_v47 = vld [vmem:[%s18494_s24 + $0x2390] sm:$0xff] }
 0xa2e   : > { %13195 = vmatpush1.bf16.msra.mxu0 %v16677_v58  ;;  %v16214_v32 = vld [vmem:[%s18494_s24 + $0x23b0] sm:$0xff]  ;;  %v16717_v58 = vcombine.low %v16202_v60, %v16206_v10 }
 0xa2f   : > { %13236 = vmatpush1.bf16.msra.mxu1 %v16805_v59  ;;  %13196 = vmatprep.subr.bf16.mxu0 %v16686_v28  ;;  %v16338_v49 = vld [vmem:[%s18494_s24 + $0x2790] sm:$0xff]  ;;  %v16845_v59 = vcombine.low %v16330_v4, %v16334_v37  ;;  %v16726_v28 = vcombine.high %v16210_v47, %v16214_v32 }
 0xa30   : > { %13237 = vmatprep.subr.bf16.mxu1 %v16814_v31  ;;  %v16342_v0 = vld [vmem:[%s18494_s24 + $0x27b0] sm:$0xff] }
 0xa31   : > { %v16854_v31 = vcombine.high %v16338_v49, %v16342_v0  ;;  %v16218_v51 = vld [vmem:[%s18494_s24 + $0x23d0] sm:$0xff] }
 0xa32   : > { %13197 = vmatpush1.bf16.msra.mxu0 %v16685_v13  ;;  %v16222_v50 = vld [vmem:[%s18494_s24 + $0x23f0] sm:$0xff]  ;;  %v16725_v13 = vcombine.low %v16210_v47, %v16214_v32 }
 0xa33   : > { %13238 = vmatpush1.bf16.msra.mxu1 %v16813_v12  ;;  %13198 = vmatprep.subr.bf16.mxu0 %v16694_v14  ;;  %v16346_v41 = vld [vmem:[%s18494_s24 + $0x27d0] sm:$0xff]  ;;  %v16853_v12 = vcombine.low %v16338_v49, %v16342_v0  ;;  %v16734_v14 = vcombine.high %v16218_v51, %v16222_v50 }
 0xa34   : > { %13239 = vmatprep.subr.bf16.mxu1 %v16822_v48  ;;  %v16350_v11 = vld [vmem:[%s18494_s24 + $0x27f0] sm:$0xff] }
 0xa35   : > { %v16862_v48 = vcombine.high %v16346_v41, %v16350_v11  ;;  %v16354_v29 = vld [vmem:[%s18494_s24 + $0x2810] sm:$0xff] }
 0xa36   : > { %13199 = vmatpush1.bf16.msra.mxu0 %v16693_v6  ;;  %v16358_v61 = vld [vmem:[%s18494_s24 + $0x2830] sm:$0xff]  ;;  %v16733_v6 = vcombine.low %v16218_v51, %v16222_v50 }
 0xa37   : > { %13240 = vmatpush1.bf16.msra.mxu1 %v16821_v21  ;;  %13200 = vmatprep.subr.bf16.mxu0 %v16702_v27  ;;  %v16482_v2 = vld [vmem:[%s18494_s24 + $0x2c10] sm:$0xff]  ;;  %v16861_v21 = vcombine.low %v16346_v41, %v16350_v11  ;;  %v16870_v27 = vcombine.high %v16354_v29, %v16358_v61  ;;  %v16869_v43 = vcombine.low %v16354_v29, %v16358_v61 }
 0xa38   : > { %13241 = vmatprep.subr.bf16.mxu1 %v16830_v23  ;;  %v16486_v33 = vld [vmem:[%s18494_s24 + $0x2c30] sm:$0xff] }
 0xa39   : > { %v16998_v23 = vcombine.high %v16482_v2, %v16486_v33  ;;  %v16362_v40 = vld [vmem:[%s18494_s24 + $0x2850] sm:$0xff] }
 0xa3a   : > { %13201 = vmatpush1.bf16.msra.mxu0 %v16701_v16  ;;  %v16366_v15 = vld [vmem:[%s18494_s24 + $0x2870] sm:$0xff] }
 0xa3b   : > { %13242 = vmatpush1.bf16.msra.mxu1 %v16829_v17  ;;  %13202 = vmatprep.subr.bf16.mxu0 %v16710_v1  ;;  %v16490_v19 = vld [vmem:[%s18494_s24 + $0x2c50] sm:$0xff]  ;;  %v16997_v17 = vcombine.low %v16482_v2, %v16486_v33  ;;  %v16878_v1 = vcombine.high %v16362_v40, %v16366_v15 }
 0xa3c   : > { %13243 = vmatprep.subr.bf16.mxu1 %v16838_v9  ;;  %v16494_v16 = vld [vmem:[%s18494_s24 + $0x2c70] sm:$0xff] }
 0xa3d   : > { %v16370_v9 = vld [vmem:[%s18494_s24 + $0x2890] sm:$0xff]  ;;  %v17006_v10 = vcombine.high %v16490_v19, %v16494_v16 }
 0xa3e   : > { %13203 = vmatpush1.bf16.msra.mxu0 %v16709_v7  ;;  %v16374_v60 = vld [vmem:[%s18494_s24 + $0x28b0] sm:$0xff]  ;;  %v16877_v7 = vcombine.low %v16362_v40, %v16366_v15 }
 0xa3f   : > { %13244 = vmatpush1.bf16.msra.mxu1 %v16837_v44  ;;  %13204 = vmatprep.subr.bf16.mxu0 %v16718_v45  ;;  %v16498_v4 = vld [vmem:[%s18494_s24 + $0x2c90] sm:$0xff]  ;;  %v17005_v44 = vcombine.low %v16490_v19, %v16494_v16  ;;  %v16886_v45 = vcombine.high %v16370_v9, %v16374_v60 }
 0xa40   : > { %13245 = vmatprep.subr.bf16.mxu1 %v16846_v30  ;;  %v16502_v37 = vld [vmem:[%s18494_s24 + $0x2cb0] sm:$0xff] }
 0xa41   : > { %v17014_v30 = vcombine.high %v16498_v4, %v16502_v37  ;;  %v16378_v47 = vld [vmem:[%s18494_s24 + $0x28d0] sm:$0xff] }
 0xa42   : > { %13205 = vmatpush1.bf16.msra.mxu0 %v16717_v58  ;;  %v16382_v32 = vld [vmem:[%s18494_s24 + $0x28f0] sm:$0xff]  ;;  %v16885_v58 = vcombine.low %v16370_v9, %v16374_v60 }
 0xa43   : > { %13246 = vmatpush1.bf16.msra.mxu1 %v16845_v59  ;;  %13206 = vmatprep.subr.bf16.mxu0 %v16726_v28  ;;  %v16506_v49 = vld [vmem:[%s18494_s24 + $0x2cd0] sm:$0xff]  ;;  %v17013_v59 = vcombine.low %v16498_v4, %v16502_v37  ;;  %v16894_v28 = vcombine.high %v16378_v47, %v16382_v32 }
 0xa44   : > { %13247 = vmatprep.subr.bf16.mxu1 %v16854_v31  ;;  %v16510_v0 = vld [vmem:[%s18494_s24 + $0x2cf0] sm:$0xff] }
 0xa45   : > { %v17022_v31 = vcombine.high %v16506_v49, %v16510_v0  ;;  %v16386_v51 = vld [vmem:[%s18494_s24 + $0x2910] sm:$0xff] }
 0xa46   : > { %13207 = vmatpush1.bf16.msra.mxu0 %v16725_v13  ;;  %v16390_v50 = vld [vmem:[%s18494_s24 + $0x2930] sm:$0xff]  ;;  %v16893_v13 = vcombine.low %v16378_v47, %v16382_v32 }
 0xa47   : > { %13248 = vmatpush1.bf16.msra.mxu1 %v16853_v12  ;;  %13208 = vmatprep.subr.bf16.mxu0 %v16734_v14  ;;  %v16514_v41 = vld [vmem:[%s18494_s24 + $0x2d10] sm:$0xff]  ;;  %v17021_v12 = vcombine.low %v16506_v49, %v16510_v0  ;;  %v16902_v14 = vcombine.high %v16386_v51, %v16390_v50 }
 0xa48   : > { %13249 = vmatprep.subr.bf16.mxu1 %v16862_v48  ;;  %v16518_v11 = vld [vmem:[%s18494_s24 + $0x2d30] sm:$0xff] }
 0xa49   : > { %v17030_v48 = vcombine.high %v16514_v41, %v16518_v11  ;;  %v16394_v29 = vld [vmem:[%s18494_s24 + $0x2950] sm:$0xff] }
 0xa4a   : > { %13209 = vmatpush1.bf16.msra.mxu0 %v16733_v6  ;;  %v16398_v61 = vld [vmem:[%s18494_s24 + $0x2970] sm:$0xff]  ;;  %v16901_v6 = vcombine.low %v16386_v51, %v16390_v50 }
 0xa4b   : > { %13250 = vmatpush1.bf16.msra.mxu1 %v16861_v21  ;;  %13260 = vmatprep.subr.bf16.mxu0 %v16870_v27  ;;  %v16522_v2 = vld [vmem:[%s18494_s24 + $0x2d50] sm:$0xff]  ;;  %v17029_v21 = vcombine.low %v16514_v41, %v16518_v11  ;;  %v16910_v27 = vcombine.high %v16394_v29, %v16398_v61  ;;  %v16909_v16 = vcombine.low %v16394_v29, %v16398_v61 }
 0xa4c   : > { %13301 = vmatprep.subr.bf16.mxu1 %v16998_v23  ;;  %v16526_v33 = vld [vmem:[%s18494_s24 + $0x2d70] sm:$0xff] }
 0xa4d   : > { %13211 = vmatmul.mubr.bf16.vlgmr.msra.gmra.mrb[96].mxu0 %v20295_v42  ;;  %v17038_v23 = vcombine.high %v16522_v2, %v16526_v33  ;;  %v16402_v40 = vld [vmem:[%s18494_s24 + $0x2990] sm:$0xff] }
 0xa4e   : > { %13252 = vmatmul.mubr.bf16.vlgmr.msra.gmra.mrb[96].mxu1 %v20299_v8  ;;  %13261 = vmatpush1.bf16.msra.mxu0 %v16869_v43  ;;  %v16406_v15 = vld [vmem:[%s18494_s24 + $0x29b0] sm:$0xff] }
 0xa4f   : > { %13292 = vmatprep.mubr.bf16.mxu0 %v20327_v56  ;;  %13302 = vmatpush1.bf16.msra.mxu1 %v16997_v17  ;;  %v16530_v43 = vld [vmem:[%s18494_s24 + $0x2d90] sm:$0xff]  ;;  %v17037_v17 = vcombine.low %v16522_v2, %v16526_v33 }
 0xa50   : > { %13333 = vmatprep.mubr.bf16.mxu1 %v20331_v24  ;;  %13262 = vmatprep.subr.bf16.mxu0 %v16878_v1  ;;  %v16534_v19 = vld [vmem:[%s18494_s24 + $0x2db0] sm:$0xff]  ;;  %v16918_v1 = vcombine.high %v16402_v40, %v16406_v15 }
 0xa51   : > { %13303 = vmatprep.subr.bf16.mxu1 %v17006_v10  ;;  %v17046_v10 = vcombine.high %v16530_v43, %v16534_v19  ;;  %v16410_v4 = vld [vmem:[%s18494_s24 + $0x29d0] sm:$0xff] }
 0xa52   : > { %13263 = vmatpush1.bf16.msra.mxu0 %v16877_v7  ;;  %v16414_v37 = vld [vmem:[%s18494_s24 + $0x29f0] sm:$0xff] }
 0xa53   : > { %13304 = vmatpush1.bf16.msra.mxu1 %v17005_v44  ;;  %13264 = vmatprep.subr.bf16.mxu0 %v16886_v45  ;;  %v16542_v47 = vld [vmem:[%s18494_s24 + $0x2df0] sm:$0xff]  ;;  %v16926_v51 = vcombine.high %v16410_v4, %v16414_v37 }
 0xa54   : > { %13305 = vmatprep.subr.bf16.mxu1 %v17014_v30  ;;  %v16538_v30 = vld [vmem:[%s18494_s24 + $0x2dd0] sm:$0xff] }
 0xa55   : > { %v16418_v41 = vld [vmem:[%s18494_s24 + $0x2a10] sm:$0xff] }
 0xa56   : > { %13265 = vmatpush1.bf16.msra.mxu0 %v16885_v58  ;;  %v16917_v58 = vcombine.low %v16402_v40, %v16406_v15  ;;  %v16422_v11 = vld [vmem:[%s18494_s24 + $0x2a30] sm:$0xff] }
 0xa57   : > { %13306 = vmatpush1.bf16.msra.mxu1 %v17013_v59  ;;  %13266 = vmatprep.subr.bf16.mxu0 %v16894_v28  ;;  %v16934_v29 = vcombine.high %v16418_v41, %v16422_v11  ;;  %v16426_v2 = vld [vmem:[%s18494_s24 + $0x2a50] sm:$0xff] }
 0xa58   : > { %13307 = vmatprep.subr.bf16.mxu1 %v17022_v31  ;;  %v16430_v33 = vld [vmem:[%s18494_s24 + $0x2a70] sm:$0xff] }
 0xa59   : > { %v16942_v40 = vcombine.high %v16426_v2, %v16430_v33 }
 0xa5a   : > { %13267 = vmatpush1.bf16.msra.mxu0 %v16893_v13  ;;  %v16546_v13 = vld [vmem:[%s18494_s24 + $0x2e10] sm:$0xff] }
 0xa5b   : > { %13308 = vmatpush1.bf16.msra.mxu1 %v17021_v12  ;;  %13268 = vmatprep.subr.bf16.mxu0 %v16902_v14  ;;  %v16550_v12 = vld [vmem:[%s18494_s24 + $0x2e30] sm:$0xff]  ;;  %v16925_v14 = vcombine.low %v16410_v4, %v16414_v37 }
 0xa5c   : > { %13309 = vmatprep.subr.bf16.mxu1 %v17030_v48  ;;  %v17053_v48 = vcombine.low %v16538_v30, %v16542_v47  ;;  %v17062_v61 = vcombine.high %v16546_v13, %v16550_v12  ;;  %v16442_v4 = vld [vmem:[%s18494_s24 + $0x2ad0] sm:$0xff] }
 0xa5d   : > { %v16446_v37 = vld [vmem:[%s18494_s24 + $0x2af0] sm:$0xff] }
 0xa5e   : > { %13269 = vmatpush1.bf16.msra.mxu0 %v16901_v6  ;;  %v16554_v6 = vld [vmem:[%s18494_s24 + $0x2e50] sm:$0xff] }
 0xa5f   : > { %13310 = vmatpush1.bf16.msra.mxu1 %v17029_v21  ;;  %13270 = vmatprep.subr.bf16.mxu0 %v16910_v27  ;;  %v16558_v21 = vld [vmem:[%s18494_s24 + $0x2e70] sm:$0xff]  ;;  %v16933_v27 = vcombine.low %v16418_v41, %v16422_v11 }
 0xa60   : > { %v12966_v9 = vpop.f32.mrb[84].mxu0  ;;  %v13007_v60 = vpop.f32.mrb[84].mxu1  ;;  %13311 = vmatprep.subr.bf16.mxu1 %v17038_v23  ;;  %v17061_v23 = vcombine.low %v16546_v13, %v16550_v12  ;;  %v17070_v15 = vcombine.high %v16554_v6, %v16558_v21  ;;  %v16458_v41 = vld [vmem:[%s18494_s24 + $0x2b50] sm:$0xff] }
 0xa61   : > { %v12967_v7 = vadd.f32 %v12966_v9, %v20578_v36  ;;  %v12968_v44 = vpop.f32.mrb[85].mxu0  ;;  %v13009_v45 = vpop.f32.mrb[85].mxu1  ;;  %v17045_v36 = vcombine.low %v16530_v43, %v16534_v19  ;;  %v16434_v43 = vld [vmem:[%s18494_s24 + $0x2a90] sm:$0xff]  ;;  %v17069_v9 = vcombine.low %v16554_v6, %v16558_v21 }
 0xa62   : > { %v12969_v32 = vadd.f32 %v12968_v44, %v20580_v3  ;;  %v12970_v49 = vpop.f32.mrb[86].mxu0  ;;  %v13011_v0 = vpop.f32.mrb[86].mxu1  ;;  %13271 = vmatpush1.bf16.msra.mxu0 %v16909_v16  ;;  %v17054_v3 = vcombine.high %v16538_v30, %v16542_v47  ;;  %v16438_v19 = vld [vmem:[%s18494_s24 + $0x2ab0] sm:$0xff]  ;;  %v16958_v47 = vcombine.high %v16442_v4, %v16446_v37 }
 0xa63   : > { %v20652_v59 = vadd.f32 %v13007_v60, %v12967_v7  ;;  %13312 = vmatpush1.bf16.msra.mxu1 %v17037_v17  ;;  %v12971_v28 = vpop.f32.mrb[87].mxu0  ;;  %v13012_v31 = vpop.f32.mrb[87].mxu1  ;;  %13272 = vmatprep.subr.bf16.mxu0 %v16918_v1  ;;  %v16562_v16 = vld [vmem:[%s18494_s24 + $0x2e90] sm:$0xff]  ;;  %v16941_v1 = vcombine.low %v16426_v2, %v16430_v33  ;;  %v16950_v60 = vcombine.high %v16434_v43, %v16438_v19 }
 0xa64   : > { %v20654_v50 = vadd.f32 %v13009_v45, %v12969_v32  ;;  %13313 = vmatprep.subr.bf16.mxu1 %v17046_v10  ;;  %v16566_v17 = vld [vmem:[%s18494_s24 + $0x2eb0] sm:$0xff]  ;;  %v16949_v45 = vcombine.low %v16434_v43, %v16438_v19  ;;  %v16957_v31 = vcombine.low %v16442_v4, %v16446_v37  ;;  %v16099_v4 = vld [vmem:[%s18494_s24 + $0x2018] sm:$0xff] }
 0xa65   : > { %v17078_v10 = vcombine.high %v16562_v16, %v16566_v17  ;;  %v16570_v7 = vld [vmem:[%s18494_s24 + $0x2ed0] sm:$0xff]  ;;  %v17077_v30 = vcombine.low %v16562_v16, %v16566_v17  ;;  %v16103_v37 = vld [vmem:[%s18494_s24 + $0x2038] sm:$0xff] }
 0xa66   : > { %13273 = vmatpush1.bf16.msra.mxu0 %v16917_v58  ;;  %v16574_v44 = vld [vmem:[%s18494_s24 + $0x2ef0] sm:$0xff] }
 0xa67   : > { %13314 = vmatpush1.bf16.msra.mxu1 %v17045_v36  ;;  %13274 = vmatprep.subr.bf16.mxu0 %v16926_v51  ;;  %v17086_v32 = vcombine.high %v16570_v7, %v16574_v44  ;;  %v16450_v49 = vld [vmem:[%s18494_s24 + $0x2b10] sm:$0xff]  ;;  %v17085_v36 = vcombine.low %v16570_v7, %v16574_v44  ;;  %v16227_v7 = vld [vmem:[%s18494_s24 + $0x2418] sm:$0xff] }
 0xa68   : > { %13315 = vmatprep.subr.bf16.mxu1 %v17054_v3  ;;  %v16454_v0 = vld [vmem:[%s18494_s24 + $0x2b30] sm:$0xff]  ;;  %v16231_v44 = vld [vmem:[%s18494_s24 + $0x2438] sm:$0xff] }
 0xa69   : > { %v16578_v58 = vld [vmem:[%s18494_s24 + $0x2f10] sm:$0xff]  ;;  %v16966_v51 = vcombine.high %v16450_v49, %v16454_v0 }
 0xa6a   : > { %13275 = vmatpush1.bf16.msra.mxu0 %v16925_v14  ;;  %v16582_v28 = vld [vmem:[%s18494_s24 + $0x2f30] sm:$0xff]  ;;  %v16965_v14 = vcombine.low %v16450_v49, %v16454_v0  ;;  %v16107_v49 = vld [vmem:[%s18494_s24 + $0x2058] sm:$0xff] }
 0xa6b   : > { %13316 = vmatpush1.bf16.msra.mxu1 %v17053_v48  ;;  %13276 = vmatprep.subr.bf16.mxu0 %v16934_v29  ;;  %v17094_v3 = vcombine.high %v16578_v58, %v16582_v28  ;;  %v16462_v11 = vld [vmem:[%s18494_s24 + $0x2b70] sm:$0xff]  ;;  %v17093_v48 = vcombine.low %v16578_v58, %v16582_v28  ;;  %v16111_v0 = vld [vmem:[%s18494_s24 + $0x2078] sm:$0xff]  ;;  %v16615_v58 = vcombine.low %v16099_v4, %v16103_v37 }
 0xa6c   : > { %13317 = vmatprep.subr.bf16.mxu1 %v17062_v61  ;;  %v16586_v13 = vld [vmem:[%s18494_s24 + $0x2f50] sm:$0xff]  ;;  %v16974_v29 = vcombine.high %v16458_v41, %v16462_v11  ;;  %v16235_v28 = vld [vmem:[%s18494_s24 + $0x2458] sm:$0xff] }
 0xa6d   : > { %v16590_v12 = vld [vmem:[%s18494_s24 + $0x2f70] sm:$0xff] }
 0xa6e   : > { %13277 = vmatpush1.bf16.msra.mxu0 %v16933_v27  ;;  %v17102_v61 = vcombine.high %v16586_v13, %v16590_v12  ;;  %v16466_v2 = vld [vmem:[%s18494_s24 + $0x2b90] sm:$0xff]  ;;  %v16973_v27 = vcombine.low %v16458_v41, %v16462_v11  ;;  %v16119_v41 = vld [vmem:[%s18494_s24 + $0x20b8] sm:$0xff] }
 0xa6f   : > { %13318 = vmatpush1.bf16.msra.mxu1 %v17061_v23  ;;  %13278 = vmatprep.subr.bf16.mxu0 %v16942_v40  ;;  %v16470_v33 = vld [vmem:[%s18494_s24 + $0x2bb0] sm:$0xff]  ;;  %v17101_v23 = vcombine.low %v16586_v13, %v16590_v12  ;;  %v16243_v13 = vld [vmem:[%s18494_s24 + $0x2498] sm:$0xff] }
 0xa70   : > { %13319 = vmatprep.subr.bf16.mxu1 %v17070_v15  ;;  %v16594_v6 = vld [vmem:[%s18494_s24 + $0x2f90] sm:$0xff]  ;;  %v16982_v40 = vcombine.high %v16466_v2, %v16470_v33  ;;  %v16247_v12 = vld [vmem:[%s18494_s24 + $0x24b8] sm:$0xff] }
 0xa71   : > { %v16598_v21 = vld [vmem:[%s18494_s24 + $0x2fb0] sm:$0xff] }
 0xa72   : > { %13279 = vmatpush1.bf16.msra.mxu0 %v16941_v1  ;;  %v17110_v15 = vcombine.high %v16594_v6, %v16598_v21  ;;  %v16474_v43 = vld [vmem:[%s18494_s24 + $0x2bd0] sm:$0xff]  ;;  %v16981_v1 = vcombine.low %v16466_v2, %v16470_v33  ;;  %v16123_v2 = vld [vmem:[%s18494_s24 + $0x20d8] sm:$0xff] }
 0xa73   : > { %13320 = vmatpush1.bf16.msra.mxu1 %v17069_v9  ;;  %13280 = vmatprep.subr.bf16.mxu0 %v16950_v60  ;;  %v16478_v19 = vld [vmem:[%s18494_s24 + $0x2bf0] sm:$0xff]  ;;  %v17109_v9 = vcombine.low %v16594_v6, %v16598_v21  ;;  %v16127_v33 = vld [vmem:[%s18494_s24 + $0x20f8] sm:$0xff] }
 0xa74   : > { %13321 = vmatprep.subr.bf16.mxu1 %v17078_v10  ;;  %v16602_v16 = vld [vmem:[%s18494_s24 + $0x2fd0] sm:$0xff]  ;;  %v16990_v60 = vcombine.high %v16474_v43, %v16478_v19  ;;  %v16251_v6 = vld [vmem:[%s18494_s24 + $0x24d8] sm:$0xff] }
 0xa75   : > { %v16606_v17 = vld [vmem:[%s18494_s24 + $0x2ff0] sm:$0xff]  ;;  %v16255_v21 = vld [vmem:[%s18494_s24 + $0x24f8] sm:$0xff] }
 0xa76   : > { %13281 = vmatpush1.bf16.msra.mxu0 %v16949_v45  ;;  %v17118_v10 = vcombine.high %v16602_v16, %v16606_v17  ;;  %v16989_v45 = vcombine.low %v16474_v43, %v16478_v19  ;;  %v16259_v43 = vld [vmem:[%s18494_s24 + $0x2518] sm:$0xff] }
 0xa77   : > { %13322 = vmatpush1.bf16.msra.mxu1 %v17077_v30  ;;  %13282 = vmatprep.subr.bf16.mxu0 %v16958_v47  ;;  %v17117_v30 = vcombine.low %v16602_v16, %v16606_v17  ;;  %v16616_v47 = vcombine.high %v16099_v4, %v16103_v37  ;;  %v16263_v19 = vld [vmem:[%s18494_s24 + $0x2538] sm:$0xff]  ;;  %v16639_v16 = vcombine.low %v16123_v2, %v16127_v33 }
 0xa78   : > { %13323 = vmatprep.subr.bf16.mxu1 %v17086_v32  ;;  %v16744_v32 = vcombine.high %v16227_v7, %v16231_v44  ;;  %v16767_v17 = vcombine.low %v16251_v6, %v16255_v21  ;;  %v10229_v4 = vrot.slane %v20558_v39, %v19023_v53  ;;  %v16267_v37 = vld [vmem:[%s18494_s24 + $0x2558] sm:$0xff] }
 0xa7a   : > { %13283 = vmatpush1.bf16.msra.mxu0 %v16957_v31  ;;  %v16239_v31 = vld [vmem:[%s18494_s24 + $0x2478] sm:$0xff] }
 0xa7b   : > { %13324 = vmatpush1.bf16.msra.mxu1 %v17085_v36  ;;  %13284 = vmatprep.subr.bf16.mxu0 %v16966_v51  ;;  %v16743_v36 = vcombine.low %v16227_v7, %v16231_v44  ;;  %v16624_v51 = vcombine.high %v16107_v49, %v16111_v0  ;;  %v16752_v11 = vcombine.high %v16235_v28, %v16239_v31  ;;  %v16271_v7 = vld [vmem:[%s18494_s24 + $0x2578] sm:$0xff] }
 0xa7c   : > { %13325 = vmatprep.subr.bf16.mxu1 %v17094_v3  ;;  %v16115_v3 = vld [vmem:[%s18494_s24 + $0x2098] sm:$0xff] }
 0xa7e   : > { %13285 = vmatpush1.bf16.msra.mxu0 %v16965_v14  ;;  %v16623_v14 = vcombine.low %v16107_v49, %v16111_v0  ;;  %v16147_v49 = vld [vmem:[%s18494_s24 + $0x2198] sm:$0xff] }
 0xa7f   : > { %13326 = vmatpush1.bf16.msra.mxu1 %v17093_v48  ;;  %13286 = vmatprep.subr.bf16.mxu0 %v16974_v29  ;;  %v16751_v48 = vcombine.low %v16235_v28, %v16239_v31  ;;  %v16632_v29 = vcombine.high %v16115_v3, %v16119_v41  ;;  %v16151_v0 = vld [vmem:[%s18494_s24 + $0x21b8] sm:$0xff] }
 0xa80   : > { %13327 = vmatprep.subr.bf16.mxu1 %v17102_v61  ;;  %v16760_v61 = vcombine.high %v16243_v13, %v16247_v12  ;;  %v16275_v28 = vld [vmem:[%s18494_s24 + $0x2598] sm:$0xff] }
 0xa81   : > { %v16279_v31 = vld [vmem:[%s18494_s24 + $0x25b8] sm:$0xff] }
 0xa82   : > { %13287 = vmatpush1.bf16.msra.mxu0 %v16973_v27  ;;  %v16631_v27 = vcombine.low %v16115_v3, %v16119_v41  ;;  %v16664_v3 = vcombine.high %v16147_v49, %v16151_v0 }
 0xa83   : > { %13328 = vmatpush1.bf16.msra.mxu1 %v17101_v23  ;;  %13288 = vmatprep.subr.bf16.mxu0 %v16982_v40  ;;  %v16640_v23 = vcombine.high %v16123_v2, %v16127_v33  ;;  %v16131_v40 = vld [vmem:[%s18494_s24 + $0x2118] sm:$0xff] }
 0xa84   : > { %13329 = vmatprep.subr.bf16.mxu1 %v17110_v15  ;;  %v16135_v15 = vld [vmem:[%s18494_s24 + $0x2138] sm:$0xff] }
 0xa85   : > { %v16647_v44 = vcombine.low %v16131_v40, %v16135_v15  ;;  %v16287_v2 = vld [vmem:[%s18494_s24 + $0x25f8] sm:$0xff] }
 0xa86   : > { %13289 = vmatpush1.bf16.msra.mxu0 %v16981_v1  ;;  %v16648_v1 = vcombine.high %v16131_v40, %v16135_v15  ;;  %v16791_v40 = vcombine.low %v16275_v28, %v16279_v31 }
 0xa87   : > { %13330 = vmatpush1.bf16.msra.mxu1 %v17109_v9  ;;  %13290 = vmatprep.subr.bf16.mxu0 %v16990_v60  ;;  %v16776_v9 = vcombine.high %v16259_v43, %v16263_v19  ;;  %v16139_v60 = vld [vmem:[%s18494_s24 + $0x2158] sm:$0xff] }
 0xa88   : > { %13331 = vmatprep.subr.bf16.mxu1 %v17118_v10  ;;  %v16143_v10 = vld [vmem:[%s18494_s24 + $0x2178] sm:$0xff] }
 0xa8a   : > { %13291 = vmatpush1.bf16.msra.mxu0 %v16989_v45  ;;  %v10233_v45 = vrot.slane %v20558_v39, %v19026_v54  ;;  %v16655_v39 = vcombine.low %v16139_v60, %v16143_v10 }
 0xa8b   : > { %13332 = vmatpush1.bf16.msra.mxu1 %v17117_v30  ;;  %13342 = vmatprep.subr.bf16.mxu0 %v16616_v47  ;;  %v16775_v30 = vcombine.low %v16259_v43, %v16263_v19  ;;  %v16656_v47 = vcombine.high %v16139_v60, %v16143_v10  ;;  %v16295_v60 = vld [vmem:[%s18494_s24 + $0x2638] sm:$0xff] }
 0xa8c   : > { %13383 = vmatprep.subr.bf16.mxu1 %v16744_v32  ;;  %v16784_v32 = vcombine.high %v16267_v37, %v16271_v7 }
 0xa8d   : > { %13293 = vmatmul.mubr.bf16.vlgmr.msra.gmra.mrb[100].mxu0 %v20399_v5 }
 0xa8e   : > { %13334 = vmatmul.mubr.bf16.vlgmr.msra.gmra.mrb[100].mxu1 %v20403_v18  ;;  %13343 = vmatpush1.bf16.msra.mxu0 %v16615_v58  ;;  %v10269_v58 = vrot.slane %v10229_v4, %v18865_v20 }
 0xa8f   : > { %13374 = vmatprep.mubr.bf16.mxu0 %v20287_v38  ;;  %13384 = vmatpush1.bf16.msra.mxu1 %v16743_v36  ;;  %v16759_v38 = vcombine.low %v16243_v13, %v16247_v12  ;;  %v10273_v36 = vrot.slane %v10233_v45, %v18865_v20  ;;  %v16155_v13 = vld [vmem:[%s18494_s24 + $0x21d8] sm:$0xff] }
 0xa90   : > { %13415 = vmatprep.mubr.bf16.mxu1 %v20291_v25  ;;  %13344 = vmatprep.subr.bf16.mxu0 %v16624_v51  ;;  %v16768_v25 = vcombine.high %v16251_v6, %v16255_v21  ;;  %v16783_v51 = vcombine.low %v16267_v37, %v16271_v7  ;;  %v16159_v12 = vld [vmem:[%s18494_s24 + $0x21f8] sm:$0xff] }
 0xa91   : > { %13385 = vmatprep.subr.bf16.mxu1 %v16752_v11  ;;  %v16792_v11 = vcombine.high %v16275_v28, %v16279_v31  ;;  %v16672_v15 = vcombine.high %v16155_v13, %v16159_v12  ;;  %v16671_v10 = vcombine.low %v16155_v13, %v16159_v12  ;;  %v16175_v45 = vld [vmem:[%s18494_s24 + $0x2278] sm:$0xff] }
 0xa92   : > { %13345 = vmatpush1.bf16.msra.mxu0 %v16623_v14  ;;  %v16179_v28 = vld [vmem:[%s18494_s24 + $0x2298] sm:$0xff] }
 0xa93   : > { %13386 = vmatpush1.bf16.msra.mxu1 %v16751_v48  ;;  %13346 = vmatprep.subr.bf16.mxu0 %v16632_v29  ;;  %v16183_v31 = vld [vmem:[%s18494_s24 + $0x22b8] sm:$0xff] }
 0xa94   : > { %13387 = vmatprep.subr.bf16.mxu1 %v16760_v61  ;;  %v16283_v61 = vld [vmem:[%s18494_s24 + $0x25d8] sm:$0xff] }
 0xa95   : > { %v16799_v4 = vcombine.low %v16283_v61, %v16287_v2  ;;  %v16187_v13 = vld [vmem:[%s18494_s24 + $0x22d8] sm:$0xff] }
 0xa96   : > { %13347 = vmatpush1.bf16.msra.mxu0 %v16631_v27  ;;  %v16663_v27 = vcombine.low %v16147_v49, %v16151_v0  ;;  %v16191_v12 = vld [vmem:[%s18494_s24 + $0x22f8] sm:$0xff] }
 0xa97   : > { %13388 = vmatpush1.bf16.msra.mxu1 %v16759_v38  ;;  %13348 = vmatprep.subr.bf16.mxu0 %v16640_v23 }
 0xa98   : > { %13389 = vmatprep.subr.bf16.mxu1 %v16768_v25 }
 0xa9a   : > { %13349 = vmatpush1.bf16.msra.mxu0 %v16639_v16  ;;  %v16800_v16 = vcombine.high %v16283_v61, %v16287_v2  ;;  %v16704_v2 = vcombine.high %v16187_v13, %v16191_v12 }
 0xa9b   : > { %13390 = vmatpush1.bf16.msra.mxu1 %v16767_v17  ;;  %13350 = vmatprep.subr.bf16.mxu0 %v16648_v1  ;;  %v16163_v17 = vld [vmem:[%s18494_s24 + $0x2218] sm:$0xff] }
 0xa9c   : > { %13391 = vmatprep.subr.bf16.mxu1 %v16776_v9  ;;  %v16167_v1 = vld [vmem:[%s18494_s24 + $0x2238] sm:$0xff] }
 0xa9d   : > { %v16291_v9 = vld [vmem:[%s18494_s24 + $0x2618] sm:$0xff]  ;;  %v16680_v37 = vcombine.high %v16163_v17, %v16167_v1 }
 0xa9e   : > { %13351 = vmatpush1.bf16.msra.mxu0 %v16647_v44  ;;  %v16808_v7 = vcombine.high %v16291_v9, %v16295_v60  ;;  %v16171_v44 = vld [vmem:[%s18494_s24 + $0x2258] sm:$0xff]  ;;  %v16807_v49 = vcombine.low %v16291_v9, %v16295_v60 }
 0xa9f   : > { %13392 = vmatpush1.bf16.msra.mxu1 %v16775_v30  ;;  %13352 = vmatprep.subr.bf16.mxu0 %v16656_v47  ;;  %v16299_v30 = vld [vmem:[%s18494_s24 + $0x2658] sm:$0xff]  ;;  %v16688_v0 = vcombine.high %v16171_v44, %v16175_v45 }
 0xaa0   : > { %v13048_v41 = vpop.f32.mrb[88].mxu0  ;;  %13393 = vmatprep.subr.bf16.mxu1 %v16784_v32  ;;  %v16303_v47 = vld [vmem:[%s18494_s24 + $0x2678] sm:$0xff]  ;;  %v16679_v32 = vcombine.low %v16163_v17, %v16167_v1 }
 0xaa1   : > { %v13049_v14 = vadd.f32 %v13048_v41, %v10269_v58  ;;  %v13089_v48 = vpop.f32.mrb[88].mxu1  ;;  %v13050_v29 = vpop.f32.mrb[89].mxu0  ;;  %v16816_v58 = vcombine.high %v16299_v30, %v16303_v47  ;;  %v16696_v41 = vcombine.high %v16179_v28, %v16183_v31  ;;  %v16207_v17 = vld [vmem:[%s18494_s24 + $0x2378] sm:$0xff] }
 0xaa2   : > { %v13051_v33 = vadd.f32 %v13050_v29, %v10273_v36  ;;  %v13091_v6 = vpop.f32.mrb[89].mxu1  ;;  %v13052_v21 = vpop.f32.mrb[90].mxu0  ;;  %13353 = vmatpush1.bf16.msra.mxu0 %v16655_v39  ;;  %v16307_v36 = vld [vmem:[%s18494_s24 + $0x2698] sm:$0xff]  ;;  %v16695_v29 = vcombine.low %v16179_v28, %v16183_v31 }
 0xaa3   : > { %v20730_v38 = vadd.f32 %v13089_v48, %v13049_v14  ;;  %v13093_v23 = vpop.f32.mrb[90].mxu1  ;;  %13394 = vmatpush1.bf16.msra.mxu1 %v16783_v51  ;;  %v13053_v25 = vpop.f32.mrb[91].mxu0  ;;  %13354 = vmatprep.subr.bf16.mxu0 %v16664_v3  ;;  %v16311_v39 = vld [vmem:[%s18494_s24 + $0x26b8] sm:$0xff]  ;;  %v16687_v51 = vcombine.low %v16171_v44, %v16175_v45  ;;  %v16815_v3 = vcombine.low %v16299_v30, %v16303_v47 }
 0xaa4   : > { %v20732_v43 = vadd.f32 %v13091_v6, %v13051_v33  ;;  %v13094_v19 = vpop.f32.mrb[91].mxu1  ;;  %13395 = vmatprep.subr.bf16.mxu1 %v16792_v11  ;;  %v16824_v11 = vcombine.high %v16307_v36, %v16311_v39  ;;  %v16315_v14 = vld [vmem:[%s18494_s24 + $0x26d8] sm:$0xff]  ;;  %v16823_v61 = vcombine.low %v16307_v36, %v16311_v39  ;;  %v16703_v25 = vcombine.low %v16187_v13, %v16191_v12 }
 0xaa5   : > { %v16319_v48 = vld [vmem:[%s18494_s24 + $0x26f8] sm:$0xff] }
 0xaa6   : > { %13355 = vmatpush1.bf16.msra.mxu0 %v16663_v27  ;;  %v16832_v33 = vcombine.high %v16315_v14, %v16319_v48  ;;  %v16195_v6 = vld [vmem:[%s18494_s24 + $0x2318] sm:$0xff] }
 0xaa7   : > { %13396 = vmatpush1.bf16.msra.mxu1 %v16791_v40  ;;  %13356 = vmatprep.subr.bf16.mxu0 %v16672_v15  ;;  %v16199_v21 = vld [vmem:[%s18494_s24 + $0x2338] sm:$0xff]  ;;  %v16831_v40 = vcombine.low %v16315_v14, %v16319_v48 }
 0xaa8   : > { %13397 = vmatprep.subr.bf16.mxu1 %v16800_v16  ;;  %v16323_v27 = vld [vmem:[%s18494_s24 + $0x2718] sm:$0xff]  ;;  %v16712_v15 = vcombine.high %v16195_v6, %v16199_v21  ;;  %v16711_v60 = vcombine.low %v16195_v6, %v16199_v21 }
 0xaa9   : > { %v16327_v23 = vld [vmem:[%s18494_s24 + $0x2738] sm:$0xff] }
 0xaaa   : > { %13357 = vmatpush1.bf16.msra.mxu0 %v16671_v10  ;;  %v16840_v19 = vcombine.high %v16323_v27, %v16327_v23  ;;  %v16203_v16 = vld [vmem:[%s18494_s24 + $0x2358] sm:$0xff]  ;;  %v16839_v10 = vcombine.low %v16323_v27, %v16327_v23 }
 0xaab   : > { %13398 = vmatpush1.bf16.msra.mxu1 %v16799_v4  ;;  %13358 = vmatprep.subr.bf16.mxu0 %v16680_v37  ;;  %v16331_v1 = vld [vmem:[%s18494_s24 + $0x2758] sm:$0xff]  ;;  %v16720_v4 = vcombine.high %v16203_v16, %v16207_v17  ;;  %v16719_v47 = vcombine.low %v16203_v16, %v16207_v17 }
 0xaac   : > { %13399 = vmatprep.subr.bf16.mxu1 %v16808_v7  ;;  %v16335_v9 = vld [vmem:[%s18494_s24 + $0x2778] sm:$0xff] }
 0xaad   : > { %v16848_v37 = vcombine.high %v16331_v1, %v16335_v9  ;;  %v16211_v7 = vld [vmem:[%s18494_s24 + $0x2398] sm:$0xff] }
 0xaae   : > { %13359 = vmatpush1.bf16.msra.mxu0 %v16679_v32  ;;  %v16215_v44 = vld [vmem:[%s18494_s24 + $0x23b8] sm:$0xff]  ;;  %v16847_v32 = vcombine.low %v16331_v1, %v16335_v9 }
 0xaaf   : > { %13400 = vmatpush1.bf16.msra.mxu1 %v16807_v49  ;;  %13360 = vmatprep.subr.bf16.mxu0 %v16688_v0  ;;  %v16339_v45 = vld [vmem:[%s18494_s24 + $0x2798] sm:$0xff]  ;;  %v16728_v49 = vcombine.high %v16211_v7, %v16215_v44  ;;  %v16727_v39 = vcombine.low %v16211_v7, %v16215_v44 }
 0xab0   : > { %13401 = vmatprep.subr.bf16.mxu1 %v16816_v58  ;;  %v16343_v30 = vld [vmem:[%s18494_s24 + $0x27b8] sm:$0xff] }
 0xab1   : > { %v16856_v0 = vcombine.high %v16339_v45, %v16343_v30  ;;  %v16219_v58 = vld [vmem:[%s18494_s24 + $0x23d8] sm:$0xff] }
 0xab2   : > { %13361 = vmatpush1.bf16.msra.mxu0 %v16687_v51  ;;  %v16223_v28 = vld [vmem:[%s18494_s24 + $0x23f8] sm:$0xff]  ;;  %v16855_v51 = vcombine.low %v16339_v45, %v16343_v30 }
 0xab3   : > { %13402 = vmatpush1.bf16.msra.mxu1 %v16815_v3  ;;  %13362 = vmatprep.subr.bf16.mxu0 %v16696_v41  ;;  %v16347_v31 = vld [vmem:[%s18494_s24 + $0x27d8] sm:$0xff]  ;;  %v16736_v3 = vcombine.high %v16219_v58, %v16223_v28  ;;  %v16735_v48 = vcombine.low %v16219_v58, %v16223_v28 }
 0xab4   : > { %13403 = vmatprep.subr.bf16.mxu1 %v16824_v11  ;;  %v16351_v36 = vld [vmem:[%s18494_s24 + $0x27f8] sm:$0xff] }
 0xab5   : > { %v16864_v41 = vcombine.high %v16347_v31, %v16351_v36  ;;  %v16355_v11 = vld [vmem:[%s18494_s24 + $0x2818] sm:$0xff] }
 0xab6   : > { %13363 = vmatpush1.bf16.msra.mxu0 %v16695_v29  ;;  %v16359_v13 = vld [vmem:[%s18494_s24 + $0x2838] sm:$0xff]  ;;  %v16863_v29 = vcombine.low %v16347_v31, %v16351_v36 }
 0xab7   : > { %13404 = vmatpush1.bf16.msra.mxu1 %v16823_v61  ;;  %13364 = vmatprep.subr.bf16.mxu0 %v16704_v2  ;;  %v16483_v12 = vld [vmem:[%s18494_s24 + $0x2c18] sm:$0xff]  ;;  %v16872_v61 = vcombine.high %v16355_v11, %v16359_v13  ;;  %v16871_v21 = vcombine.low %v16355_v11, %v16359_v13 }
 0xab8   : > { %13405 = vmatprep.subr.bf16.mxu1 %v16832_v33  ;;  %v16487_v14 = vld [vmem:[%s18494_s24 + $0x2c38] sm:$0xff] }
 0xab9   : > { %v17000_v2 = vcombine.high %v16483_v12, %v16487_v14  ;;  %v16363_v33 = vld [vmem:[%s18494_s24 + $0x2858] sm:$0xff] }
 0xaba   : > { %13365 = vmatpush1.bf16.msra.mxu0 %v16703_v25  ;;  %v16367_v6 = vld [vmem:[%s18494_s24 + $0x2878] sm:$0xff]  ;;  %v16999_v25 = vcombine.low %v16483_v12, %v16487_v14 }
 0xabb   : > { %13406 = vmatpush1.bf16.msra.mxu1 %v16831_v40  ;;  %13366 = vmatprep.subr.bf16.mxu0 %v16712_v15  ;;  %v16491_v27 = vld [vmem:[%s18494_s24 + $0x2c58] sm:$0xff]  ;;  %v16880_v40 = vcombine.high %v16363_v33, %v16367_v6  ;;  %v16879_v9 = vcombine.low %v16363_v33, %v16367_v6 }
 0xabc   : > { %13407 = vmatprep.subr.bf16.mxu1 %v16840_v19  ;;  %v16495_v23 = vld [vmem:[%s18494_s24 + $0x2c78] sm:$0xff] }
 0xabd   : > { %v16371_v15 = vld [vmem:[%s18494_s24 + $0x2898] sm:$0xff]  ;;  %v17008_v16 = vcombine.high %v16491_v27, %v16495_v23 }
 0xabe   : > { %13367 = vmatpush1.bf16.msra.mxu0 %v16711_v60  ;;  %v16375_v19 = vld [vmem:[%s18494_s24 + $0x28b8] sm:$0xff]  ;;  %v17007_v60 = vcombine.low %v16491_v27, %v16495_v23 }
 0xabf   : > { %13408 = vmatpush1.bf16.msra.mxu1 %v16839_v10  ;;  %13368 = vmatprep.subr.bf16.mxu0 %v16720_v4  ;;  %v16499_v17 = vld [vmem:[%s18494_s24 + $0x2c98] sm:$0xff]  ;;  %v16888_v10 = vcombine.high %v16371_v15, %v16375_v19  ;;  %v16887_v44 = vcombine.low %v16371_v15, %v16375_v19 }
 0xac0   : > { %13409 = vmatprep.subr.bf16.mxu1 %v16848_v37  ;;  %v16503_v1 = vld [vmem:[%s18494_s24 + $0x2cb8] sm:$0xff] }
 0xac1   : > { %v16379_v4 = vld [vmem:[%s18494_s24 + $0x28d8] sm:$0xff] }
 0xac2   : > { %13369 = vmatpush1.bf16.msra.mxu0 %v16719_v47  ;;  %v16383_v37 = vld [vmem:[%s18494_s24 + $0x28f8] sm:$0xff] }
 0xac3   : > { %13410 = vmatpush1.bf16.msra.mxu1 %v16847_v32  ;;  %13370 = vmatprep.subr.bf16.mxu0 %v16728_v49  ;;  %v16507_v7 = vld [vmem:[%s18494_s24 + $0x2cd8] sm:$0xff]  ;;  %v16896_v45 = vcombine.high %v16379_v4, %v16383_v37 }
 0xac4   : > { %13411 = vmatprep.subr.bf16.mxu1 %v16856_v0  ;;  %v16387_v30 = vld [vmem:[%s18494_s24 + $0x2918] sm:$0xff]  ;;  %v16895_v0 = vcombine.low %v16379_v4, %v16383_v37 }
 0xac5   : > { %v16391_v47 = vld [vmem:[%s18494_s24 + $0x2938] sm:$0xff] }
 0xac6   : > { %13371 = vmatpush1.bf16.msra.mxu0 %v16727_v39  ;;  %v16515_v32 = vld [vmem:[%s18494_s24 + $0x2d18] sm:$0xff]  ;;  %v16904_v28 = vcombine.high %v16387_v30, %v16391_v47 }
 0xac7   : > { %13412 = vmatpush1.bf16.msra.mxu1 %v16855_v51  ;;  %13372 = vmatprep.subr.bf16.mxu0 %v16736_v3  ;;  %v16519_v49 = vld [vmem:[%s18494_s24 + $0x2d38] sm:$0xff] }
 0xac8   : > { %13413 = vmatprep.subr.bf16.mxu1 %v16864_v41  ;;  %v17032_v31 = vcombine.high %v16515_v32, %v16519_v49  ;;  %v16395_v36 = vld [vmem:[%s18494_s24 + $0x2958] sm:$0xff]  ;;  %v16903_v41 = vcombine.low %v16387_v30, %v16391_v47  ;;  %v17031_v11 = vcombine.low %v16515_v32, %v16519_v49 }
 0xac9   : > { %v16399_v39 = vld [vmem:[%s18494_s24 + $0x2978] sm:$0xff] }
 0xaca   : > { %13373 = vmatpush1.bf16.msra.mxu0 %v16735_v48  ;;  %v16523_v51 = vld [vmem:[%s18494_s24 + $0x2d58] sm:$0xff]  ;;  %v16912_v13 = vcombine.high %v16395_v36, %v16399_v39 }
 0xacb   : > { %13414 = vmatpush1.bf16.msra.mxu1 %v16863_v29  ;;  %13424 = vmatprep.subr.bf16.mxu0 %v16872_v61  ;;  %v16527_v3 = vld [vmem:[%s18494_s24 + $0x2d78] sm:$0xff] }
 0xacc   : > { %13465 = vmatprep.subr.bf16.mxu1 %v17000_v2  ;;  %v17040_v12 = vcombine.high %v16523_v51, %v16527_v3  ;;  %v16403_v14 = vld [vmem:[%s18494_s24 + $0x2998] sm:$0xff]  ;;  %v16911_v2 = vcombine.low %v16395_v36, %v16399_v39  ;;  %v17039_v33 = vcombine.low %v16523_v51, %v16527_v3 }
 0xacd   : > { %13375 = vmatmul.mubr.bf16.vlgmr.msra.gmra.mrb[104].mxu0 %v20295_v42  ;;  %v17016_v42 = vcombine.high %v16499_v17, %v16503_v1  ;;  %v16407_v48 = vld [vmem:[%s18494_s24 + $0x29b8] sm:$0xff] }
 0xace   : > { %13416 = vmatmul.mubr.bf16.vlgmr.msra.gmra.mrb[104].mxu1 %v20299_v8  ;;  %13425 = vmatpush1.bf16.msra.mxu0 %v16871_v21  ;;  %v16511_v8 = vld [vmem:[%s18494_s24 + $0x2cf8] sm:$0xff]  ;;  %v16920_v6 = vcombine.high %v16403_v14, %v16407_v48 }
 0xacf   : > { %13456 = vmatprep.mubr.bf16.mxu0 %v20327_v56  ;;  %13466 = vmatpush1.bf16.msra.mxu1 %v16999_v25  ;;  %v17015_v56 = vcombine.low %v16499_v17, %v16503_v1  ;;  %v17023_v58 = vcombine.low %v16507_v7, %v16511_v8  ;;  %v16531_v29 = vld [vmem:[%s18494_s24 + $0x2d98] sm:$0xff] }
 0xad0   : > { %13497 = vmatprep.mubr.bf16.mxu1 %v20331_v24  ;;  %13426 = vmatprep.subr.bf16.mxu0 %v16880_v40  ;;  %v17024_v24 = vcombine.high %v16507_v7, %v16511_v8  ;;  %v16535_v61 = vld [vmem:[%s18494_s24 + $0x2db8] sm:$0xff] }
 0xad1   : > { %13467 = vmatprep.subr.bf16.mxu1 %v17008_v16  ;;  %v17048_v27 = vcombine.high %v16531_v29, %v16535_v61  ;;  %v16411_v23 = vld [vmem:[%s18494_s24 + $0x29d8] sm:$0xff] }
 0xad2   : > { %13427 = vmatpush1.bf16.msra.mxu0 %v16879_v9  ;;  %v16415_v25 = vld [vmem:[%s18494_s24 + $0x29f8] sm:$0xff] }
 0xad3   : > { %13468 = vmatpush1.bf16.msra.mxu1 %v17007_v60  ;;  %13428 = vmatprep.subr.bf16.mxu0 %v16888_v10  ;;  %v16539_v16 = vld [vmem:[%s18494_s24 + $0x2dd8] sm:$0xff]  ;;  %v16919_v10 = vcombine.low %v16403_v14, %v16407_v48  ;;  %v16928_v7 = vcombine.high %v16411_v23, %v16415_v25  ;;  %v16927_v47 = vcombine.low %v16411_v23, %v16415_v25 }
 0xad4   : > { %13469 = vmatprep.subr.bf16.mxu1 %v17016_v42  ;;  %v16543_v17 = vld [vmem:[%s18494_s24 + $0x2df8] sm:$0xff] }
 0xad5   : > { %v16551_v30 = vld [vmem:[%s18494_s24 + $0x2e38] sm:$0xff]  ;;  %v17055_v32 = vcombine.low %v16539_v16, %v16543_v17 }
 0xad6   : > { %13429 = vmatpush1.bf16.msra.mxu0 %v16887_v44  ;;  %v17056_v44 = vcombine.high %v16539_v16, %v16543_v17  ;;  %v16559_v36 = vld [vmem:[%s18494_s24 + $0x2e78] sm:$0xff] }
 0xad7   : > { %13470 = vmatpush1.bf16.msra.mxu1 %v17015_v56  ;;  %13430 = vmatprep.subr.bf16.mxu0 %v16896_v45  ;;  %v16419_v56 = vld [vmem:[%s18494_s24 + $0x2a18] sm:$0xff] }
 0xad8   : > { %13471 = vmatprep.subr.bf16.mxu1 %v17024_v24  ;;  %v16423_v45 = vld [vmem:[%s18494_s24 + $0x2a38] sm:$0xff] }
 0xad9   : > { %v16547_v24 = vld [vmem:[%s18494_s24 + $0x2e18] sm:$0xff]  ;;  %v16936_v49 = vcombine.high %v16419_v56, %v16423_v45  ;;  %v16935_v39 = vcombine.low %v16419_v56, %v16423_v45 }
 0xada   : > { %13431 = vmatpush1.bf16.msra.mxu0 %v16895_v0  ;;  %v17064_v0 = vcombine.high %v16547_v24, %v16551_v30  ;;  %v17063_v51 = vcombine.low %v16547_v24, %v16551_v30  ;;  %v16567_v14 = vld [vmem:[%s18494_s24 + $0x2eb8] sm:$0xff] }
 0xadb   : > { %13472 = vmatpush1.bf16.msra.mxu1 %v17023_v58  ;;  %13432 = vmatprep.subr.bf16.mxu0 %v16904_v28  ;;  %v16427_v58 = vld [vmem:[%s18494_s24 + $0x2a58] sm:$0xff] }
 0xadc   : > { %13473 = vmatprep.subr.bf16.mxu1 %v17032_v31  ;;  %v16431_v28 = vld [vmem:[%s18494_s24 + $0x2a78] sm:$0xff] }
 0xadd   : > { %v16555_v31 = vld [vmem:[%s18494_s24 + $0x2e58] sm:$0xff]  ;;  %v16944_v3 = vcombine.high %v16427_v58, %v16431_v28  ;;  %v16943_v48 = vcombine.low %v16427_v58, %v16431_v28 }
 0xade   : > { %13433 = vmatpush1.bf16.msra.mxu0 %v16903_v41  ;;  %v17072_v41 = vcombine.high %v16555_v31, %v16559_v36  ;;  %v16455_v16 = vld [vmem:[%s18494_s24 + $0x2b38] sm:$0xff] }
 0xadf   : > { %13474 = vmatpush1.bf16.msra.mxu1 %v17031_v11  ;;  %13434 = vmatprep.subr.bf16.mxu0 %v16912_v13  ;;  %v16435_v11 = vld [vmem:[%s18494_s24 + $0x2a98] sm:$0xff] }
 0xae0   : > { %v13130_v21 = vpop.f32.mrb[92].mxu0  ;;  %13475 = vmatprep.subr.bf16.mxu1 %v17040_v12  ;;  %v16439_v13 = vld [vmem:[%s18494_s24 + $0x2ab8] sm:$0xff] }
 0xae1   : > { %v13131_v40 = vadd.f32 %v13130_v21, %v20730_v38  ;;  %v13171_v15 = vpop.f32.mrb[92].mxu1  ;;  %v13132_v19 = vpop.f32.mrb[93].mxu0  ;;  %v17047_v38 = vcombine.low %v16531_v29, %v16535_v61  ;;  %v16563_v12 = vld [vmem:[%s18494_s24 + $0x2e98] sm:$0xff]  ;;  %v17071_v29 = vcombine.low %v16555_v31, %v16559_v36  ;;  %v16952_v61 = vcombine.high %v16435_v11, %v16439_v13 }
 0xae2   : > { %v13133_v1 = vadd.f32 %v13132_v19, %v20732_v43  ;;  %v13173_v9 = vpop.f32.mrb[93].mxu1  ;;  %v13134_v60 = vpop.f32.mrb[94].mxu0  ;;  %13435 = vmatpush1.bf16.msra.mxu0 %v16911_v2  ;;  %v17080_v2 = vcombine.high %v16563_v12, %v16567_v14  ;;  %v16571_v21 = vld [vmem:[%s18494_s24 + $0x2ed8] sm:$0xff]  ;;  %v16951_v23 = vcombine.low %v16435_v11, %v16439_v13  ;;  %v17079_v25 = vcombine.low %v16563_v12, %v16567_v14  ;;  %v17137_v14 = vld [vmem:[%s18509_s12 + $0x880] sm:$0xff] }
 0xae3   : > { %v20804_v42 = vadd.f32 %v13171_v15, %v13131_v40  ;;  %v13175_v4 = vpop.f32.mrb[94].mxu1  ;;  %13476 = vmatpush1.bf16.msra.mxu1 %v17039_v33  ;;  %v13135_v37 = vpop.f32.mrb[95].mxu0  ;;  %13436 = vmatprep.subr.bf16.mxu0 %v16920_v6  ;;  %v16443_v33 = vld [vmem:[%s18494_s24 + $0x2ad8] sm:$0xff] }
 0xae4   : > { %v20806_v8 = vadd.f32 %v13173_v9, %v13133_v1  ;;  %v13176_v43 = vpop.f32.mrb[95].mxu1  ;;  %13477 = vmatprep.subr.bf16.mxu1 %v17048_v27  ;;  %v16447_v6 = vld [vmem:[%s18494_s24 + $0x2af8] sm:$0xff] }
 0xae5   : > { %v16575_v27 = vld [vmem:[%s18494_s24 + $0x2ef8] sm:$0xff]  ;;  %v16960_v40 = vcombine.high %v16443_v33, %v16447_v6  ;;  %v16959_v9 = vcombine.low %v16443_v33, %v16447_v6 }
 0xae6   : > { %13437 = vmatpush1.bf16.msra.mxu0 %v16919_v10  ;;  %v17088_v15 = vcombine.high %v16571_v21, %v16575_v27  ;;  %v16451_v19 = vld [vmem:[%s18494_s24 + $0x2b18] sm:$0xff]  ;;  %v17087_v60 = vcombine.low %v16571_v21, %v16575_v27  ;;  %v17121_v21 = vld [vmem:[%s18509_s12 + $0x800] sm:$0xff]  ;;  %v17122_v27 = vld [vmem:[%s18509_s12 + $0x808] sm:$0xff] }
 0xae7   : > { %13478 = vmatpush1.bf16.msra.mxu1 %v17047_v38  ;;  %13438 = vmatprep.subr.bf16.mxu0 %v16928_v7  ;;  %v16579_v17 = vld [vmem:[%s18494_s24 + $0x2f18] sm:$0xff]  ;;  %v16968_v10 = vcombine.high %v16451_v19, %v16455_v16 }
 0xae8   : > { %13479 = vmatprep.subr.bf16.mxu1 %v17056_v44  ;;  %v16583_v1 = vld [vmem:[%s18494_s24 + $0x2f38] sm:$0xff]  ;;  %v16967_v44 = vcombine.low %v16451_v19, %v16455_v16  ;;  %v18037_v16 = vpack.c.bf16 %v17122_v27, %v17121_v21  ;;  %v17129_v27 = vld [vmem:[%s18509_s12 + $0x840] sm:$0xff] }
 0xae9   : > { %v17096_v4 = vcombine.high %v16579_v17, %v16583_v1  ;;  %v16459_v37 = vld [vmem:[%s18494_s24 + $0x2b58] sm:$0xff]  ;;  %v17095_v56 = vcombine.low %v16579_v17, %v16583_v1  ;;  %v17171_v17 = vld [vmem:[%s18509_s12 + $0x990] sm:$0xff] }
 0xaea   : > { %13439 = vmatpush1.bf16.msra.mxu0 %v16927_v47  ;;  %v16463_v38 = vld [vmem:[%s18494_s24 + $0x2b78] sm:$0xff] }
 0xaeb   : > { %13480 = vmatpush1.bf16.msra.mxu1 %v17055_v32  ;;  %13440 = vmatprep.subr.bf16.mxu0 %v16936_v49  ;;  %v16587_v7 = vld [vmem:[%s18494_s24 + $0x2f58] sm:$0xff]  ;;  %v16976_v45 = vcombine.high %v16459_v37, %v16463_v38 }
 0xaec   : > { %13481 = vmatprep.subr.bf16.mxu1 %v17064_v0  ;;  %v16591_v43 = vld [vmem:[%s18494_s24 + $0x2f78] sm:$0xff]  ;;  %v16975_v0 = vcombine.low %v16459_v37, %v16463_v38 }
 0xaed   : > { %v17104_v24 = vcombine.high %v16587_v7, %v16591_v43  ;;  %v16467_v30 = vld [vmem:[%s18494_s24 + $0x2b98] sm:$0xff]  ;;  %v17103_v58 = vcombine.low %v16587_v7, %v16591_v43  ;;  %v17141_v7 = vld [vmem:[%s18509_s12 + $0x8a0] sm:$0xff]  ;;  %v17142_v43 = vld [vmem:[%s18509_s12 + $0x8a8] sm:$0xff] }
 0xaee   : > { %13441 = vmatpush1.bf16.msra.mxu0 %v16935_v39  ;;  %v16471_v47 = vld [vmem:[%s18494_s24 + $0x2bb8] sm:$0xff] }
 0xaef   : > { %13482 = vmatpush1.bf16.msra.mxu1 %v17063_v51  ;;  %13442 = vmatprep.subr.bf16.mxu0 %v16944_v3  ;;  %v16595_v32 = vld [vmem:[%s18494_s24 + $0x2f98] sm:$0xff]  ;;  %v16984_v28 = vcombine.high %v16467_v30, %v16471_v47 }
 0xaf0   : > { %13483 = vmatprep.subr.bf16.mxu1 %v17072_v41  ;;  %v16599_v49 = vld [vmem:[%s18494_s24 + $0x2fb8] sm:$0xff]  ;;  %v16983_v41 = vcombine.low %v16467_v30, %v16471_v47  ;;  %v18043_v47 = vpack.c.bf16 %v17142_v43, %v17141_v7  ;;  %v17163_v43 = vld [vmem:[%s18509_s12 + $0x950] sm:$0xff] }
 0xaf1   : > { %v17112_v31 = vcombine.high %v16595_v32, %v16599_v49  ;;  %v16475_v36 = vld [vmem:[%s18494_s24 + $0x2bd8] sm:$0xff]  ;;  %v17111_v11 = vcombine.low %v16595_v32, %v16599_v49  ;;  %v17125_v32 = vld [vmem:[%s18509_s12 + $0x820] sm:$0xff]  ;;  %v17126_v49 = vld [vmem:[%s18509_s12 + $0x828] sm:$0xff] }
 0xaf2   : > { %13443 = vmatpush1.bf16.msra.mxu0 %v16943_v48  ;;  %v16479_v39 = vld [vmem:[%s18494_s24 + $0x2bf8] sm:$0xff]  ;;  %v17138_v48 = vld [vmem:[%s18509_s12 + $0x888] sm:$0xff] }
 0xaf3   : > { %13484 = vmatpush1.bf16.msra.mxu1 %v17071_v29  ;;  %13444 = vmatprep.subr.bf16.mxu0 %v16952_v61  ;;  %v16603_v51 = vld [vmem:[%s18494_s24 + $0x2fd8] sm:$0xff]  ;;  %v16992_v13 = vcombine.high %v16475_v36, %v16479_v39  ;;  %v17169_v29 = vld [vmem:[%s18509_s12 + $0x980] sm:$0xff]  ;;  %v17170_v61 = vld [vmem:[%s18509_s12 + $0x988] sm:$0xff]  ;;  %v18035_v6 = vpack.c.bf16 %v17138_v48, %v17137_v14 }
 0xaf4   : > { %13485 = vmatprep.subr.bf16.mxu1 %v17080_v2  ;;  %v16607_v3 = vld [vmem:[%s18494_s24 + $0x2ff8] sm:$0xff]  ;;  %v16991_v2 = vcombine.low %v16475_v36, %v16479_v39  ;;  %v18045_v36 = vpack.c.bf16 %v17126_v49, %v17125_v32  ;;  %v17146_v14 = vld [vmem:[%s18509_s12 + $0x8c8] sm:$0xff]  ;;  %v17177_v48 = vld [vmem:[%s18509_s12 + $0x9c0] sm:$0xff] }
 0xaf5   : > { %v17120_v12 = vcombine.high %v16603_v51, %v16607_v3  ;;  %v17119_v33 = vcombine.low %v16603_v51, %v16607_v3  ;;  %v17140_v19 = vld [vmem:[%s18509_s12 + $0x898] sm:$0xff]  ;;  %v17127_v51 = vld [vmem:[%s18509_s12 + $0x830] sm:$0xff] }
 0xaf6   : > { %13445 = vmatpush1.bf16.msra.mxu0 %v16951_v23  ;;  %v18067_v23 = vpack.c.bf16 %v17170_v61, %v17169_v29  ;;  %v17172_v1 = vld [vmem:[%s18509_s12 + $0x998] sm:$0xff]  ;;  %v17178_v29 = vld [vmem:[%s18509_s12 + $0x9c8] sm:$0xff]  ;;  %v18258_v61 = vld [vmem:[%s18504_s20 + $0x10] sm:$0xff] }
 0xaf7   : > { %13486 = vmatpush1.bf16.msra.mxu1 %v17079_v25  ;;  %13446 = vmatprep.subr.bf16.mxu0 %v16960_v40  ;;  %v17153_v25 = vld [vmem:[%s18509_s12 + $0x900] sm:$0xff]  ;;  %v17154_v40 = vld [vmem:[%s18509_s12 + $0x908] sm:$0xff]  ;;  %v17156_v38 = vld [vmem:[%s18509_s12 + $0x918] sm:$0xff] }
 0xaf8   : > { %13487 = vmatprep.subr.bf16.mxu1 %v17088_v15  ;;  %v17139_v15 = vld [vmem:[%s18509_s12 + $0x890] sm:$0xff]  ;;  %v17128_v3 = vld [vmem:[%s18509_s12 + $0x838] sm:$0xff] }
 0xaf9   : > { %v18039_v37 = vpack.c.bf16 %v17140_v19, %v17139_v15  ;;  %v17162_v15 = vld [vmem:[%s18509_s12 + $0x948] sm:$0xff]  ;;  %v17147_v19 = vld [vmem:[%s18509_s12 + $0x8d0] sm:$0xff]  ;;  %v17132_v7 = vld [vmem:[%s18509_s12 + $0x858] sm:$0xff] }
 0xafa   : > { %13447 = vmatpush1.bf16.msra.mxu0 %v16959_v9  ;;  %v18069_v9 = vpack.c.bf16 %v17154_v40, %v17153_v25  ;;  %v17161_v25 = vld [vmem:[%s18509_s12 + $0x940] sm:$0xff]  ;;  %v18083_v40 = vpack.c.bf16 %v17178_v29, %v17177_v48 }
 0xafb   : > { %13488 = vmatpush1.bf16.msra.mxu1 %v17087_v60  ;;  %13448 = vmatprep.subr.bf16.mxu0 %v16968_v10  ;;  %v17123_v60 = vld [vmem:[%s18509_s12 + $0x810] sm:$0xff]  ;;  %v17124_v10 = vld [vmem:[%s18509_s12 + $0x818] sm:$0xff] }
 0xafc   : > { %13489 = vmatprep.subr.bf16.mxu1 %v17096_v4  ;;  %v17155_v4 = vld [vmem:[%s18509_s12 + $0x910] sm:$0xff] }
 0xafd   : > { %v18073_v30 = vpack.c.bf16 %v17156_v38, %v17155_v4  ;;  %v18085_v4 = vpack.c.bf16 %v17162_v15, %v17161_v25  ;;  %v17131_v38 = vld [vmem:[%s18509_s12 + $0x850] sm:$0xff]  ;;  %v17136_v25 = vld [vmem:[%s18509_s12 + $0x878] sm:$0xff] }
 0xafe   : > { %13449 = vmatpush1.bf16.msra.mxu0 %v16967_v44  ;;  %v18071_v44 = vpack.c.bf16 %v17172_v1, %v17171_v17  ;;  %v17179_v1 = vld [vmem:[%s18509_s12 + $0x9d0] sm:$0xff]  ;;  %v18057_v49 = vpack.c.bf16 %v17132_v7, %v17131_v38  ;;  %v17185_v7 = vld [vmem:[%s18509_s12 + $0xa00] sm:$0xff] }
 0xaff   : > { %13490 = vmatpush1.bf16.msra.mxu1 %v17095_v56  ;;  %13450 = vmatprep.subr.bf16.mxu0 %v16976_v45  ;;  %v17173_v56 = vld [vmem:[%s18509_s12 + $0x9a0] sm:$0xff]  ;;  %v17174_v45 = vld [vmem:[%s18509_s12 + $0x9a8] sm:$0xff] }
 0xb00   : > { %13491 = vmatprep.subr.bf16.mxu1 %v17104_v24  ;;  %v18041_v24 = vpack.c.bf16 %v17124_v10, %v17123_v60 }
 0xb02   : > { %13451 = vmatpush1.bf16.msra.mxu0 %v16975_v0  ;;  %v18075_v0 = vpack.c.bf16 %v17174_v45, %v17173_v56  ;;  %v17164_v56 = vld [vmem:[%s18509_s12 + $0x958] sm:$0xff]  ;;  %v17149_v45 = vld [vmem:[%s18509_s12 + $0x8e0] sm:$0xff] }
 0xb03   : > { %13492 = vmatpush1.bf16.msra.mxu1 %v17103_v58  ;;  %13452 = vmatprep.subr.bf16.mxu0 %v16984_v28  ;;  %v17143_v58 = vld [vmem:[%s18509_s12 + $0x8b0] sm:$0xff]  ;;  %v17144_v28 = vld [vmem:[%s18509_s12 + $0x8b8] sm:$0xff] }
 0xb04   : > { %13493 = vmatprep.subr.bf16.mxu1 %v17112_v31  ;;  %v17176_v31 = vld [vmem:[%s18509_s12 + $0x9b8] sm:$0xff]  ;;  %v18047_v39 = vpack.c.bf16 %v17144_v28, %v17143_v58  ;;  %v17134_v58 = vld [vmem:[%s18509_s12 + $0x868] sm:$0xff]  ;;  %v17165_v28 = vld [vmem:[%s18509_s12 + $0x960] sm:$0xff] }
 0xb06   : > { %13453 = vmatpush1.bf16.msra.mxu0 %v16983_v41  ;;  %v17159_v41 = vld [vmem:[%s18509_s12 + $0x930] sm:$0xff] }
 0xb07   : > { %13494 = vmatpush1.bf16.msra.mxu1 %v17111_v11  ;;  %13454 = vmatprep.subr.bf16.mxu0 %v16992_v13  ;;  %v17160_v13 = vld [vmem:[%s18509_s12 + $0x938] sm:$0xff] }
 0xb08   : > { %13495 = vmatprep.subr.bf16.mxu1 %v17120_v12  ;;  %v17145_v12 = vld [vmem:[%s18509_s12 + $0x8c0] sm:$0xff] }
 0xb09   : > { %v18051_v21 = vpack.c.bf16 %v17146_v14, %v17145_v12 }
 0xb0a   : > { %13455 = vmatpush1.bf16.msra.mxu0 %v16991_v2  ;;  %v20881_v2 = vunpack.c.h.bf16 %v18258_v61 }
 0xb0b   : > { %13496 = vmatpush1.bf16.msra.mxu1 %v17119_v33  ;;  %18036 = vmatprep.subr.bf16.mxu0 %v18035_v6  ;;  %v18049_v33 = vpack.c.bf16 %v17128_v3, %v17127_v51  ;;  %v18081_v6 = vpack.c.bf16 %v17160_v13, %v17159_v41  ;;  %v17184_v13 = vld [vmem:[%s18509_s12 + $0x9f8] sm:$0xff] }
 0xb0c   : > { %18068 = vmatprep.subr.bf16.mxu1 %v18067_v23  ;;  %v17130_v23 = vld [vmem:[%s18509_s12 + $0x848] sm:$0xff]  ;;  %v10237_v17 = vrot.slane %v20881_v2, %v18865_v20  ;;  %v10241_v10 = vrot.slane %v20881_v2, %v18868_v22 }
 0xb0d   : > { %13457 = vmatmul.mubr.bf16.vlgmr.msra.gmra.mrb[108].mxu0 %v20399_v5  ;;  %v17157_v5 = vld [vmem:[%s18509_s12 + $0x920] sm:$0xff]  ;;  %v18053_v60 = vpack.c.bf16 %v17130_v23, %v17129_v27  ;;  %v17182_v22 = vld [vmem:[%s18509_s12 + $0x9e8] sm:$0xff]  ;;  %v17135_v23 = vld [vmem:[%s18509_s12 + $0x870] sm:$0xff] }
 0xb0e   : > { %13498 = vmatmul.mubr.bf16.vlgmr.msra.gmra.mrb[108].mxu1 %v20403_v18  ;;  %18038 = vmatpush3.bf16.msra.mxu0 %v18037_v16  ;;  %v17158_v18 = vld [vmem:[%s18509_s12 + $0x928] sm:$0xff]  ;;  %v17148_v16 = vld [vmem:[%s18509_s12 + $0x8d8] sm:$0xff]  ;;  %v10281_v32 = vrot.slane %v10241_v10, %v18865_v20 }
 0xb0f   : > { %13699 = vmatprep.mubr.f32.mxu0 %v20281_v52  ;;  %18070 = vmatpush3.bf16.msra.mxu1 %v18069_v9  ;;  %v17175_v52 = vld [vmem:[%s18509_s12 + $0x9b0] sm:$0xff]  ;;  %v17180_v9 = vld [vmem:[%s18509_s12 + $0x9d8] sm:$0xff]  ;;  %v17234_v10 = vld [vmem:[%s18509_s12 + $0xb88] sm:$0xff] }
 0xb10   : > { %13769 = vmatprep.mubr.f32.mxu1 %v20283_v46  ;;  %18040 = vmatprep.subr.bf16.mxu0 %v18039_v37  ;;  %v18077_v46 = vpack.c.bf16 %v17158_v18, %v17157_v5  ;;  %v18079_v11 = vpack.c.bf16 %v17176_v31, %v17175_v52  ;;  %v18055_v37 = vpack.c.bf16 %v17148_v16, %v17147_v19  ;;  %v17133_v18 = vld [vmem:[%s18509_s12 + $0x860] sm:$0xff] }
 0xb11   : > { %18072 = vmatprep.subr.bf16.mxu1 %v18071_v44  ;;  %v18087_v44 = vpack.c.bf16 %v17180_v9, %v17179_v1  ;;  %v18089_v5 = vpack.c.bf16 %v17164_v56, %v17163_v43  ;;  %v18061_v29 = vpack.c.bf16 %v17134_v58, %v17133_v18  ;;  %v17201_v1 = vld [vmem:[%s18509_s12 + $0xa80] sm:$0xff]  ;;  %v17202_v9 = vld [vmem:[%s18509_s12 + $0xa88] sm:$0xff]  ;;  %v17219_v18 = vld [vmem:[%s18509_s12 + $0xb10] sm:$0xff] }
 0xb12   : > { %18042 = vmatpush3.bf16.msra.mxu0 %v18041_v24  ;;  %v17150_v24 = vld [vmem:[%s18509_s12 + $0x8e8] sm:$0xff]  ;;  %v18099_v38 = vpack.c.bf16 %v17202_v9, %v17201_v1  ;;  %v17217_v56 = vld [vmem:[%s18509_s12 + $0xb00] sm:$0xff] }
 0xb13   : > { %18074 = vmatpush3.bf16.msra.mxu1 %v18073_v30  ;;  %18044 = vmatprep.subr.bf16.mxu0 %v18043_v47  ;;  %v10277_v30 = vrot.slane %v10237_v17, %v18865_v20  ;;  %v17181_v47 = vld [vmem:[%s18509_s12 + $0x9e0] sm:$0xff]  ;;  %v17168_v17 = vld [vmem:[%s18509_s12 + $0x978] sm:$0xff]  ;;  %v17186_v43 = vld [vmem:[%s18509_s12 + $0xa08] sm:$0xff] }
 0xb14   : > { %18076 = vmatprep.subr.bf16.mxu1 %v18075_v0  ;;  %v18059_v0 = vpack.c.bf16 %v17150_v24, %v17149_v45  ;;  %v18091_v31 = vpack.c.bf16 %v17182_v22, %v17181_v47  ;;  %v17218_v45 = vld [vmem:[%s18509_s12 + $0xb08] sm:$0xff]  ;;  %v17203_v24 = vld [vmem:[%s18509_s12 + $0xa90] sm:$0xff]  ;;  %v18101_v47 = vpack.c.bf16 %v17186_v43, %v17185_v7 }
 0xb15   : > { %v17235_v22 = vld [vmem:[%s18509_s12 + $0xb90] sm:$0xff]  ;;  %v17242_v1 = vld [vmem:[%s18509_s12 + $0xbc8] sm:$0xff] }
 0xb16   : > { %18046 = vmatpush3.bf16.msra.mxu0 %v18045_v36  ;;  %v17166_v36 = vld [vmem:[%s18509_s12 + $0x968] sm:$0xff] }
 0xb17   : > { %18078 = vmatpush3.bf16.msra.mxu1 %v18077_v46  ;;  %18048 = vmatprep.subr.bf16.mxu0 %v18047_v39  ;;  %v17151_v46 = vld [vmem:[%s18509_s12 + $0x8f0] sm:$0xff]  ;;  %v17152_v39 = vld [vmem:[%s18509_s12 + $0x8f8] sm:$0xff]  ;;  %v17226_v43 = vld [vmem:[%s18509_s12 + $0xb48] sm:$0xff] }
 0xb18   : > { %18080 = vmatprep.subr.bf16.mxu1 %v18079_v11  ;;  %v17183_v11 = vld [vmem:[%s18509_s12 + $0x9f0] sm:$0xff]  ;;  %v18063_v27 = vpack.c.bf16 %v17152_v39, %v17151_v46  ;;  %v17237_v46 = vld [vmem:[%s18509_s12 + $0xba0] sm:$0xff]  ;;  %v17238_v39 = vld [vmem:[%s18509_s12 + $0xba8] sm:$0xff] }
 0xb19   : > { %v18095_v16 = vpack.c.bf16 %v17184_v13, %v17183_v11  ;;  %v17189_v11 = vld [vmem:[%s18509_s12 + $0xa20] sm:$0xff]  ;;  %v17190_v13 = vld [vmem:[%s18509_s12 + $0xa28] sm:$0xff] }
 0xb1a   : > { %18050 = vmatpush3.bf16.msra.mxu0 %v18049_v33 }
 0xb1b   : > { %18082 = vmatpush3.bf16.msra.mxu1 %v18081_v6  ;;  %18052 = vmatprep.subr.bf16.mxu0 %v18051_v21  ;;  %v18093_v21 = vpack.c.bf16 %v17166_v36, %v17165_v28  ;;  %v17220_v28 = vld [vmem:[%s18509_s12 + $0xb18] sm:$0xff] }
 0xb1c   : > { %18084 = vmatprep.subr.bf16.mxu1 %v18083_v40  ;;  %v17167_v40 = vld [vmem:[%s18509_s12 + $0x970] sm:$0xff] }
 0xb1e   : > { %18054 = vmatpush3.bf16.msra.mxu0 %v18053_v60  ;;  %v17233_v60 = vld [vmem:[%s18509_s12 + $0xb80] sm:$0xff] }
 0xb1f   : > { %18086 = vmatpush3.bf16.msra.mxu1 %v18085_v4  ;;  %18056 = vmatprep.subr.bf16.mxu0 %v18055_v37  ;;  %v18065_v4 = vpack.c.bf16 %v17136_v25, %v17135_v23  ;;  %v18097_v37 = vpack.c.bf16 %v17168_v17, %v17167_v40  ;;  %v17223_v23 = vld [vmem:[%s18509_s12 + $0xb30] sm:$0xff]  ;;  %v17224_v40 = vld [vmem:[%s18509_s12 + $0xb38] sm:$0xff]  ;;  %v17241_v17 = vld [vmem:[%s18509_s12 + $0xbc0] sm:$0xff] }
 0xb20   : > { %v13212_v52 = vpop.f32.mrb[96].mxu0  ;;  %18088 = vmatprep.subr.bf16.mxu1 %v18087_v44  ;;  %v18131_v44 = vpack.c.bf16 %v17234_v10, %v17233_v60  ;;  %v18145_v60 = vpack.c.bf16 %v17224_v40, %v17223_v23  ;;  %v18147_v7 = vpack.c.bf16 %v17242_v1, %v17241_v17 }
 0xb21   : > { %v13213_v51 = vadd.f32 %v13212_v52, %v10277_v30  ;;  %v13253_v3 = vpop.f32.mrb[96].mxu1  ;;  %v13214_v41 = vpop.f32.mrb[97].mxu0  ;;  %v17204_v30 = vld [vmem:[%s18509_s12 + $0xa98] sm:$0xff]  ;;  %v17205_v52 = vld [vmem:[%s18509_s12 + $0xaa0] sm:$0xff] }
 0xb22   : > { %v13215_v12 = vadd.f32 %v13214_v41, %v10281_v32  ;;  %v13255_v14 = vpop.f32.mrb[97].mxu1  ;;  %v13216_v48 = vpop.f32.mrb[98].mxu0  ;;  %18058 = vmatpush3.bf16.msra.mxu0 %v18057_v49  ;;  %v17236_v32 = vld [vmem:[%s18509_s12 + $0xb98] sm:$0xff]  ;;  %v18133_v49 = vpack.c.bf16 %v17218_v45, %v17217_v56  ;;  %v18103_v58 = vpack.c.bf16 %v17204_v30, %v17203_v24  ;;  %v17243_v45 = vld [vmem:[%s18509_s12 + $0xbd0] sm:$0xff] }
 0xb23   : > { %v20913_v61 = vadd.f32 %v13253_v3, %v13213_v51  ;;  %v13257_v33 = vpop.f32.mrb[98].mxu1  ;;  %18090 = vmatpush3.bf16.msra.mxu1 %v18089_v5  ;;  %v13217_v6 = vpop.f32.mrb[99].mxu0  ;;  %18060 = vmatprep.subr.bf16.mxu0 %v18059_v0  ;;  %v17187_v5 = vld [vmem:[%s18509_s12 + $0xa10] sm:$0xff]  ;;  %v17188_v0 = vld [vmem:[%s18509_s12 + $0xa18] sm:$0xff]  ;;  %v18135_v36 = vpack.c.bf16 %v17236_v32, %v17235_v22  ;;  %v18137_v3 = vpack.c.bf16 %v17220_v28, %v17219_v18  ;;  %v17214_v28 = vld [vmem:[%s18509_s12 + $0xae8] sm:$0xff] }
 0xb24   : > { %v20918_v15 = vadd.f32 %v13255_v14, %v13215_v12  ;;  %v13258_v19 = vpop.f32.mrb[99].mxu1  ;;  %18092 = vmatprep.subr.bf16.mxu1 %v18091_v31  ;;  %v17206_v31 = vld [vmem:[%s18509_s12 + $0xaa8] sm:$0xff]  ;;  %v18105_v51 = vpack.c.bf16 %v17188_v0, %v17187_v5  ;;  %v18139_v12 = vpack.c.bf16 %v17238_v39, %v17237_v46  ;;  %v17207_v14 = vld [vmem:[%s18509_s12 + $0xab0] sm:$0xff]  ;;  %v17208_v48 = vld [vmem:[%s18509_s12 + $0xab8] sm:$0xff]  ;;  %v18109_v33 = vpack.c.bf16 %v17190_v13, %v17189_v11 }
 0xb25   : > { %v18107_v41 = vpack.c.bf16 %v17206_v31, %v17205_v52  ;;  %v18111_v6 = vpack.c.bf16 %v17208_v48, %v17207_v14  ;;  %v17209_v19 = vld [vmem:[%s18509_s12 + $0xac0] sm:$0xff]  ;;  %v17212_v56 = vld [vmem:[%s18509_s12 + $0xad8] sm:$0xff]  ;;  %v17195_v32 = vld [vmem:[%s18509_s12 + $0xa50] sm:$0xff] }
 0xb26   : > { %18062 = vmatpush3.bf16.msra.mxu0 %v18061_v29  ;;  %v17240_v29 = vld [vmem:[%s18509_s12 + $0xbb8] sm:$0xff]  ;;  %v17227_v5 = vld [vmem:[%s18509_s12 + $0xb50] sm:$0xff]  ;;  %v17245_v52 = vld [vmem:[%s18509_s12 + $0xbe0] sm:$0xff] }
 0xb27   : > { %18094 = vmatpush3.bf16.msra.mxu1 %v18093_v21  ;;  %18064 = vmatprep.subr.bf16.mxu0 %v18063_v27  ;;  %v17191_v21 = vld [vmem:[%s18509_s12 + $0xa30] sm:$0xff]  ;;  %v17192_v27 = vld [vmem:[%s18509_s12 + $0xa38] sm:$0xff]  ;;  %v17246_v31 = vld [vmem:[%s18509_s12 + $0xbe8] sm:$0xff] }
 0xb28   : > { %18096 = vmatprep.subr.bf16.mxu1 %v18095_v16  ;;  %v17210_v16 = vld [vmem:[%s18509_s12 + $0xac8] sm:$0xff]  ;;  %v18113_v9 = vpack.c.bf16 %v17192_v27, %v17191_v21  ;;  %v17244_v24 = vld [vmem:[%s18509_s12 + $0xbd8] sm:$0xff]  ;;  %v18155_v11 = vpack.c.bf16 %v17246_v31, %v17245_v52  ;;  %v17231_v21 = vld [vmem:[%s18509_s12 + $0xb70] sm:$0xff] }
 0xb29   : > { %v18115_v10 = vpack.c.bf16 %v17210_v16, %v17209_v19  ;;  %v18151_v0 = vpack.c.bf16 %v17244_v24, %v17243_v45  ;;  %v17228_v18 = vld [vmem:[%s18509_s12 + $0xb58] sm:$0xff]  ;;  %v17230_v13 = vld [vmem:[%s18509_s12 + $0xb68] sm:$0xff]  ;;  %v10249_v45 = vrot.slane %v20881_v2, %v19026_v54 }
 0xb2a   : > { %18066 = vmatpush3.bf16.msra.mxu0 %v18065_v4  ;;  %v17193_v4 = vld [vmem:[%s18509_s12 + $0xa40] sm:$0xff]  ;;  %v18153_v46 = vpack.c.bf16 %v17228_v18, %v17227_v5  ;;  %v17248_v14 = vld [vmem:[%s18509_s12 + $0xbf8] sm:$0xff]  ;;  %v17274_v31 = vld [vmem:[%s18514_s16 + $0x2c8] sm:$0xff] }
 0xb2b   : > { %18098 = vmatpush3.bf16.msra.mxu1 %v18097_v37  ;;  %18100 = vmatprep.subr.bf16.mxu0 %v18099_v38  ;;  %v17194_v37 = vld [vmem:[%s18509_s12 + $0xa48] sm:$0xff]  ;;  %v17225_v38 = vld [vmem:[%s18509_s12 + $0xb40] sm:$0xff]  ;;  %v17232_v27 = vld [vmem:[%s18509_s12 + $0xb78] sm:$0xff] }
 0xb2c   : > { %18132 = vmatprep.subr.bf16.mxu1 %v18131_v44  ;;  %v17211_v44 = vld [vmem:[%s18509_s12 + $0xad0] sm:$0xff]  ;;  %v18117_v30 = vpack.c.bf16 %v17194_v37, %v17193_v4 }
 0xb2d   : > { %13700 = vmatmul.mubr.f32.vlgmr.msra.gmra.mrb[112].mxu0 %v20274_v26  ;;  %v17221_v26 = vld [vmem:[%s18509_s12 + $0xb20] sm:$0xff]  ;;  %v18119_v22 = vpack.c.bf16 %v17212_v56, %v17211_v44  ;;  %v17260_v44 = vld [vmem:[%s18514_s16 + $0x258] sm:$0xff] }
 0xb2e   : > { %13770 = vmatmul.mubr.f32.vlgmr.msra.gmra.mrb[112].mxu1 %v20276_v57  ;;  %18102 = vmatpush3.bf16.msra.mxu0 %v18101_v47  ;;  %v17222_v57 = vld [vmem:[%s18509_s12 + $0xb28] sm:$0xff]  ;;  %v18149_v47 = vpack.c.bf16 %v17226_v43, %v17225_v38 }
 0xb2f   : > { %13839 = vmatprep.mubr.f32.mxu0 %v20318_v35  ;;  %18134 = vmatpush3.bf16.msra.mxu1 %v18133_v49  ;;  %v17239_v35 = vld [vmem:[%s18509_s12 + $0xbb0] sm:$0xff]  ;;  %v17196_v49 = vld [vmem:[%s18509_s12 + $0xa58] sm:$0xff]  ;;  %v17250_v38 = vld [vmem:[%s18514_s16 + $0x208] sm:$0xff] }
 0xb30   : > { %13909 = vmatprep.mubr.f32.mxu1 %v20320_v55  ;;  %18104 = vmatprep.subr.bf16.mxu0 %v18103_v58  ;;  %v18141_v55 = vpack.c.bf16 %v17222_v57, %v17221_v26  ;;  %v18143_v25 = vpack.c.bf16 %v17240_v29, %v17239_v35  ;;  %v17213_v58 = vld [vmem:[%s18509_s12 + $0xae0] sm:$0xff]  ;;  %v17215_v26 = vld [vmem:[%s18509_s12 + $0xaf0] sm:$0xff] }
 0xb31   : > { %18136 = vmatprep.subr.bf16.mxu1 %v18135_v36  ;;  %v18121_v36 = vpack.c.bf16 %v17196_v49, %v17195_v32  ;;  %v18123_v39 = vpack.c.bf16 %v17214_v28, %v17213_v58  ;;  %v17247_v57 = vld [vmem:[%s18509_s12 + $0xbf0] sm:$0xff] }
 0xb32   : > { %18106 = vmatpush3.bf16.msra.mxu0 %v18105_v51  ;;  %v17197_v51 = vld [vmem:[%s18509_s12 + $0xa60] sm:$0xff]  ;;  %v17251_v32 = vld [vmem:[%s18514_s16 + $0x210] sm:$0xff] }
 0xb33   : > { %18138 = vmatpush3.bf16.msra.mxu1 %v18137_v3  ;;  %18108 = vmatprep.subr.bf16.mxu0 %v18107_v41  ;;  %v17198_v3 = vld [vmem:[%s18509_s12 + $0xa68] sm:$0xff]  ;;  %v17229_v41 = vld [vmem:[%s18509_s12 + $0xb60] sm:$0xff] }
 0xb34   : > { %18140 = vmatprep.subr.bf16.mxu1 %v18139_v12  ;;  %v17216_v12 = vld [vmem:[%s18509_s12 + $0xaf8] sm:$0xff]  ;;  %v18125_v48 = vpack.c.bf16 %v17198_v3, %v17197_v51  ;;  %v18157_v35 = vpack.c.bf16 %v17230_v13, %v17229_v41  ;;  %v17273_v13 = vld [vmem:[%s18514_s16 + $0x2c0] sm:$0xff] }
 0xb35   : > { %v18127_v29 = vpack.c.bf16 %v17216_v12, %v17215_v26  ;;  %v17276_v41 = vld [vmem:[%s18514_s16 + $0x2d8] sm:$0xff] }
 0xb36   : > { %18110 = vmatpush3.bf16.msra.mxu0 %v18109_v33  ;;  %v17199_v33 = vld [vmem:[%s18509_s12 + $0xa70] sm:$0xff] }
 0xb37   : > { %18142 = vmatpush3.bf16.msra.mxu1 %v18141_v55  ;;  %18112 = vmatprep.subr.bf16.mxu0 %v18111_v6  ;;  %v17200_v55 = vld [vmem:[%s18509_s12 + $0xa78] sm:$0xff]  ;;  %v18159_v6 = vpack.c.bf16 %v17248_v14, %v17247_v57 }
 0xb38   : > { %18144 = vmatprep.subr.bf16.mxu1 %v18143_v25  ;;  %v18129_v23 = vpack.c.bf16 %v17200_v55, %v17199_v33  ;;  %v18161_v25 = vpack.c.bf16 %v17232_v27, %v17231_v21  ;;  %v17254_v33 = vld [vmem:[%s18514_s16 + $0x228] sm:$0xff]  ;;  %v17264_v27 = vld [vmem:[%s18514_s16 + $0x278] sm:$0xff] }
 0xb39   : > { %v17262_v55 = vld [vmem:[%s18514_s16 + $0x268] sm:$0xff] }
 0xb3a   : > { %18114 = vmatpush3.bf16.msra.mxu0 %v18113_v9  ;;  %v18179_v21 = vpack.c.bf16 %v17262_v55, %v17254_v33 }
 0xb3b   : > { %18146 = vmatpush3.bf16.msra.mxu1 %v18145_v60  ;;  %18116 = vmatprep.subr.bf16.mxu0 %v18115_v10 }
 0xb3c   : > { %18148 = vmatprep.subr.bf16.mxu1 %v18147_v7  ;;  %v17258_v7 = vld [vmem:[%s18514_s16 + $0x248] sm:$0xff] }
 0xb3d   : > { %v18163_v43 = vpack.c.bf16 %v17258_v7, %v17250_v38 }
 0xb3e   : > { %18118 = vmatpush3.bf16.msra.mxu0 %v18117_v30  ;;  %v10289_v30 = vrot.slane %v10249_v45, %v18865_v20 }
 0xb3f   : > { %18150 = vmatpush3.bf16.msra.mxu1 %v18149_v47  ;;  %18120 = vmatprep.subr.bf16.mxu0 %v18119_v22  ;;  %v17249_v47 = vld [vmem:[%s18514_s16 + $0x200] sm:$0xff] }
 0xb40   : > { %18152 = vmatprep.subr.bf16.mxu1 %v18151_v0  ;;  %v17257_v22 = vld [vmem:[%s18514_s16 + $0x240] sm:$0xff]  ;;  %v17259_v0 = vld [vmem:[%s18514_s16 + $0x250] sm:$0xff] }
 0xb41   : > { %v18165_v5 = vpack.c.bf16 %v17257_v22, %v17249_v47  ;;  %v18173_v54 = vpack.c.bf16 %v17259_v0, %v17251_v32  ;;  %v17253_v22 = vld [vmem:[%s18514_s16 + $0x220] sm:$0xff]  ;;  %v17255_v0 = vld [vmem:[%s18514_s16 + $0x230] sm:$0xff] }
 0xb42   : > { %18122 = vmatpush3.bf16.msra.mxu0 %v18121_v36  ;;  %v17268_v36 = vld [vmem:[%s18514_s16 + $0x298] sm:$0xff]  ;;  %v17261_v32 = vld [vmem:[%s18514_s16 + $0x260] sm:$0xff] }
 0xb43   : > { %18154 = vmatpush3.bf16.msra.mxu1 %v18153_v46  ;;  %18124 = vmatprep.subr.bf16.mxu0 %v18123_v39  ;;  %v18175_v57 = vpack.c.bf16 %v17276_v41, %v17268_v36  ;;  %v17269_v36 = vld [vmem:[%s18514_s16 + $0x2a0] sm:$0xff]  ;;  %v17271_v41 = vld [vmem:[%s18514_s16 + $0x2b0] sm:$0xff] }
 0xb44   : > { %18156 = vmatprep.subr.bf16.mxu1 %v18155_v11  ;;  %v17265_v11 = vld [vmem:[%s18514_s16 + $0x280] sm:$0xff] }
 0xb45   : > { %v18169_v14 = vpack.c.bf16 %v17273_v13, %v17265_v11  ;;  %v17279_v11 = vld [vmem:[%s18514_s16 + $0x2f0] sm:$0xff] }
 0xb46   : > { %18126 = vmatpush3.bf16.msra.mxu0 %v18125_v48  ;;  %v17267_v48 = vld [vmem:[%s18514_s16 + $0x290] sm:$0xff] }
 0xb47   : > { %18158 = vmatpush3.bf16.msra.mxu1 %v18157_v35  ;;  %18128 = vmatprep.subr.bf16.mxu0 %v18127_v29  ;;  %v17275_v35 = vld [vmem:[%s18514_s16 + $0x2d0] sm:$0xff] }
 0xb48   : > { %18160 = vmatprep.subr.bf16.mxu1 %v18159_v6  ;;  %v18177_v29 = vpack.c.bf16 %v17275_v35, %v17267_v48  ;;  %v17256_v6 = vld [vmem:[%s18514_s16 + $0x238] sm:$0xff] }
 0xb4a   : > { %18130 = vmatpush3.bf16.msra.mxu0 %v18129_v23  ;;  %v18187_v23 = vpack.c.bf16 %v17264_v27, %v17256_v6 }
 0xb4b   : > { %18162 = vmatpush3.bf16.msra.mxu1 %v18161_v25  ;;  %18164 = vmatprep.subr.bf16.mxu0 %v18163_v43 }
 0xb4d   : > { %13840 = vmatmul.mubr.f32.vlgmr.msra.gmra.mrb[114].mxu0 %v20388_v62 }
 0xb4e   : > { %13910 = vmatmul.mubr.f32.vlgmr.msra.gmra.mrb[114].mxu1 %v20391_v63  ;;  %14015 = vmatprep.mubr.f32.mxu0 %v18366_v34 }
 0xb4f   : > { %14086 = vmatprep.mubr.f32.mxu1 %v18366_v34  ;;  %18166 = vmatpush1.bf16.msra.mxu0 %v18165_v5 }
 0xb60   : > { %v13294_v40 = vpop.f32.mrb[100].mxu0 }
 0xb61   : > { %v13295_v19 = vadd.f32 %v13294_v40, %v20913_v61  ;;  %v13335_v16 = vpop.f32.mrb[100].mxu1  ;;  %v13296_v17 = vpop.f32.mrb[101].mxu0  ;;  %v17252_v61 = vld [vmem:[%s18514_s16 + $0x218] sm:$0xff] }
 0xb62   : > { %v13297_v1 = vadd.f32 %v13296_v17, %v20918_v15  ;;  %v13337_v9 = vpop.f32.mrb[101].mxu1  ;;  %v13298_v60 = vpop.f32.mrb[102].mxu0  ;;  %v18171_v56 = vpack.c.bf16 %v17260_v44, %v17252_v61  ;;  %v10245_v15 = vrot.slane %v20881_v2, %v19023_v53 }
 0xb63   : > { %v20995_v62 = vadd.f32 %v13335_v16, %v13295_v19  ;;  %v13339_v10 = vpop.f32.mrb[102].mxu1  ;;  %v13299_v63 = vpop.f32.mrb[103].mxu0 }
 0xb64   : > { %v20997_v4 = vadd.f32 %v13337_v9, %v13297_v1  ;;  %v13340_v37 = vpop.f32.mrb[103].mxu1  ;;  %18172 = vmatprep.subr.bf16.mxu1 %v18171_v56  ;;  %v10285_v24 = vrot.slane %v10245_v15, %v18865_v20  ;;  %v17266_v20 = vld [vmem:[%s18514_s16 + $0x288] sm:$0xff] }
 0xb65   : > { %18174 = vmatpush1.bf16.msra.mxu1 %v18173_v54  ;;  %v18167_v3 = vpack.c.bf16 %v17274_v31, %v17266_v20  ;;  %v17278_v54 = vld [vmem:[%s18514_s16 + $0x2e8] sm:$0xff]  ;;  %v18181_v20 = vpack.c.bf16 %v17261_v32, %v17253_v22  ;;  %v18266_v32 = vld [vmem:[#allocation2 + $0x38] sm:$0xff] }
 0xb66   : > { %18176 = vmatprep.subr.bf16.mxu1 %v18175_v57 }
 0xb67   : > { %18168 = vmatprep.subr.bf16.mxu0 %v18167_v3  ;;  %v17277_v3 = vld [vmem:[%s18514_s16 + $0x2e0] sm:$0xff] }
 0xb68   : > { %18170 = vmatpush1.bf16.msra.mxu0 %v18169_v14  ;;  %v18185_v13 = vpack.c.bf16 %v17277_v3, %v17269_v36 }
 0xb69   : > { %18178 = vmatpush1.bf16.msra.mxu1 %v18177_v29  ;;  %18180 = vmatprep.subr.bf16.mxu0 %v18179_v21 }
 0xb6a   : > { %18188 = vmatprep.subr.bf16.mxu1 %v18187_v23  ;;  %v18259_v23 = vld [vmem:[#allocation2] sm:$0xff] }
 0xba0   : > { %v13376_v49 = vpop.f32.mrb[104].mxu0 }
 0xba1   : > { %v13377_v18 = vadd.f32 %v13376_v49, %v10285_v24  ;;  %v13417_v58 = vpop.f32.mrb[104].mxu1  ;;  %v13378_v53 = vpop.f32.mrb[105].mxu0 }
 0xba2   : > { %v13379_v2 = vadd.f32 %v13378_v53, %v10289_v30  ;;  %v13419_v28 = vpop.f32.mrb[105].mxu1  ;;  %v13380_v52 = vpop.f32.mrb[106].mxu0 }
 0xba3   : > { %v13418_v46 = vadd.f32 %v13417_v58, %v13377_v18  ;;  %v13421_v39 = vpop.f32.mrb[106].mxu1  ;;  %v13381_v51 = vpop.f32.mrb[107].mxu0  ;;  %v17263_v18 = vld [vmem:[%s18514_s16 + $0x270] sm:$0xff]  ;;  %v17270_v58 = vld [vmem:[%s18514_s16 + $0x2a8] sm:$0xff] }
 0xba4   : > { %v13420_v26 = vadd.f32 %v13419_v28, %v13379_v2  ;;  %v13422_v12 = vpop.f32.mrb[107].mxu1  ;;  %v17272_v2 = vld [vmem:[%s18514_s16 + $0x2b8] sm:$0xff]  ;;  %v18189_v31 = vpack.c.bf16 %v17263_v18, %v17255_v0  ;;  %v18183_v39 = vpack.c.bf16 %v17278_v54, %v17270_v58 }
 0xba5   : > { %v17280_v28 = vld [vmem:[%s18514_s16 + $0x2f8] sm:$0xff] }
 0xba6   : > { %v18191_v51 = vpack.c.bf16 %v17280_v28, %v17272_v2 }
 0xbe0   : > { %v13458_v25 = vpop.f32.mrb[108].mxu0 }
 0xbe1   : > { %v13459_v40 = vadd.f32 %v13458_v25, %v13418_v46  ;;  %v13499_v19 = vpop.f32.mrb[108].mxu1  ;;  %v13460_v16 = vpop.f32.mrb[109].mxu0 }
 0xbe2   : > { %v13461_v17 = vadd.f32 %v13460_v16, %v13420_v26  ;;  %v13501_v1 = vpop.f32.mrb[109].mxu1  ;;  %v13462_v9 = vpop.f32.mrb[110].mxu0  ;;  %v18193_v26 = vpack.c.bf16 %v17279_v11, %v17271_v41  ;;  %v18261_v16 = vld [vmem:[#allocation2 + $0x8] sm:$0xff] }
 0xbe3   : > { %v21025_v60 = vadd.f32 %v13499_v19, %v13459_v40  ;;  %v13503_v10 = vpop.f32.mrb[110].mxu1  ;;  %v13463_v63 = vpop.f32.mrb[111].mxu0  ;;  %v18260_v40 = vld [vmem:[#allocation2 + $0x10] sm:$0xff] }
 0xbe4   : > { %v21027_v37 = vadd.f32 %v13501_v1, %v13461_v17  ;;  %v13504_v38 = vpop.f32.mrb[111].mxu1  ;;  %v18262_v1 = vld [vmem:[#allocation2 + $0x18] sm:$0xff] }
 0xc00   : > { %v17607_v7 = vpop.f32.mrb[112].mxu0 }
 0xc01   : > { %v17642_v61 = vpop.f32.mrb[112].mxu1  ;;  %v17608_v43 = vpop.f32.mrb[113].mxu0 }
 0xc02   : > { %v17609_v44 = vadd.f32 %v17608_v43, %v17607_v7  ;;  %v17643_v56 = vpop.f32.mrb[113].mxu1 }
 0xc03   : > { %v17644_v15 = vadd.f32 %v17643_v56, %v17642_v61 }
 0xc05   : > { %v13772_v45 = vadd.f32 %v17644_v15, %v17609_v44  ;;  %v18263_v15 = vld [vmem:[#allocation2 + $0x20] sm:$0xff] }
 0xc20   : > { %v17677_v24 = vpop.f32.mrb[114].mxu0 }
 0xc21   : > { %v17712_v30 = vpop.f32.mrb[114].mxu1  ;;  %v17678_v47 = vpop.f32.mrb[115].mxu0 }
 0xc22   : > { %v17679_v49 = vadd.f32 %v17678_v47, %v17677_v24  ;;  %v17713_v5 = vpop.f32.mrb[115].mxu1  ;;  %v18264_v24 = vld [vmem:[#allocation2 + $0x30] sm:$0xff]  ;;  %v18265_v47 = vld [vmem:[#allocation2 + $0x28] sm:$0xff] }
 0xc23   : > { %v17714_v53 = vadd.f32 %v17713_v5, %v17712_v30 }
 0xc24   : > { %v13842_v52 = vadd.f32 %v17679_v49, %v13772_v45 }
 0xc26   : > { %v13912_v46 = vadd.f32 %v17714_v53, %v13842_v52 }
 0xc28   : > { %17281 = vmatmul.mubr.msk.f32.vlgmr.msra.gmra.mrb[116].mxu0 %vm4811_vm0, %v13912_v46  ;;  %17282 = vmatmul.mubr.msk.f32.vlgmr.msra.gmra.mrb[116].mxu1 %vm4811_vm0, %v13912_v46 }
 0xc29   : > { %18182 = vmatpush1.bf16.msra.mxu0 %v18181_v20  ;;  %18190 = vmatpush1.bf16.msra.mxu1 %v18189_v31 }
 0xc2a   : > { %18184 = vmatprep.subr.bf16.mxu0 %v18183_v39  ;;  %18192 = vmatprep.subr.bf16.mxu1 %v18191_v51 }
 0xc2b   : > { %14157 = vmatprep.mubr.f32.mxu0 %v18366_v34  ;;  %14228 = vmatprep.mubr.f32.mxu1 %v18366_v34 }
 0xc2d   : > { %18186 = vmatpush1.bf16.msra.mxu0 %v18185_v13  ;;  %18194 = vmatpush1.bf16.msra.mxu1 %v18193_v26 }
 0xc30   : > { %17283 = vmatmul.mubr.msk.f32.vlgmr.msra.gmra.mrb[118].mxu0 %vm4811_vm0, %v13912_v46  ;;  %17284 = vmatmul.mubr.msk.f32.vlgmr.msra.gmra.mrb[118].mxu1 %vm4811_vm0, %v13912_v46 }
 0xcfb   : > { %v14017_v12 = vpop.f32.mrb[116].mxu0  ;;  %v14088_v57 = vpop.f32.mrb[116].mxu1 }
 0xcfc   : > { %v14235_v14 = vmul.f32 0.03125, %v14017_v12  ;;  %v14237_v48 = vmul.f32 0.03125, %v14088_v57  ;;  %v14019_v35 = vpop.f32.mrb[117].mxu0  ;;  %v14090_v29 = vpop.f32.mrb[117].mxu1 }
 0xcfd   : > { %v14236_v33 = vmul.f32 0.03125, %v14019_v35  ;;  %v14238_v55 = vmul.f32 0.03125, %v14090_v29 }
 0xcfe   : > { %v14243_v6 = vadd.f32 %v14235_v14, %v20652_v59  ;;  %v14245_v21 = vadd.f32 %v14237_v48, %v20804_v42 }
 0xcff   : > { %v14244_v34 = vadd.f32 %v14236_v33, %v20654_v50  ;;  %v14246_v27 = vadd.f32 %v14238_v55, %v20806_v8 }
 0xd00   : > { %v14251_v25 = vadd.f32 %v18259_v23, %v14243_v6  ;;  %v14253_v19 = vadd.f32 %v18260_v40, %v14245_v21 }
 0xd01   : > { %v14252_v17 = vadd.f32 %v18261_v16, %v14244_v34  ;;  %v14254_v9 = vadd.f32 %v18262_v1, %v14246_v27 }
 0xd02   : > { %14259 = vst [vmem:[#allocation2] sm:$0xff] %v14251_v25  ;;  %14261 = vst [vmem:[#allocation2 + $0x10] sm:$0xff] %v14253_v19 }
 0xd03   : > { %14260 = vst [vmem:[#allocation2 + $0x8] sm:$0xff] %v14252_v17  ;;  %14262 = vst [vmem:[#allocation2 + $0x18] sm:$0xff] %v14254_v9  ;;  %v14159_v10 = vpop.f32.mrb[118].mxu0  ;;  %v14230_v59 = vpop.f32.mrb[118].mxu1 }
 0xd04   : > { %v14239_v63 = vmul.f32 0.03125, %v14159_v10  ;;  %v14241_v42 = vmul.f32 0.03125, %v14230_v59  ;;  %v14161_v38 = vpop.f32.mrb[119].mxu0  ;;  %v14232_v50 = vpop.f32.mrb[119].mxu1  ;;  %14271 = vst [vmem:[#allocation6] sm:$0xff] (!%p17285_p4), %v14251_v25  ;;  %14272 = vst [vmem:[#allocation6 + $0x8] sm:$0xff] (!%p17285_p4), %v14252_v17 }
 0xd05   : > { %v14240_v7 = vmul.f32 0.03125, %v14161_v38  ;;  %v14242_v8 = vmul.f32 0.03125, %v14232_v50  ;;  %14270 = sbr.rel (%p17285_p4) target bundleno = 3342 (0xd0e), region = 64  ;;  %14273 = vst [vmem:[#allocation6 + $0x10] sm:$0xff] (!%p17285_p4), %v14253_v19  ;;  %14274 = vst [vmem:[#allocation6 + $0x18] sm:$0xff] (!%p17285_p4), %v14254_v9 }
 0xd06   : > { %v14247_v61 = vadd.f32 %v14239_v63, %v20995_v62  ;;  %v14249_v43 = vadd.f32 %v14241_v42, %v21025_v60 }
 0xd07   : > { %v14248_v44 = vadd.f32 %v14240_v7, %v20997_v4  ;;  %v14250_v56 = vadd.f32 %v14242_v8, %v21027_v37 }
 0xd08   : > { %v14255_v45 = vadd.f32 %v18263_v15, %v14247_v61  ;;  %v14257_v30 = vadd.f32 %v18264_v24, %v14249_v43 }
 0xd09   : > { %v14256_v22 = vadd.f32 %v18265_v47, %v14248_v44  ;;  %v14258_v49 = vadd.f32 %v18266_v32, %v14250_v56 }
 0xd0a   : > { %14263 = vst [vmem:[#allocation2 + $0x20] sm:$0xff] %v14255_v45  ;;  %14265 = vst [vmem:[#allocation2 + $0x30] sm:$0xff] %v14257_v30 }
 0xd0b   : > { %14264 = vst [vmem:[#allocation2 + $0x28] sm:$0xff] %v14256_v22  ;;  %14266 = vst [vmem:[#allocation2 + $0x38] sm:$0xff] %v14258_v49 }
 0xd0c   : > { %14275 = vst [vmem:[#allocation6 + $0x20] sm:$0xff] %v14255_v45  ;;  %14276 = vst [vmem:[#allocation6 + $0x28] sm:$0xff] %v14256_v22 }
 0xd0d   : > { %14277 = vst [vmem:[#allocation6 + $0x30] sm:$0xff] %v14257_v30  ;;  %14278 = vst [vmem:[#allocation6 + $0x38] sm:$0xff] %v14258_v49 }
 0xd0e PF: > { %p18208_p5 = scmp.eq.s32.totalorder %s18427_s28, 5  ;;  %s18367_s24 = smov [#allocation6]  }
 0xd0f   : > { %s14286_s20 = sshll.u32 %s18367_s24, 4  ;;  %s14287_s20 = int_to_ptr.vmem [resolvable:$true] %s14286_s20 }
 0xd10   : > { %s18297_s12 = scalar_lea.vmem %s14287_s20, 1024  ;;  %p18304_p0 = scmp.lt.s32.totalorder %s14287_s20, %s14287_s20 }
 0xd11   : > { %p18298_p6 = scmp.ne.s32.totalorder %s14287_s20, %s18297_s12  ;;  %p18305_p1 = scmp.lt.s32.totalorder %s18297_s12, %s18297_s12 }
 0xd13   : > { %p18299_p10 = pnand %p18298_p6, %p18208_p5  ;;  %p18306_p2 = por %p18305_p1, %p18304_p0 }
 0xd15   : > { %p18300_p12 = pneg %p18299_p10 }
 0xd17   : > { %p18307_p11 = pnand %p18306_p2, %p18300_p12 }
 0xd19   : > { %18310 = shalt.err (!%p18307_p11)
}
 0xd1a   : > { %s18311_s13 = scalar_lea.hbm %s21099_s7, 1024 }
 0xd1b   : > { %p18312_p13 = scmp.ne.s32.totalorder %s21099_s7, %s18311_s13  ;;  %p18317_p7 = scmp.lt.u32.totalorder %s18311_s13, %s21099_s7 }
 0xd1d   : > { %p18313_p3 = pnand %p18312_p13, %p18208_p5 }
 0xd1f   : > { %p18314_p9 = pneg %p18313_p3 }
 0xd21   : > { %p18319_p8 = pnand %p18317_p7, %p18314_p9 }
 0xd23   : > { %18322 = shalt.err (!%p18319_p8)
}
 0xd24   : > { %18200 = dma.vmem_to_hbm [thread:$0]  (%p18208_p5), %s14287_s20, 1024, %s21099_s7, [#allocation5]  }
 0xd25   : > { %18344 = dma.done.wait (%p18208_p5), [#allocation5], 1024  }
 0xd26   : > { %18346 = vsyncadd (%p18208_p5), [#allocation5], 4294966272 }
 0xd27 PF: > { %p18_p4 = scmp.ge.s32.totalorder %s18430_s29, 8   ;;  %s21103_s24 = smov %s18353_s25 }
 0xd28   : > { %s21104_s25 = smov %s18357_s26  ;;  %s21105_s26 = smov %s18440_s9 }
 0xd29   : > { %s21106_s27 = smov %s18430_s29  ;;  %20 = sbr.rel (!%p18_p4) target bundleno = 4 (0x4), region = 116 }
 0xd30   :  { %14299 = vsyncpa [#allocation4], 1 }
 0xd31   :  { %14301 = vsyncpa [#allocation4 + $0x1], 1 }
 0xd32   :  { %14302 = vsyncpa [#allocation5], 1 }
 0xd33   :  { %14304 = vsyncpa [#allocation5 + $0x1], 1 }

</bundles_post_ra>
